<compile_context>
chip_gen: v7x
topology: tpu7x:2x2x1
jax: 0.10.0
libtpu: 0.0.40
codegen_flags: <defaults>
</compile_context>

<pallas_src>
import functools

import jax
import jax.numpy as jnp
from jax import lax
from jax.experimental import pallas as pl
from jax.experimental.pallas import tpu as pltpu

NEG_INF = -1e30
VMEM_LIMIT = 32 * 1024 * 1024  # safe on v5e/v6e (128 MiB) and v7x (64 MiB physical)


def _pick_batch_block(B, cap=8):
    """Largest divisor of B that is <= cap (whole batch if B <= cap)."""
    if B <= cap:
        return B
    for bb in range(cap, 0, -1):
        if B % bb == 0:
            return bb
    return 1


# ----------------------------------------------------------------------------- #
# BiLSTM kernel (packed-sequence semantics via length masking).
# pool=False -> per-timestep outputs (fed to attention)
# pool=True  -> fused avg/max pooling over the padded length (inference composition)
# ----------------------------------------------------------------------------- #
def _bilstm_kernel(L, B, Hh, pool, x_ref, len_ref, wih_ref, whhf_ref, whhb_ref,
                   bias_ref, *rest):
    if pool:
        out_ref, gxf_ref, gxb_ref = rest
    else:
        out_f_ref, out_b_ref, gxf_ref, gxb_ref = rest

    G = 4 * Hh
    f32 = jnp.float32
    bf16 = jnp.bfloat16

    # (1) Hoisted input projection: one big MXU matmul over all L*B rows,
    #     bf16 operands, f32 accumulate, biases folded in.
    gx = jnp.dot(x_ref[...], wih_ref[...],
                 preferred_element_type=f32) + bias_ref[...]        # (L*B, 8Hh)
    for t in range(L):                                              # static scatter
        gxf_ref[t] = gx[t * B:(t + 1) * B, 0:G]
        gxb_ref[t] = gx[t * B:(t + 1) * B, G:2 * G]

    # (2) Weights / lengths loaded once, outside the recurrent loop.
    whh_f = whhf_ref[...]                                           # (Hh, 4Hh) bf16
    whh_b = whhb_ref[...]
    lens = len_ref[...]                                             # (B, 1) int32

    h0 = jnp.zeros((B, Hh), f32)
    c0 = jnp.zeros((B, Hh), f32)
    neg = jnp.full((B, Hh), -jnp.inf, f32)

    def cell(g_in, h, c, whh):
        g = g_in + jnp.dot(h.astype(bf16), whh, preferred_element_type=f32)
        i = jax.nn.sigmoid(g[:, 0:Hh])
        f = jax.nn.sigmoid(g[:, Hh:2 * Hh])
        gg = jnp.tanh(g[:, 2 * Hh:3 * Hh])
        o = jax.nn.sigmoid(g[:, 3 * Hh:4 * Hh])
        c_new = f * c + i * gg
        h_new = o * jnp.tanh(c_new)
        return h_new, c_new

    # (3) Forward and backward recurrences interleaved in a single loop.
    def step(idx, carry):
        if pool:
            h_f, c_f, h_b, c_b, s_f, s_b, m_f, m_b = carry
        else:
            h_f, c_f, h_b, c_b = carry
        t_f = idx
        t_b = L - 1 - idx

        gf = gxf_ref[t_f]                                           # (B, 4Hh)
        gb = gxb_ref[t_b]

        hf_new, cf_new = cell(gf, h_f, c_f, whh_f)
        hb_new, cb_new = cell(gb, h_b, c_b, whh_b)

        vf = (t_f < lens).astype(f32)                               # (B, 1)
        vb = (t_b < lens).astype(f32)
        h_f = vf * hf_new + (1.0 - vf) * h_f
        c_f = vf * cf_new + (1.0 - vf) * c_f
        h_b = vb * hb_new + (1.0 - vb) * h_b
        c_b = vb * cb_new + (1.0 - vb) * c_b

        of = h_f * vf                                               # zero past length
        ob = h_b * vb
        if pool:
            return (h_f, c_f, h_b, c_b,
                    s_f + of, s_b + ob,
                    jnp.maximum(m_f, of), jnp.maximum(m_b, ob))
        out_f_ref[t_f] = of.astype(out_f_ref.dtype)
        out_b_ref[t_b] = ob.astype(out_b_ref.dtype)
        return (h_f, c_f, h_b, c_b)

    # Short fixed trip-count -> unroll so the LLO scheduler sees the whole chain.
    unroll = True if L <= 16 else False
    if pool:
        init = (h0, c0, h0, c0, h0, h0, neg, neg)
        _, _, _, _, s_f, s_b, m_f, m_b = lax.fori_loop(0, L, step, init,
                                                       unroll=unroll)
        inv_L = 1.0 / L
        # [avg_fwd | avg_bwd | max_fwd | max_bwd]  == cat([avg, max]) of cat([f, b])
        out_ref[...] = jnp.concatenate(
            [s_f * inv_L, s_b * inv_L, m_f, m_b], axis=-1).astype(out_ref.dtype)
    else:
        lax.fori_loop(0, L, step, (h0, c0, h0, c0), unroll=unroll)


def _bilstm(x, lengths, lstm_params, pool):
    """x: (B, L, D) float.  Returns (B, L, 2*Hh) bf16 if not pool else (B, 4*Hh) f32."""
    B, L, D = x.shape
    wih_f, whh_f, bih_f, bhh_f, wih_b, whh_b, bih_b, bhh_b = lstm_params
    Hh = whh_f.shape[1]
    G = 4 * Hh
    Bb = _pick_batch_block(B)
    nb = B // Bb

    bf16 = jnp.bfloat16
    f32 = jnp.float32

    # time-major, batch-blocked, flattened rows (row = t*Bb + b_local) so the whole
    # input projection is one MXU matmul inside the kernel.
    x_t = jnp.transpose(x.astype(bf16), (1, 0, 2))                         # (L, B, D)
    x_blk = x_t.reshape(L, nb, Bb, D).transpose(1, 0, 2, 3).reshape(nb, L * Bb, D)
    len_blk = lengths.astype(jnp.int32).reshape(nb, Bb, 1)

    wih = jnp.concatenate([wih_f.T, wih_b.T], axis=-1).astype(bf16)        # (D, 8Hh)
    bias = jnp.concatenate([bih_f + bhh_f, bih_b + bhh_b]).reshape(1, 2 * G).astype(f32)
    whhf = whh_f.T.astype(bf16)                                            # (Hh, 4Hh)
    whhb = whh_b.T.astype(bf16)

    kernel = functools.partial(_bilstm_kernel, L, Bb, Hh, pool)

    in_specs = [
        pl.BlockSpec((None, L * Bb, D), lambda g: (g, 0, 0)),
        pl.BlockSpec((None, Bb, 1), lambda g: (g, 0, 0)),
        pl.BlockSpec((D, 2 * G), lambda g: (0, 0)),
        pl.BlockSpec((Hh, G), lambda g: (0, 0)),
        pl.BlockSpec((Hh, G), lambda g: (0, 0)),
        pl.BlockSpec((1, 2 * G), lambda g: (0, 0)),
    ]
    scratch = [pltpu.VMEM((L, Bb, G), f32), pltpu.VMEM((L, Bb, G), f32)]

    if pool:
        out_shape = jax.ShapeDtypeStruct((nb, Bb, G), f32)
        out_specs = pl.BlockSpec((None, Bb, G), lambda g: (g, 0, 0))
    else:
        out_shape = (jax.ShapeDtypeStruct((nb, L, Bb, Hh), bf16),
                     jax.ShapeDtypeStruct((nb, L, Bb, Hh), bf16))
        out_specs = (pl.BlockSpec((None, L, Bb, Hh), lambda g: (g, 0, 0, 0)),
                     pl.BlockSpec((None, L, Bb, Hh), lambda g: (g, 0, 0, 0)))

    res = pl.pallas_call(
        kernel,
        grid=(nb,),
        in_specs=in_specs,
        out_specs=out_specs,
        out_shape=out_shape,
        scratch_shapes=scratch,
        compiler_params=pltpu.CompilerParams(
            dimension_semantics=("parallel",), vmem_limit_bytes=VMEM_LIMIT),
    )(x_blk, len_blk, wih, whhf, whhb, bias)

    if pool:
        return res.reshape(B, G)                                           # (B, 2H)
    out_f, out_b = res
    v = jnp.concatenate([out_f, out_b], axis=-1)                           # (nb,L,Bb,2Hh)
    v = v.transpose(1, 0, 2, 3).reshape(L, B, 2 * Hh)
    return jnp.transpose(v, (1, 0, 2))                                     # (B, L, 2Hh)


# ----------------------------------------------------------------------------- #
# Local inference modeling (masked co-attention + enhancement) fused with the
# F Linear + ReLU projection of InferenceComposition.
# ----------------------------------------------------------------------------- #
def _attn_f_kernel(Bb, L1, L2, H, len1_ref, len2_ref,
                   x1_ref, x2_ref, wf_ref, bf_ref, f1_ref, f2_ref):
    f32 = jnp.float32
    bf16 = jnp.bfloat16
    g = pl.program_id(0)

    wf = wf_ref[...]                                   # (4H, H) bf16, loaded once
    bfv = bf_ref[...]                                  # (1, H)  f32

    cols = lax.broadcasted_iota(jnp.int32, (L1, L2), 1)
    rows = lax.broadcasted_iota(jnp.int32, (L1, L2), 0)

    for bi in range(Bb):                               # static unroll over batch block
        b = g * Bb + bi
        l1 = len1_ref[b]
        l2 = len2_ref[b]
        x1 = x1_ref[bi]                                # (L1, H) bf16
        x2 = x2_ref[bi]                                # (L2, H) bf16

        # e = x1 @ x2^T without materializing the transpose (MXU-native NT matmul)
        e = lax.dot_general(x1, x2, (((1,), (1,)), ((), ())),
                            preferred_element_type=f32)            # (L1, L2)

        # softmax over keys, masked by len2
        e1 = jnp.where(cols >= l2, NEG_INF, e)
        mx1 = jnp.max(e1, axis=-1, keepdims=True)
        p1 = jnp.exp(e1 - mx1)
        p1 = p1 / jnp.sum(p1, axis=-1, keepdims=True)
        x1_tilde = jnp.dot(p1.astype(bf16), x2, preferred_element_type=f32)  # (L1, H)

        # softmax over queries (axis 0), masked by len1; contract q directly (no e.T)
        e2 = jnp.where(rows >= l1, NEG_INF, e)
        mx2 = jnp.max(e2, axis=0, keepdims=True)
        p2 = jnp.exp(e2 - mx2)
        p2 = p2 / jnp.sum(p2, axis=0, keepdims=True)
        x2_tilde = lax.dot_general(p2, x1, (((0,), (0,)), ((), ())),
                                   preferred_element_type=f32)               # (L2, H)

        # enhancement + fused F (Linear 4H->H + ReLU); 4H tensor never leaves VMEM
        x1f = x1.astype(f32)
        x2f = x2.astype(f32)
        m1 = jnp.concatenate([x1f, x1_tilde, x1f - x1_tilde, x1f * x1_tilde], axis=-1)
        m2 = jnp.concatenate([x2f, x2_tilde, x2f - x2_tilde, x2f * x2_tilde], axis=-1)
        f1 = jnp.dot(m1.astype(bf16), wf, preferred_element_type=f32) + bfv
        f2 = jnp.dot(m2.astype(bf16), wf, preferred_element_type=f32) + bfv
        f1_ref[bi] = jnp.maximum(f1, 0.0).astype(f1_ref.dtype)
        f2_ref[bi] = jnp.maximum(f2, 0.0).astype(f2_ref.dtype)


def local_inference_fused_f(x1_bar, len1, x2_bar, len2, F_w, F_b):
    """Returns f1: (B, L1, H) bf16 and f2: (B, L2, H) bf16 (= relu(F(enhancement)))."""
    B, L1, H = x1_bar.shape
    L2 = x2_bar.shape[1]
    Bb = _pick_batch_block(B)
    nb = B // Bb
    bf16 = jnp.bfloat16

    kernel = functools.partial(_attn_f_kernel, Bb, L1, L2, H)
    grid_spec = pltpu.PrefetchScalarGridSpec(
        num_scalar_prefetch=2,
        grid=(nb,),
        in_specs=[pl.BlockSpec((Bb, L1, H), lambda g, l1, l2: (g, 0, 0)),
                  pl.BlockSpec((Bb, L2, H), lambda g, l1, l2: (g, 0, 0)),
                  pl.BlockSpec((4 * H, H), lambda g, l1, l2: (0, 0)),
                  pl.BlockSpec((1, H), lambda g, l1, l2: (0, 0))],
        out_specs=[pl.BlockSpec((Bb, L1, H), lambda g, l1, l2: (g, 0, 0)),
                   pl.BlockSpec((Bb, L2, H), lambda g, l1, l2: (g, 0, 0))],
    )
    return pl.pallas_call(
        kernel,
        grid_spec=grid_spec,
        out_shape=(jax.ShapeDtypeStruct((B, L1, H), bf16),
                   jax.ShapeDtypeStruct((B, L2, H), bf16)),
        compiler_params=pltpu.CompilerParams(
            dimension_semantics=("parallel",), vmem_limit_bytes=VMEM_LIMIT),
    )(len1.astype(jnp.int32), len2.astype(jnp.int32),
      x1_bar.astype(bf16), x2_bar.astype(bf16),
      F_w.T.astype(bf16), F_b.reshape(1, H).astype(jnp.float32))


# ----------------------------------------------------------------------------- #
# MLP (Linear -> tanh -> Linear) + mean cross-entropy loss
# ----------------------------------------------------------------------------- #
def _mlp_ce_kernel(v_ref, w1_ref, b1_ref, w2_ref, b2_ref, yoh_ref, loss_ref):
    h = jnp.tanh(jnp.dot(v_ref[...], w1_ref[...],
                         preferred_element_type=jnp.float32) + b1_ref[...])
    s = jnp.dot(h, w2_ref[...], preferred_element_type=jnp.float32) + b2_ref[...]
    m = jnp.max(s, axis=-1, keepdims=True)
    lse = jnp.log(jnp.sum(jnp.exp(s - m), axis=-1, keepdims=True)) + m       # (B, 1)
    picked = jnp.sum(s * yoh_ref[...], axis=-1, keepdims=True)               # (B, 1)
    per_ex = lse - picked
    loss_ref[...] = jnp.sum(per_ex, axis=0, keepdims=True) / per_ex.shape[0]


def mlp_ce(v, w1, b1, w2, b2, y_onehot):
    loss = pl.pallas_call(
        _mlp_ce_kernel,
        out_shape=jax.ShapeDtypeStruct((1, 1), jnp.float32),
    )(v.astype(jnp.float32), w1.T, b1.reshape(1, -1),
      w2.T, b2.reshape(1, -1), y_onehot)
    return loss[0, 0]


# ----------------------------------------------------------------------------- #
# Parameter initialization (deterministic, torch-style shapes)
# ----------------------------------------------------------------------------- #
def init_lstm_params(key, input_size, hidden_size, scale=0.1):
    ks = jax.random.split(key, 8)
    shapes = [(4 * hidden_size, input_size), (4 * hidden_size, hidden_size),
              (4 * hidden_size,), (4 * hidden_size,)]
    fwd = [scale * jax.random.normal(ks[i], shapes[i], jnp.float32) for i in range(4)]
    bwd = [scale * jax.random.normal(ks[4 + i], shapes[i], jnp.float32) for i in range(4)]
    return tuple(fwd + bwd)


def init_linear(key, out_features, in_features, scale=0.1):
    kw, kb = jax.random.split(key)
    w = scale * jax.random.normal(kw, (out_features, in_features), jnp.float32)
    b = scale * jax.random.normal(kb, (out_features,), jnp.float32)
    return w, b


def init_esim_params(key, vocab, emb_size, hidden_size, class_num):
    assert hidden_size % 2 == 0
    keys = jax.random.split(key, 6)
    F_w, F_b = init_linear(keys[2], hidden_size, 4 * hidden_size)
    mlp_w1, mlp_b1 = init_linear(keys[4], hidden_size, 4 * hidden_size)
    mlp_w2, mlp_b2 = init_linear(keys[5], class_num, hidden_size)
    return dict(
        embedding=0.1 * jax.random.normal(keys[0], (vocab, emb_size), jnp.float32),
        bilstm1=init_lstm_params(keys[1], emb_size, hidden_size // 2),
        F_w=F_w, F_b=F_b,
        bilstm2=init_lstm_params(keys[3], hidden_size, hidden_size // 2),
        mlp_w1=mlp_w1, mlp_b1=mlp_b1, mlp_w2=mlp_w2, mlp_b2=mlp_b2,
    )


# ----------------------------------------------------------------------------- #
# ESIM forward (returns mean cross-entropy loss, like the torch module)
# ----------------------------------------------------------------------------- #
def esim_forward(params, x1_idx, len1, x2_idx, len2, y):
    # embedding lookup kept as JAX glue (index gather)
    x1 = jnp.take(params['embedding'], x1_idx, axis=0)          # (B, L1, E)
    x2 = jnp.take(params['embedding'], x2_idx, axis=0)          # (B, L2, E)

    x1_bar = _bilstm(x1, len1, params['bilstm1'], pool=False)   # (B, L1, H) bf16
    x2_bar = _bilstm(x2, len2, params['bilstm1'], pool=False)   # (B, L2, H) bf16

    # attention + enhancement + F linear/ReLU fused into one kernel
    f1, f2 = local_inference_fused_f(x1_bar, len1, x2_bar, len2,
                                     params['F_w'], params['F_b'])

    # composition BiLSTM with fused avg/max pooling -> (B, 2H) each
    v1 = _bilstm(f1, len1, params['bilstm2'], pool=True)
    v2 = _bilstm(f2, len2, params['bilstm2'], pool=True)
    v = jnp.concatenate([v1, v2], axis=-1)                      # (B, 4H)

    class_num = params['mlp_w2'].shape[0]
    y_onehot = jax.nn.one_hot(y, class_num, dtype=jnp.float32)
    return mlp_ce(v, params['mlp_w1'], params['mlp_b1'],
                  params['mlp_w2'], params['mlp_b2'], y_onehot)


if __name__ == "__main__":
    VOCAB, EMB, HIDDEN, CLASSES = 32, 16, 32, 3
    B, L = 2, 8

    root = jax.random.PRNGKey(0)
    k_params, k_x1, k_x2 = jax.random.split(root, 3)
    params = init_esim_params(k_params, VOCAB, EMB, HIDDEN, CLASSES)

    x1_indices = jax.random.randint(k_x1, (B, L), 0, VOCAB, dtype=jnp.int32)
    x2_indices = jax.random.randint(k_x2, (B, L), 0, VOCAB, dtype=jnp.int32)
    # keep max length == padded length so pad_packed_sequence / pooling semantics match
    seq_lengths1 = jnp.array([8, 5], dtype=jnp.int32)
    seq_lengths2 = jnp.array([7, 8], dtype=jnp.int32)
    y = jnp.array([1, 2], dtype=jnp.int32)

    loss_fn = jax.jit(esim_forward)
    loss = loss_fn(params, x1_indices, seq_lengths1, x2_indices, seq_lengths2, y)
    loss = jax.block_until_ready(loss)
    assert jnp.isfinite(loss)
    print("KERNEL_OK")
</pallas_src>

<mosaic_0001>
module attributes {stable_mosaic.version = 11 : i64} {
  func.func @_attn_f_kernel(%arg0: i32, %arg1: memref<2xi32, #tpu.memory_space<smem>>, %arg2: memref<2xi32, #tpu.memory_space<smem>>, %arg3: memref<2x8x32xbf16, #tpu.memory_space<vmem>>, %arg4: memref<2x8x32xbf16, #tpu.memory_space<vmem>>, %arg5: memref<128x32xbf16, #tpu.memory_space<vmem>>, %arg6: memref<1x32xf32, #tpu.memory_space<vmem>>, %arg7: memref<2x8x32xbf16, #tpu.memory_space<vmem>>, %arg8: memref<2x8x32xbf16, #tpu.memory_space<vmem>>) attributes {dimension_semantics = [#tpu.dimension_semantics<parallel>], iteration_bounds = array<i64: 1>, scalar_prefetch = 2 : i64, scratch_operands = 0 : i64, tpu.core_type = #tpu.core_type<tc>, window_params = [{transform_indices = @transform_0, window_bounds = array<i64: 2, 8, 32>}, {transform_indices = @transform_1, window_bounds = array<i64: 2, 8, 32>}, {pipeline_mode = #tpu.pipeline_mode<synchronous>, transform_indices = @transform_2, window_bounds = array<i64: 128, 32>}, {pipeline_mode = #tpu.pipeline_mode<synchronous>, transform_indices = @transform_3, window_bounds = array<i64: 1, 32>}, {transform_indices = @transform_4, window_bounds = array<i64: 2, 8, 32>}, {transform_indices = @transform_5, window_bounds = array<i64: 2, 8, 32>}]} {
    %c0 = arith.constant 0 : index
    %c0_0 = arith.constant 0 : index
    %0 = vector.load %arg5[%c0, %c0_0] : memref<128x32xbf16, #tpu.memory_space<vmem>>, vector<128x32xbf16>
    %c0_1 = arith.constant 0 : index
    %c0_2 = arith.constant 0 : index
    %1 = vector.load %arg6[%c0_1, %c0_2] : memref<1x32xf32, #tpu.memory_space<vmem>>, vector<1x32xf32>
    %2 = tpu.iota {dimensions = array<i32: 1>} : vector<8x8xi32>
    %3 = tpu.iota {dimensions = array<i32: 0>} : vector<8x8xi32>
    %c2_i32 = arith.constant 2 : i32
    %4 = arith.muli %arg0, %c2_i32 : i32
    %c0_i32 = arith.constant 0 : i32
    %5 = arith.addi %4, %c0_i32 : i32
    %6 = arith.index_cast %5 : i32 to index
    %7 = memref.load %arg1[%6] : memref<2xi32, #tpu.memory_space<smem>>
    %8 = arith.index_cast %5 : i32 to index
    %9 = memref.load %arg2[%8] : memref<2xi32, #tpu.memory_space<smem>>
    %c0_3 = arith.constant 0 : index
    %c0_4 = arith.constant 0 : index
    %c0_5 = arith.constant 0 : index
    %10 = vector.load %arg3[%c0_3, %c0_4, %c0_5] : memref<2x8x32xbf16, #tpu.memory_space<vmem>>, vector<1x8x32xbf16>
    %11 = vector.shape_cast %10 : vector<1x8x32xbf16> to vector<8x32xbf16>
    %c0_6 = arith.constant 0 : index
    %c0_7 = arith.constant 0 : index
    %c0_8 = arith.constant 0 : index
    %12 = vector.load %arg4[%c0_6, %c0_7, %c0_8] : memref<2x8x32xbf16, #tpu.memory_space<vmem>>, vector<1x8x32xbf16>
    %13 = vector.shape_cast %12 : vector<1x8x32xbf16> to vector<8x32xbf16>
    %cst = arith.constant dense<0.000000e+00> : vector<8x8xf32>
    %14 = tpu.matmul %11, %13, %cst {dimension_numbers = #tpu.dot_dimension_numbers<[1], [1], [0], [0], [0, 0, 1, 0], [], []>} : vector<8x32xbf16>, vector<8x32xbf16>, vector<8x8xf32> -> vector<8x8xf32>
    %15 = vector.broadcast %9 : i32 to vector<8x8xi32>
    %16 = arith.cmpi sge, %2, %15 : vector<8x8xi32>
    %cst_9 = arith.constant -1.000000e+30 : f32
    %17 = vector.broadcast %cst_9 : f32 to vector<8x8xf32>
    %18 = arith.select %16, %17, %14 : vector<8x8xi1>, vector<8x8xf32>
    %cst_10 = arith.constant dense<0xFF800000> : vector<8xf32>
    %19 = vector.multi_reduction <maximumf>, %18, %cst_10 [1] : vector<8x8xf32> to vector<8xf32>
    %20 = vector.shape_cast %19 : vector<8xf32> to vector<8x1xf32>
    %21 = vector.broadcast %20 : vector<8x1xf32> to vector<8x8xf32>
    %22 = arith.subf %18, %21 : vector<8x8xf32>
    %23 = math.exp %22 : vector<8x8xf32>
    %cst_11 = arith.constant dense<0.000000e+00> : vector<8xf32>
    %24 = vector.multi_reduction <add>, %23, %cst_11 [1] : vector<8x8xf32> to vector<8xf32>
    %25 = vector.shape_cast %24 : vector<8xf32> to vector<8x1xf32>
    %26 = vector.broadcast %25 : vector<8x1xf32> to vector<8x8xf32>
    %27 = arith.divf %23, %26 : vector<8x8xf32>
    %28 = arith.truncf %27 : vector<8x8xf32> to vector<8x8xbf16>
    %cst_12 = arith.constant dense<0.000000e+00> : vector<8x32xf32>
    %29 = tpu.matmul %28, %13, %cst_12 {dimension_numbers = #tpu.dot_dimension_numbers<[1], [0], [0], [1], [0, 0, 1, 1], [], []>} : vector<8x8xbf16>, vector<8x32xbf16>, vector<8x32xf32> -> vector<8x32xf32>
    %30 = vector.broadcast %7 : i32 to vector<8x8xi32>
    %31 = arith.cmpi sge, %3, %30 : vector<8x8xi32>
    %cst_13 = arith.constant -1.000000e+30 : f32
    %32 = vector.broadcast %cst_13 : f32 to vector<8x8xf32>
    %33 = arith.select %31, %32, %14 : vector<8x8xi1>, vector<8x8xf32>
    %cst_14 = arith.constant dense<0xFF800000> : vector<8xf32>
    %34 = vector.multi_reduction <maximumf>, %33, %cst_14 [0] : vector<8x8xf32> to vector<8xf32>
    %35 = vector.shape_cast %34 : vector<8xf32> to vector<1x8xf32>
    %36 = vector.broadcast %35 : vector<1x8xf32> to vector<8x8xf32>
    %37 = arith.subf %33, %36 : vector<8x8xf32>
    %38 = math.exp %37 : vector<8x8xf32>
    %cst_15 = arith.constant dense<0.000000e+00> : vector<8xf32>
    %39 = vector.multi_reduction <add>, %38, %cst_15 [0] : vector<8x8xf32> to vector<8xf32>
    %40 = vector.shape_cast %39 : vector<8xf32> to vector<1x8xf32>
    %41 = vector.broadcast %40 : vector<1x8xf32> to vector<8x8xf32>
    %42 = arith.divf %38, %41 : vector<8x8xf32>
    %cst_16 = arith.constant dense<0.000000e+00> : vector<8x32xf32>
    %43 = tpu.matmul %42, %11, %cst_16 {dimension_numbers = #tpu.dot_dimension_numbers<[0], [0], [1], [1], [0, 1, 1, 1], [], []>} : vector<8x8xf32>, vector<8x32xbf16>, vector<8x32xf32> -> vector<8x32xf32>
    %44 = arith.extf %11 : vector<8x32xbf16> to vector<8x32xf32>
    %45 = arith.extf %13 : vector<8x32xbf16> to vector<8x32xf32>
    %46 = arith.subf %44, %29 : vector<8x32xf32>
    %47 = arith.mulf %44, %29 : vector<8x32xf32>
    %48 = tpu.concatenate %44, %29, %46, %47 in 1 : vector<8x32xf32>, vector<8x32xf32>, vector<8x32xf32>, vector<8x32xf32> -> vector<8x128xf32>
    %49 = arith.subf %45, %43 : vector<8x32xf32>
    %50 = arith.mulf %45, %43 : vector<8x32xf32>
    %51 = tpu.concatenate %45, %43, %49, %50 in 1 : vector<8x32xf32>, vector<8x32xf32>, vector<8x32xf32>, vector<8x32xf32> -> vector<8x128xf32>
    %52 = arith.truncf %48 : vector<8x128xf32> to vector<8x128xbf16>
    %cst_17 = arith.constant dense<0.000000e+00> : vector<8x32xf32>
    %53 = tpu.matmul %52, %0, %cst_17 {dimension_numbers = #tpu.dot_dimension_numbers<[1], [0], [0], [1], [0, 0, 1, 1], [], []>} : vector<8x128xbf16>, vector<128x32xbf16>, vector<8x32xf32> -> vector<8x32xf32>
    %54 = vector.broadcast %1 : vector<1x32xf32> to vector<8x32xf32>
    %55 = arith.addf %53, %54 : vector<8x32xf32>
    %56 = arith.truncf %51 : vector<8x128xf32> to vector<8x128xbf16>
    %cst_18 = arith.constant dense<0.000000e+00> : vector<8x32xf32>
    %57 = tpu.matmul %56, %0, %cst_18 {dimension_numbers = #tpu.dot_dimension_numbers<[1], [0], [0], [1], [0, 0, 1, 1], [], []>} : vector<8x128xbf16>, vector<128x32xbf16>, vector<8x32xf32> -> vector<8x32xf32>
    %58 = vector.broadcast %1 : vector<1x32xf32> to vector<8x32xf32>
    %59 = arith.addf %57, %58 : vector<8x32xf32>
    %cst_19 = arith.constant 0.000000e+00 : f32
    %60 = vector.broadcast %cst_19 : f32 to vector<8x32xf32>
    %61 = arith.maximumf %55, %60 : vector<8x32xf32>
    %62 = arith.truncf %61 : vector<8x32xf32> to vector<8x32xbf16>
    %c0_20 = arith.constant 0 : index
    %c0_21 = arith.constant 0 : index
    %c0_22 = arith.constant 0 : index
    %63 = vector.load %arg7[%c0_20, %c0_21, %c0_22] : memref<2x8x32xbf16, #tpu.memory_space<vmem>>, vector<1x8x32xbf16>
    %64 = vector.shape_cast %63 : vector<1x8x32xbf16> to vector<8x32xbf16>
    %65 = vector.shape_cast %62 : vector<8x32xbf16> to vector<1x8x32xbf16>
    tpu.vector_store %arg7[%c0_20, %c0_21, %c0_22], %65 {strides = array<i32>} : memref<2x8x32xbf16, #tpu.memory_space<vmem>>, vector<1x8x32xbf16>,
    %cst_23 = arith.constant 0.000000e+00 : f32
    %66 = vector.broadcast %cst_23 : f32 to vector<8x32xf32>
    %67 = arith.maximumf %59, %66 : vector<8x32xf32>
    %68 = arith.truncf %67 : vector<8x32xf32> to vector<8x32xbf16>
    %c0_24 = arith.constant 0 : index
    %c0_25 = arith.constant 0 : index
    %c0_26 = arith.constant 0 : index
    %69 = vector.load %arg8[%c0_24, %c0_25, %c0_26] : memref<2x8x32xbf16, #tpu.memory_space<vmem>>, vector<1x8x32xbf16>
    %70 = vector.shape_cast %69 : vector<1x8x32xbf16> to vector<8x32xbf16>
    %71 = vector.shape_cast %68 : vector<8x32xbf16> to vector<1x8x32xbf16>
    tpu.vector_store %arg8[%c0_24, %c0_25, %c0_26], %71 {strides = array<i32>} : memref<2x8x32xbf16, #tpu.memory_space<vmem>>, vector<1x8x32xbf16>,
    %c2_i32_27 = arith.constant 2 : i32
    %72 = arith.muli %arg0, %c2_i32_27 : i32
    %c1_i32 = arith.constant 1 : i32
    %73 = arith.addi %72, %c1_i32 : i32
    %74 = arith.index_cast %73 : i32 to index
    %75 = memref.load %arg1[%74] : memref<2xi32, #tpu.memory_space<smem>>
    %76 = arith.index_cast %73 : i32 to index
    %77 = memref.load %arg2[%76] : memref<2xi32, #tpu.memory_space<smem>>
    %c1 = arith.constant 1 : index
    %c0_28 = arith.constant 0 : index
    %c0_29 = arith.constant 0 : index
    %78 = vector.load %arg3[%c1, %c0_28, %c0_29] : memref<2x8x32xbf16, #tpu.memory_space<vmem>>, vector<1x8x32xbf16>
    %79 = vector.shape_cast %78 : vector<1x8x32xbf16> to vector<8x32xbf16>
    %c1_30 = arith.constant 1 : index
    %c0_31 = arith.constant 0 : index
    %c0_32 = arith.constant 0 : index
    %80 = vector.load %arg4[%c1_30, %c0_31, %c0_32] : memref<2x8x32xbf16, #tpu.memory_space<vmem>>, vector<1x8x32xbf16>
    %81 = vector.shape_cast %80 : vector<1x8x32xbf16> to vector<8x32xbf16>
    %cst_33 = arith.constant dense<0.000000e+00> : vector<8x8xf32>
    %82 = tpu.matmul %79, %81, %cst_33 {dimension_numbers = #tpu.dot_dimension_numbers<[1], [1], [0], [0], [0, 0, 1, 0], [], []>} : vector<8x32xbf16>, vector<8x32xbf16>, vector<8x8xf32> -> vector<8x8xf32>
    %83 = vector.broadcast %77 : i32 to vector<8x8xi32>
    %84 = arith.cmpi sge, %2, %83 : vector<8x8xi32>
    %cst_34 = arith.constant -1.000000e+30 : f32
    %85 = vector.broadcast %cst_34 : f32 to vector<8x8xf32>
    %86 = arith.select %84, %85, %82 : vector<8x8xi1>, vector<8x8xf32>
    %cst_35 = arith.constant dense<0xFF800000> : vector<8xf32>
    %87 = vector.multi_reduction <maximumf>, %86, %cst_35 [1] : vector<8x8xf32> to vector<8xf32>
    %88 = vector.shape_cast %87 : vector<8xf32> to vector<8x1xf32>
    %89 = vector.broadcast %88 : vector<8x1xf32> to vector<8x8xf32>
    %90 = arith.subf %86, %89 : vector<8x8xf32>
    %91 = math.exp %90 : vector<8x8xf32>
    %cst_36 = arith.constant dense<0.000000e+00> : vector<8xf32>
    %92 = vector.multi_reduction <add>, %91, %cst_36 [1] : vector<8x8xf32> to vector<8xf32>
    %93 = vector.shape_cast %92 : vector<8xf32> to vector<8x1xf32>
    %94 = vector.broadcast %93 : vector<8x1xf32> to vector<8x8xf32>
    %95 = arith.divf %91, %94 : vector<8x8xf32>
    %96 = arith.truncf %95 : vector<8x8xf32> to vector<8x8xbf16>
    %cst_37 = arith.constant dense<0.000000e+00> : vector<8x32xf32>
    %97 = tpu.matmul %96, %81, %cst_37 {dimension_numbers = #tpu.dot_dimension_numbers<[1], [0], [0], [1], [0, 0, 1, 1], [], []>} : vector<8x8xbf16>, vector<8x32xbf16>, vector<8x32xf32> -> vector<8x32xf32>
    %98 = vector.broadcast %75 : i32 to vector<8x8xi32>
    %99 = arith.cmpi sge, %3, %98 : vector<8x8xi32>
    %cst_38 = arith.constant -1.000000e+30 : f32
    %100 = vector.broadcast %cst_38 : f32 to vector<8x8xf32>
    %101 = arith.select %99, %100, %82 : vector<8x8xi1>, vector<8x8xf32>
    %cst_39 = arith.constant dense<0xFF800000> : vector<8xf32>
    %102 = vector.multi_reduction <maximumf>, %101, %cst_39 [0] : vector<8x8xf32> to vector<8xf32>
    %103 = vector.shape_cast %102 : vector<8xf32> to vector<1x8xf32>
    %104 = vector.broadcast %103 : vector<1x8xf32> to vector<8x8xf32>
    %105 = arith.subf %101, %104 : vector<8x8xf32>
    %106 = math.exp %105 : vector<8x8xf32>
    %cst_40 = arith.constant dense<0.000000e+00> : vector<8xf32>
    %107 = vector.multi_reduction <add>, %106, %cst_40 [0] : vector<8x8xf32> to vector<8xf32>
    %108 = vector.shape_cast %107 : vector<8xf32> to vector<1x8xf32>
    %109 = vector.broadcast %108 : vector<1x8xf32> to vector<8x8xf32>
    %110 = arith.divf %106, %109 : vector<8x8xf32>
    %cst_41 = arith.constant dense<0.000000e+00> : vector<8x32xf32>
    %111 = tpu.matmul %110, %79, %cst_41 {dimension_numbers = #tpu.dot_dimension_numbers<[0], [0], [1], [1], [0, 1, 1, 1], [], []>} : vector<8x8xf32>, vector<8x32xbf16>, vector<8x32xf32> -> vector<8x32xf32>
    %112 = arith.extf %79 : vector<8x32xbf16> to vector<8x32xf32>
    %113 = arith.extf %81 : vector<8x32xbf16> to vector<8x32xf32>
    %114 = arith.subf %112, %97 : vector<8x32xf32>
    %115 = arith.mulf %112, %97 : vector<8x32xf32>
    %116 = tpu.concatenate %112, %97, %114, %115 in 1 : vector<8x32xf32>, vector<8x32xf32>, vector<8x32xf32>, vector<8x32xf32> -> vector<8x128xf32>
    %117 = arith.subf %113, %111 : vector<8x32xf32>
    %118 = arith.mulf %113, %111 : vector<8x32xf32>
    %119 = tpu.concatenate %113, %111, %117, %118 in 1 : vector<8x32xf32>, vector<8x32xf32>, vector<8x32xf32>, vector<8x32xf32> -> vector<8x128xf32>
    %120 = arith.truncf %116 : vector<8x128xf32> to vector<8x128xbf16>
    %cst_42 = arith.constant dense<0.000000e+00> : vector<8x32xf32>
    %121 = tpu.matmul %120, %0, %cst_42 {dimension_numbers = #tpu.dot_dimension_numbers<[1], [0], [0], [1], [0, 0, 1, 1], [], []>} : vector<8x128xbf16>, vector<128x32xbf16>, vector<8x32xf32> -> vector<8x32xf32>
    %122 = vector.broadcast %1 : vector<1x32xf32> to vector<8x32xf32>
    %123 = arith.addf %121, %122 : vector<8x32xf32>
    %124 = arith.truncf %119 : vector<8x128xf32> to vector<8x128xbf16>
    %cst_43 = arith.constant dense<0.000000e+00> : vector<8x32xf32>
    %125 = tpu.matmul %124, %0, %cst_43 {dimension_numbers = #tpu.dot_dimension_numbers<[1], [0], [0], [1], [0, 0, 1, 1], [], []>} : vector<8x128xbf16>, vector<128x32xbf16>, vector<8x32xf32> -> vector<8x32xf32>
    %126 = vector.broadcast %1 : vector<1x32xf32> to vector<8x32xf32>
    %127 = arith.addf %125, %126 : vector<8x32xf32>
    %cst_44 = arith.constant 0.000000e+00 : f32
    %128 = vector.broadcast %cst_44 : f32 to vector<8x32xf32>
    %129 = arith.maximumf %123, %128 : vector<8x32xf32>
    %130 = arith.truncf %129 : vector<8x32xf32> to vector<8x32xbf16>
    %c1_45 = arith.constant 1 : index
    %c0_46 = arith.constant 0 : index
    %c0_47 = arith.constant 0 : index
    %131 = vector.load %arg7[%c1_45, %c0_46, %c0_47] : memref<2x8x32xbf16, #tpu.memory_space<vmem>>, vector<1x8x32xbf16>
    %132 = vector.shape_cast %131 : vector<1x8x32xbf16> to vector<8x32xbf16>
    %133 = vector.shape_cast %130 : vector<8x32xbf16> to vector<1x8x32xbf16>
    tpu.vector_store %arg7[%c1_45, %c0_46, %c0_47], %133 {strides = array<i32>} : memref<2x8x32xbf16, #tpu.memory_space<vmem>>, vector<1x8x32xbf16>,
    %cst_48 = arith.constant 0.000000e+00 : f32
    %134 = vector.broadcast %cst_48 : f32 to vector<8x32xf32>
    %135 = arith.maximumf %127, %134 : vector<8x32xf32>
    %136 = arith.truncf %135 : vector<8x32xf32> to vector<8x32xbf16>
    %c1_49 = arith.constant 1 : index
    %c0_50 = arith.constant 0 : index
    %c0_51 = arith.constant 0 : index
    %137 = vector.load %arg8[%c1_49, %c0_50, %c0_51] : memref<2x8x32xbf16, #tpu.memory_space<vmem>>, vector<1x8x32xbf16>
    %138 = vector.shape_cast %137 : vector<1x8x32xbf16> to vector<8x32xbf16>
    %139 = vector.shape_cast %136 : vector<8x32xbf16> to vector<1x8x32xbf16>
    tpu.vector_store %arg8[%c1_49, %c0_50, %c0_51], %139 {strides = array<i32>} : memref<2x8x32xbf16, #tpu.memory_space<vmem>>, vector<1x8x32xbf16>,
    return
  }
  func.func @transform_0(%arg0: i32, %arg1: memref<2xi32, #tpu.memory_space<smem>>, %arg2: memref<2xi32, #tpu.memory_space<smem>>) -> (i32, i32, i32) {
    %c0_i32 = arith.constant 0 : i32
    %c0_i32_0 = arith.constant 0 : i32
    %c0_i32_1 = arith.constant 0 : i32
    return %arg0, %c0_i32, %c0_i32_0 : i32, i32, i32
  }
  func.func @transform_1(%arg0: i32, %arg1: memref<2xi32, #tpu.memory_space<smem>>, %arg2: memref<2xi32, #tpu.memory_space<smem>>) -> (i32, i32, i32) {
    %c0_i32 = arith.constant 0 : i32
    %c0_i32_0 = arith.constant 0 : i32
    %c0_i32_1 = arith.constant 0 : i32
    return %arg0, %c0_i32, %c0_i32_0 : i32, i32, i32
  }
  func.func @transform_2(%arg0: i32, %arg1: memref<2xi32, #tpu.memory_space<smem>>, %arg2: memref<2xi32, #tpu.memory_space<smem>>) -> (i32, i32) {
    %c0_i32 = arith.constant 0 : i32
    %c0_i32_0 = arith.constant 0 : i32
    %c0_i32_1 = arith.constant 0 : i32
    return %c0_i32, %c0_i32_0 : i32, i32
  }
  func.func @transform_3(%arg0: i32, %arg1: memref<2xi32, #tpu.memory_space<smem>>, %arg2: memref<2xi32, #tpu.memory_space<smem>>) -> (i32, i32) {
    %c0_i32 = arith.constant 0 : i32
    %c0_i32_0 = arith.constant 0 : i32
    %c0_i32_1 = arith.constant 0 : i32
    return %c0_i32, %c0_i32_0 : i32, i32
  }
  func.func @transform_4(%arg0: i32, %arg1: memref<2xi32, #tpu.memory_space<smem>>, %arg2: memref<2xi32, #tpu.memory_space<smem>>) -> (i32, i32, i32) {
    %c0_i32 = arith.constant 0 : i32
    %c0_i32_0 = arith.constant 0 : i32
    %c0_i32_1 = arith.constant 0 : i32
    return %arg0, %c0_i32, %c0_i32_0 : i32, i32, i32
  }
  func.func @transform_5(%arg0: i32, %arg1: memref<2xi32, #tpu.memory_space<smem>>, %arg2: memref<2xi32, #tpu.memory_space<smem>>) -> (i32, i32, i32) {
    %c0_i32 = arith.constant 0 : i32
    %c0_i32_0 = arith.constant 0 : i32
    %c0_i32_1 = arith.constant 0 : i32
    return %arg0, %c0_i32, %c0_i32_0 : i32, i32, i32
  }
}

module attributes {stable_mosaic.version = 11 : i64} {
  func.func @_bilstm_kernel(%arg0: i32, %arg1: memref<1x16x16xbf16, #tpu.memory_space<vmem>>, %arg2: memref<1x2x1xi32, #tpu.memory_space<vmem>>, %arg3: memref<16x128xbf16, #tpu.memory_space<vmem>>, %arg4: memref<16x64xbf16, #tpu.memory_space<vmem>>, %arg5: memref<16x64xbf16, #tpu.memory_space<vmem>>, %arg6: memref<1x128xf32, #tpu.memory_space<vmem>>, %arg7: memref<1x8x2x16xbf16, #tpu.memory_space<vmem>>, %arg8: memref<1x8x2x16xbf16, #tpu.memory_space<vmem>>, %arg9: memref<8x2x64xf32, #tpu.memory_space<vmem>>, %arg10: memref<8x2x64xf32, #tpu.memory_space<vmem>>) attributes {dimension_semantics = [#tpu.dimension_semantics<parallel>], iteration_bounds = array<i64: 1>, scalar_prefetch = 0 : i64, scratch_operands = 2 : i64, tpu.core_type = #tpu.core_type<tc>, window_params = [{transform_indices = @transform_0, window_bounds = array<i64: 1, 16, 16>}, {transform_indices = @transform_1, window_bounds = array<i64: 1, 2, 1>}, {pipeline_mode = #tpu.pipeline_mode<synchronous>, transform_indices = @transform_2, window_bounds = array<i64: 16, 128>}, {pipeline_mode = #tpu.pipeline_mode<synchronous>, transform_indices = @transform_3, window_bounds = array<i64: 16, 64>}, {pipeline_mode = #tpu.pipeline_mode<synchronous>, transform_indices = @transform_4, window_bounds = array<i64: 16, 64>}, {pipeline_mode = #tpu.pipeline_mode<synchronous>, transform_indices = @transform_5, window_bounds = array<i64: 1, 128>}, {transform_indices = @transform_6, window_bounds = array<i64: 1, 8, 2, 16>}, {transform_indices = @transform_7, window_bounds = array<i64: 1, 8, 2, 16>}]} {
    %c0 = arith.constant 0 : index
    %c0_0 = arith.constant 0 : index
    %c0_1 = arith.constant 0 : index
    %0 = vector.load %arg1[%c0, %c0_0, %c0_1] : memref<1x16x16xbf16, #tpu.memory_space<vmem>>, vector<1x16x16xbf16>
    %1 = vector.shape_cast %0 : vector<1x16x16xbf16> to vector<16x16xbf16>
    %c0_2 = arith.constant 0 : index
    %c0_3 = arith.constant 0 : index
    %2 = vector.load %arg3[%c0_2, %c0_3] : memref<16x128xbf16, #tpu.memory_space<vmem>>, vector<16x128xbf16>
    %cst = arith.constant dense<0.000000e+00> : vector<16x128xf32>
    %3 = tpu.matmul %1, %2, %cst {dimension_numbers = #tpu.dot_dimension_numbers<[1], [0], [0], [1], [0, 0, 1, 1], [], []>} : vector<16x16xbf16>, vector<16x128xbf16>, vector<16x128xf32> -> vector<16x128xf32>
    %c0_4 = arith.constant 0 : index
    %c0_5 = arith.constant 0 : index
    %4 = vector.load %arg6[%c0_4, %c0_5] : memref<1x128xf32, #tpu.memory_space<vmem>>, vector<1x128xf32>
    %5 = vector.broadcast %4 : vector<1x128xf32> to vector<16x128xf32>
    %6 = arith.addf %3, %5 : vector<16x128xf32>
    %7 = vector.extract_strided_slice %6 {offsets = [0, 0], sizes = [2, 64], strides = [1, 1]} : vector<16x128xf32> to vector<2x64xf32>
    %c0_6 = arith.constant 0 : index
    %c0_7 = arith.constant 0 : index
    %c0_8 = arith.constant 0 : index
    %8 = vector.load %arg9[%c0_6, %c0_7, %c0_8] : memref<8x2x64xf32, #tpu.memory_space<vmem>>, vector<1x2x64xf32>
    %9 = vector.shape_cast %8 : vector<1x2x64xf32> to vector<2x64xf32>
    %10 = vector.shape_cast %7 : vector<2x64xf32> to vector<1x2x64xf32>
    tpu.vector_store %arg9[%c0_6, %c0_7, %c0_8], %10 {strides = array<i32>} : memref<8x2x64xf32, #tpu.memory_space<vmem>>, vector<1x2x64xf32>,
    %11 = vector.extract_strided_slice %6 {offsets = [0, 64], sizes = [2, 64], strides = [1, 1]} : vector<16x128xf32> to vector<2x64xf32>
    %c0_9 = arith.constant 0 : index
    %c0_10 = arith.constant 0 : index
    %c0_11 = arith.constant 0 : index
    %12 = vector.load %arg10[%c0_9, %c0_10, %c0_11] : memref<8x2x64xf32, #tpu.memory_space<vmem>>, vector<1x2x64xf32>
    %13 = vector.shape_cast %12 : vector<1x2x64xf32> to vector<2x64xf32>
    %14 = vector.shape_cast %11 : vector<2x64xf32> to vector<1x2x64xf32>
    tpu.vector_store %arg10[%c0_9, %c0_10, %c0_11], %14 {strides = array<i32>} : memref<8x2x64xf32, #tpu.memory_space<vmem>>, vector<1x2x64xf32>,
    %15 = vector.extract_strided_slice %6 {offsets = [2, 0], sizes = [2, 64], strides = [1, 1]} : vector<16x128xf32> to vector<2x64xf32>
    %c1 = arith.constant 1 : index
    %c0_12 = arith.constant 0 : index
    %c0_13 = arith.constant 0 : index
    %16 = vector.load %arg9[%c1, %c0_12, %c0_13] : memref<8x2x64xf32, #tpu.memory_space<vmem>>, vector<1x2x64xf32>
    %17 = vector.shape_cast %16 : vector<1x2x64xf32> to vector<2x64xf32>
    %18 = vector.shape_cast %15 : vector<2x64xf32> to vector<1x2x64xf32>
    tpu.vector_store %arg9[%c1, %c0_12, %c0_13], %18 {strides = array<i32>} : memref<8x2x64xf32, #tpu.memory_space<vmem>>, vector<1x2x64xf32>,
    %19 = vector.extract_strided_slice %6 {offsets = [2, 64], sizes = [2, 64], strides = [1, 1]} : vector<16x128xf32> to vector<2x64xf32>
    %c1_14 = arith.constant 1 : index
    %c0_15 = arith.constant 0 : index
    %c0_16 = arith.constant 0 : index
    %20 = vector.load %arg10[%c1_14, %c0_15, %c0_16] : memref<8x2x64xf32, #tpu.memory_space<vmem>>, vector<1x2x64xf32>
    %21 = vector.shape_cast %20 : vector<1x2x64xf32> to vector<2x64xf32>
    %22 = vector.shape_cast %19 : vector<2x64xf32> to vector<1x2x64xf32>
    tpu.vector_store %arg10[%c1_14, %c0_15, %c0_16], %22 {strides = array<i32>} : memref<8x2x64xf32, #tpu.memory_space<vmem>>, vector<1x2x64xf32>,
    %23 = vector.extract_strided_slice %6 {offsets = [4, 0], sizes = [2, 64], strides = [1, 1]} : vector<16x128xf32> to vector<2x64xf32>
    %c2 = arith.constant 2 : index
    %c0_17 = arith.constant 0 : index
    %c0_18 = arith.constant 0 : index
    %24 = vector.load %arg9[%c2, %c0_17, %c0_18] : memref<8x2x64xf32, #tpu.memory_space<vmem>>, vector<1x2x64xf32>
    %25 = vector.shape_cast %24 : vector<1x2x64xf32> to vector<2x64xf32>
    %26 = vector.shape_cast %23 : vector<2x64xf32> to vector<1x2x64xf32>
    tpu.vector_store %arg9[%c2, %c0_17, %c0_18], %26 {strides = array<i32>} : memref<8x2x64xf32, #tpu.memory_space<vmem>>, vector<1x2x64xf32>,
    %27 = vector.extract_strided_slice %6 {offsets = [4, 64], sizes = [2, 64], strides = [1, 1]} : vector<16x128xf32> to vector<2x64xf32>
    %c2_19 = arith.constant 2 : index
    %c0_20 = arith.constant 0 : index
    %c0_21 = arith.constant 0 : index
    %28 = vector.load %arg10[%c2_19, %c0_20, %c0_21] : memref<8x2x64xf32, #tpu.memory_space<vmem>>, vector<1x2x64xf32>
    %29 = vector.shape_cast %28 : vector<1x2x64xf32> to vector<2x64xf32>
    %30 = vector.shape_cast %27 : vector<2x64xf32> to vector<1x2x64xf32>
    tpu.vector_store %arg10[%c2_19, %c0_20, %c0_21], %30 {strides = array<i32>} : memref<8x2x64xf32, #tpu.memory_space<vmem>>, vector<1x2x64xf32>,
    %31 = vector.extract_strided_slice %6 {offsets = [6, 0], sizes = [2, 64], strides = [1, 1]} : vector<16x128xf32> to vector<2x64xf32>
    %c3 = arith.constant 3 : index
    %c0_22 = arith.constant 0 : index
    %c0_23 = arith.constant 0 : index
    %32 = vector.load %arg9[%c3, %c0_22, %c0_23] : memref<8x2x64xf32, #tpu.memory_space<vmem>>, vector<1x2x64xf32>
    %33 = vector.shape_cast %32 : vector<1x2x64xf32> to vector<2x64xf32>
    %34 = vector.shape_cast %31 : vector<2x64xf32> to vector<1x2x64xf32>
    tpu.vector_store %arg9[%c3, %c0_22, %c0_23], %34 {strides = array<i32>} : memref<8x2x64xf32, #tpu.memory_space<vmem>>, vector<1x2x64xf32>,
    %35 = vector.extract_strided_slice %6 {offsets = [6, 64], sizes = [2, 64], strides = [1, 1]} : vector<16x128xf32> to vector<2x64xf32>
    %c3_24 = arith.constant 3 : index
    %c0_25 = arith.constant 0 : index
    %c0_26 = arith.constant 0 : index
    %36 = vector.load %arg10[%c3_24, %c0_25, %c0_26] : memref<8x2x64xf32, #tpu.memory_space<vmem>>, vector<1x2x64xf32>
    %37 = vector.shape_cast %36 : vector<1x2x64xf32> to vector<2x64xf32>
    %38 = vector.shape_cast %35 : vector<2x64xf32> to vector<1x2x64xf32>
    tpu.vector_store %arg10[%c3_24, %c0_25, %c0_26], %38 {strides = array<i32>} : memref<8x2x64xf32, #tpu.memory_space<vmem>>, vector<1x2x64xf32>,
    %39 = vector.extract_strided_slice %6 {offsets = [8, 0], sizes = [2, 64], strides = [1, 1]} : vector<16x128xf32> to vector<2x64xf32>
    %c4 = arith.constant 4 : index
    %c0_27 = arith.constant 0 : index
    %c0_28 = arith.constant 0 : index
    %40 = vector.load %arg9[%c4, %c0_27, %c0_28] : memref<8x2x64xf32, #tpu.memory_space<vmem>>, vector<1x2x64xf32>
    %41 = vector.shape_cast %40 : vector<1x2x64xf32> to vector<2x64xf32>
    %42 = vector.shape_cast %39 : vector<2x64xf32> to vector<1x2x64xf32>
    tpu.vector_store %arg9[%c4, %c0_27, %c0_28], %42 {strides = array<i32>} : memref<8x2x64xf32, #tpu.memory_space<vmem>>, vector<1x2x64xf32>,
    %43 = vector.extract_strided_slice %6 {offsets = [8, 64], sizes = [2, 64], strides = [1, 1]} : vector<16x128xf32> to vector<2x64xf32>
    %c4_29 = arith.constant 4 : index
    %c0_30 = arith.constant 0 : index
    %c0_31 = arith.constant 0 : index
    %44 = vector.load %arg10[%c4_29, %c0_30, %c0_31] : memref<8x2x64xf32, #tpu.memory_space<vmem>>, vector<1x2x64xf32>
    %45 = vector.shape_cast %44 : vector<1x2x64xf32> to vector<2x64xf32>
    %46 = vector.shape_cast %43 : vector<2x64xf32> to vector<1x2x64xf32>
    tpu.vector_store %arg10[%c4_29, %c0_30, %c0_31], %46 {strides = array<i32>} : memref<8x2x64xf32, #tpu.memory_space<vmem>>, vector<1x2x64xf32>,
    %47 = vector.extract_strided_slice %6 {offsets = [10, 0], sizes = [2, 64], strides = [1, 1]} : vector<16x128xf32> to vector<2x64xf32>
    %c5 = arith.constant 5 : index
    %c0_32 = arith.constant 0 : index
    %c0_33 = arith.constant 0 : index
    %48 = vector.load %arg9[%c5, %c0_32, %c0_33] : memref<8x2x64xf32, #tpu.memory_space<vmem>>, vector<1x2x64xf32>
    %49 = vector.shape_cast %48 : vector<1x2x64xf32> to vector<2x64xf32>
    %50 = vector.shape_cast %47 : vector<2x64xf32> to vector<1x2x64xf32>
    tpu.vector_store %arg9[%c5, %c0_32, %c0_33], %50 {strides = array<i32>} : memref<8x2x64xf32, #tpu.memory_space<vmem>>, vector<1x2x64xf32>,
    %51 = vector.extract_strided_slice %6 {offsets = [10, 64], sizes = [2, 64], strides = [1, 1]} : vector<16x128xf32> to vector<2x64xf32>
    %c5_34 = arith.constant 5 : index
    %c0_35 = arith.constant 0 : index
    %c0_36 = arith.constant 0 : index
    %52 = vector.load %arg10[%c5_34, %c0_35, %c0_36] : memref<8x2x64xf32, #tpu.memory_space<vmem>>, vector<1x2x64xf32>
    %53 = vector.shape_cast %52 : vector<1x2x64xf32> to vector<2x64xf32>
    %54 = vector.shape_cast %51 : vector<2x64xf32> to vector<1x2x64xf32>
    tpu.vector_store %arg10[%c5_34, %c0_35, %c0_36], %54 {strides = array<i32>} : memref<8x2x64xf32, #tpu.memory_space<vmem>>, vector<1x2x64xf32>,
    %55 = vector.extract_strided_slice %6 {offsets = [12, 0], sizes = [2, 64], strides = [1, 1]} : vector<16x128xf32> to vector<2x64xf32>
    %c6 = arith.constant 6 : index
    %c0_37 = arith.constant 0 : index
    %c0_38 = arith.constant 0 : index
    %56 = vector.load %arg9[%c6, %c0_37, %c0_38] : memref<8x2x64xf32, #tpu.memory_space<vmem>>, vector<1x2x64xf32>
    %57 = vector.shape_cast %56 : vector<1x2x64xf32> to vector<2x64xf32>
    %58 = vector.shape_cast %55 : vector<2x64xf32> to vector<1x2x64xf32>
    tpu.vector_store %arg9[%c6, %c0_37, %c0_38], %58 {strides = array<i32>} : memref<8x2x64xf32, #tpu.memory_space<vmem>>, vector<1x2x64xf32>,
    %59 = vector.extract_strided_slice %6 {offsets = [12, 64], sizes = [2, 64], strides = [1, 1]} : vector<16x128xf32> to vector<2x64xf32>
    %c6_39 = arith.constant 6 : index
    %c0_40 = arith.constant 0 : index
    %c0_41 = arith.constant 0 : index
    %60 = vector.load %arg10[%c6_39, %c0_40, %c0_41] : memref<8x2x64xf32, #tpu.memory_space<vmem>>, vector<1x2x64xf32>
    %61 = vector.shape_cast %60 : vector<1x2x64xf32> to vector<2x64xf32>
    %62 = vector.shape_cast %59 : vector<2x64xf32> to vector<1x2x64xf32>
    tpu.vector_store %arg10[%c6_39, %c0_40, %c0_41], %62 {strides = array<i32>} : memref<8x2x64xf32, #tpu.memory_space<vmem>>, vector<1x2x64xf32>,
    %63 = vector.extract_strided_slice %6 {offsets = [14, 0], sizes = [2, 64], strides = [1, 1]} : vector<16x128xf32> to vector<2x64xf32>
    %c7 = arith.constant 7 : index
    %c0_42 = arith.constant 0 : index
    %c0_43 = arith.constant 0 : index
    %64 = vector.load %arg9[%c7, %c0_42, %c0_43] : memref<8x2x64xf32, #tpu.memory_space<vmem>>, vector<1x2x64xf32>
    %65 = vector.shape_cast %64 : vector<1x2x64xf32> to vector<2x64xf32>
    %66 = vector.shape_cast %63 : vector<2x64xf32> to vector<1x2x64xf32>
    tpu.vector_store %arg9[%c7, %c0_42, %c0_43], %66 {strides = array<i32>} : memref<8x2x64xf32, #tpu.memory_space<vmem>>, vector<1x2x64xf32>,
    %67 = vector.extract_strided_slice %6 {offsets = [14, 64], sizes = [2, 64], strides = [1, 1]} : vector<16x128xf32> to vector<2x64xf32>
    %c7_44 = arith.constant 7 : index
    %c0_45 = arith.constant 0 : index
    %c0_46 = arith.constant 0 : index
    %68 = vector.load %arg10[%c7_44, %c0_45, %c0_46] : memref<8x2x64xf32, #tpu.memory_space<vmem>>, vector<1x2x64xf32>
    %69 = vector.shape_cast %68 : vector<1x2x64xf32> to vector<2x64xf32>
    %70 = vector.shape_cast %67 : vector<2x64xf32> to vector<1x2x64xf32>
    tpu.vector_store %arg10[%c7_44, %c0_45, %c0_46], %70 {strides = array<i32>} : memref<8x2x64xf32, #tpu.memory_space<vmem>>, vector<1x2x64xf32>,
    %c0_47 = arith.constant 0 : index
    %c0_48 = arith.constant 0 : index
    %71 = vector.load %arg4[%c0_47, %c0_48] : memref<16x64xbf16, #tpu.memory_space<vmem>>, vector<16x64xbf16>
    %c0_49 = arith.constant 0 : index
    %c0_50 = arith.constant 0 : index
    %72 = vector.load %arg5[%c0_49, %c0_50] : memref<16x64xbf16, #tpu.memory_space<vmem>>, vector<16x64xbf16>
    %c0_51 = arith.constant 0 : index
    %c0_52 = arith.constant 0 : index
    %c0_53 = arith.constant 0 : index
    %73 = vector.load %arg2[%c0_51, %c0_52, %c0_53] : memref<1x2x1xi32, #tpu.memory_space<vmem>>, vector<1x2x1xi32>
    %74 = vector.shape_cast %73 : vector<1x2x1xi32> to vector<2x1xi32>
    %cst_54 = arith.constant 0.000000e+00 : f32
    %75 = vector.broadcast %cst_54 : f32 to vector<2x16xf32>
    %cst_55 = arith.constant 0.000000e+00 : f32
    %76 = vector.broadcast %cst_55 : f32 to vector<2x16xf32>
    %c0_i32 = arith.constant 0 : i32
    %c7_i32 = arith.constant 7 : i32
    %77 = arith.subi %c7_i32, %c0_i32 : i32
    %78 = arith.index_cast %c0_i32 : i32 to index
    %c0_56 = arith.constant 0 : index
    %c0_57 = arith.constant 0 : index
    %79 = vector.load %arg9[%78, %c0_56, %c0_57] : memref<8x2x64xf32, #tpu.memory_space<vmem>>, vector<1x2x64xf32>
    %80 = vector.shape_cast %79 : vector<1x2x64xf32> to vector<2x64xf32>
    %81 = arith.index_cast %77 : i32 to index
    %c0_58 = arith.constant 0 : index
    %c0_59 = arith.constant 0 : index
    %82 = vector.load %arg10[%81, %c0_58, %c0_59] : memref<8x2x64xf32, #tpu.memory_space<vmem>>, vector<1x2x64xf32>
    %83 = vector.shape_cast %82 : vector<1x2x64xf32> to vector<2x64xf32>
    %84 = arith.truncf %75 : vector<2x16xf32> to vector<2x16xbf16>
    %cst_60 = arith.constant dense<0.000000e+00> : vector<2x64xf32>
    %85 = tpu.matmul %84, %71, %cst_60 {dimension_numbers = #tpu.dot_dimension_numbers<[1], [0], [0], [1], [0, 0, 1, 1], [], []>} : vector<2x16xbf16>, vector<16x64xbf16>, vector<2x64xf32> -> vector<2x64xf32>
    %86 = arith.addf %80, %85 : vector<2x64xf32>
    %87 = vector.extract_strided_slice %86 {offsets = [0, 0], sizes = [2, 16], strides = [1, 1]} : vector<2x64xf32> to vector<2x16xf32>
    %88 = arith.negf %87 : vector<2x16xf32>
    %89 = math.exp %88 : vector<2x16xf32>
    %cst_61 = arith.constant 1.000000e+00 : f32
    %90 = vector.broadcast %cst_61 : f32 to vector<2x16xf32>
    %91 = arith.addf %90, %89 : vector<2x16xf32>
    %92 = arith.divf %90, %91 : vector<2x16xf32>
    %93 = vector.extract_strided_slice %86 {offsets = [0, 16], sizes = [2, 16], strides = [1, 1]} : vector<2x64xf32> to vector<2x16xf32>
    %94 = arith.negf %93 : vector<2x16xf32>
    %95 = math.exp %94 : vector<2x16xf32>
    %cst_62 = arith.constant 1.000000e+00 : f32
    %96 = vector.broadcast %cst_62 : f32 to vector<2x16xf32>
    %97 = arith.addf %96, %95 : vector<2x16xf32>
    %98 = arith.divf %96, %97 : vector<2x16xf32>
    %99 = vector.extract_strided_slice %86 {offsets = [0, 32], sizes = [2, 16], strides = [1, 1]} : vector<2x64xf32> to vector<2x16xf32>
    %100 = math.tanh %99 : vector<2x16xf32>
    %101 = vector.extract_strided_slice %86 {offsets = [0, 48], sizes = [2, 16], strides = [1, 1]} : vector<2x64xf32> to vector<2x16xf32>
    %102 = arith.negf %101 : vector<2x16xf32>
    %103 = math.exp %102 : vector<2x16xf32>
    %cst_63 = arith.constant 1.000000e+00 : f32
    %104 = vector.broadcast %cst_63 : f32 to vector<2x16xf32>
    %105 = arith.addf %104, %103 : vector<2x16xf32>
    %106 = arith.divf %104, %105 : vector<2x16xf32>
    %107 = arith.mulf %98, %76 : vector<2x16xf32>
    %108 = arith.mulf %92, %100 : vector<2x16xf32>
    %109 = arith.addf %107, %108 : vector<2x16xf32>
    %110 = math.tanh %109 : vector<2x16xf32>
    %111 = arith.mulf %106, %110 : vector<2x16xf32>
    %112 = arith.truncf %75 : vector<2x16xf32> to vector<2x16xbf16>
    %cst_64 = arith.constant dense<0.000000e+00> : vector<2x64xf32>
    %113 = tpu.matmul %112, %72, %cst_64 {dimension_numbers = #tpu.dot_dimension_numbers<[1], [0], [0], [1], [0, 0, 1, 1], [], []>} : vector<2x16xbf16>, vector<16x64xbf16>, vector<2x64xf32> -> vector<2x64xf32>
    %114 = arith.addf %83, %113 : vector<2x64xf32>
    %115 = vector.extract_strided_slice %114 {offsets = [0, 0], sizes = [2, 16], strides = [1, 1]} : vector<2x64xf32> to vector<2x16xf32>
    %116 = arith.negf %115 : vector<2x16xf32>
    %117 = math.exp %116 : vector<2x16xf32>
    %cst_65 = arith.constant 1.000000e+00 : f32
    %118 = vector.broadcast %cst_65 : f32 to vector<2x16xf32>
    %119 = arith.addf %118, %117 : vector<2x16xf32>
    %120 = arith.divf %118, %119 : vector<2x16xf32>
    %121 = vector.extract_strided_slice %114 {offsets = [0, 16], sizes = [2, 16], strides = [1, 1]} : vector<2x64xf32> to vector<2x16xf32>
    %122 = arith.negf %121 : vector<2x16xf32>
    %123 = math.exp %122 : vector<2x16xf32>
    %cst_66 = arith.constant 1.000000e+00 : f32
    %124 = vector.broadcast %cst_66 : f32 to vector<2x16xf32>
    %125 = arith.addf %124, %123 : vector<2x16xf32>
    %126 = arith.divf %124, %125 : vector<2x16xf32>
    %127 = vector.extract_strided_slice %114 {offsets = [0, 32], sizes = [2, 16], strides = [1, 1]} : vector<2x64xf32> to vector<2x16xf32>
    %128 = math.tanh %127 : vector<2x16xf32>
    %129 = vector.extract_strided_slice %114 {offsets = [0, 48], sizes = [2, 16], strides = [1, 1]} : vector<2x64xf32> to vector<2x16xf32>
    %130 = arith.negf %129 : vector<2x16xf32>
    %131 = math.exp %130 : vector<2x16xf32>
    %cst_67 = arith.constant 1.000000e+00 : f32
    %132 = vector.broadcast %cst_67 : f32 to vector<2x16xf32>
    %133 = arith.addf %132, %131 : vector<2x16xf32>
    %134 = arith.divf %132, %133 : vector<2x16xf32>
    %135 = arith.mulf %126, %76 : vector<2x16xf32>
    %136 = arith.mulf %120, %128 : vector<2x16xf32>
    %137 = arith.addf %135, %136 : vector<2x16xf32>
    %138 = math.tanh %137 : vector<2x16xf32>
    %139 = arith.mulf %134, %138 : vector<2x16xf32>
    %140 = vector.broadcast %c0_i32 : i32 to vector<2x1xi32>
    %141 = arith.cmpi slt, %140, %74 : vector<2x1xi32>
    %142 = arith.extui %141 : vector<2x1xi1> to vector<2x1xi32>
    %143 = arith.sitofp %142 : vector<2x1xi32> to vector<2x1xf32>
    %144 = vector.broadcast %77 : i32 to vector<2x1xi32>
    %145 = arith.cmpi slt, %144, %74 : vector<2x1xi32>
    %146 = arith.extui %145 : vector<2x1xi1> to vector<2x1xi32>
    %147 = arith.sitofp %146 : vector<2x1xi32> to vector<2x1xf32>
    %148 = vector.broadcast %143 : vector<2x1xf32> to vector<2x16xf32>
    %149 = arith.mulf %148, %111 : vector<2x16xf32>
    %cst_68 = arith.constant 1.000000e+00 : f32
    %150 = vector.broadcast %cst_68 : f32 to vector<2x1xf32>
    %151 = arith.subf %150, %143 : vector<2x1xf32>
    %152 = vector.broadcast %151 : vector<2x1xf32> to vector<2x16xf32>
    %153 = arith.mulf %152, %75 : vector<2x16xf32>
    %154 = arith.addf %149, %153 : vector<2x16xf32>
    %155 = vector.broadcast %143 : vector<2x1xf32> to vector<2x16xf32>
    %156 = arith.mulf %155, %109 : vector<2x16xf32>
    %cst_69 = arith.constant 1.000000e+00 : f32
    %157 = vector.broadcast %cst_69 : f32 to vector<2x1xf32>
    %158 = arith.subf %157, %143 : vector<2x1xf32>
    %159 = vector.broadcast %158 : vector<2x1xf32> to vector<2x16xf32>
    %160 = arith.mulf %159, %76 : vector<2x16xf32>
    %161 = arith.addf %156, %160 : vector<2x16xf32>
    %162 = vector.broadcast %147 : vector<2x1xf32> to vector<2x16xf32>
    %163 = arith.mulf %162, %139 : vector<2x16xf32>
    %cst_70 = arith.constant 1.000000e+00 : f32
    %164 = vector.broadcast %cst_70 : f32 to vector<2x1xf32>
    %165 = arith.subf %164, %147 : vector<2x1xf32>
    %166 = vector.broadcast %165 : vector<2x1xf32> to vector<2x16xf32>
    %167 = arith.mulf %166, %75 : vector<2x16xf32>
    %168 = arith.addf %163, %167 : vector<2x16xf32>
    %169 = vector.broadcast %147 : vector<2x1xf32> to vector<2x16xf32>
    %170 = arith.mulf %169, %137 : vector<2x16xf32>
    %cst_71 = arith.constant 1.000000e+00 : f32
    %171 = vector.broadcast %cst_71 : f32 to vector<2x1xf32>
    %172 = arith.subf %171, %147 : vector<2x1xf32>
    %173 = vector.broadcast %172 : vector<2x1xf32> to vector<2x16xf32>
    %174 = arith.mulf %173, %76 : vector<2x16xf32>
    %175 = arith.addf %170, %174 : vector<2x16xf32>
    %176 = vector.broadcast %143 : vector<2x1xf32> to vector<2x16xf32>
    %177 = arith.mulf %154, %176 : vector<2x16xf32>
    %178 = vector.broadcast %147 : vector<2x1xf32> to vector<2x16xf32>
    %179 = arith.mulf %168, %178 : vector<2x16xf32>
    %180 = arith.truncf %177 : vector<2x16xf32> to vector<2x16xbf16>
    %c0_72 = arith.constant 0 : index
    %181 = arith.index_cast %c0_i32 : i32 to index
    %c0_73 = arith.constant 0 : index
    %c0_74 = arith.constant 0 : index
    %182 = vector.load %arg7[%c0_72, %181, %c0_73, %c0_74] : memref<1x8x2x16xbf16, #tpu.memory_space<vmem>>, vector<1x1x2x16xbf16>
    %183 = vector.shape_cast %182 : vector<1x1x2x16xbf16> to vector<2x16xbf16>
    %184 = vector.shape_cast %180 : vector<2x16xbf16> to vector<1x1x2x16xbf16>
    tpu.vector_store %arg7[%c0_72, %181, %c0_73, %c0_74], %184 {strides = array<i32>} : memref<1x8x2x16xbf16, #tpu.memory_space<vmem>>, vector<1x1x2x16xbf16>,
    %185 = arith.truncf %179 : vector<2x16xf32> to vector<2x16xbf16>
    %c0_75 = arith.constant 0 : index
    %186 = arith.index_cast %77 : i32 to index
    %c0_76 = arith.constant 0 : index
    %c0_77 = arith.constant 0 : index
    %187 = vector.load %arg8[%c0_75, %186, %c0_76, %c0_77] : memref<1x8x2x16xbf16, #tpu.memory_space<vmem>>, vector<1x1x2x16xbf16>
    %188 = vector.shape_cast %187 : vector<1x1x2x16xbf16> to vector<2x16xbf16>
    %189 = vector.shape_cast %185 : vector<2x16xbf16> to vector<1x1x2x16xbf16>
    tpu.vector_store %arg8[%c0_75, %186, %c0_76, %c0_77], %189 {strides = array<i32>} : memref<1x8x2x16xbf16, #tpu.memory_space<vmem>>, vector<1x1x2x16xbf16>,
    %c1_i32 = arith.constant 1 : i32
    %c7_i32_78 = arith.constant 7 : i32
    %190 = arith.subi %c7_i32_78, %c1_i32 : i32
    %191 = arith.index_cast %c1_i32 : i32 to index
    %c0_79 = arith.constant 0 : index
    %c0_80 = arith.constant 0 : index
    %192 = vector.load %arg9[%191, %c0_79, %c0_80] : memref<8x2x64xf32, #tpu.memory_space<vmem>>, vector<1x2x64xf32>
    %193 = vector.shape_cast %192 : vector<1x2x64xf32> to vector<2x64xf32>
    %194 = arith.index_cast %190 : i32 to index
    %c0_81 = arith.constant 0 : index
    %c0_82 = arith.constant 0 : index
    %195 = vector.load %arg10[%194, %c0_81, %c0_82] : memref<8x2x64xf32, #tpu.memory_space<vmem>>, vector<1x2x64xf32>
    %196 = vector.shape_cast %195 : vector<1x2x64xf32> to vector<2x64xf32>
    %197 = arith.truncf %154 : vector<2x16xf32> to vector<2x16xbf16>
    %cst_83 = arith.constant dense<0.000000e+00> : vector<2x64xf32>
    %198 = tpu.matmul %197, %71, %cst_83 {dimension_numbers = #tpu.dot_dimension_numbers<[1], [0], [0], [1], [0, 0, 1, 1], [], []>} : vector<2x16xbf16>, vector<16x64xbf16>, vector<2x64xf32> -> vector<2x64xf32>
    %199 = arith.addf %193, %198 : vector<2x64xf32>
    %200 = vector.extract_strided_slice %199 {offsets = [0, 0], sizes = [2, 16], strides = [1, 1]} : vector<2x64xf32> to vector<2x16xf32>
    %201 = arith.negf %200 : vector<2x16xf32>
    %202 = math.exp %201 : vector<2x16xf32>
    %cst_84 = arith.constant 1.000000e+00 : f32
    %203 = vector.broadcast %cst_84 : f32 to vector<2x16xf32>
    %204 = arith.addf %203, %202 : vector<2x16xf32>
    %205 = arith.divf %203, %204 : vector<2x16xf32>
    %206 = vector.extract_strided_slice %199 {offsets = [0, 16], sizes = [2, 16], strides = [1, 1]} : vector<2x64xf32> to vector<2x16xf32>
    %207 = arith.negf %206 : vector<2x16xf32>
    %208 = math.exp %207 : vector<2x16xf32>
    %cst_85 = arith.constant 1.000000e+00 : f32
    %209 = vector.broadcast %cst_85 : f32 to vector<2x16xf32>
    %210 = arith.addf %209, %208 : vector<2x16xf32>
    %211 = arith.divf %209, %210 : vector<2x16xf32>
    %212 = vector.extract_strided_slice %199 {offsets = [0, 32], sizes = [2, 16], strides = [1, 1]} : vector<2x64xf32> to vector<2x16xf32>
    %213 = math.tanh %212 : vector<2x16xf32>
    %214 = vector.extract_strided_slice %199 {offsets = [0, 48], sizes = [2, 16], strides = [1, 1]} : vector<2x64xf32> to vector<2x16xf32>
    %215 = arith.negf %214 : vector<2x16xf32>
    %216 = math.exp %215 : vector<2x16xf32>
    %cst_86 = arith.constant 1.000000e+00 : f32
    %217 = vector.broadcast %cst_86 : f32 to vector<2x16xf32>
    %218 = arith.addf %217, %216 : vector<2x16xf32>
    %219 = arith.divf %217, %218 : vector<2x16xf32>
    %220 = arith.mulf %211, %161 : vector<2x16xf32>
    %221 = arith.mulf %205, %213 : vector<2x16xf32>
    %222 = arith.addf %220, %221 : vector<2x16xf32>
    %223 = math.tanh %222 : vector<2x16xf32>
    %224 = arith.mulf %219, %223 : vector<2x16xf32>
    %225 = arith.truncf %168 : vector<2x16xf32> to vector<2x16xbf16>
    %cst_87 = arith.constant dense<0.000000e+00> : vector<2x64xf32>
    %226 = tpu.matmul %225, %72, %cst_87 {dimension_numbers = #tpu.dot_dimension_numbers<[1], [0], [0], [1], [0, 0, 1, 1], [], []>} : vector<2x16xbf16>, vector<16x64xbf16>, vector<2x64xf32> -> vector<2x64xf32>
    %227 = arith.addf %196, %226 : vector<2x64xf32>
    %228 = vector.extract_strided_slice %227 {offsets = [0, 0], sizes = [2, 16], strides = [1, 1]} : vector<2x64xf32> to vector<2x16xf32>
    %229 = arith.negf %228 : vector<2x16xf32>
    %230 = math.exp %229 : vector<2x16xf32>
    %cst_88 = arith.constant 1.000000e+00 : f32
    %231 = vector.broadcast %cst_88 : f32 to vector<2x16xf32>
    %232 = arith.addf %231, %230 : vector<2x16xf32>
    %233 = arith.divf %231, %232 : vector<2x16xf32>
    %234 = vector.extract_strided_slice %227 {offsets = [0, 16], sizes = [2, 16], strides = [1, 1]} : vector<2x64xf32> to vector<2x16xf32>
    %235 = arith.negf %234 : vector<2x16xf32>
    %236 = math.exp %235 : vector<2x16xf32>
    %cst_89 = arith.constant 1.000000e+00 : f32
    %237 = vector.broadcast %cst_89 : f32 to vector<2x16xf32>
    %238 = arith.addf %237, %236 : vector<2x16xf32>
    %239 = arith.divf %237, %238 : vector<2x16xf32>
    %240 = vector.extract_strided_slice %227 {offsets = [0, 32], sizes = [2, 16], strides = [1, 1]} : vector<2x64xf32> to vector<2x16xf32>
    %241 = math.tanh %240 : vector<2x16xf32>
    %242 = vector.extract_strided_slice %227 {offsets = [0, 48], sizes = [2, 16], strides = [1, 1]} : vector<2x64xf32> to vector<2x16xf32>
    %243 = arith.negf %242 : vector<2x16xf32>
    %244 = math.exp %243 : vector<2x16xf32>
    %cst_90 = arith.constant 1.000000e+00 : f32
    %245 = vector.broadcast %cst_90 : f32 to vector<2x16xf32>
    %246 = arith.addf %245, %244 : vector<2x16xf32>
    %247 = arith.divf %245, %246 : vector<2x16xf32>
    %248 = arith.mulf %239, %175 : vector<2x16xf32>
    %249 = arith.mulf %233, %241 : vector<2x16xf32>
    %250 = arith.addf %248, %249 : vector<2x16xf32>
    %251 = math.tanh %250 : vector<2x16xf32>
    %252 = arith.mulf %247, %251 : vector<2x16xf32>
    %253 = vector.broadcast %c1_i32 : i32 to vector<2x1xi32>
    %254 = arith.cmpi slt, %253, %74 : vector<2x1xi32>
    %255 = arith.extui %254 : vector<2x1xi1> to vector<2x1xi32>
    %256 = arith.sitofp %255 : vector<2x1xi32> to vector<2x1xf32>
    %257 = vector.broadcast %190 : i32 to vector<2x1xi32>
    %258 = arith.cmpi slt, %257, %74 : vector<2x1xi32>
    %259 = arith.extui %258 : vector<2x1xi1> to vector<2x1xi32>
    %260 = arith.sitofp %259 : vector<2x1xi32> to vector<2x1xf32>
    %261 = vector.broadcast %256 : vector<2x1xf32> to vector<2x16xf32>
    %262 = arith.mulf %261, %224 : vector<2x16xf32>
    %cst_91 = arith.constant 1.000000e+00 : f32
    %263 = vector.broadcast %cst_91 : f32 to vector<2x1xf32>
    %264 = arith.subf %263, %256 : vector<2x1xf32>
    %265 = vector.broadcast %264 : vector<2x1xf32> to vector<2x16xf32>
    %266 = arith.mulf %265, %154 : vector<2x16xf32>
    %267 = arith.addf %262, %266 : vector<2x16xf32>
    %268 = vector.broadcast %256 : vector<2x1xf32> to vector<2x16xf32>
    %269 = arith.mulf %268, %222 : vector<2x16xf32>
    %cst_92 = arith.constant 1.000000e+00 : f32
    %270 = vector.broadcast %cst_92 : f32 to vector<2x1xf32>
    %271 = arith.subf %270, %256 : vector<2x1xf32>
    %272 = vector.broadcast %271 : vector<2x1xf32> to vector<2x16xf32>
    %273 = arith.mulf %272, %161 : vector<2x16xf32>
    %274 = arith.addf %269, %273 : vector<2x16xf32>
    %275 = vector.broadcast %260 : vector<2x1xf32> to vector<2x16xf32>
    %276 = arith.mulf %275, %252 : vector<2x16xf32>
    %cst_93 = arith.constant 1.000000e+00 : f32
    %277 = vector.broadcast %cst_93 : f32 to vector<2x1xf32>
    %278 = arith.subf %277, %260 : vector<2x1xf32>
    %279 = vector.broadcast %278 : vector<2x1xf32> to vector<2x16xf32>
    %280 = arith.mulf %279, %168 : vector<2x16xf32>
    %281 = arith.addf %276, %280 : vector<2x16xf32>
    %282 = vector.broadcast %260 : vector<2x1xf32> to vector<2x16xf32>
    %283 = arith.mulf %282, %250 : vector<2x16xf32>
    %cst_94 = arith.constant 1.000000e+00 : f32
    %284 = vector.broadcast %cst_94 : f32 to vector<2x1xf32>
    %285 = arith.subf %284, %260 : vector<2x1xf32>
    %286 = vector.broadcast %285 : vector<2x1xf32> to vector<2x16xf32>
    %287 = arith.mulf %286, %175 : vector<2x16xf32>
    %288 = arith.addf %283, %287 : vector<2x16xf32>
    %289 = vector.broadcast %256 : vector<2x1xf32> to vector<2x16xf32>
    %290 = arith.mulf %267, %289 : vector<2x16xf32>
    %291 = vector.broadcast %260 : vector<2x1xf32> to vector<2x16xf32>
    %292 = arith.mulf %281, %291 : vector<2x16xf32>
    %293 = arith.truncf %290 : vector<2x16xf32> to vector<2x16xbf16>
    %c0_95 = arith.constant 0 : index
    %294 = arith.index_cast %c1_i32 : i32 to index
    %c0_96 = arith.constant 0 : index
    %c0_97 = arith.constant 0 : index
    %295 = vector.load %arg7[%c0_95, %294, %c0_96, %c0_97] : memref<1x8x2x16xbf16, #tpu.memory_space<vmem>>, vector<1x1x2x16xbf16>
    %296 = vector.shape_cast %295 : vector<1x1x2x16xbf16> to vector<2x16xbf16>
    %297 = vector.shape_cast %293 : vector<2x16xbf16> to vector<1x1x2x16xbf16>
    tpu.vector_store %arg7[%c0_95, %294, %c0_96, %c0_97], %297 {strides = array<i32>} : memref<1x8x2x16xbf16, #tpu.memory_space<vmem>>, vector<1x1x2x16xbf16>,
    %298 = arith.truncf %292 : vector<2x16xf32> to vector<2x16xbf16>
    %c0_98 = arith.constant 0 : index
    %299 = arith.index_cast %190 : i32 to index
    %c0_99 = arith.constant 0 : index
    %c0_100 = arith.constant 0 : index
    %300 = vector.load %arg8[%c0_98, %299, %c0_99, %c0_100] : memref<1x8x2x16xbf16, #tpu.memory_space<vmem>>, vector<1x1x2x16xbf16>
    %301 = vector.shape_cast %300 : vector<1x1x2x16xbf16> to vector<2x16xbf16>
    %302 = vector.shape_cast %298 : vector<2x16xbf16> to vector<1x1x2x16xbf16>
    tpu.vector_store %arg8[%c0_98, %299, %c0_99, %c0_100], %302 {strides = array<i32>} : memref<1x8x2x16xbf16, #tpu.memory_space<vmem>>, vector<1x1x2x16xbf16>,
    %c2_i32 = arith.constant 2 : i32
    %c7_i32_101 = arith.constant 7 : i32
    %303 = arith.subi %c7_i32_101, %c2_i32 : i32
    %304 = arith.index_cast %c2_i32 : i32 to index
    %c0_102 = arith.constant 0 : index
    %c0_103 = arith.constant 0 : index
    %305 = vector.load %arg9[%304, %c0_102, %c0_103] : memref<8x2x64xf32, #tpu.memory_space<vmem>>, vector<1x2x64xf32>
    %306 = vector.shape_cast %305 : vector<1x2x64xf32> to vector<2x64xf32>
    %307 = arith.index_cast %303 : i32 to index
    %c0_104 = arith.constant 0 : index
    %c0_105 = arith.constant 0 : index
    %308 = vector.load %arg10[%307, %c0_104, %c0_105] : memref<8x2x64xf32, #tpu.memory_space<vmem>>, vector<1x2x64xf32>
    %309 = vector.shape_cast %308 : vector<1x2x64xf32> to vector<2x64xf32>
    %310 = arith.truncf %267 : vector<2x16xf32> to vector<2x16xbf16>
    %cst_106 = arith.constant dense<0.000000e+00> : vector<2x64xf32>
    %311 = tpu.matmul %310, %71, %cst_106 {dimension_numbers = #tpu.dot_dimension_numbers<[1], [0], [0], [1], [0, 0, 1, 1], [], []>} : vector<2x16xbf16>, vector<16x64xbf16>, vector<2x64xf32> -> vector<2x64xf32>
    %312 = arith.addf %306, %311 : vector<2x64xf32>
    %313 = vector.extract_strided_slice %312 {offsets = [0, 0], sizes = [2, 16], strides = [1, 1]} : vector<2x64xf32> to vector<2x16xf32>
    %314 = arith.negf %313 : vector<2x16xf32>
    %315 = math.exp %314 : vector<2x16xf32>
    %cst_107 = arith.constant 1.000000e+00 : f32
    %316 = vector.broadcast %cst_107 : f32 to vector<2x16xf32>
    %317 = arith.addf %316, %315 : vector<2x16xf32>
    %318 = arith.divf %316, %317 : vector<2x16xf32>
    %319 = vector.extract_strided_slice %312 {offsets = [0, 16], sizes = [2, 16], strides = [1, 1]} : vector<2x64xf32> to vector<2x16xf32>
    %320 = arith.negf %319 : vector<2x16xf32>
    %321 = math.exp %320 : vector<2x16xf32>
    %cst_108 = arith.constant 1.000000e+00 : f32
    %322 = vector.broadcast %cst_108 : f32 to vector<2x16xf32>
    %323 = arith.addf %322, %321 : vector<2x16xf32>
    %324 = arith.divf %322, %323 : vector<2x16xf32>
    %325 = vector.extract_strided_slice %312 {offsets = [0, 32], sizes = [2, 16], strides = [1, 1]} : vector<2x64xf32> to vector<2x16xf32>
    %326 = math.tanh %325 : vector<2x16xf32>
    %327 = vector.extract_strided_slice %312 {offsets = [0, 48], sizes = [2, 16], strides = [1, 1]} : vector<2x64xf32> to vector<2x16xf32>
    %328 = arith.negf %327 : vector<2x16xf32>
    %329 = math.exp %328 : vector<2x16xf32>
    %cst_109 = arith.constant 1.000000e+00 : f32
    %330 = vector.broadcast %cst_109 : f32 to vector<2x16xf32>
    %331 = arith.addf %330, %329 : vector<2x16xf32>
    %332 = arith.divf %330, %331 : vector<2x16xf32>
    %333 = arith.mulf %324, %274 : vector<2x16xf32>
    %334 = arith.mulf %318, %326 : vector<2x16xf32>
    %335 = arith.addf %333, %334 : vector<2x16xf32>
    %336 = math.tanh %335 : vector<2x16xf32>
    %337 = arith.mulf %332, %336 : vector<2x16xf32>
    %338 = arith.truncf %281 : vector<2x16xf32> to vector<2x16xbf16>
    %cst_110 = arith.constant dense<0.000000e+00> : vector<2x64xf32>
    %339 = tpu.matmul %338, %72, %cst_110 {dimension_numbers = #tpu.dot_dimension_numbers<[1], [0], [0], [1], [0, 0, 1, 1], [], []>} : vector<2x16xbf16>, vector<16x64xbf16>, vector<2x64xf32> -> vector<2x64xf32>
    %340 = arith.addf %309, %339 : vector<2x64xf32>
    %341 = vector.extract_strided_slice %340 {offsets = [0, 0], sizes = [2, 16], strides = [1, 1]} : vector<2x64xf32> to vector<2x16xf32>
    %342 = arith.negf %341 : vector<2x16xf32>
    %343 = math.exp %342 : vector<2x16xf32>
    %cst_111 = arith.constant 1.000000e+00 : f32
    %344 = vector.broadcast %cst_111 : f32 to vector<2x16xf32>
    %345 = arith.addf %344, %343 : vector<2x16xf32>
    %346 = arith.divf %344, %345 : vector<2x16xf32>
    %347 = vector.extract_strided_slice %340 {offsets = [0, 16], sizes = [2, 16], strides = [1, 1]} : vector<2x64xf32> to vector<2x16xf32>
    %348 = arith.negf %347 : vector<2x16xf32>
    %349 = math.exp %348 : vector<2x16xf32>
    %cst_112 = arith.constant 1.000000e+00 : f32
    %350 = vector.broadcast %cst_112 : f32 to vector<2x16xf32>
    %351 = arith.addf %350, %349 : vector<2x16xf32>
    %352 = arith.divf %350, %351 : vector<2x16xf32>
    %353 = vector.extract_strided_slice %340 {offsets = [0, 32], sizes = [2, 16], strides = [1, 1]} : vector<2x64xf32> to vector<2x16xf32>
    %354 = math.tanh %353 : vector<2x16xf32>
    %355 = vector.extract_strided_slice %340 {offsets = [0, 48], sizes = [2, 16], strides = [1, 1]} : vector<2x64xf32> to vector<2x16xf32>
    %356 = arith.negf %355 : vector<2x16xf32>
    %357 = math.exp %356 : vector<2x16xf32>
    %cst_113 = arith.constant 1.000000e+00 : f32
    %358 = vector.broadcast %cst_113 : f32 to vector<2x16xf32>
    %359 = arith.addf %358, %357 : vector<2x16xf32>
    %360 = arith.divf %358, %359 : vector<2x16xf32>
    %361 = arith.mulf %352, %288 : vector<2x16xf32>
    %362 = arith.mulf %346, %354 : vector<2x16xf32>
    %363 = arith.addf %361, %362 : vector<2x16xf32>
    %364 = math.tanh %363 : vector<2x16xf32>
    %365 = arith.mulf %360, %364 : vector<2x16xf32>
    %366 = vector.broadcast %c2_i32 : i32 to vector<2x1xi32>
    %367 = arith.cmpi slt, %366, %74 : vector<2x1xi32>
    %368 = arith.extui %367 : vector<2x1xi1> to vector<2x1xi32>
    %369 = arith.sitofp %368 : vector<2x1xi32> to vector<2x1xf32>
    %370 = vector.broadcast %303 : i32 to vector<2x1xi32>
    %371 = arith.cmpi slt, %370, %74 : vector<2x1xi32>
    %372 = arith.extui %371 : vector<2x1xi1> to vector<2x1xi32>
    %373 = arith.sitofp %372 : vector<2x1xi32> to vector<2x1xf32>
    %374 = vector.broadcast %369 : vector<2x1xf32> to vector<2x16xf32>
    %375 = arith.mulf %374, %337 : vector<2x16xf32>
    %cst_114 = arith.constant 1.000000e+00 : f32
    %376 = vector.broadcast %cst_114 : f32 to vector<2x1xf32>
    %377 = arith.subf %376, %369 : vector<2x1xf32>
    %378 = vector.broadcast %377 : vector<2x1xf32> to vector<2x16xf32>
    %379 = arith.mulf %378, %267 : vector<2x16xf32>
    %380 = arith.addf %375, %379 : vector<2x16xf32>
    %381 = vector.broadcast %369 : vector<2x1xf32> to vector<2x16xf32>
    %382 = arith.mulf %381, %335 : vector<2x16xf32>
    %cst_115 = arith.constant 1.000000e+00 : f32
    %383 = vector.broadcast %cst_115 : f32 to vector<2x1xf32>
    %384 = arith.subf %383, %369 : vector<2x1xf32>
    %385 = vector.broadcast %384 : vector<2x1xf32> to vector<2x16xf32>
    %386 = arith.mulf %385, %274 : vector<2x16xf32>
    %387 = arith.addf %382, %386 : vector<2x16xf32>
    %388 = vector.broadcast %373 : vector<2x1xf32> to vector<2x16xf32>
    %389 = arith.mulf %388, %365 : vector<2x16xf32>
    %cst_116 = arith.constant 1.000000e+00 : f32
    %390 = vector.broadcast %cst_116 : f32 to vector<2x1xf32>
    %391 = arith.subf %390, %373 : vector<2x1xf32>
    %392 = vector.broadcast %391 : vector<2x1xf32> to vector<2x16xf32>
    %393 = arith.mulf %392, %281 : vector<2x16xf32>
    %394 = arith.addf %389, %393 : vector<2x16xf32>
    %395 = vector.broadcast %373 : vector<2x1xf32> to vector<2x16xf32>
    %396 = arith.mulf %395, %363 : vector<2x16xf32>
    %cst_117 = arith.constant 1.000000e+00 : f32
    %397 = vector.broadcast %cst_117 : f32 to vector<2x1xf32>
    %398 = arith.subf %397, %373 : vector<2x1xf32>
    %399 = vector.broadcast %398 : vector<2x1xf32> to vector<2x16xf32>
    %400 = arith.mulf %399, %288 : vector<2x16xf32>
    %401 = arith.addf %396, %400 : vector<2x16xf32>
    %402 = vector.broadcast %369 : vector<2x1xf32> to vector<2x16xf32>
    %403 = arith.mulf %380, %402 : vector<2x16xf32>
    %404 = vector.broadcast %373 : vector<2x1xf32> to vector<2x16xf32>
    %405 = arith.mulf %394, %404 : vector<2x16xf32>
    %406 = arith.truncf %403 : vector<2x16xf32> to vector<2x16xbf16>
    %c0_118 = arith.constant 0 : index
    %407 = arith.index_cast %c2_i32 : i32 to index
    %c0_119 = arith.constant 0 : index
    %c0_120 = arith.constant 0 : index
    %408 = vector.load %arg7[%c0_118, %407, %c0_119, %c0_120] : memref<1x8x2x16xbf16, #tpu.memory_space<vmem>>, vector<1x1x2x16xbf16>
    %409 = vector.shape_cast %408 : vector<1x1x2x16xbf16> to vector<2x16xbf16>
    %410 = vector.shape_cast %406 : vector<2x16xbf16> to vector<1x1x2x16xbf16>
    tpu.vector_store %arg7[%c0_118, %407, %c0_119, %c0_120], %410 {strides = array<i32>} : memref<1x8x2x16xbf16, #tpu.memory_space<vmem>>, vector<1x1x2x16xbf16>,
    %411 = arith.truncf %405 : vector<2x16xf32> to vector<2x16xbf16>
    %c0_121 = arith.constant 0 : index
    %412 = arith.index_cast %303 : i32 to index
    %c0_122 = arith.constant 0 : index
    %c0_123 = arith.constant 0 : index
    %413 = vector.load %arg8[%c0_121, %412, %c0_122, %c0_123] : memref<1x8x2x16xbf16, #tpu.memory_space<vmem>>, vector<1x1x2x16xbf16>
    %414 = vector.shape_cast %413 : vector<1x1x2x16xbf16> to vector<2x16xbf16>
    %415 = vector.shape_cast %411 : vector<2x16xbf16> to vector<1x1x2x16xbf16>
    tpu.vector_store %arg8[%c0_121, %412, %c0_122, %c0_123], %415 {strides = array<i32>} : memref<1x8x2x16xbf16, #tpu.memory_space<vmem>>, vector<1x1x2x16xbf16>,
    %c3_i32 = arith.constant 3 : i32
    %c7_i32_124 = arith.constant 7 : i32
    %416 = arith.subi %c7_i32_124, %c3_i32 : i32
    %417 = arith.index_cast %c3_i32 : i32 to index
    %c0_125 = arith.constant 0 : index
    %c0_126 = arith.constant 0 : index
    %418 = vector.load %arg9[%417, %c0_125, %c0_126] : memref<8x2x64xf32, #tpu.memory_space<vmem>>, vector<1x2x64xf32>
    %419 = vector.shape_cast %418 : vector<1x2x64xf32> to vector<2x64xf32>
    %420 = arith.index_cast %416 : i32 to index
    %c0_127 = arith.constant 0 : index
    %c0_128 = arith.constant 0 : index
    %421 = vector.load %arg10[%420, %c0_127, %c0_128] : memref<8x2x64xf32, #tpu.memory_space<vmem>>, vector<1x2x64xf32>
    %422 = vector.shape_cast %421 : vector<1x2x64xf32> to vector<2x64xf32>
    %423 = arith.truncf %380 : vector<2x16xf32> to vector<2x16xbf16>
    %cst_129 = arith.constant dense<0.000000e+00> : vector<2x64xf32>
    %424 = tpu.matmul %423, %71, %cst_129 {dimension_numbers = #tpu.dot_dimension_numbers<[1], [0], [0], [1], [0, 0, 1, 1], [], []>} : vector<2x16xbf16>, vector<16x64xbf16>, vector<2x64xf32> -> vector<2x64xf32>
    %425 = arith.addf %419, %424 : vector<2x64xf32>
    %426 = vector.extract_strided_slice %425 {offsets = [0, 0], sizes = [2, 16], strides = [1, 1]} : vector<2x64xf32> to vector<2x16xf32>
    %427 = arith.negf %426 : vector<2x16xf32>
    %428 = math.exp %427 : vector<2x16xf32>
    %cst_130 = arith.constant 1.000000e+00 : f32
    %429 = vector.broadcast %cst_130 : f32 to vector<2x16xf32>
    %430 = arith.addf %429, %428 : vector<2x16xf32>
    %431 = arith.divf %429, %430 : vector<2x16xf32>
    %432 = vector.extract_strided_slice %425 {offsets = [0, 16], sizes = [2, 16], strides = [1, 1]} : vector<2x64xf32> to vector<2x16xf32>
    %433 = arith.negf %432 : vector<2x16xf32>
    %434 = math.exp %433 : vector<2x16xf32>
    %cst_131 = arith.constant 1.000000e+00 : f32
    %435 = vector.broadcast %cst_131 : f32 to vector<2x16xf32>
    %436 = arith.addf %435, %434 : vector<2x16xf32>
    %437 = arith.divf %435, %436 : vector<2x16xf32>
    %438 = vector.extract_strided_slice %425 {offsets = [0, 32], sizes = [2, 16], strides = [1, 1]} : vector<2x64xf32> to vector<2x16xf32>
    %439 = math.tanh %438 : vector<2x16xf32>
    %440 = vector.extract_strided_slice %425 {offsets = [0, 48], sizes = [2, 16], strides = [1, 1]} : vector<2x64xf32> to vector<2x16xf32>
    %441 = arith.negf %440 : vector<2x16xf32>
    %442 = math.exp %441 : vector<2x16xf32>
    %cst_132 = arith.constant 1.000000e+00 : f32
    %443 = vector.broadcast %cst_132 : f32 to vector<2x16xf32>
    %444 = arith.addf %443, %442 : vector<2x16xf32>
    %445 = arith.divf %443, %444 : vector<2x16xf32>
    %446 = arith.mulf %437, %387 : vector<2x16xf32>
    %447 = arith.mulf %431, %439 : vector<2x16xf32>
    %448 = arith.addf %446, %447 : vector<2x16xf32>
    %449 = math.tanh %448 : vector<2x16xf32>
    %450 = arith.mulf %445, %449 : vector<2x16xf32>
    %451 = arith.truncf %394 : vector<2x16xf32> to vector<2x16xbf16>
    %cst_133 = arith.constant dense<0.000000e+00> : vector<2x64xf32>
    %452 = tpu.matmul %451, %72, %cst_133 {dimension_numbers = #tpu.dot_dimension_numbers<[1], [0], [0], [1], [0, 0, 1, 1], [], []>} : vector<2x16xbf16>, vector<16x64xbf16>, vector<2x64xf32> -> vector<2x64xf32>
    %453 = arith.addf %422, %452 : vector<2x64xf32>
    %454 = vector.extract_strided_slice %453 {offsets = [0, 0], sizes = [2, 16], strides = [1, 1]} : vector<2x64xf32> to vector<2x16xf32>
    %455 = arith.negf %454 : vector<2x16xf32>
    %456 = math.exp %455 : vector<2x16xf32>
    %cst_134 = arith.constant 1.000000e+00 : f32
    %457 = vector.broadcast %cst_134 : f32 to vector<2x16xf32>
    %458 = arith.addf %457, %456 : vector<2x16xf32>
    %459 = arith.divf %457, %458 : vector<2x16xf32>
    %460 = vector.extract_strided_slice %453 {offsets = [0, 16], sizes = [2, 16], strides = [1, 1]} : vector<2x64xf32> to vector<2x16xf32>
    %461 = arith.negf %460 : vector<2x16xf32>
    %462 = math.exp %461 : vector<2x16xf32>
    %cst_135 = arith.constant 1.000000e+00 : f32
    %463 = vector.broadcast %cst_135 : f32 to vector<2x16xf32>
    %464 = arith.addf %463, %462 : vector<2x16xf32>
    %465 = arith.divf %463, %464 : vector<2x16xf32>
    %466 = vector.extract_strided_slice %453 {offsets = [0, 32], sizes = [2, 16], strides = [1, 1]} : vector<2x64xf32> to vector<2x16xf32>
    %467 = math.tanh %466 : vector<2x16xf32>
    %468 = vector.extract_strided_slice %453 {offsets = [0, 48], sizes = [2, 16], strides = [1, 1]} : vector<2x64xf32> to vector<2x16xf32>
    %469 = arith.negf %468 : vector<2x16xf32>
    %470 = math.exp %469 : vector<2x16xf32>
    %cst_136 = arith.constant 1.000000e+00 : f32
    %471 = vector.broadcast %cst_136 : f32 to vector<2x16xf32>
    %472 = arith.addf %471, %470 : vector<2x16xf32>
    %473 = arith.divf %471, %472 : vector<2x16xf32>
    %474 = arith.mulf %465, %401 : vector<2x16xf32>
    %475 = arith.mulf %459, %467 : vector<2x16xf32>
    %476 = arith.addf %474, %475 : vector<2x16xf32>
    %477 = math.tanh %476 : vector<2x16xf32>
    %478 = arith.mulf %473, %477 : vector<2x16xf32>
    %479 = vector.broadcast %c3_i32 : i32 to vector<2x1xi32>
    %480 = arith.cmpi slt, %479, %74 : vector<2x1xi32>
    %481 = arith.extui %480 : vector<2x1xi1> to vector<2x1xi32>
    %482 = arith.sitofp %481 : vector<2x1xi32> to vector<2x1xf32>
    %483 = vector.broadcast %416 : i32 to vector<2x1xi32>
    %484 = arith.cmpi slt, %483, %74 : vector<2x1xi32>
    %485 = arith.extui %484 : vector<2x1xi1> to vector<2x1xi32>
    %486 = arith.sitofp %485 : vector<2x1xi32> to vector<2x1xf32>
    %487 = vector.broadcast %482 : vector<2x1xf32> to vector<2x16xf32>
    %488 = arith.mulf %487, %450 : vector<2x16xf32>
    %cst_137 = arith.constant 1.000000e+00 : f32
    %489 = vector.broadcast %cst_137 : f32 to vector<2x1xf32>
    %490 = arith.subf %489, %482 : vector<2x1xf32>
    %491 = vector.broadcast %490 : vector<2x1xf32> to vector<2x16xf32>
    %492 = arith.mulf %491, %380 : vector<2x16xf32>
    %493 = arith.addf %488, %492 : vector<2x16xf32>
    %494 = vector.broadcast %482 : vector<2x1xf32> to vector<2x16xf32>
    %495 = arith.mulf %494, %448 : vector<2x16xf32>
    %cst_138 = arith.constant 1.000000e+00 : f32
    %496 = vector.broadcast %cst_138 : f32 to vector<2x1xf32>
    %497 = arith.subf %496, %482 : vector<2x1xf32>
    %498 = vector.broadcast %497 : vector<2x1xf32> to vector<2x16xf32>
    %499 = arith.mulf %498, %387 : vector<2x16xf32>
    %500 = arith.addf %495, %499 : vector<2x16xf32>
    %501 = vector.broadcast %486 : vector<2x1xf32> to vector<2x16xf32>
    %502 = arith.mulf %501, %478 : vector<2x16xf32>
    %cst_139 = arith.constant 1.000000e+00 : f32
    %503 = vector.broadcast %cst_139 : f32 to vector<2x1xf32>
    %504 = arith.subf %503, %486 : vector<2x1xf32>
    %505 = vector.broadcast %504 : vector<2x1xf32> to vector<2x16xf32>
    %506 = arith.mulf %505, %394 : vector<2x16xf32>
    %507 = arith.addf %502, %506 : vector<2x16xf32>
    %508 = vector.broadcast %486 : vector<2x1xf32> to vector<2x16xf32>
    %509 = arith.mulf %508, %476 : vector<2x16xf32>
    %cst_140 = arith.constant 1.000000e+00 : f32
    %510 = vector.broadcast %cst_140 : f32 to vector<2x1xf32>
    %511 = arith.subf %510, %486 : vector<2x1xf32>
    %512 = vector.broadcast %511 : vector<2x1xf32> to vector<2x16xf32>
    %513 = arith.mulf %512, %401 : vector<2x16xf32>
    %514 = arith.addf %509, %513 : vector<2x16xf32>
    %515 = vector.broadcast %482 : vector<2x1xf32> to vector<2x16xf32>
    %516 = arith.mulf %493, %515 : vector<2x16xf32>
    %517 = vector.broadcast %486 : vector<2x1xf32> to vector<2x16xf32>
    %518 = arith.mulf %507, %517 : vector<2x16xf32>
    %519 = arith.truncf %516 : vector<2x16xf32> to vector<2x16xbf16>
    %c0_141 = arith.constant 0 : index
    %520 = arith.index_cast %c3_i32 : i32 to index
    %c0_142 = arith.constant 0 : index
    %c0_143 = arith.constant 0 : index
    %521 = vector.load %arg7[%c0_141, %520, %c0_142, %c0_143] : memref<1x8x2x16xbf16, #tpu.memory_space<vmem>>, vector<1x1x2x16xbf16>
    %522 = vector.shape_cast %521 : vector<1x1x2x16xbf16> to vector<2x16xbf16>
    %523 = vector.shape_cast %519 : vector<2x16xbf16> to vector<1x1x2x16xbf16>
    tpu.vector_store %arg7[%c0_141, %520, %c0_142, %c0_143], %523 {strides = array<i32>} : memref<1x8x2x16xbf16, #tpu.memory_space<vmem>>, vector<1x1x2x16xbf16>,
    %524 = arith.truncf %518 : vector<2x16xf32> to vector<2x16xbf16>
    %c0_144 = arith.constant 0 : index
    %525 = arith.index_cast %416 : i32 to index
    %c0_145 = arith.constant 0 : index
    %c0_146 = arith.constant 0 : index
    %526 = vector.load %arg8[%c0_144, %525, %c0_145, %c0_146] : memref<1x8x2x16xbf16, #tpu.memory_space<vmem>>, vector<1x1x2x16xbf16>
    %527 = vector.shape_cast %526 : vector<1x1x2x16xbf16> to vector<2x16xbf16>
    %528 = vector.shape_cast %524 : vector<2x16xbf16> to vector<1x1x2x16xbf16>
    tpu.vector_store %arg8[%c0_144, %525, %c0_145, %c0_146], %528 {strides = array<i32>} : memref<1x8x2x16xbf16, #tpu.memory_space<vmem>>, vector<1x1x2x16xbf16>,
    %c4_i32 = arith.constant 4 : i32
    %c7_i32_147 = arith.constant 7 : i32
    %529 = arith.subi %c7_i32_147, %c4_i32 : i32
    %530 = arith.index_cast %c4_i32 : i32 to index
    %c0_148 = arith.constant 0 : index
    %c0_149 = arith.constant 0 : index
    %531 = vector.load %arg9[%530, %c0_148, %c0_149] : memref<8x2x64xf32, #tpu.memory_space<vmem>>, vector<1x2x64xf32>
    %532 = vector.shape_cast %531 : vector<1x2x64xf32> to vector<2x64xf32>
    %533 = arith.index_cast %529 : i32 to index
    %c0_150 = arith.constant 0 : index
    %c0_151 = arith.constant 0 : index
    %534 = vector.load %arg10[%533, %c0_150, %c0_151] : memref<8x2x64xf32, #tpu.memory_space<vmem>>, vector<1x2x64xf32>
    %535 = vector.shape_cast %534 : vector<1x2x64xf32> to vector<2x64xf32>
    %536 = arith.truncf %493 : vector<2x16xf32> to vector<2x16xbf16>
    %cst_152 = arith.constant dense<0.000000e+00> : vector<2x64xf32>
    %537 = tpu.matmul %536, %71, %cst_152 {dimension_numbers = #tpu.dot_dimension_numbers<[1], [0], [0], [1], [0, 0, 1, 1], [], []>} : vector<2x16xbf16>, vector<16x64xbf16>, vector<2x64xf32> -> vector<2x64xf32>
    %538 = arith.addf %532, %537 : vector<2x64xf32>
    %539 = vector.extract_strided_slice %538 {offsets = [0, 0], sizes = [2, 16], strides = [1, 1]} : vector<2x64xf32> to vector<2x16xf32>
    %540 = arith.negf %539 : vector<2x16xf32>
    %541 = math.exp %540 : vector<2x16xf32>
    %cst_153 = arith.constant 1.000000e+00 : f32
    %542 = vector.broadcast %cst_153 : f32 to vector<2x16xf32>
    %543 = arith.addf %542, %541 : vector<2x16xf32>
    %544 = arith.divf %542, %543 : vector<2x16xf32>
    %545 = vector.extract_strided_slice %538 {offsets = [0, 16], sizes = [2, 16], strides = [1, 1]} : vector<2x64xf32> to vector<2x16xf32>
    %546 = arith.negf %545 : vector<2x16xf32>
    %547 = math.exp %546 : vector<2x16xf32>
    %cst_154 = arith.constant 1.000000e+00 : f32
    %548 = vector.broadcast %cst_154 : f32 to vector<2x16xf32>
    %549 = arith.addf %548, %547 : vector<2x16xf32>
    %550 = arith.divf %548, %549 : vector<2x16xf32>
    %551 = vector.extract_strided_slice %538 {offsets = [0, 32], sizes = [2, 16], strides = [1, 1]} : vector<2x64xf32> to vector<2x16xf32>
    %552 = math.tanh %551 : vector<2x16xf32>
    %553 = vector.extract_strided_slice %538 {offsets = [0, 48], sizes = [2, 16], strides = [1, 1]} : vector<2x64xf32> to vector<2x16xf32>
    %554 = arith.negf %553 : vector<2x16xf32>
    %555 = math.exp %554 : vector<2x16xf32>
    %cst_155 = arith.constant 1.000000e+00 : f32
    %556 = vector.broadcast %cst_155 : f32 to vector<2x16xf32>
    %557 = arith.addf %556, %555 : vector<2x16xf32>
    %558 = arith.divf %556, %557 : vector<2x16xf32>
    %559 = arith.mulf %550, %500 : vector<2x16xf32>
    %560 = arith.mulf %544, %552 : vector<2x16xf32>
    %561 = arith.addf %559, %560 : vector<2x16xf32>
    %562 = math.tanh %561 : vector<2x16xf32>
    %563 = arith.mulf %558, %562 : vector<2x16xf32>
    %564 = arith.truncf %507 : vector<2x16xf32> to vector<2x16xbf16>
    %cst_156 = arith.constant dense<0.000000e+00> : vector<2x64xf32>
    %565 = tpu.matmul %564, %72, %cst_156 {dimension_numbers = #tpu.dot_dimension_numbers<[1], [0], [0], [1], [0, 0, 1, 1], [], []>} : vector<2x16xbf16>, vector<16x64xbf16>, vector<2x64xf32> -> vector<2x64xf32>
    %566 = arith.addf %535, %565 : vector<2x64xf32>
    %567 = vector.extract_strided_slice %566 {offsets = [0, 0], sizes = [2, 16], strides = [1, 1]} : vector<2x64xf32> to vector<2x16xf32>
    %568 = arith.negf %567 : vector<2x16xf32>
    %569 = math.exp %568 : vector<2x16xf32>
    %cst_157 = arith.constant 1.000000e+00 : f32
    %570 = vector.broadcast %cst_157 : f32 to vector<2x16xf32>
    %571 = arith.addf %570, %569 : vector<2x16xf32>
    %572 = arith.divf %570, %571 : vector<2x16xf32>
    %573 = vector.extract_strided_slice %566 {offsets = [0, 16], sizes = [2, 16], strides = [1, 1]} : vector<2x64xf32> to vector<2x16xf32>
    %574 = arith.negf %573 : vector<2x16xf32>
    %575 = math.exp %574 : vector<2x16xf32>
    %cst_158 = arith.constant 1.000000e+00 : f32
    %576 = vector.broadcast %cst_158 : f32 to vector<2x16xf32>
    %577 = arith.addf %576, %575 : vector<2x16xf32>
    %578 = arith.divf %576, %577 : vector<2x16xf32>
    %579 = vector.extract_strided_slice %566 {offsets = [0, 32], sizes = [2, 16], strides = [1, 1]} : vector<2x64xf32> to vector<2x16xf32>
    %580 = math.tanh %579 : vector<2x16xf32>
    %581 = vector.extract_strided_slice %566 {offsets = [0, 48], sizes = [2, 16], strides = [1, 1]} : vector<2x64xf32> to vector<2x16xf32>
    %582 = arith.negf %581 : vector<2x16xf32>
    %583 = math.exp %582 : vector<2x16xf32>
    %cst_159 = arith.constant 1.000000e+00 : f32
    %584 = vector.broadcast %cst_159 : f32 to vector<2x16xf32>
    %585 = arith.addf %584, %583 : vector<2x16xf32>
    %586 = arith.divf %584, %585 : vector<2x16xf32>
    %587 = arith.mulf %578, %514 : vector<2x16xf32>
    %588 = arith.mulf %572, %580 : vector<2x16xf32>
    %589 = arith.addf %587, %588 : vector<2x16xf32>
    %590 = math.tanh %589 : vector<2x16xf32>
    %591 = arith.mulf %586, %590 : vector<2x16xf32>
    %592 = vector.broadcast %c4_i32 : i32 to vector<2x1xi32>
    %593 = arith.cmpi slt, %592, %74 : vector<2x1xi32>
    %594 = arith.extui %593 : vector<2x1xi1> to vector<2x1xi32>
    %595 = arith.sitofp %594 : vector<2x1xi32> to vector<2x1xf32>
    %596 = vector.broadcast %529 : i32 to vector<2x1xi32>
    %597 = arith.cmpi slt, %596, %74 : vector<2x1xi32>
    %598 = arith.extui %597 : vector<2x1xi1> to vector<2x1xi32>
    %599 = arith.sitofp %598 : vector<2x1xi32> to vector<2x1xf32>
    %600 = vector.broadcast %595 : vector<2x1xf32> to vector<2x16xf32>
    %601 = arith.mulf %600, %563 : vector<2x16xf32>
    %cst_160 = arith.constant 1.000000e+00 : f32
    %602 = vector.broadcast %cst_160 : f32 to vector<2x1xf32>
    %603 = arith.subf %602, %595 : vector<2x1xf32>
    %604 = vector.broadcast %603 : vector<2x1xf32> to vector<2x16xf32>
    %605 = arith.mulf %604, %493 : vector<2x16xf32>
    %606 = arith.addf %601, %605 : vector<2x16xf32>
    %607 = vector.broadcast %595 : vector<2x1xf32> to vector<2x16xf32>
    %608 = arith.mulf %607, %561 : vector<2x16xf32>
    %cst_161 = arith.constant 1.000000e+00 : f32
    %609 = vector.broadcast %cst_161 : f32 to vector<2x1xf32>
    %610 = arith.subf %609, %595 : vector<2x1xf32>
    %611 = vector.broadcast %610 : vector<2x1xf32> to vector<2x16xf32>
    %612 = arith.mulf %611, %500 : vector<2x16xf32>
    %613 = arith.addf %608, %612 : vector<2x16xf32>
    %614 = vector.broadcast %599 : vector<2x1xf32> to vector<2x16xf32>
    %615 = arith.mulf %614, %591 : vector<2x16xf32>
    %cst_162 = arith.constant 1.000000e+00 : f32
    %616 = vector.broadcast %cst_162 : f32 to vector<2x1xf32>
    %617 = arith.subf %616, %599 : vector<2x1xf32>
    %618 = vector.broadcast %617 : vector<2x1xf32> to vector<2x16xf32>
    %619 = arith.mulf %618, %507 : vector<2x16xf32>
    %620 = arith.addf %615, %619 : vector<2x16xf32>
    %621 = vector.broadcast %599 : vector<2x1xf32> to vector<2x16xf32>
    %622 = arith.mulf %621, %589 : vector<2x16xf32>
    %cst_163 = arith.constant 1.000000e+00 : f32
    %623 = vector.broadcast %cst_163 : f32 to vector<2x1xf32>
    %624 = arith.subf %623, %599 : vector<2x1xf32>
    %625 = vector.broadcast %624 : vector<2x1xf32> to vector<2x16xf32>
    %626 = arith.mulf %625, %514 : vector<2x16xf32>
    %627 = arith.addf %622, %626 : vector<2x16xf32>
    %628 = vector.broadcast %595 : vector<2x1xf32> to vector<2x16xf32>
    %629 = arith.mulf %606, %628 : vector<2x16xf32>
    %630 = vector.broadcast %599 : vector<2x1xf32> to vector<2x16xf32>
    %631 = arith.mulf %620, %630 : vector<2x16xf32>
    %632 = arith.truncf %629 : vector<2x16xf32> to vector<2x16xbf16>
    %c0_164 = arith.constant 0 : index
    %633 = arith.index_cast %c4_i32 : i32 to index
    %c0_165 = arith.constant 0 : index
    %c0_166 = arith.constant 0 : index
    %634 = vector.load %arg7[%c0_164, %633, %c0_165, %c0_166] : memref<1x8x2x16xbf16, #tpu.memory_space<vmem>>, vector<1x1x2x16xbf16>
    %635 = vector.shape_cast %634 : vector<1x1x2x16xbf16> to vector<2x16xbf16>
    %636 = vector.shape_cast %632 : vector<2x16xbf16> to vector<1x1x2x16xbf16>
    tpu.vector_store %arg7[%c0_164, %633, %c0_165, %c0_166], %636 {strides = array<i32>} : memref<1x8x2x16xbf16, #tpu.memory_space<vmem>>, vector<1x1x2x16xbf16>,
    %637 = arith.truncf %631 : vector<2x16xf32> to vector<2x16xbf16>
    %c0_167 = arith.constant 0 : index
    %638 = arith.index_cast %529 : i32 to index
    %c0_168 = arith.constant 0 : index
    %c0_169 = arith.constant 0 : index
    %639 = vector.load %arg8[%c0_167, %638, %c0_168, %c0_169] : memref<1x8x2x16xbf16, #tpu.memory_space<vmem>>, vector<1x1x2x16xbf16>
    %640 = vector.shape_cast %639 : vector<1x1x2x16xbf16> to vector<2x16xbf16>
    %641 = vector.shape_cast %637 : vector<2x16xbf16> to vector<1x1x2x16xbf16>
    tpu.vector_store %arg8[%c0_167, %638, %c0_168, %c0_169], %641 {strides = array<i32>} : memref<1x8x2x16xbf16, #tpu.memory_space<vmem>>, vector<1x1x2x16xbf16>,
    %c5_i32 = arith.constant 5 : i32
    %c7_i32_170 = arith.constant 7 : i32
    %642 = arith.subi %c7_i32_170, %c5_i32 : i32
    %643 = arith.index_cast %c5_i32 : i32 to index
    %c0_171 = arith.constant 0 : index
    %c0_172 = arith.constant 0 : index
    %644 = vector.load %arg9[%643, %c0_171, %c0_172] : memref<8x2x64xf32, #tpu.memory_space<vmem>>, vector<1x2x64xf32>
    %645 = vector.shape_cast %644 : vector<1x2x64xf32> to vector<2x64xf32>
    %646 = arith.index_cast %642 : i32 to index
    %c0_173 = arith.constant 0 : index
    %c0_174 = arith.constant 0 : index
    %647 = vector.load %arg10[%646, %c0_173, %c0_174] : memref<8x2x64xf32, #tpu.memory_space<vmem>>, vector<1x2x64xf32>
    %648 = vector.shape_cast %647 : vector<1x2x64xf32> to vector<2x64xf32>
    %649 = arith.truncf %606 : vector<2x16xf32> to vector<2x16xbf16>
    %cst_175 = arith.constant dense<0.000000e+00> : vector<2x64xf32>
    %650 = tpu.matmul %649, %71, %cst_175 {dimension_numbers = #tpu.dot_dimension_numbers<[1], [0], [0], [1], [0, 0, 1, 1], [], []>} : vector<2x16xbf16>, vector<16x64xbf16>, vector<2x64xf32> -> vector<2x64xf32>
    %651 = arith.addf %645, %650 : vector<2x64xf32>
    %652 = vector.extract_strided_slice %651 {offsets = [0, 0], sizes = [2, 16], strides = [1, 1]} : vector<2x64xf32> to vector<2x16xf32>
    %653 = arith.negf %652 : vector<2x16xf32>
    %654 = math.exp %653 : vector<2x16xf32>
    %cst_176 = arith.constant 1.000000e+00 : f32
    %655 = vector.broadcast %cst_176 : f32 to vector<2x16xf32>
    %656 = arith.addf %655, %654 : vector<2x16xf32>
    %657 = arith.divf %655, %656 : vector<2x16xf32>
    %658 = vector.extract_strided_slice %651 {offsets = [0, 16], sizes = [2, 16], strides = [1, 1]} : vector<2x64xf32> to vector<2x16xf32>
    %659 = arith.negf %658 : vector<2x16xf32>
    %660 = math.exp %659 : vector<2x16xf32>
    %cst_177 = arith.constant 1.000000e+00 : f32
    %661 = vector.broadcast %cst_177 : f32 to vector<2x16xf32>
    %662 = arith.addf %661, %660 : vector<2x16xf32>
    %663 = arith.divf %661, %662 : vector<2x16xf32>
    %664 = vector.extract_strided_slice %651 {offsets = [0, 32], sizes = [2, 16], strides = [1, 1]} : vector<2x64xf32> to vector<2x16xf32>
    %665 = math.tanh %664 : vector<2x16xf32>
    %666 = vector.extract_strided_slice %651 {offsets = [0, 48], sizes = [2, 16], strides = [1, 1]} : vector<2x64xf32> to vector<2x16xf32>
    %667 = arith.negf %666 : vector<2x16xf32>
    %668 = math.exp %667 : vector<2x16xf32>
    %cst_178 = arith.constant 1.000000e+00 : f32
    %669 = vector.broadcast %cst_178 : f32 to vector<2x16xf32>
    %670 = arith.addf %669, %668 : vector<2x16xf32>
    %671 = arith.divf %669, %670 : vector<2x16xf32>
    %672 = arith.mulf %663, %613 : vector<2x16xf32>
    %673 = arith.mulf %657, %665 : vector<2x16xf32>
    %674 = arith.addf %672, %673 : vector<2x16xf32>
    %675 = math.tanh %674 : vector<2x16xf32>
    %676 = arith.mulf %671, %675 : vector<2x16xf32>
    %677 = arith.truncf %620 : vector<2x16xf32> to vector<2x16xbf16>
    %cst_179 = arith.constant dense<0.000000e+00> : vector<2x64xf32>
    %678 = tpu.matmul %677, %72, %cst_179 {dimension_numbers = #tpu.dot_dimension_numbers<[1], [0], [0], [1], [0, 0, 1, 1], [], []>} : vector<2x16xbf16>, vector<16x64xbf16>, vector<2x64xf32> -> vector<2x64xf32>
    %679 = arith.addf %648, %678 : vector<2x64xf32>
    %680 = vector.extract_strided_slice %679 {offsets = [0, 0], sizes = [2, 16], strides = [1, 1]} : vector<2x64xf32> to vector<2x16xf32>
    %681 = arith.negf %680 : vector<2x16xf32>
    %682 = math.exp %681 : vector<2x16xf32>
    %cst_180 = arith.constant 1.000000e+00 : f32
    %683 = vector.broadcast %cst_180 : f32 to vector<2x16xf32>
    %684 = arith.addf %683, %682 : vector<2x16xf32>
    %685 = arith.divf %683, %684 : vector<2x16xf32>
    %686 = vector.extract_strided_slice %679 {offsets = [0, 16], sizes = [2, 16], strides = [1, 1]} : vector<2x64xf32> to vector<2x16xf32>
    %687 = arith.negf %686 : vector<2x16xf32>
    %688 = math.exp %687 : vector<2x16xf32>
    %cst_181 = arith.constant 1.000000e+00 : f32
    %689 = vector.broadcast %cst_181 : f32 to vector<2x16xf32>
    %690 = arith.addf %689, %688 : vector<2x16xf32>
    %691 = arith.divf %689, %690 : vector<2x16xf32>
    %692 = vector.extract_strided_slice %679 {offsets = [0, 32], sizes = [2, 16], strides = [1, 1]} : vector<2x64xf32> to vector<2x16xf32>
    %693 = math.tanh %692 : vector<2x16xf32>
    %694 = vector.extract_strided_slice %679 {offsets = [0, 48], sizes = [2, 16], strides = [1, 1]} : vector<2x64xf32> to vector<2x16xf32>
    %695 = arith.negf %694 : vector<2x16xf32>
    %696 = math.exp %695 : vector<2x16xf32>
    %cst_182 = arith.constant 1.000000e+00 : f32
    %697 = vector.broadcast %cst_182 : f32 to vector<2x16xf32>
    %698 = arith.addf %697, %696 : vector<2x16xf32>
    %699 = arith.divf %697, %698 : vector<2x16xf32>
    %700 = arith.mulf %691, %627 : vector<2x16xf32>
    %701 = arith.mulf %685, %693 : vector<2x16xf32>
    %702 = arith.addf %700, %701 : vector<2x16xf32>
    %703 = math.tanh %702 : vector<2x16xf32>
    %704 = arith.mulf %699, %703 : vector<2x16xf32>
    %705 = vector.broadcast %c5_i32 : i32 to vector<2x1xi32>
    %706 = arith.cmpi slt, %705, %74 : vector<2x1xi32>
    %707 = arith.extui %706 : vector<2x1xi1> to vector<2x1xi32>
    %708 = arith.sitofp %707 : vector<2x1xi32> to vector<2x1xf32>
    %709 = vector.broadcast %642 : i32 to vector<2x1xi32>
    %710 = arith.cmpi slt, %709, %74 : vector<2x1xi32>
    %711 = arith.extui %710 : vector<2x1xi1> to vector<2x1xi32>
    %712 = arith.sitofp %711 : vector<2x1xi32> to vector<2x1xf32>
    %713 = vector.broadcast %708 : vector<2x1xf32> to vector<2x16xf32>
    %714 = arith.mulf %713, %676 : vector<2x16xf32>
    %cst_183 = arith.constant 1.000000e+00 : f32
    %715 = vector.broadcast %cst_183 : f32 to vector<2x1xf32>
    %716 = arith.subf %715, %708 : vector<2x1xf32>
    %717 = vector.broadcast %716 : vector<2x1xf32> to vector<2x16xf32>
    %718 = arith.mulf %717, %606 : vector<2x16xf32>
    %719 = arith.addf %714, %718 : vector<2x16xf32>
    %720 = vector.broadcast %708 : vector<2x1xf32> to vector<2x16xf32>
    %721 = arith.mulf %720, %674 : vector<2x16xf32>
    %cst_184 = arith.constant 1.000000e+00 : f32
    %722 = vector.broadcast %cst_184 : f32 to vector<2x1xf32>
    %723 = arith.subf %722, %708 : vector<2x1xf32>
    %724 = vector.broadcast %723 : vector<2x1xf32> to vector<2x16xf32>
    %725 = arith.mulf %724, %613 : vector<2x16xf32>
    %726 = arith.addf %721, %725 : vector<2x16xf32>
    %727 = vector.broadcast %712 : vector<2x1xf32> to vector<2x16xf32>
    %728 = arith.mulf %727, %704 : vector<2x16xf32>
    %cst_185 = arith.constant 1.000000e+00 : f32
    %729 = vector.broadcast %cst_185 : f32 to vector<2x1xf32>
    %730 = arith.subf %729, %712 : vector<2x1xf32>
    %731 = vector.broadcast %730 : vector<2x1xf32> to vector<2x16xf32>
    %732 = arith.mulf %731, %620 : vector<2x16xf32>
    %733 = arith.addf %728, %732 : vector<2x16xf32>
    %734 = vector.broadcast %712 : vector<2x1xf32> to vector<2x16xf32>
    %735 = arith.mulf %734, %702 : vector<2x16xf32>
    %cst_186 = arith.constant 1.000000e+00 : f32
    %736 = vector.broadcast %cst_186 : f32 to vector<2x1xf32>
    %737 = arith.subf %736, %712 : vector<2x1xf32>
    %738 = vector.broadcast %737 : vector<2x1xf32> to vector<2x16xf32>
    %739 = arith.mulf %738, %627 : vector<2x16xf32>
    %740 = arith.addf %735, %739 : vector<2x16xf32>
    %741 = vector.broadcast %708 : vector<2x1xf32> to vector<2x16xf32>
    %742 = arith.mulf %719, %741 : vector<2x16xf32>
    %743 = vector.broadcast %712 : vector<2x1xf32> to vector<2x16xf32>
    %744 = arith.mulf %733, %743 : vector<2x16xf32>
    %745 = arith.truncf %742 : vector<2x16xf32> to vector<2x16xbf16>
    %c0_187 = arith.constant 0 : index
    %746 = arith.index_cast %c5_i32 : i32 to index
    %c0_188 = arith.constant 0 : index
    %c0_189 = arith.constant 0 : index
    %747 = vector.load %arg7[%c0_187, %746, %c0_188, %c0_189] : memref<1x8x2x16xbf16, #tpu.memory_space<vmem>>, vector<1x1x2x16xbf16>
    %748 = vector.shape_cast %747 : vector<1x1x2x16xbf16> to vector<2x16xbf16>
    %749 = vector.shape_cast %745 : vector<2x16xbf16> to vector<1x1x2x16xbf16>
    tpu.vector_store %arg7[%c0_187, %746, %c0_188, %c0_189], %749 {strides = array<i32>} : memref<1x8x2x16xbf16, #tpu.memory_space<vmem>>, vector<1x1x2x16xbf16>,
    %750 = arith.truncf %744 : vector<2x16xf32> to vector<2x16xbf16>
    %c0_190 = arith.constant 0 : index
    %751 = arith.index_cast %642 : i32 to index
    %c0_191 = arith.constant 0 : index
    %c0_192 = arith.constant 0 : index
    %752 = vector.load %arg8[%c0_190, %751, %c0_191, %c0_192] : memref<1x8x2x16xbf16, #tpu.memory_space<vmem>>, vector<1x1x2x16xbf16>
    %753 = vector.shape_cast %752 : vector<1x1x2x16xbf16> to vector<2x16xbf16>
    %754 = vector.shape_cast %750 : vector<2x16xbf16> to vector<1x1x2x16xbf16>
    tpu.vector_store %arg8[%c0_190, %751, %c0_191, %c0_192], %754 {strides = array<i32>} : memref<1x8x2x16xbf16, #tpu.memory_space<vmem>>, vector<1x1x2x16xbf16>,
    %c6_i32 = arith.constant 6 : i32
    %c7_i32_193 = arith.constant 7 : i32
    %755 = arith.subi %c7_i32_193, %c6_i32 : i32
    %756 = arith.index_cast %c6_i32 : i32 to index
    %c0_194 = arith.constant 0 : index
    %c0_195 = arith.constant 0 : index
    %757 = vector.load %arg9[%756, %c0_194, %c0_195] : memref<8x2x64xf32, #tpu.memory_space<vmem>>, vector<1x2x64xf32>
    %758 = vector.shape_cast %757 : vector<1x2x64xf32> to vector<2x64xf32>
    %759 = arith.index_cast %755 : i32 to index
    %c0_196 = arith.constant 0 : index
    %c0_197 = arith.constant 0 : index
    %760 = vector.load %arg10[%759, %c0_196, %c0_197] : memref<8x2x64xf32, #tpu.memory_space<vmem>>, vector<1x2x64xf32>
    %761 = vector.shape_cast %760 : vector<1x2x64xf32> to vector<2x64xf32>
    %762 = arith.truncf %719 : vector<2x16xf32> to vector<2x16xbf16>
    %cst_198 = arith.constant dense<0.000000e+00> : vector<2x64xf32>
    %763 = tpu.matmul %762, %71, %cst_198 {dimension_numbers = #tpu.dot_dimension_numbers<[1], [0], [0], [1], [0, 0, 1, 1], [], []>} : vector<2x16xbf16>, vector<16x64xbf16>, vector<2x64xf32> -> vector<2x64xf32>
    %764 = arith.addf %758, %763 : vector<2x64xf32>
    %765 = vector.extract_strided_slice %764 {offsets = [0, 0], sizes = [2, 16], strides = [1, 1]} : vector<2x64xf32> to vector<2x16xf32>
    %766 = arith.negf %765 : vector<2x16xf32>
    %767 = math.exp %766 : vector<2x16xf32>
    %cst_199 = arith.constant 1.000000e+00 : f32
    %768 = vector.broadcast %cst_199 : f32 to vector<2x16xf32>
    %769 = arith.addf %768, %767 : vector<2x16xf32>
    %770 = arith.divf %768, %769 : vector<2x16xf32>
    %771 = vector.extract_strided_slice %764 {offsets = [0, 16], sizes = [2, 16], strides = [1, 1]} : vector<2x64xf32> to vector<2x16xf32>
    %772 = arith.negf %771 : vector<2x16xf32>
    %773 = math.exp %772 : vector<2x16xf32>
    %cst_200 = arith.constant 1.000000e+00 : f32
    %774 = vector.broadcast %cst_200 : f32 to vector<2x16xf32>
    %775 = arith.addf %774, %773 : vector<2x16xf32>
    %776 = arith.divf %774, %775 : vector<2x16xf32>
    %777 = vector.extract_strided_slice %764 {offsets = [0, 32], sizes = [2, 16], strides = [1, 1]} : vector<2x64xf32> to vector<2x16xf32>
    %778 = math.tanh %777 : vector<2x16xf32>
    %779 = vector.extract_strided_slice %764 {offsets = [0, 48], sizes = [2, 16], strides = [1, 1]} : vector<2x64xf32> to vector<2x16xf32>
    %780 = arith.negf %779 : vector<2x16xf32>
    %781 = math.exp %780 : vector<2x16xf32>
    %cst_201 = arith.constant 1.000000e+00 : f32
    %782 = vector.broadcast %cst_201 : f32 to vector<2x16xf32>
    %783 = arith.addf %782, %781 : vector<2x16xf32>
    %784 = arith.divf %782, %783 : vector<2x16xf32>
    %785 = arith.mulf %776, %726 : vector<2x16xf32>
    %786 = arith.mulf %770, %778 : vector<2x16xf32>
    %787 = arith.addf %785, %786 : vector<2x16xf32>
    %788 = math.tanh %787 : vector<2x16xf32>
    %789 = arith.mulf %784, %788 : vector<2x16xf32>
    %790 = arith.truncf %733 : vector<2x16xf32> to vector<2x16xbf16>
    %cst_202 = arith.constant dense<0.000000e+00> : vector<2x64xf32>
    %791 = tpu.matmul %790, %72, %cst_202 {dimension_numbers = #tpu.dot_dimension_numbers<[1], [0], [0], [1], [0, 0, 1, 1], [], []>} : vector<2x16xbf16>, vector<16x64xbf16>, vector<2x64xf32> -> vector<2x64xf32>
    %792 = arith.addf %761, %791 : vector<2x64xf32>
    %793 = vector.extract_strided_slice %792 {offsets = [0, 0], sizes = [2, 16], strides = [1, 1]} : vector<2x64xf32> to vector<2x16xf32>
    %794 = arith.negf %793 : vector<2x16xf32>
    %795 = math.exp %794 : vector<2x16xf32>
    %cst_203 = arith.constant 1.000000e+00 : f32
    %796 = vector.broadcast %cst_203 : f32 to vector<2x16xf32>
    %797 = arith.addf %796, %795 : vector<2x16xf32>
    %798 = arith.divf %796, %797 : vector<2x16xf32>
    %799 = vector.extract_strided_slice %792 {offsets = [0, 16], sizes = [2, 16], strides = [1, 1]} : vector<2x64xf32> to vector<2x16xf32>
    %800 = arith.negf %799 : vector<2x16xf32>
    %801 = math.exp %800 : vector<2x16xf32>
    %cst_204 = arith.constant 1.000000e+00 : f32
    %802 = vector.broadcast %cst_204 : f32 to vector<2x16xf32>
    %803 = arith.addf %802, %801 : vector<2x16xf32>
    %804 = arith.divf %802, %803 : vector<2x16xf32>
    %805 = vector.extract_strided_slice %792 {offsets = [0, 32], sizes = [2, 16], strides = [1, 1]} : vector<2x64xf32> to vector<2x16xf32>
    %806 = math.tanh %805 : vector<2x16xf32>
    %807 = vector.extract_strided_slice %792 {offsets = [0, 48], sizes = [2, 16], strides = [1, 1]} : vector<2x64xf32> to vector<2x16xf32>
    %808 = arith.negf %807 : vector<2x16xf32>
    %809 = math.exp %808 : vector<2x16xf32>
    %cst_205 = arith.constant 1.000000e+00 : f32
    %810 = vector.broadcast %cst_205 : f32 to vector<2x16xf32>
    %811 = arith.addf %810, %809 : vector<2x16xf32>
    %812 = arith.divf %810, %811 : vector<2x16xf32>
    %813 = arith.mulf %804, %740 : vector<2x16xf32>
    %814 = arith.mulf %798, %806 : vector<2x16xf32>
    %815 = arith.addf %813, %814 : vector<2x16xf32>
    %816 = math.tanh %815 : vector<2x16xf32>
    %817 = arith.mulf %812, %816 : vector<2x16xf32>
    %818 = vector.broadcast %c6_i32 : i32 to vector<2x1xi32>
    %819 = arith.cmpi slt, %818, %74 : vector<2x1xi32>
    %820 = arith.extui %819 : vector<2x1xi1> to vector<2x1xi32>
    %821 = arith.sitofp %820 : vector<2x1xi32> to vector<2x1xf32>
    %822 = vector.broadcast %755 : i32 to vector<2x1xi32>
    %823 = arith.cmpi slt, %822, %74 : vector<2x1xi32>
    %824 = arith.extui %823 : vector<2x1xi1> to vector<2x1xi32>
    %825 = arith.sitofp %824 : vector<2x1xi32> to vector<2x1xf32>
    %826 = vector.broadcast %821 : vector<2x1xf32> to vector<2x16xf32>
    %827 = arith.mulf %826, %789 : vector<2x16xf32>
    %cst_206 = arith.constant 1.000000e+00 : f32
    %828 = vector.broadcast %cst_206 : f32 to vector<2x1xf32>
    %829 = arith.subf %828, %821 : vector<2x1xf32>
    %830 = vector.broadcast %829 : vector<2x1xf32> to vector<2x16xf32>
    %831 = arith.mulf %830, %719 : vector<2x16xf32>
    %832 = arith.addf %827, %831 : vector<2x16xf32>
    %833 = vector.broadcast %821 : vector<2x1xf32> to vector<2x16xf32>
    %834 = arith.mulf %833, %787 : vector<2x16xf32>
    %cst_207 = arith.constant 1.000000e+00 : f32
    %835 = vector.broadcast %cst_207 : f32 to vector<2x1xf32>
    %836 = arith.subf %835, %821 : vector<2x1xf32>
    %837 = vector.broadcast %836 : vector<2x1xf32> to vector<2x16xf32>
    %838 = arith.mulf %837, %726 : vector<2x16xf32>
    %839 = arith.addf %834, %838 : vector<2x16xf32>
    %840 = vector.broadcast %825 : vector<2x1xf32> to vector<2x16xf32>
    %841 = arith.mulf %840, %817 : vector<2x16xf32>
    %cst_208 = arith.constant 1.000000e+00 : f32
    %842 = vector.broadcast %cst_208 : f32 to vector<2x1xf32>
    %843 = arith.subf %842, %825 : vector<2x1xf32>
    %844 = vector.broadcast %843 : vector<2x1xf32> to vector<2x16xf32>
    %845 = arith.mulf %844, %733 : vector<2x16xf32>
    %846 = arith.addf %841, %845 : vector<2x16xf32>
    %847 = vector.broadcast %825 : vector<2x1xf32> to vector<2x16xf32>
    %848 = arith.mulf %847, %815 : vector<2x16xf32>
    %cst_209 = arith.constant 1.000000e+00 : f32
    %849 = vector.broadcast %cst_209 : f32 to vector<2x1xf32>
    %850 = arith.subf %849, %825 : vector<2x1xf32>
    %851 = vector.broadcast %850 : vector<2x1xf32> to vector<2x16xf32>
    %852 = arith.mulf %851, %740 : vector<2x16xf32>
    %853 = arith.addf %848, %852 : vector<2x16xf32>
    %854 = vector.broadcast %821 : vector<2x1xf32> to vector<2x16xf32>
    %855 = arith.mulf %832, %854 : vector<2x16xf32>
    %856 = vector.broadcast %825 : vector<2x1xf32> to vector<2x16xf32>
    %857 = arith.mulf %846, %856 : vector<2x16xf32>
    %858 = arith.truncf %855 : vector<2x16xf32> to vector<2x16xbf16>
    %c0_210 = arith.constant 0 : index
    %859 = arith.index_cast %c6_i32 : i32 to index
    %c0_211 = arith.constant 0 : index
    %c0_212 = arith.constant 0 : index
    %860 = vector.load %arg7[%c0_210, %859, %c0_211, %c0_212] : memref<1x8x2x16xbf16, #tpu.memory_space<vmem>>, vector<1x1x2x16xbf16>
    %861 = vector.shape_cast %860 : vector<1x1x2x16xbf16> to vector<2x16xbf16>
    %862 = vector.shape_cast %858 : vector<2x16xbf16> to vector<1x1x2x16xbf16>
    tpu.vector_store %arg7[%c0_210, %859, %c0_211, %c0_212], %862 {strides = array<i32>} : memref<1x8x2x16xbf16, #tpu.memory_space<vmem>>, vector<1x1x2x16xbf16>,
    %863 = arith.truncf %857 : vector<2x16xf32> to vector<2x16xbf16>
    %c0_213 = arith.constant 0 : index
    %864 = arith.index_cast %755 : i32 to index
    %c0_214 = arith.constant 0 : index
    %c0_215 = arith.constant 0 : index
    %865 = vector.load %arg8[%c0_213, %864, %c0_214, %c0_215] : memref<1x8x2x16xbf16, #tpu.memory_space<vmem>>, vector<1x1x2x16xbf16>
    %866 = vector.shape_cast %865 : vector<1x1x2x16xbf16> to vector<2x16xbf16>
    %867 = vector.shape_cast %863 : vector<2x16xbf16> to vector<1x1x2x16xbf16>
    tpu.vector_store %arg8[%c0_213, %864, %c0_214, %c0_215], %867 {strides = array<i32>} : memref<1x8x2x16xbf16, #tpu.memory_space<vmem>>, vector<1x1x2x16xbf16>,
    %c7_i32_216 = arith.constant 7 : i32
    %c7_i32_217 = arith.constant 7 : i32
    %868 = arith.subi %c7_i32_217, %c7_i32_216 : i32
    %869 = arith.index_cast %c7_i32_216 : i32 to index
    %c0_218 = arith.constant 0 : index
    %c0_219 = arith.constant 0 : index
    %870 = vector.load %arg9[%869, %c0_218, %c0_219] : memref<8x2x64xf32, #tpu.memory_space<vmem>>, vector<1x2x64xf32>
    %871 = vector.shape_cast %870 : vector<1x2x64xf32> to vector<2x64xf32>
    %872 = arith.index_cast %868 : i32 to index
    %c0_220 = arith.constant 0 : index
    %c0_221 = arith.constant 0 : index
    %873 = vector.load %arg10[%872, %c0_220, %c0_221] : memref<8x2x64xf32, #tpu.memory_space<vmem>>, vector<1x2x64xf32>
    %874 = vector.shape_cast %873 : vector<1x2x64xf32> to vector<2x64xf32>
    %875 = arith.truncf %832 : vector<2x16xf32> to vector<2x16xbf16>
    %cst_222 = arith.constant dense<0.000000e+00> : vector<2x64xf32>
    %876 = tpu.matmul %875, %71, %cst_222 {dimension_numbers = #tpu.dot_dimension_numbers<[1], [0], [0], [1], [0, 0, 1, 1], [], []>} : vector<2x16xbf16>, vector<16x64xbf16>, vector<2x64xf32> -> vector<2x64xf32>
    %877 = arith.addf %871, %876 : vector<2x64xf32>
    %878 = vector.extract_strided_slice %877 {offsets = [0, 0], sizes = [2, 16], strides = [1, 1]} : vector<2x64xf32> to vector<2x16xf32>
    %879 = arith.negf %878 : vector<2x16xf32>
    %880 = math.exp %879 : vector<2x16xf32>
    %cst_223 = arith.constant 1.000000e+00 : f32
    %881 = vector.broadcast %cst_223 : f32 to vector<2x16xf32>
    %882 = arith.addf %881, %880 : vector<2x16xf32>
    %883 = arith.divf %881, %882 : vector<2x16xf32>
    %884 = vector.extract_strided_slice %877 {offsets = [0, 16], sizes = [2, 16], strides = [1, 1]} : vector<2x64xf32> to vector<2x16xf32>
    %885 = arith.negf %884 : vector<2x16xf32>
    %886 = math.exp %885 : vector<2x16xf32>
    %cst_224 = arith.constant 1.000000e+00 : f32
    %887 = vector.broadcast %cst_224 : f32 to vector<2x16xf32>
    %888 = arith.addf %887, %886 : vector<2x16xf32>
    %889 = arith.divf %887, %888 : vector<2x16xf32>
    %890 = vector.extract_strided_slice %877 {offsets = [0, 32], sizes = [2, 16], strides = [1, 1]} : vector<2x64xf32> to vector<2x16xf32>
    %891 = math.tanh %890 : vector<2x16xf32>
    %892 = vector.extract_strided_slice %877 {offsets = [0, 48], sizes = [2, 16], strides = [1, 1]} : vector<2x64xf32> to vector<2x16xf32>
    %893 = arith.negf %892 : vector<2x16xf32>
    %894 = math.exp %893 : vector<2x16xf32>
    %cst_225 = arith.constant 1.000000e+00 : f32
    %895 = vector.broadcast %cst_225 : f32 to vector<2x16xf32>
    %896 = arith.addf %895, %894 : vector<2x16xf32>
    %897 = arith.divf %895, %896 : vector<2x16xf32>
    %898 = arith.mulf %889, %839 : vector<2x16xf32>
    %899 = arith.mulf %883, %891 : vector<2x16xf32>
    %900 = arith.addf %898, %899 : vector<2x16xf32>
    %901 = math.tanh %900 : vector<2x16xf32>
    %902 = arith.mulf %897, %901 : vector<2x16xf32>
    %903 = arith.truncf %846 : vector<2x16xf32> to vector<2x16xbf16>
    %cst_226 = arith.constant dense<0.000000e+00> : vector<2x64xf32>
    %904 = tpu.matmul %903, %72, %cst_226 {dimension_numbers = #tpu.dot_dimension_numbers<[1], [0], [0], [1], [0, 0, 1, 1], [], []>} : vector<2x16xbf16>, vector<16x64xbf16>, vector<2x64xf32> -> vector<2x64xf32>
    %905 = arith.addf %874, %904 : vector<2x64xf32>
    %906 = vector.extract_strided_slice %905 {offsets = [0, 0], sizes = [2, 16], strides = [1, 1]} : vector<2x64xf32> to vector<2x16xf32>
    %907 = arith.negf %906 : vector<2x16xf32>
    %908 = math.exp %907 : vector<2x16xf32>
    %cst_227 = arith.constant 1.000000e+00 : f32
    %909 = vector.broadcast %cst_227 : f32 to vector<2x16xf32>
    %910 = arith.addf %909, %908 : vector<2x16xf32>
    %911 = arith.divf %909, %910 : vector<2x16xf32>
    %912 = vector.extract_strided_slice %905 {offsets = [0, 16], sizes = [2, 16], strides = [1, 1]} : vector<2x64xf32> to vector<2x16xf32>
    %913 = arith.negf %912 : vector<2x16xf32>
    %914 = math.exp %913 : vector<2x16xf32>
    %cst_228 = arith.constant 1.000000e+00 : f32
    %915 = vector.broadcast %cst_228 : f32 to vector<2x16xf32>
    %916 = arith.addf %915, %914 : vector<2x16xf32>
    %917 = arith.divf %915, %916 : vector<2x16xf32>
    %918 = vector.extract_strided_slice %905 {offsets = [0, 32], sizes = [2, 16], strides = [1, 1]} : vector<2x64xf32> to vector<2x16xf32>
    %919 = math.tanh %918 : vector<2x16xf32>
    %920 = vector.extract_strided_slice %905 {offsets = [0, 48], sizes = [2, 16], strides = [1, 1]} : vector<2x64xf32> to vector<2x16xf32>
    %921 = arith.negf %920 : vector<2x16xf32>
    %922 = math.exp %921 : vector<2x16xf32>
    %cst_229 = arith.constant 1.000000e+00 : f32
    %923 = vector.broadcast %cst_229 : f32 to vector<2x16xf32>
    %924 = arith.addf %923, %922 : vector<2x16xf32>
    %925 = arith.divf %923, %924 : vector<2x16xf32>
    %926 = arith.mulf %917, %853 : vector<2x16xf32>
    %927 = arith.mulf %911, %919 : vector<2x16xf32>
    %928 = arith.addf %926, %927 : vector<2x16xf32>
    %929 = math.tanh %928 : vector<2x16xf32>
    %930 = arith.mulf %925, %929 : vector<2x16xf32>
    %931 = vector.broadcast %c7_i32_216 : i32 to vector<2x1xi32>
    %932 = arith.cmpi slt, %931, %74 : vector<2x1xi32>
    %933 = arith.extui %932 : vector<2x1xi1> to vector<2x1xi32>
    %934 = arith.sitofp %933 : vector<2x1xi32> to vector<2x1xf32>
    %935 = vector.broadcast %868 : i32 to vector<2x1xi32>
    %936 = arith.cmpi slt, %935, %74 : vector<2x1xi32>
    %937 = arith.extui %936 : vector<2x1xi1> to vector<2x1xi32>
    %938 = arith.sitofp %937 : vector<2x1xi32> to vector<2x1xf32>
    %939 = vector.broadcast %934 : vector<2x1xf32> to vector<2x16xf32>
    %940 = arith.mulf %939, %902 : vector<2x16xf32>
    %cst_230 = arith.constant 1.000000e+00 : f32
    %941 = vector.broadcast %cst_230 : f32 to vector<2x1xf32>
    %942 = arith.subf %941, %934 : vector<2x1xf32>
    %943 = vector.broadcast %942 : vector<2x1xf32> to vector<2x16xf32>
    %944 = arith.mulf %943, %832 : vector<2x16xf32>
    %945 = arith.addf %940, %944 : vector<2x16xf32>
    %946 = vector.broadcast %934 : vector<2x1xf32> to vector<2x16xf32>
    %947 = arith.mulf %946, %900 : vector<2x16xf32>
    %cst_231 = arith.constant 1.000000e+00 : f32
    %948 = vector.broadcast %cst_231 : f32 to vector<2x1xf32>
    %949 = arith.subf %948, %934 : vector<2x1xf32>
    %950 = vector.broadcast %949 : vector<2x1xf32> to vector<2x16xf32>
    %951 = arith.mulf %950, %839 : vector<2x16xf32>
    %952 = arith.addf %947, %951 : vector<2x16xf32>
    %953 = vector.broadcast %938 : vector<2x1xf32> to vector<2x16xf32>
    %954 = arith.mulf %953, %930 : vector<2x16xf32>
    %cst_232 = arith.constant 1.000000e+00 : f32
    %955 = vector.broadcast %cst_232 : f32 to vector<2x1xf32>
    %956 = arith.subf %955, %938 : vector<2x1xf32>
    %957 = vector.broadcast %956 : vector<2x1xf32> to vector<2x16xf32>
    %958 = arith.mulf %957, %846 : vector<2x16xf32>
    %959 = arith.addf %954, %958 : vector<2x16xf32>
    %960 = vector.broadcast %938 : vector<2x1xf32> to vector<2x16xf32>
    %961 = arith.mulf %960, %928 : vector<2x16xf32>
    %cst_233 = arith.constant 1.000000e+00 : f32
    %962 = vector.broadcast %cst_233 : f32 to vector<2x1xf32>
    %963 = arith.subf %962, %938 : vector<2x1xf32>
    %964 = vector.broadcast %963 : vector<2x1xf32> to vector<2x16xf32>
    %965 = arith.mulf %964, %853 : vector<2x16xf32>
    %966 = arith.addf %961, %965 : vector<2x16xf32>
    %967 = vector.broadcast %934 : vector<2x1xf32> to vector<2x16xf32>
    %968 = arith.mulf %945, %967 : vector<2x16xf32>
    %969 = vector.broadcast %938 : vector<2x1xf32> to vector<2x16xf32>
    %970 = arith.mulf %959, %969 : vector<2x16xf32>
    %971 = arith.truncf %968 : vector<2x16xf32> to vector<2x16xbf16>
    %c0_234 = arith.constant 0 : index
    %972 = arith.index_cast %c7_i32_216 : i32 to index
    %c0_235 = arith.constant 0 : index
    %c0_236 = arith.constant 0 : index
    %973 = vector.load %arg7[%c0_234, %972, %c0_235, %c0_236] : memref<1x8x2x16xbf16, #tpu.memory_space<vmem>>, vector<1x1x2x16xbf16>
    %974 = vector.shape_cast %973 : vector<1x1x2x16xbf16> to vector<2x16xbf16>
    %975 = vector.shape_cast %971 : vector<2x16xbf16> to vector<1x1x2x16xbf16>
    tpu.vector_store %arg7[%c0_234, %972, %c0_235, %c0_236], %975 {strides = array<i32>} : memref<1x8x2x16xbf16, #tpu.memory_space<vmem>>, vector<1x1x2x16xbf16>,
    %976 = arith.truncf %970 : vector<2x16xf32> to vector<2x16xbf16>
    %c0_237 = arith.constant 0 : index
    %977 = arith.index_cast %868 : i32 to index
    %c0_238 = arith.constant 0 : index
    %c0_239 = arith.constant 0 : index
    %978 = vector.load %arg8[%c0_237, %977, %c0_238, %c0_239] : memref<1x8x2x16xbf16, #tpu.memory_space<vmem>>, vector<1x1x2x16xbf16>
    %979 = vector.shape_cast %978 : vector<1x1x2x16xbf16> to vector<2x16xbf16>
    %980 = vector.shape_cast %976 : vector<2x16xbf16> to vector<1x1x2x16xbf16>
    tpu.vector_store %arg8[%c0_237, %977, %c0_238, %c0_239], %980 {strides = array<i32>} : memref<1x8x2x16xbf16, #tpu.memory_space<vmem>>, vector<1x1x2x16xbf16>,
    %c8_i32 = arith.constant 8 : i32
    return
  }
  func.func @transform_0(%arg0: i32) -> (i32, i32, i32) {
    %c0_i32 = arith.constant 0 : i32
    %c0_i32_0 = arith.constant 0 : i32
    %c0_i32_1 = arith.constant 0 : i32
    return %arg0, %c0_i32, %c0_i32_0 : i32, i32, i32
  }
  func.func @transform_1(%arg0: i32) -> (i32, i32, i32) {
    %c0_i32 = arith.constant 0 : i32
    %c0_i32_0 = arith.constant 0 : i32
    %c0_i32_1 = arith.constant 0 : i32
    return %arg0, %c0_i32, %c0_i32_0 : i32, i32, i32
  }
  func.func @transform_2(%arg0: i32) -> (i32, i32) {
    %c0_i32 = arith.constant 0 : i32
    %c0_i32_0 = arith.constant 0 : i32
    %c0_i32_1 = arith.constant 0 : i32
    return %c0_i32, %c0_i32_0 : i32, i32
  }
  func.func @transform_3(%arg0: i32) -> (i32, i32) {
    %c0_i32 = arith.constant 0 : i32
    %c0_i32_0 = arith.constant 0 : i32
    %c0_i32_1 = arith.constant 0 : i32
    return %c0_i32, %c0_i32_0 : i32, i32
  }
  func.func @transform_4(%arg0: i32) -> (i32, i32) {
    %c0_i32 = arith.constant 0 : i32
    %c0_i32_0 = arith.constant 0 : i32
    %c0_i32_1 = arith.constant 0 : i32
    return %c0_i32, %c0_i32_0 : i32, i32
  }
  func.func @transform_5(%arg0: i32) -> (i32, i32) {
    %c0_i32 = arith.constant 0 : i32
    %c0_i32_0 = arith.constant 0 : i32
    %c0_i32_1 = arith.constant 0 : i32
    return %c0_i32, %c0_i32_0 : i32, i32
  }
  func.func @transform_6(%arg0: i32) -> (i32, i32, i32, i32) {
    %c0_i32 = arith.constant 0 : i32
    %c0_i32_0 = arith.constant 0 : i32
    %c0_i32_1 = arith.constant 0 : i32
    %c0_i32_2 = arith.constant 0 : i32
    return %arg0, %c0_i32, %c0_i32_0, %c0_i32_1 : i32, i32, i32, i32
  }
  func.func @transform_7(%arg0: i32) -> (i32, i32, i32, i32) {
    %c0_i32 = arith.constant 0 : i32
    %c0_i32_0 = arith.constant 0 : i32
    %c0_i32_1 = arith.constant 0 : i32
    %c0_i32_2 = arith.constant 0 : i32
    return %arg0, %c0_i32, %c0_i32_0, %c0_i32_1 : i32, i32, i32, i32
  }
}

module attributes {stable_mosaic.version = 11 : i64} {
  func.func @_mlp_ce_kernel(%arg0: memref<2x128xf32, #tpu.memory_space<vmem>>, %arg1: memref<128x32xf32, #tpu.memory_space<vmem>>, %arg2: memref<1x32xf32, #tpu.memory_space<vmem>>, %arg3: memref<32x3xf32, #tpu.memory_space<vmem>>, %arg4: memref<1x3xf32, #tpu.memory_space<vmem>>, %arg5: memref<2x3xf32, #tpu.memory_space<vmem>>, %arg6: memref<1x1xf32, #tpu.memory_space<vmem>>) attributes {dimension_semantics = [], scalar_prefetch = 0 : i64, scratch_operands = 0 : i64, tpu.core_type = #tpu.core_type<tc>} {
    %c0 = arith.constant 0 : index
    %c0_0 = arith.constant 0 : index
    %0 = vector.load %arg0[%c0, %c0_0] : memref<2x128xf32, #tpu.memory_space<vmem>>, vector<2x128xf32>
    %c0_1 = arith.constant 0 : index
    %c0_2 = arith.constant 0 : index
    %1 = vector.load %arg1[%c0_1, %c0_2] : memref<128x32xf32, #tpu.memory_space<vmem>>, vector<128x32xf32>
    %cst = arith.constant dense<0.000000e+00> : vector<2x32xf32>
    %2 = tpu.matmul %0, %1, %cst {dimension_numbers = #tpu.dot_dimension_numbers<[1], [0], [0], [1], [0, 0, 1, 1], [], []>} : vector<2x128xf32>, vector<128x32xf32>, vector<2x32xf32> -> vector<2x32xf32>
    %c0_3 = arith.constant 0 : index
    %c0_4 = arith.constant 0 : index
    %3 = vector.load %arg2[%c0_3, %c0_4] : memref<1x32xf32, #tpu.memory_space<vmem>>, vector<1x32xf32>
    %4 = vector.broadcast %3 : vector<1x32xf32> to vector<2x32xf32>
    %5 = arith.addf %2, %4 : vector<2x32xf32>
    %6 = math.tanh %5 : vector<2x32xf32>
    %c0_5 = arith.constant 0 : index
    %c0_6 = arith.constant 0 : index
    %7 = vector.load %arg3[%c0_5, %c0_6] : memref<32x3xf32, #tpu.memory_space<vmem>>, vector<32x3xf32>
    %cst_7 = arith.constant dense<0.000000e+00> : vector<2x3xf32>
    %8 = tpu.matmul %6, %7, %cst_7 {dimension_numbers = #tpu.dot_dimension_numbers<[1], [0], [0], [1], [0, 0, 1, 1], [], []>} : vector<2x32xf32>, vector<32x3xf32>, vector<2x3xf32> -> vector<2x3xf32>
    %c0_8 = arith.constant 0 : index
    %c0_9 = arith.constant 0 : index
    %9 = vector.load %arg4[%c0_8, %c0_9] : memref<1x3xf32, #tpu.memory_space<vmem>>, vector<1x3xf32>
    %10 = vector.broadcast %9 : vector<1x3xf32> to vector<2x3xf32>
    %11 = arith.addf %8, %10 : vector<2x3xf32>
    %cst_10 = arith.constant dense<0xFF800000> : vector<2xf32>
    %12 = vector.multi_reduction <maximumf>, %11, %cst_10 [1] : vector<2x3xf32> to vector<2xf32>
    %13 = vector.shape_cast %12 : vector<2xf32> to vector<2x1xf32>
    %14 = vector.broadcast %13 : vector<2x1xf32> to vector<2x3xf32>
    %15 = arith.subf %11, %14 : vector<2x3xf32>
    %16 = math.exp %15 : vector<2x3xf32>
    %cst_11 = arith.constant dense<0.000000e+00> : vector<2xf32>
    %17 = vector.multi_reduction <add>, %16, %cst_11 [1] : vector<2x3xf32> to vector<2xf32>
    %18 = vector.shape_cast %17 : vector<2xf32> to vector<2x1xf32>
    %19 = math.log %18 : vector<2x1xf32>
    %20 = arith.addf %19, %13 : vector<2x1xf32>
    %c0_12 = arith.constant 0 : index
    %c0_13 = arith.constant 0 : index
    %21 = vector.load %arg5[%c0_12, %c0_13] : memref<2x3xf32, #tpu.memory_space<vmem>>, vector<2x3xf32>
    %22 = arith.mulf %11, %21 : vector<2x3xf32>
    %cst_14 = arith.constant dense<0.000000e+00> : vector<2xf32>
    %23 = vector.multi_reduction <add>, %22, %cst_14 [1] : vector<2x3xf32> to vector<2xf32>
    %24 = vector.shape_cast %23 : vector<2xf32> to vector<2x1xf32>
    %25 = arith.subf %20, %24 : vector<2x1xf32>
    %cst_15 = arith.constant dense<0.000000e+00> : vector<1xf32>
    %26 = vector.multi_reduction <add>, %25, %cst_15 [0] : vector<2x1xf32> to vector<1xf32>
    %27 = vector.shape_cast %26 : vector<1xf32> to vector<1x1xf32>
    %cst_16 = arith.constant 2.000000e+00 : f32
    %28 = vector.broadcast %cst_16 : f32 to vector<1x1xf32>
    %29 = arith.divf %27, %28 : vector<1x1xf32>
    %c0_17 = arith.constant 0 : index
    %c0_18 = arith.constant 0 : index
    %30 = vector.load %arg6[%c0_17, %c0_18] : memref<1x1xf32, #tpu.memory_space<vmem>>, vector<1x1xf32>
    tpu.vector_store %arg6[%c0_17, %c0_18], %29 {strides = array<i32>} : memref<1x1xf32, #tpu.memory_space<vmem>>, vector<1x1xf32>,
    return
  }
}

module attributes {stable_mosaic.version = 11 : i64} {
  func.func @_bilstm_kernel(%arg0: i32, %arg1: memref<1x16x32xbf16, #tpu.memory_space<vmem>>, %arg2: memref<1x2x1xi32, #tpu.memory_space<vmem>>, %arg3: memref<32x128xbf16, #tpu.memory_space<vmem>>, %arg4: memref<16x64xbf16, #tpu.memory_space<vmem>>, %arg5: memref<16x64xbf16, #tpu.memory_space<vmem>>, %arg6: memref<1x128xf32, #tpu.memory_space<vmem>>, %arg7: memref<1x2x64xf32, #tpu.memory_space<vmem>>, %arg8: memref<8x2x64xf32, #tpu.memory_space<vmem>>, %arg9: memref<8x2x64xf32, #tpu.memory_space<vmem>>) attributes {dimension_semantics = [#tpu.dimension_semantics<parallel>], iteration_bounds = array<i64: 1>, scalar_prefetch = 0 : i64, scratch_operands = 2 : i64, tpu.core_type = #tpu.core_type<tc>, window_params = [{transform_indices = @transform_0, window_bounds = array<i64: 1, 16, 32>}, {transform_indices = @transform_1, window_bounds = array<i64: 1, 2, 1>}, {pipeline_mode = #tpu.pipeline_mode<synchronous>, transform_indices = @transform_2, window_bounds = array<i64: 32, 128>}, {pipeline_mode = #tpu.pipeline_mode<synchronous>, transform_indices = @transform_3, window_bounds = array<i64: 16, 64>}, {pipeline_mode = #tpu.pipeline_mode<synchronous>, transform_indices = @transform_4, window_bounds = array<i64: 16, 64>}, {pipeline_mode = #tpu.pipeline_mode<synchronous>, transform_indices = @transform_5, window_bounds = array<i64: 1, 128>}, {transform_indices = @transform_6, window_bounds = array<i64: 1, 2, 64>}]} {
    %c0 = arith.constant 0 : index
    %c0_0 = arith.constant 0 : index
    %c0_1 = arith.constant 0 : index
    %0 = vector.load %arg1[%c0, %c0_0, %c0_1] : memref<1x16x32xbf16, #tpu.memory_space<vmem>>, vector<1x16x32xbf16>
    %1 = vector.shape_cast %0 : vector<1x16x32xbf16> to vector<16x32xbf16>
    %c0_2 = arith.constant 0 : index
    %c0_3 = arith.constant 0 : index
    %2 = vector.load %arg3[%c0_2, %c0_3] : memref<32x128xbf16, #tpu.memory_space<vmem>>, vector<32x128xbf16>
    %cst = arith.constant dense<0.000000e+00> : vector<16x128xf32>
    %3 = tpu.matmul %1, %2, %cst {dimension_numbers = #tpu.dot_dimension_numbers<[1], [0], [0], [1], [0, 0, 1, 1], [], []>} : vector<16x32xbf16>, vector<32x128xbf16>, vector<16x128xf32> -> vector<16x128xf32>
    %c0_4 = arith.constant 0 : index
    %c0_5 = arith.constant 0 : index
    %4 = vector.load %arg6[%c0_4, %c0_5] : memref<1x128xf32, #tpu.memory_space<vmem>>, vector<1x128xf32>
    %5 = vector.broadcast %4 : vector<1x128xf32> to vector<16x128xf32>
    %6 = arith.addf %3, %5 : vector<16x128xf32>
    %7 = vector.extract_strided_slice %6 {offsets = [0, 0], sizes = [2, 64], strides = [1, 1]} : vector<16x128xf32> to vector<2x64xf32>
    %c0_6 = arith.constant 0 : index
    %c0_7 = arith.constant 0 : index
    %c0_8 = arith.constant 0 : index
    %8 = vector.load %arg8[%c0_6, %c0_7, %c0_8] : memref<8x2x64xf32, #tpu.memory_space<vmem>>, vector<1x2x64xf32>
    %9 = vector.shape_cast %8 : vector<1x2x64xf32> to vector<2x64xf32>
    %10 = vector.shape_cast %7 : vector<2x64xf32> to vector<1x2x64xf32>
    tpu.vector_store %arg8[%c0_6, %c0_7, %c0_8], %10 {strides = array<i32>} : memref<8x2x64xf32, #tpu.memory_space<vmem>>, vector<1x2x64xf32>,
    %11 = vector.extract_strided_slice %6 {offsets = [0, 64], sizes = [2, 64], strides = [1, 1]} : vector<16x128xf32> to vector<2x64xf32>
    %c0_9 = arith.constant 0 : index
    %c0_10 = arith.constant 0 : index
    %c0_11 = arith.constant 0 : index
    %12 = vector.load %arg9[%c0_9, %c0_10, %c0_11] : memref<8x2x64xf32, #tpu.memory_space<vmem>>, vector<1x2x64xf32>
    %13 = vector.shape_cast %12 : vector<1x2x64xf32> to vector<2x64xf32>
    %14 = vector.shape_cast %11 : vector<2x64xf32> to vector<1x2x64xf32>
    tpu.vector_store %arg9[%c0_9, %c0_10, %c0_11], %14 {strides = array<i32>} : memref<8x2x64xf32, #tpu.memory_space<vmem>>, vector<1x2x64xf32>,
    %15 = vector.extract_strided_slice %6 {offsets = [2, 0], sizes = [2, 64], strides = [1, 1]} : vector<16x128xf32> to vector<2x64xf32>
    %c1 = arith.constant 1 : index
    %c0_12 = arith.constant 0 : index
    %c0_13 = arith.constant 0 : index
    %16 = vector.load %arg8[%c1, %c0_12, %c0_13] : memref<8x2x64xf32, #tpu.memory_space<vmem>>, vector<1x2x64xf32>
    %17 = vector.shape_cast %16 : vector<1x2x64xf32> to vector<2x64xf32>
    %18 = vector.shape_cast %15 : vector<2x64xf32> to vector<1x2x64xf32>
    tpu.vector_store %arg8[%c1, %c0_12, %c0_13], %18 {strides = array<i32>} : memref<8x2x64xf32, #tpu.memory_space<vmem>>, vector<1x2x64xf32>,
    %19 = vector.extract_strided_slice %6 {offsets = [2, 64], sizes = [2, 64], strides = [1, 1]} : vector<16x128xf32> to vector<2x64xf32>
    %c1_14 = arith.constant 1 : index
    %c0_15 = arith.constant 0 : index
    %c0_16 = arith.constant 0 : index
    %20 = vector.load %arg9[%c1_14, %c0_15, %c0_16] : memref<8x2x64xf32, #tpu.memory_space<vmem>>, vector<1x2x64xf32>
    %21 = vector.shape_cast %20 : vector<1x2x64xf32> to vector<2x64xf32>
    %22 = vector.shape_cast %19 : vector<2x64xf32> to vector<1x2x64xf32>
    tpu.vector_store %arg9[%c1_14, %c0_15, %c0_16], %22 {strides = array<i32>} : memref<8x2x64xf32, #tpu.memory_space<vmem>>, vector<1x2x64xf32>,
    %23 = vector.extract_strided_slice %6 {offsets = [4, 0], sizes = [2, 64], strides = [1, 1]} : vector<16x128xf32> to vector<2x64xf32>
    %c2 = arith.constant 2 : index
    %c0_17 = arith.constant 0 : index
    %c0_18 = arith.constant 0 : index
    %24 = vector.load %arg8[%c2, %c0_17, %c0_18] : memref<8x2x64xf32, #tpu.memory_space<vmem>>, vector<1x2x64xf32>
    %25 = vector.shape_cast %24 : vector<1x2x64xf32> to vector<2x64xf32>
    %26 = vector.shape_cast %23 : vector<2x64xf32> to vector<1x2x64xf32>
    tpu.vector_store %arg8[%c2, %c0_17, %c0_18], %26 {strides = array<i32>} : memref<8x2x64xf32, #tpu.memory_space<vmem>>, vector<1x2x64xf32>,
    %27 = vector.extract_strided_slice %6 {offsets = [4, 64], sizes = [2, 64], strides = [1, 1]} : vector<16x128xf32> to vector<2x64xf32>
    %c2_19 = arith.constant 2 : index
    %c0_20 = arith.constant 0 : index
    %c0_21 = arith.constant 0 : index
    %28 = vector.load %arg9[%c2_19, %c0_20, %c0_21] : memref<8x2x64xf32, #tpu.memory_space<vmem>>, vector<1x2x64xf32>
    %29 = vector.shape_cast %28 : vector<1x2x64xf32> to vector<2x64xf32>
    %30 = vector.shape_cast %27 : vector<2x64xf32> to vector<1x2x64xf32>
    tpu.vector_store %arg9[%c2_19, %c0_20, %c0_21], %30 {strides = array<i32>} : memref<8x2x64xf32, #tpu.memory_space<vmem>>, vector<1x2x64xf32>,
    %31 = vector.extract_strided_slice %6 {offsets = [6, 0], sizes = [2, 64], strides = [1, 1]} : vector<16x128xf32> to vector<2x64xf32>
    %c3 = arith.constant 3 : index
    %c0_22 = arith.constant 0 : index
    %c0_23 = arith.constant 0 : index
    %32 = vector.load %arg8[%c3, %c0_22, %c0_23] : memref<8x2x64xf32, #tpu.memory_space<vmem>>, vector<1x2x64xf32>
    %33 = vector.shape_cast %32 : vector<1x2x64xf32> to vector<2x64xf32>
    %34 = vector.shape_cast %31 : vector<2x64xf32> to vector<1x2x64xf32>
    tpu.vector_store %arg8[%c3, %c0_22, %c0_23], %34 {strides = array<i32>} : memref<8x2x64xf32, #tpu.memory_space<vmem>>, vector<1x2x64xf32>,
    %35 = vector.extract_strided_slice %6 {offsets = [6, 64], sizes = [2, 64], strides = [1, 1]} : vector<16x128xf32> to vector<2x64xf32>
    %c3_24 = arith.constant 3 : index
    %c0_25 = arith.constant 0 : index
    %c0_26 = arith.constant 0 : index
    %36 = vector.load %arg9[%c3_24, %c0_25, %c0_26] : memref<8x2x64xf32, #tpu.memory_space<vmem>>, vector<1x2x64xf32>
    %37 = vector.shape_cast %36 : vector<1x2x64xf32> to vector<2x64xf32>
    %38 = vector.shape_cast %35 : vector<2x64xf32> to vector<1x2x64xf32>
    tpu.vector_store %arg9[%c3_24, %c0_25, %c0_26], %38 {strides = array<i32>} : memref<8x2x64xf32, #tpu.memory_space<vmem>>, vector<1x2x64xf32>,
    %39 = vector.extract_strided_slice %6 {offsets = [8, 0], sizes = [2, 64], strides = [1, 1]} : vector<16x128xf32> to vector<2x64xf32>
    %c4 = arith.constant 4 : index
    %c0_27 = arith.constant 0 : index
    %c0_28 = arith.constant 0 : index
    %40 = vector.load %arg8[%c4, %c0_27, %c0_28] : memref<8x2x64xf32, #tpu.memory_space<vmem>>, vector<1x2x64xf32>
    %41 = vector.shape_cast %40 : vector<1x2x64xf32> to vector<2x64xf32>
    %42 = vector.shape_cast %39 : vector<2x64xf32> to vector<1x2x64xf32>
    tpu.vector_store %arg8[%c4, %c0_27, %c0_28], %42 {strides = array<i32>} : memref<8x2x64xf32, #tpu.memory_space<vmem>>, vector<1x2x64xf32>,
    %43 = vector.extract_strided_slice %6 {offsets = [8, 64], sizes = [2, 64], strides = [1, 1]} : vector<16x128xf32> to vector<2x64xf32>
    %c4_29 = arith.constant 4 : index
    %c0_30 = arith.constant 0 : index
    %c0_31 = arith.constant 0 : index
    %44 = vector.load %arg9[%c4_29, %c0_30, %c0_31] : memref<8x2x64xf32, #tpu.memory_space<vmem>>, vector<1x2x64xf32>
    %45 = vector.shape_cast %44 : vector<1x2x64xf32> to vector<2x64xf32>
    %46 = vector.shape_cast %43 : vector<2x64xf32> to vector<1x2x64xf32>
    tpu.vector_store %arg9[%c4_29, %c0_30, %c0_31], %46 {strides = array<i32>} : memref<8x2x64xf32, #tpu.memory_space<vmem>>, vector<1x2x64xf32>,
    %47 = vector.extract_strided_slice %6 {offsets = [10, 0], sizes = [2, 64], strides = [1, 1]} : vector<16x128xf32> to vector<2x64xf32>
    %c5 = arith.constant 5 : index
    %c0_32 = arith.constant 0 : index
    %c0_33 = arith.constant 0 : index
    %48 = vector.load %arg8[%c5, %c0_32, %c0_33] : memref<8x2x64xf32, #tpu.memory_space<vmem>>, vector<1x2x64xf32>
    %49 = vector.shape_cast %48 : vector<1x2x64xf32> to vector<2x64xf32>
    %50 = vector.shape_cast %47 : vector<2x64xf32> to vector<1x2x64xf32>
    tpu.vector_store %arg8[%c5, %c0_32, %c0_33], %50 {strides = array<i32>} : memref<8x2x64xf32, #tpu.memory_space<vmem>>, vector<1x2x64xf32>,
    %51 = vector.extract_strided_slice %6 {offsets = [10, 64], sizes = [2, 64], strides = [1, 1]} : vector<16x128xf32> to vector<2x64xf32>
    %c5_34 = arith.constant 5 : index
    %c0_35 = arith.constant 0 : index
    %c0_36 = arith.constant 0 : index
    %52 = vector.load %arg9[%c5_34, %c0_35, %c0_36] : memref<8x2x64xf32, #tpu.memory_space<vmem>>, vector<1x2x64xf32>
    %53 = vector.shape_cast %52 : vector<1x2x64xf32> to vector<2x64xf32>
    %54 = vector.shape_cast %51 : vector<2x64xf32> to vector<1x2x64xf32>
    tpu.vector_store %arg9[%c5_34, %c0_35, %c0_36], %54 {strides = array<i32>} : memref<8x2x64xf32, #tpu.memory_space<vmem>>, vector<1x2x64xf32>,
    %55 = vector.extract_strided_slice %6 {offsets = [12, 0], sizes = [2, 64], strides = [1, 1]} : vector<16x128xf32> to vector<2x64xf32>
    %c6 = arith.constant 6 : index
    %c0_37 = arith.constant 0 : index
    %c0_38 = arith.constant 0 : index
    %56 = vector.load %arg8[%c6, %c0_37, %c0_38] : memref<8x2x64xf32, #tpu.memory_space<vmem>>, vector<1x2x64xf32>
    %57 = vector.shape_cast %56 : vector<1x2x64xf32> to vector<2x64xf32>
    %58 = vector.shape_cast %55 : vector<2x64xf32> to vector<1x2x64xf32>
    tpu.vector_store %arg8[%c6, %c0_37, %c0_38], %58 {strides = array<i32>} : memref<8x2x64xf32, #tpu.memory_space<vmem>>, vector<1x2x64xf32>,
    %59 = vector.extract_strided_slice %6 {offsets = [12, 64], sizes = [2, 64], strides = [1, 1]} : vector<16x128xf32> to vector<2x64xf32>
    %c6_39 = arith.constant 6 : index
    %c0_40 = arith.constant 0 : index
    %c0_41 = arith.constant 0 : index
    %60 = vector.load %arg9[%c6_39, %c0_40, %c0_41] : memref<8x2x64xf32, #tpu.memory_space<vmem>>, vector<1x2x64xf32>
    %61 = vector.shape_cast %60 : vector<1x2x64xf32> to vector<2x64xf32>
    %62 = vector.shape_cast %59 : vector<2x64xf32> to vector<1x2x64xf32>
    tpu.vector_store %arg9[%c6_39, %c0_40, %c0_41], %62 {strides = array<i32>} : memref<8x2x64xf32, #tpu.memory_space<vmem>>, vector<1x2x64xf32>,
    %63 = vector.extract_strided_slice %6 {offsets = [14, 0], sizes = [2, 64], strides = [1, 1]} : vector<16x128xf32> to vector<2x64xf32>
    %c7 = arith.constant 7 : index
    %c0_42 = arith.constant 0 : index
    %c0_43 = arith.constant 0 : index
    %64 = vector.load %arg8[%c7, %c0_42, %c0_43] : memref<8x2x64xf32, #tpu.memory_space<vmem>>, vector<1x2x64xf32>
    %65 = vector.shape_cast %64 : vector<1x2x64xf32> to vector<2x64xf32>
    %66 = vector.shape_cast %63 : vector<2x64xf32> to vector<1x2x64xf32>
    tpu.vector_store %arg8[%c7, %c0_42, %c0_43], %66 {strides = array<i32>} : memref<8x2x64xf32, #tpu.memory_space<vmem>>, vector<1x2x64xf32>,
    %67 = vector.extract_strided_slice %6 {offsets = [14, 64], sizes = [2, 64], strides = [1, 1]} : vector<16x128xf32> to vector<2x64xf32>
    %c7_44 = arith.constant 7 : index
    %c0_45 = arith.constant 0 : index
    %c0_46 = arith.constant 0 : index
    %68 = vector.load %arg9[%c7_44, %c0_45, %c0_46] : memref<8x2x64xf32, #tpu.memory_space<vmem>>, vector<1x2x64xf32>
    %69 = vector.shape_cast %68 : vector<1x2x64xf32> to vector<2x64xf32>
    %70 = vector.shape_cast %67 : vector<2x64xf32> to vector<1x2x64xf32>
    tpu.vector_store %arg9[%c7_44, %c0_45, %c0_46], %70 {strides = array<i32>} : memref<8x2x64xf32, #tpu.memory_space<vmem>>, vector<1x2x64xf32>,
    %c0_47 = arith.constant 0 : index
    %c0_48 = arith.constant 0 : index
    %71 = vector.load %arg4[%c0_47, %c0_48] : memref<16x64xbf16, #tpu.memory_space<vmem>>, vector<16x64xbf16>
    %c0_49 = arith.constant 0 : index
    %c0_50 = arith.constant 0 : index
    %72 = vector.load %arg5[%c0_49, %c0_50] : memref<16x64xbf16, #tpu.memory_space<vmem>>, vector<16x64xbf16>
    %c0_51 = arith.constant 0 : index
    %c0_52 = arith.constant 0 : index
    %c0_53 = arith.constant 0 : index
    %73 = vector.load %arg2[%c0_51, %c0_52, %c0_53] : memref<1x2x1xi32, #tpu.memory_space<vmem>>, vector<1x2x1xi32>
    %74 = vector.shape_cast %73 : vector<1x2x1xi32> to vector<2x1xi32>
    %cst_54 = arith.constant 0.000000e+00 : f32
    %75 = vector.broadcast %cst_54 : f32 to vector<2x16xf32>
    %cst_55 = arith.constant 0.000000e+00 : f32
    %76 = vector.broadcast %cst_55 : f32 to vector<2x16xf32>
    %cst_56 = arith.constant 0xFF800000 : f32
    %77 = vector.broadcast %cst_56 : f32 to vector<2x16xf32>
    %c0_i32 = arith.constant 0 : i32
    %c7_i32 = arith.constant 7 : i32
    %78 = arith.subi %c7_i32, %c0_i32 : i32
    %79 = arith.index_cast %c0_i32 : i32 to index
    %c0_57 = arith.constant 0 : index
    %c0_58 = arith.constant 0 : index
    %80 = vector.load %arg8[%79, %c0_57, %c0_58] : memref<8x2x64xf32, #tpu.memory_space<vmem>>, vector<1x2x64xf32>
    %81 = vector.shape_cast %80 : vector<1x2x64xf32> to vector<2x64xf32>
    %82 = arith.index_cast %78 : i32 to index
    %c0_59 = arith.constant 0 : index
    %c0_60 = arith.constant 0 : index
    %83 = vector.load %arg9[%82, %c0_59, %c0_60] : memref<8x2x64xf32, #tpu.memory_space<vmem>>, vector<1x2x64xf32>
    %84 = vector.shape_cast %83 : vector<1x2x64xf32> to vector<2x64xf32>
    %85 = arith.truncf %75 : vector<2x16xf32> to vector<2x16xbf16>
    %cst_61 = arith.constant dense<0.000000e+00> : vector<2x64xf32>
    %86 = tpu.matmul %85, %71, %cst_61 {dimension_numbers = #tpu.dot_dimension_numbers<[1], [0], [0], [1], [0, 0, 1, 1], [], []>} : vector<2x16xbf16>, vector<16x64xbf16>, vector<2x64xf32> -> vector<2x64xf32>
    %87 = arith.addf %81, %86 : vector<2x64xf32>
    %88 = vector.extract_strided_slice %87 {offsets = [0, 0], sizes = [2, 16], strides = [1, 1]} : vector<2x64xf32> to vector<2x16xf32>
    %89 = arith.negf %88 : vector<2x16xf32>
    %90 = math.exp %89 : vector<2x16xf32>
    %cst_62 = arith.constant 1.000000e+00 : f32
    %91 = vector.broadcast %cst_62 : f32 to vector<2x16xf32>
    %92 = arith.addf %91, %90 : vector<2x16xf32>
    %93 = arith.divf %91, %92 : vector<2x16xf32>
    %94 = vector.extract_strided_slice %87 {offsets = [0, 16], sizes = [2, 16], strides = [1, 1]} : vector<2x64xf32> to vector<2x16xf32>
    %95 = arith.negf %94 : vector<2x16xf32>
    %96 = math.exp %95 : vector<2x16xf32>
    %cst_63 = arith.constant 1.000000e+00 : f32
    %97 = vector.broadcast %cst_63 : f32 to vector<2x16xf32>
    %98 = arith.addf %97, %96 : vector<2x16xf32>
    %99 = arith.divf %97, %98 : vector<2x16xf32>
    %100 = vector.extract_strided_slice %87 {offsets = [0, 32], sizes = [2, 16], strides = [1, 1]} : vector<2x64xf32> to vector<2x16xf32>
    %101 = math.tanh %100 : vector<2x16xf32>
    %102 = vector.extract_strided_slice %87 {offsets = [0, 48], sizes = [2, 16], strides = [1, 1]} : vector<2x64xf32> to vector<2x16xf32>
    %103 = arith.negf %102 : vector<2x16xf32>
    %104 = math.exp %103 : vector<2x16xf32>
    %cst_64 = arith.constant 1.000000e+00 : f32
    %105 = vector.broadcast %cst_64 : f32 to vector<2x16xf32>
    %106 = arith.addf %105, %104 : vector<2x16xf32>
    %107 = arith.divf %105, %106 : vector<2x16xf32>
    %108 = arith.mulf %99, %76 : vector<2x16xf32>
    %109 = arith.mulf %93, %101 : vector<2x16xf32>
    %110 = arith.addf %108, %109 : vector<2x16xf32>
    %111 = math.tanh %110 : vector<2x16xf32>
    %112 = arith.mulf %107, %111 : vector<2x16xf32>
    %113 = arith.truncf %75 : vector<2x16xf32> to vector<2x16xbf16>
    %cst_65 = arith.constant dense<0.000000e+00> : vector<2x64xf32>
    %114 = tpu.matmul %113, %72, %cst_65 {dimension_numbers = #tpu.dot_dimension_numbers<[1], [0], [0], [1], [0, 0, 1, 1], [], []>} : vector<2x16xbf16>, vector<16x64xbf16>, vector<2x64xf32> -> vector<2x64xf32>
    %115 = arith.addf %84, %114 : vector<2x64xf32>
    %116 = vector.extract_strided_slice %115 {offsets = [0, 0], sizes = [2, 16], strides = [1, 1]} : vector<2x64xf32> to vector<2x16xf32>
    %117 = arith.negf %116 : vector<2x16xf32>
    %118 = math.exp %117 : vector<2x16xf32>
    %cst_66 = arith.constant 1.000000e+00 : f32
    %119 = vector.broadcast %cst_66 : f32 to vector<2x16xf32>
    %120 = arith.addf %119, %118 : vector<2x16xf32>
    %121 = arith.divf %119, %120 : vector<2x16xf32>
    %122 = vector.extract_strided_slice %115 {offsets = [0, 16], sizes = [2, 16], strides = [1, 1]} : vector<2x64xf32> to vector<2x16xf32>
    %123 = arith.negf %122 : vector<2x16xf32>
    %124 = math.exp %123 : vector<2x16xf32>
    %cst_67 = arith.constant 1.000000e+00 : f32
    %125 = vector.broadcast %cst_67 : f32 to vector<2x16xf32>
    %126 = arith.addf %125, %124 : vector<2x16xf32>
    %127 = arith.divf %125, %126 : vector<2x16xf32>
    %128 = vector.extract_strided_slice %115 {offsets = [0, 32], sizes = [2, 16], strides = [1, 1]} : vector<2x64xf32> to vector<2x16xf32>
    %129 = math.tanh %128 : vector<2x16xf32>
    %130 = vector.extract_strided_slice %115 {offsets = [0, 48], sizes = [2, 16], strides = [1, 1]} : vector<2x64xf32> to vector<2x16xf32>
    %131 = arith.negf %130 : vector<2x16xf32>
    %132 = math.exp %131 : vector<2x16xf32>
    %cst_68 = arith.constant 1.000000e+00 : f32
    %133 = vector.broadcast %cst_68 : f32 to vector<2x16xf32>
    %134 = arith.addf %133, %132 : vector<2x16xf32>
    %135 = arith.divf %133, %134 : vector<2x16xf32>
    %136 = arith.mulf %127, %76 : vector<2x16xf32>
    %137 = arith.mulf %121, %129 : vector<2x16xf32>
    %138 = arith.addf %136, %137 : vector<2x16xf32>
    %139 = math.tanh %138 : vector<2x16xf32>
    %140 = arith.mulf %135, %139 : vector<2x16xf32>
    %141 = vector.broadcast %c0_i32 : i32 to vector<2x1xi32>
    %142 = arith.cmpi slt, %141, %74 : vector<2x1xi32>
    %143 = arith.extui %142 : vector<2x1xi1> to vector<2x1xi32>
    %144 = arith.sitofp %143 : vector<2x1xi32> to vector<2x1xf32>
    %145 = vector.broadcast %78 : i32 to vector<2x1xi32>
    %146 = arith.cmpi slt, %145, %74 : vector<2x1xi32>
    %147 = arith.extui %146 : vector<2x1xi1> to vector<2x1xi32>
    %148 = arith.sitofp %147 : vector<2x1xi32> to vector<2x1xf32>
    %149 = vector.broadcast %144 : vector<2x1xf32> to vector<2x16xf32>
    %150 = arith.mulf %149, %112 : vector<2x16xf32>
    %cst_69 = arith.constant 1.000000e+00 : f32
    %151 = vector.broadcast %cst_69 : f32 to vector<2x1xf32>
    %152 = arith.subf %151, %144 : vector<2x1xf32>
    %153 = vector.broadcast %152 : vector<2x1xf32> to vector<2x16xf32>
    %154 = arith.mulf %153, %75 : vector<2x16xf32>
    %155 = arith.addf %150, %154 : vector<2x16xf32>
    %156 = vector.broadcast %144 : vector<2x1xf32> to vector<2x16xf32>
    %157 = arith.mulf %156, %110 : vector<2x16xf32>
    %cst_70 = arith.constant 1.000000e+00 : f32
    %158 = vector.broadcast %cst_70 : f32 to vector<2x1xf32>
    %159 = arith.subf %158, %144 : vector<2x1xf32>
    %160 = vector.broadcast %159 : vector<2x1xf32> to vector<2x16xf32>
    %161 = arith.mulf %160, %76 : vector<2x16xf32>
    %162 = arith.addf %157, %161 : vector<2x16xf32>
    %163 = vector.broadcast %148 : vector<2x1xf32> to vector<2x16xf32>
    %164 = arith.mulf %163, %140 : vector<2x16xf32>
    %cst_71 = arith.constant 1.000000e+00 : f32
    %165 = vector.broadcast %cst_71 : f32 to vector<2x1xf32>
    %166 = arith.subf %165, %148 : vector<2x1xf32>
    %167 = vector.broadcast %166 : vector<2x1xf32> to vector<2x16xf32>
    %168 = arith.mulf %167, %75 : vector<2x16xf32>
    %169 = arith.addf %164, %168 : vector<2x16xf32>
    %170 = vector.broadcast %148 : vector<2x1xf32> to vector<2x16xf32>
    %171 = arith.mulf %170, %138 : vector<2x16xf32>
    %cst_72 = arith.constant 1.000000e+00 : f32
    %172 = vector.broadcast %cst_72 : f32 to vector<2x1xf32>
    %173 = arith.subf %172, %148 : vector<2x1xf32>
    %174 = vector.broadcast %173 : vector<2x1xf32> to vector<2x16xf32>
    %175 = arith.mulf %174, %76 : vector<2x16xf32>
    %176 = arith.addf %171, %175 : vector<2x16xf32>
    %177 = vector.broadcast %144 : vector<2x1xf32> to vector<2x16xf32>
    %178 = arith.mulf %155, %177 : vector<2x16xf32>
    %179 = vector.broadcast %148 : vector<2x1xf32> to vector<2x16xf32>
    %180 = arith.mulf %169, %179 : vector<2x16xf32>
    %181 = arith.addf %75, %178 : vector<2x16xf32>
    %182 = arith.addf %75, %180 : vector<2x16xf32>
    %183 = arith.maximumf %77, %178 : vector<2x16xf32>
    %184 = arith.maximumf %77, %180 : vector<2x16xf32>
    %c1_i32 = arith.constant 1 : i32
    %c7_i32_73 = arith.constant 7 : i32
    %185 = arith.subi %c7_i32_73, %c1_i32 : i32
    %186 = arith.index_cast %c1_i32 : i32 to index
    %c0_74 = arith.constant 0 : index
    %c0_75 = arith.constant 0 : index
    %187 = vector.load %arg8[%186, %c0_74, %c0_75] : memref<8x2x64xf32, #tpu.memory_space<vmem>>, vector<1x2x64xf32>
    %188 = vector.shape_cast %187 : vector<1x2x64xf32> to vector<2x64xf32>
    %189 = arith.index_cast %185 : i32 to index
    %c0_76 = arith.constant 0 : index
    %c0_77 = arith.constant 0 : index
    %190 = vector.load %arg9[%189, %c0_76, %c0_77] : memref<8x2x64xf32, #tpu.memory_space<vmem>>, vector<1x2x64xf32>
    %191 = vector.shape_cast %190 : vector<1x2x64xf32> to vector<2x64xf32>
    %192 = arith.truncf %155 : vector<2x16xf32> to vector<2x16xbf16>
    %cst_78 = arith.constant dense<0.000000e+00> : vector<2x64xf32>
    %193 = tpu.matmul %192, %71, %cst_78 {dimension_numbers = #tpu.dot_dimension_numbers<[1], [0], [0], [1], [0, 0, 1, 1], [], []>} : vector<2x16xbf16>, vector<16x64xbf16>, vector<2x64xf32> -> vector<2x64xf32>
    %194 = arith.addf %188, %193 : vector<2x64xf32>
    %195 = vector.extract_strided_slice %194 {offsets = [0, 0], sizes = [2, 16], strides = [1, 1]} : vector<2x64xf32> to vector<2x16xf32>
    %196 = arith.negf %195 : vector<2x16xf32>
    %197 = math.exp %196 : vector<2x16xf32>
    %cst_79 = arith.constant 1.000000e+00 : f32
    %198 = vector.broadcast %cst_79 : f32 to vector<2x16xf32>
    %199 = arith.addf %198, %197 : vector<2x16xf32>
    %200 = arith.divf %198, %199 : vector<2x16xf32>
    %201 = vector.extract_strided_slice %194 {offsets = [0, 16], sizes = [2, 16], strides = [1, 1]} : vector<2x64xf32> to vector<2x16xf32>
    %202 = arith.negf %201 : vector<2x16xf32>
    %203 = math.exp %202 : vector<2x16xf32>
    %cst_80 = arith.constant 1.000000e+00 : f32
    %204 = vector.broadcast %cst_80 : f32 to vector<2x16xf32>
    %205 = arith.addf %204, %203 : vector<2x16xf32>
    %206 = arith.divf %204, %205 : vector<2x16xf32>
    %207 = vector.extract_strided_slice %194 {offsets = [0, 32], sizes = [2, 16], strides = [1, 1]} : vector<2x64xf32> to vector<2x16xf32>
    %208 = math.tanh %207 : vector<2x16xf32>
    %209 = vector.extract_strided_slice %194 {offsets = [0, 48], sizes = [2, 16], strides = [1, 1]} : vector<2x64xf32> to vector<2x16xf32>
    %210 = arith.negf %209 : vector<2x16xf32>
    %211 = math.exp %210 : vector<2x16xf32>
    %cst_81 = arith.constant 1.000000e+00 : f32
    %212 = vector.broadcast %cst_81 : f32 to vector<2x16xf32>
    %213 = arith.addf %212, %211 : vector<2x16xf32>
    %214 = arith.divf %212, %213 : vector<2x16xf32>
    %215 = arith.mulf %206, %162 : vector<2x16xf32>
    %216 = arith.mulf %200, %208 : vector<2x16xf32>
    %217 = arith.addf %215, %216 : vector<2x16xf32>
    %218 = math.tanh %217 : vector<2x16xf32>
    %219 = arith.mulf %214, %218 : vector<2x16xf32>
    %220 = arith.truncf %169 : vector<2x16xf32> to vector<2x16xbf16>
    %cst_82 = arith.constant dense<0.000000e+00> : vector<2x64xf32>
    %221 = tpu.matmul %220, %72, %cst_82 {dimension_numbers = #tpu.dot_dimension_numbers<[1], [0], [0], [1], [0, 0, 1, 1], [], []>} : vector<2x16xbf16>, vector<16x64xbf16>, vector<2x64xf32> -> vector<2x64xf32>
    %222 = arith.addf %191, %221 : vector<2x64xf32>
    %223 = vector.extract_strided_slice %222 {offsets = [0, 0], sizes = [2, 16], strides = [1, 1]} : vector<2x64xf32> to vector<2x16xf32>
    %224 = arith.negf %223 : vector<2x16xf32>
    %225 = math.exp %224 : vector<2x16xf32>
    %cst_83 = arith.constant 1.000000e+00 : f32
    %226 = vector.broadcast %cst_83 : f32 to vector<2x16xf32>
    %227 = arith.addf %226, %225 : vector<2x16xf32>
    %228 = arith.divf %226, %227 : vector<2x16xf32>
    %229 = vector.extract_strided_slice %222 {offsets = [0, 16], sizes = [2, 16], strides = [1, 1]} : vector<2x64xf32> to vector<2x16xf32>
    %230 = arith.negf %229 : vector<2x16xf32>
    %231 = math.exp %230 : vector<2x16xf32>
    %cst_84 = arith.constant 1.000000e+00 : f32
    %232 = vector.broadcast %cst_84 : f32 to vector<2x16xf32>
    %233 = arith.addf %232, %231 : vector<2x16xf32>
    %234 = arith.divf %232, %233 : vector<2x16xf32>
    %235 = vector.extract_strided_slice %222 {offsets = [0, 32], sizes = [2, 16], strides = [1, 1]} : vector<2x64xf32> to vector<2x16xf32>
    %236 = math.tanh %235 : vector<2x16xf32>
    %237 = vector.extract_strided_slice %222 {offsets = [0, 48], sizes = [2, 16], strides = [1, 1]} : vector<2x64xf32> to vector<2x16xf32>
    %238 = arith.negf %237 : vector<2x16xf32>
    %239 = math.exp %238 : vector<2x16xf32>
    %cst_85 = arith.constant 1.000000e+00 : f32
    %240 = vector.broadcast %cst_85 : f32 to vector<2x16xf32>
    %241 = arith.addf %240, %239 : vector<2x16xf32>
    %242 = arith.divf %240, %241 : vector<2x16xf32>
    %243 = arith.mulf %234, %176 : vector<2x16xf32>
    %244 = arith.mulf %228, %236 : vector<2x16xf32>
    %245 = arith.addf %243, %244 : vector<2x16xf32>
    %246 = math.tanh %245 : vector<2x16xf32>
    %247 = arith.mulf %242, %246 : vector<2x16xf32>
    %248 = vector.broadcast %c1_i32 : i32 to vector<2x1xi32>
    %249 = arith.cmpi slt, %248, %74 : vector<2x1xi32>
    %250 = arith.extui %249 : vector<2x1xi1> to vector<2x1xi32>
    %251 = arith.sitofp %250 : vector<2x1xi32> to vector<2x1xf32>
    %252 = vector.broadcast %185 : i32 to vector<2x1xi32>
    %253 = arith.cmpi slt, %252, %74 : vector<2x1xi32>
    %254 = arith.extui %253 : vector<2x1xi1> to vector<2x1xi32>
    %255 = arith.sitofp %254 : vector<2x1xi32> to vector<2x1xf32>
    %256 = vector.broadcast %251 : vector<2x1xf32> to vector<2x16xf32>
    %257 = arith.mulf %256, %219 : vector<2x16xf32>
    %cst_86 = arith.constant 1.000000e+00 : f32
    %258 = vector.broadcast %cst_86 : f32 to vector<2x1xf32>
    %259 = arith.subf %258, %251 : vector<2x1xf32>
    %260 = vector.broadcast %259 : vector<2x1xf32> to vector<2x16xf32>
    %261 = arith.mulf %260, %155 : vector<2x16xf32>
    %262 = arith.addf %257, %261 : vector<2x16xf32>
    %263 = vector.broadcast %251 : vector<2x1xf32> to vector<2x16xf32>
    %264 = arith.mulf %263, %217 : vector<2x16xf32>
    %cst_87 = arith.constant 1.000000e+00 : f32
    %265 = vector.broadcast %cst_87 : f32 to vector<2x1xf32>
    %266 = arith.subf %265, %251 : vector<2x1xf32>
    %267 = vector.broadcast %266 : vector<2x1xf32> to vector<2x16xf32>
    %268 = arith.mulf %267, %162 : vector<2x16xf32>
    %269 = arith.addf %264, %268 : vector<2x16xf32>
    %270 = vector.broadcast %255 : vector<2x1xf32> to vector<2x16xf32>
    %271 = arith.mulf %270, %247 : vector<2x16xf32>
    %cst_88 = arith.constant 1.000000e+00 : f32
    %272 = vector.broadcast %cst_88 : f32 to vector<2x1xf32>
    %273 = arith.subf %272, %255 : vector<2x1xf32>
    %274 = vector.broadcast %273 : vector<2x1xf32> to vector<2x16xf32>
    %275 = arith.mulf %274, %169 : vector<2x16xf32>
    %276 = arith.addf %271, %275 : vector<2x16xf32>
    %277 = vector.broadcast %255 : vector<2x1xf32> to vector<2x16xf32>
    %278 = arith.mulf %277, %245 : vector<2x16xf32>
    %cst_89 = arith.constant 1.000000e+00 : f32
    %279 = vector.broadcast %cst_89 : f32 to vector<2x1xf32>
    %280 = arith.subf %279, %255 : vector<2x1xf32>
    %281 = vector.broadcast %280 : vector<2x1xf32> to vector<2x16xf32>
    %282 = arith.mulf %281, %176 : vector<2x16xf32>
    %283 = arith.addf %278, %282 : vector<2x16xf32>
    %284 = vector.broadcast %251 : vector<2x1xf32> to vector<2x16xf32>
    %285 = arith.mulf %262, %284 : vector<2x16xf32>
    %286 = vector.broadcast %255 : vector<2x1xf32> to vector<2x16xf32>
    %287 = arith.mulf %276, %286 : vector<2x16xf32>
    %288 = arith.addf %181, %285 : vector<2x16xf32>
    %289 = arith.addf %182, %287 : vector<2x16xf32>
    %290 = arith.maximumf %183, %285 : vector<2x16xf32>
    %291 = arith.maximumf %184, %287 : vector<2x16xf32>
    %c2_i32 = arith.constant 2 : i32
    %c7_i32_90 = arith.constant 7 : i32
    %292 = arith.subi %c7_i32_90, %c2_i32 : i32
    %293 = arith.index_cast %c2_i32 : i32 to index
    %c0_91 = arith.constant 0 : index
    %c0_92 = arith.constant 0 : index
    %294 = vector.load %arg8[%293, %c0_91, %c0_92] : memref<8x2x64xf32, #tpu.memory_space<vmem>>, vector<1x2x64xf32>
    %295 = vector.shape_cast %294 : vector<1x2x64xf32> to vector<2x64xf32>
    %296 = arith.index_cast %292 : i32 to index
    %c0_93 = arith.constant 0 : index
    %c0_94 = arith.constant 0 : index
    %297 = vector.load %arg9[%296, %c0_93, %c0_94] : memref<8x2x64xf32, #tpu.memory_space<vmem>>, vector<1x2x64xf32>
    %298 = vector.shape_cast %297 : vector<1x2x64xf32> to vector<2x64xf32>
    %299 = arith.truncf %262 : vector<2x16xf32> to vector<2x16xbf16>
    %cst_95 = arith.constant dense<0.000000e+00> : vector<2x64xf32>
    %300 = tpu.matmul %299, %71, %cst_95 {dimension_numbers = #tpu.dot_dimension_numbers<[1], [0], [0], [1], [0, 0, 1, 1], [], []>} : vector<2x16xbf16>, vector<16x64xbf16>, vector<2x64xf32> -> vector<2x64xf32>
    %301 = arith.addf %295, %300 : vector<2x64xf32>
    %302 = vector.extract_strided_slice %301 {offsets = [0, 0], sizes = [2, 16], strides = [1, 1]} : vector<2x64xf32> to vector<2x16xf32>
    %303 = arith.negf %302 : vector<2x16xf32>
    %304 = math.exp %303 : vector<2x16xf32>
    %cst_96 = arith.constant 1.000000e+00 : f32
    %305 = vector.broadcast %cst_96 : f32 to vector<2x16xf32>
    %306 = arith.addf %305, %304 : vector<2x16xf32>
    %307 = arith.divf %305, %306 : vector<2x16xf32>
    %308 = vector.extract_strided_slice %301 {offsets = [0, 16], sizes = [2, 16], strides = [1, 1]} : vector<2x64xf32> to vector<2x16xf32>
    %309 = arith.negf %308 : vector<2x16xf32>
    %310 = math.exp %309 : vector<2x16xf32>
    %cst_97 = arith.constant 1.000000e+00 : f32
    %311 = vector.broadcast %cst_97 : f32 to vector<2x16xf32>
    %312 = arith.addf %311, %310 : vector<2x16xf32>
    %313 = arith.divf %311, %312 : vector<2x16xf32>
    %314 = vector.extract_strided_slice %301 {offsets = [0, 32], sizes = [2, 16], strides = [1, 1]} : vector<2x64xf32> to vector<2x16xf32>
    %315 = math.tanh %314 : vector<2x16xf32>
    %316 = vector.extract_strided_slice %301 {offsets = [0, 48], sizes = [2, 16], strides = [1, 1]} : vector<2x64xf32> to vector<2x16xf32>
    %317 = arith.negf %316 : vector<2x16xf32>
    %318 = math.exp %317 : vector<2x16xf32>
    %cst_98 = arith.constant 1.000000e+00 : f32
    %319 = vector.broadcast %cst_98 : f32 to vector<2x16xf32>
    %320 = arith.addf %319, %318 : vector<2x16xf32>
    %321 = arith.divf %319, %320 : vector<2x16xf32>
    %322 = arith.mulf %313, %269 : vector<2x16xf32>
    %323 = arith.mulf %307, %315 : vector<2x16xf32>
    %324 = arith.addf %322, %323 : vector<2x16xf32>
    %325 = math.tanh %324 : vector<2x16xf32>
    %326 = arith.mulf %321, %325 : vector<2x16xf32>
    %327 = arith.truncf %276 : vector<2x16xf32> to vector<2x16xbf16>
    %cst_99 = arith.constant dense<0.000000e+00> : vector<2x64xf32>
    %328 = tpu.matmul %327, %72, %cst_99 {dimension_numbers = #tpu.dot_dimension_numbers<[1], [0], [0], [1], [0, 0, 1, 1], [], []>} : vector<2x16xbf16>, vector<16x64xbf16>, vector<2x64xf32> -> vector<2x64xf32>
    %329 = arith.addf %298, %328 : vector<2x64xf32>
    %330 = vector.extract_strided_slice %329 {offsets = [0, 0], sizes = [2, 16], strides = [1, 1]} : vector<2x64xf32> to vector<2x16xf32>
    %331 = arith.negf %330 : vector<2x16xf32>
    %332 = math.exp %331 : vector<2x16xf32>
    %cst_100 = arith.constant 1.000000e+00 : f32
    %333 = vector.broadcast %cst_100 : f32 to vector<2x16xf32>
    %334 = arith.addf %333, %332 : vector<2x16xf32>
    %335 = arith.divf %333, %334 : vector<2x16xf32>
    %336 = vector.extract_strided_slice %329 {offsets = [0, 16], sizes = [2, 16], strides = [1, 1]} : vector<2x64xf32> to vector<2x16xf32>
    %337 = arith.negf %336 : vector<2x16xf32>
    %338 = math.exp %337 : vector<2x16xf32>
    %cst_101 = arith.constant 1.000000e+00 : f32
    %339 = vector.broadcast %cst_101 : f32 to vector<2x16xf32>
    %340 = arith.addf %339, %338 : vector<2x16xf32>
    %341 = arith.divf %339, %340 : vector<2x16xf32>
    %342 = vector.extract_strided_slice %329 {offsets = [0, 32], sizes = [2, 16], strides = [1, 1]} : vector<2x64xf32> to vector<2x16xf32>
    %343 = math.tanh %342 : vector<2x16xf32>
    %344 = vector.extract_strided_slice %329 {offsets = [0, 48], sizes = [2, 16], strides = [1, 1]} : vector<2x64xf32> to vector<2x16xf32>
    %345 = arith.negf %344 : vector<2x16xf32>
    %346 = math.exp %345 : vector<2x16xf32>
    %cst_102 = arith.constant 1.000000e+00 : f32
    %347 = vector.broadcast %cst_102 : f32 to vector<2x16xf32>
    %348 = arith.addf %347, %346 : vector<2x16xf32>
    %349 = arith.divf %347, %348 : vector<2x16xf32>
    %350 = arith.mulf %341, %283 : vector<2x16xf32>
    %351 = arith.mulf %335, %343 : vector<2x16xf32>
    %352 = arith.addf %350, %351 : vector<2x16xf32>
    %353 = math.tanh %352 : vector<2x16xf32>
    %354 = arith.mulf %349, %353 : vector<2x16xf32>
    %355 = vector.broadcast %c2_i32 : i32 to vector<2x1xi32>
    %356 = arith.cmpi slt, %355, %74 : vector<2x1xi32>
    %357 = arith.extui %356 : vector<2x1xi1> to vector<2x1xi32>
    %358 = arith.sitofp %357 : vector<2x1xi32> to vector<2x1xf32>
    %359 = vector.broadcast %292 : i32 to vector<2x1xi32>
    %360 = arith.cmpi slt, %359, %74 : vector<2x1xi32>
    %361 = arith.extui %360 : vector<2x1xi1> to vector<2x1xi32>
    %362 = arith.sitofp %361 : vector<2x1xi32> to vector<2x1xf32>
    %363 = vector.broadcast %358 : vector<2x1xf32> to vector<2x16xf32>
    %364 = arith.mulf %363, %326 : vector<2x16xf32>
    %cst_103 = arith.constant 1.000000e+00 : f32
    %365 = vector.broadcast %cst_103 : f32 to vector<2x1xf32>
    %366 = arith.subf %365, %358 : vector<2x1xf32>
    %367 = vector.broadcast %366 : vector<2x1xf32> to vector<2x16xf32>
    %368 = arith.mulf %367, %262 : vector<2x16xf32>
    %369 = arith.addf %364, %368 : vector<2x16xf32>
    %370 = vector.broadcast %358 : vector<2x1xf32> to vector<2x16xf32>
    %371 = arith.mulf %370, %324 : vector<2x16xf32>
    %cst_104 = arith.constant 1.000000e+00 : f32
    %372 = vector.broadcast %cst_104 : f32 to vector<2x1xf32>
    %373 = arith.subf %372, %358 : vector<2x1xf32>
    %374 = vector.broadcast %373 : vector<2x1xf32> to vector<2x16xf32>
    %375 = arith.mulf %374, %269 : vector<2x16xf32>
    %376 = arith.addf %371, %375 : vector<2x16xf32>
    %377 = vector.broadcast %362 : vector<2x1xf32> to vector<2x16xf32>
    %378 = arith.mulf %377, %354 : vector<2x16xf32>
    %cst_105 = arith.constant 1.000000e+00 : f32
    %379 = vector.broadcast %cst_105 : f32 to vector<2x1xf32>
    %380 = arith.subf %379, %362 : vector<2x1xf32>
    %381 = vector.broadcast %380 : vector<2x1xf32> to vector<2x16xf32>
    %382 = arith.mulf %381, %276 : vector<2x16xf32>
    %383 = arith.addf %378, %382 : vector<2x16xf32>
    %384 = vector.broadcast %362 : vector<2x1xf32> to vector<2x16xf32>
    %385 = arith.mulf %384, %352 : vector<2x16xf32>
    %cst_106 = arith.constant 1.000000e+00 : f32
    %386 = vector.broadcast %cst_106 : f32 to vector<2x1xf32>
    %387 = arith.subf %386, %362 : vector<2x1xf32>
    %388 = vector.broadcast %387 : vector<2x1xf32> to vector<2x16xf32>
    %389 = arith.mulf %388, %283 : vector<2x16xf32>
    %390 = arith.addf %385, %389 : vector<2x16xf32>
    %391 = vector.broadcast %358 : vector<2x1xf32> to vector<2x16xf32>
    %392 = arith.mulf %369, %391 : vector<2x16xf32>
    %393 = vector.broadcast %362 : vector<2x1xf32> to vector<2x16xf32>
    %394 = arith.mulf %383, %393 : vector<2x16xf32>
    %395 = arith.addf %288, %392 : vector<2x16xf32>
    %396 = arith.addf %289, %394 : vector<2x16xf32>
    %397 = arith.maximumf %290, %392 : vector<2x16xf32>
    %398 = arith.maximumf %291, %394 : vector<2x16xf32>
    %c3_i32 = arith.constant 3 : i32
    %c7_i32_107 = arith.constant 7 : i32
    %399 = arith.subi %c7_i32_107, %c3_i32 : i32
    %400 = arith.index_cast %c3_i32 : i32 to index
    %c0_108 = arith.constant 0 : index
    %c0_109 = arith.constant 0 : index
    %401 = vector.load %arg8[%400, %c0_108, %c0_109] : memref<8x2x64xf32, #tpu.memory_space<vmem>>, vector<1x2x64xf32>
    %402 = vector.shape_cast %401 : vector<1x2x64xf32> to vector<2x64xf32>
    %403 = arith.index_cast %399 : i32 to index
    %c0_110 = arith.constant 0 : index
    %c0_111 = arith.constant 0 : index
    %404 = vector.load %arg9[%403, %c0_110, %c0_111] : memref<8x2x64xf32, #tpu.memory_space<vmem>>, vector<1x2x64xf32>
    %405 = vector.shape_cast %404 : vector<1x2x64xf32> to vector<2x64xf32>
    %406 = arith.truncf %369 : vector<2x16xf32> to vector<2x16xbf16>
    %cst_112 = arith.constant dense<0.000000e+00> : vector<2x64xf32>
    %407 = tpu.matmul %406, %71, %cst_112 {dimension_numbers = #tpu.dot_dimension_numbers<[1], [0], [0], [1], [0, 0, 1, 1], [], []>} : vector<2x16xbf16>, vector<16x64xbf16>, vector<2x64xf32> -> vector<2x64xf32>
    %408 = arith.addf %402, %407 : vector<2x64xf32>
    %409 = vector.extract_strided_slice %408 {offsets = [0, 0], sizes = [2, 16], strides = [1, 1]} : vector<2x64xf32> to vector<2x16xf32>
    %410 = arith.negf %409 : vector<2x16xf32>
    %411 = math.exp %410 : vector<2x16xf32>
    %cst_113 = arith.constant 1.000000e+00 : f32
    %412 = vector.broadcast %cst_113 : f32 to vector<2x16xf32>
    %413 = arith.addf %412, %411 : vector<2x16xf32>
    %414 = arith.divf %412, %413 : vector<2x16xf32>
    %415 = vector.extract_strided_slice %408 {offsets = [0, 16], sizes = [2, 16], strides = [1, 1]} : vector<2x64xf32> to vector<2x16xf32>
    %416 = arith.negf %415 : vector<2x16xf32>
    %417 = math.exp %416 : vector<2x16xf32>
    %cst_114 = arith.constant 1.000000e+00 : f32
    %418 = vector.broadcast %cst_114 : f32 to vector<2x16xf32>
    %419 = arith.addf %418, %417 : vector<2x16xf32>
    %420 = arith.divf %418, %419 : vector<2x16xf32>
    %421 = vector.extract_strided_slice %408 {offsets = [0, 32], sizes = [2, 16], strides = [1, 1]} : vector<2x64xf32> to vector<2x16xf32>
    %422 = math.tanh %421 : vector<2x16xf32>
    %423 = vector.extract_strided_slice %408 {offsets = [0, 48], sizes = [2, 16], strides = [1, 1]} : vector<2x64xf32> to vector<2x16xf32>
    %424 = arith.negf %423 : vector<2x16xf32>
    %425 = math.exp %424 : vector<2x16xf32>
    %cst_115 = arith.constant 1.000000e+00 : f32
    %426 = vector.broadcast %cst_115 : f32 to vector<2x16xf32>
    %427 = arith.addf %426, %425 : vector<2x16xf32>
    %428 = arith.divf %426, %427 : vector<2x16xf32>
    %429 = arith.mulf %420, %376 : vector<2x16xf32>
    %430 = arith.mulf %414, %422 : vector<2x16xf32>
    %431 = arith.addf %429, %430 : vector<2x16xf32>
    %432 = math.tanh %431 : vector<2x16xf32>
    %433 = arith.mulf %428, %432 : vector<2x16xf32>
    %434 = arith.truncf %383 : vector<2x16xf32> to vector<2x16xbf16>
    %cst_116 = arith.constant dense<0.000000e+00> : vector<2x64xf32>
    %435 = tpu.matmul %434, %72, %cst_116 {dimension_numbers = #tpu.dot_dimension_numbers<[1], [0], [0], [1], [0, 0, 1, 1], [], []>} : vector<2x16xbf16>, vector<16x64xbf16>, vector<2x64xf32> -> vector<2x64xf32>
    %436 = arith.addf %405, %435 : vector<2x64xf32>
    %437 = vector.extract_strided_slice %436 {offsets = [0, 0], sizes = [2, 16], strides = [1, 1]} : vector<2x64xf32> to vector<2x16xf32>
    %438 = arith.negf %437 : vector<2x16xf32>
    %439 = math.exp %438 : vector<2x16xf32>
    %cst_117 = arith.constant 1.000000e+00 : f32
    %440 = vector.broadcast %cst_117 : f32 to vector<2x16xf32>
    %441 = arith.addf %440, %439 : vector<2x16xf32>
    %442 = arith.divf %440, %441 : vector<2x16xf32>
    %443 = vector.extract_strided_slice %436 {offsets = [0, 16], sizes = [2, 16], strides = [1, 1]} : vector<2x64xf32> to vector<2x16xf32>
    %444 = arith.negf %443 : vector<2x16xf32>
    %445 = math.exp %444 : vector<2x16xf32>
    %cst_118 = arith.constant 1.000000e+00 : f32
    %446 = vector.broadcast %cst_118 : f32 to vector<2x16xf32>
    %447 = arith.addf %446, %445 : vector<2x16xf32>
    %448 = arith.divf %446, %447 : vector<2x16xf32>
    %449 = vector.extract_strided_slice %436 {offsets = [0, 32], sizes = [2, 16], strides = [1, 1]} : vector<2x64xf32> to vector<2x16xf32>
    %450 = math.tanh %449 : vector<2x16xf32>
    %451 = vector.extract_strided_slice %436 {offsets = [0, 48], sizes = [2, 16], strides = [1, 1]} : vector<2x64xf32> to vector<2x16xf32>
    %452 = arith.negf %451 : vector<2x16xf32>
    %453 = math.exp %452 : vector<2x16xf32>
    %cst_119 = arith.constant 1.000000e+00 : f32
    %454 = vector.broadcast %cst_119 : f32 to vector<2x16xf32>
    %455 = arith.addf %454, %453 : vector<2x16xf32>
    %456 = arith.divf %454, %455 : vector<2x16xf32>
    %457 = arith.mulf %448, %390 : vector<2x16xf32>
    %458 = arith.mulf %442, %450 : vector<2x16xf32>
    %459 = arith.addf %457, %458 : vector<2x16xf32>
    %460 = math.tanh %459 : vector<2x16xf32>
    %461 = arith.mulf %456, %460 : vector<2x16xf32>
    %462 = vector.broadcast %c3_i32 : i32 to vector<2x1xi32>
    %463 = arith.cmpi slt, %462, %74 : vector<2x1xi32>
    %464 = arith.extui %463 : vector<2x1xi1> to vector<2x1xi32>
    %465 = arith.sitofp %464 : vector<2x1xi32> to vector<2x1xf32>
    %466 = vector.broadcast %399 : i32 to vector<2x1xi32>
    %467 = arith.cmpi slt, %466, %74 : vector<2x1xi32>
    %468 = arith.extui %467 : vector<2x1xi1> to vector<2x1xi32>
    %469 = arith.sitofp %468 : vector<2x1xi32> to vector<2x1xf32>
    %470 = vector.broadcast %465 : vector<2x1xf32> to vector<2x16xf32>
    %471 = arith.mulf %470, %433 : vector<2x16xf32>
    %cst_120 = arith.constant 1.000000e+00 : f32
    %472 = vector.broadcast %cst_120 : f32 to vector<2x1xf32>
    %473 = arith.subf %472, %465 : vector<2x1xf32>
    %474 = vector.broadcast %473 : vector<2x1xf32> to vector<2x16xf32>
    %475 = arith.mulf %474, %369 : vector<2x16xf32>
    %476 = arith.addf %471, %475 : vector<2x16xf32>
    %477 = vector.broadcast %465 : vector<2x1xf32> to vector<2x16xf32>
    %478 = arith.mulf %477, %431 : vector<2x16xf32>
    %cst_121 = arith.constant 1.000000e+00 : f32
    %479 = vector.broadcast %cst_121 : f32 to vector<2x1xf32>
    %480 = arith.subf %479, %465 : vector<2x1xf32>
    %481 = vector.broadcast %480 : vector<2x1xf32> to vector<2x16xf32>
    %482 = arith.mulf %481, %376 : vector<2x16xf32>
    %483 = arith.addf %478, %482 : vector<2x16xf32>
    %484 = vector.broadcast %469 : vector<2x1xf32> to vector<2x16xf32>
    %485 = arith.mulf %484, %461 : vector<2x16xf32>
    %cst_122 = arith.constant 1.000000e+00 : f32
    %486 = vector.broadcast %cst_122 : f32 to vector<2x1xf32>
    %487 = arith.subf %486, %469 : vector<2x1xf32>
    %488 = vector.broadcast %487 : vector<2x1xf32> to vector<2x16xf32>
    %489 = arith.mulf %488, %383 : vector<2x16xf32>
    %490 = arith.addf %485, %489 : vector<2x16xf32>
    %491 = vector.broadcast %469 : vector<2x1xf32> to vector<2x16xf32>
    %492 = arith.mulf %491, %459 : vector<2x16xf32>
    %cst_123 = arith.constant 1.000000e+00 : f32
    %493 = vector.broadcast %cst_123 : f32 to vector<2x1xf32>
    %494 = arith.subf %493, %469 : vector<2x1xf32>
    %495 = vector.broadcast %494 : vector<2x1xf32> to vector<2x16xf32>
    %496 = arith.mulf %495, %390 : vector<2x16xf32>
    %497 = arith.addf %492, %496 : vector<2x16xf32>
    %498 = vector.broadcast %465 : vector<2x1xf32> to vector<2x16xf32>
    %499 = arith.mulf %476, %498 : vector<2x16xf32>
    %500 = vector.broadcast %469 : vector<2x1xf32> to vector<2x16xf32>
    %501 = arith.mulf %490, %500 : vector<2x16xf32>
    %502 = arith.addf %395, %499 : vector<2x16xf32>
    %503 = arith.addf %396, %501 : vector<2x16xf32>
    %504 = arith.maximumf %397, %499 : vector<2x16xf32>
    %505 = arith.maximumf %398, %501 : vector<2x16xf32>
    %c4_i32 = arith.constant 4 : i32
    %c7_i32_124 = arith.constant 7 : i32
    %506 = arith.subi %c7_i32_124, %c4_i32 : i32
    %507 = arith.index_cast %c4_i32 : i32 to index
    %c0_125 = arith.constant 0 : index
    %c0_126 = arith.constant 0 : index
    %508 = vector.load %arg8[%507, %c0_125, %c0_126] : memref<8x2x64xf32, #tpu.memory_space<vmem>>, vector<1x2x64xf32>
    %509 = vector.shape_cast %508 : vector<1x2x64xf32> to vector<2x64xf32>
    %510 = arith.index_cast %506 : i32 to index
    %c0_127 = arith.constant 0 : index
    %c0_128 = arith.constant 0 : index
    %511 = vector.load %arg9[%510, %c0_127, %c0_128] : memref<8x2x64xf32, #tpu.memory_space<vmem>>, vector<1x2x64xf32>
    %512 = vector.shape_cast %511 : vector<1x2x64xf32> to vector<2x64xf32>
    %513 = arith.truncf %476 : vector<2x16xf32> to vector<2x16xbf16>
    %cst_129 = arith.constant dense<0.000000e+00> : vector<2x64xf32>
    %514 = tpu.matmul %513, %71, %cst_129 {dimension_numbers = #tpu.dot_dimension_numbers<[1], [0], [0], [1], [0, 0, 1, 1], [], []>} : vector<2x16xbf16>, vector<16x64xbf16>, vector<2x64xf32> -> vector<2x64xf32>
    %515 = arith.addf %509, %514 : vector<2x64xf32>
    %516 = vector.extract_strided_slice %515 {offsets = [0, 0], sizes = [2, 16], strides = [1, 1]} : vector<2x64xf32> to vector<2x16xf32>
    %517 = arith.negf %516 : vector<2x16xf32>
    %518 = math.exp %517 : vector<2x16xf32>
    %cst_130 = arith.constant 1.000000e+00 : f32
    %519 = vector.broadcast %cst_130 : f32 to vector<2x16xf32>
    %520 = arith.addf %519, %518 : vector<2x16xf32>
    %521 = arith.divf %519, %520 : vector<2x16xf32>
    %522 = vector.extract_strided_slice %515 {offsets = [0, 16], sizes = [2, 16], strides = [1, 1]} : vector<2x64xf32> to vector<2x16xf32>
    %523 = arith.negf %522 : vector<2x16xf32>
    %524 = math.exp %523 : vector<2x16xf32>
    %cst_131 = arith.constant 1.000000e+00 : f32
    %525 = vector.broadcast %cst_131 : f32 to vector<2x16xf32>
    %526 = arith.addf %525, %524 : vector<2x16xf32>
    %527 = arith.divf %525, %526 : vector<2x16xf32>
    %528 = vector.extract_strided_slice %515 {offsets = [0, 32], sizes = [2, 16], strides = [1, 1]} : vector<2x64xf32> to vector<2x16xf32>
    %529 = math.tanh %528 : vector<2x16xf32>
    %530 = vector.extract_strided_slice %515 {offsets = [0, 48], sizes = [2, 16], strides = [1, 1]} : vector<2x64xf32> to vector<2x16xf32>
    %531 = arith.negf %530 : vector<2x16xf32>
    %532 = math.exp %531 : vector<2x16xf32>
    %cst_132 = arith.constant 1.000000e+00 : f32
    %533 = vector.broadcast %cst_132 : f32 to vector<2x16xf32>
    %534 = arith.addf %533, %532 : vector<2x16xf32>
    %535 = arith.divf %533, %534 : vector<2x16xf32>
    %536 = arith.mulf %527, %483 : vector<2x16xf32>
    %537 = arith.mulf %521, %529 : vector<2x16xf32>
    %538 = arith.addf %536, %537 : vector<2x16xf32>
    %539 = math.tanh %538 : vector<2x16xf32>
    %540 = arith.mulf %535, %539 : vector<2x16xf32>
    %541 = arith.truncf %490 : vector<2x16xf32> to vector<2x16xbf16>
    %cst_133 = arith.constant dense<0.000000e+00> : vector<2x64xf32>
    %542 = tpu.matmul %541, %72, %cst_133 {dimension_numbers = #tpu.dot_dimension_numbers<[1], [0], [0], [1], [0, 0, 1, 1], [], []>} : vector<2x16xbf16>, vector<16x64xbf16>, vector<2x64xf32> -> vector<2x64xf32>
    %543 = arith.addf %512, %542 : vector<2x64xf32>
    %544 = vector.extract_strided_slice %543 {offsets = [0, 0], sizes = [2, 16], strides = [1, 1]} : vector<2x64xf32> to vector<2x16xf32>
    %545 = arith.negf %544 : vector<2x16xf32>
    %546 = math.exp %545 : vector<2x16xf32>
    %cst_134 = arith.constant 1.000000e+00 : f32
    %547 = vector.broadcast %cst_134 : f32 to vector<2x16xf32>
    %548 = arith.addf %547, %546 : vector<2x16xf32>
    %549 = arith.divf %547, %548 : vector<2x16xf32>
    %550 = vector.extract_strided_slice %543 {offsets = [0, 16], sizes = [2, 16], strides = [1, 1]} : vector<2x64xf32> to vector<2x16xf32>
    %551 = arith.negf %550 : vector<2x16xf32>
    %552 = math.exp %551 : vector<2x16xf32>
    %cst_135 = arith.constant 1.000000e+00 : f32
    %553 = vector.broadcast %cst_135 : f32 to vector<2x16xf32>
    %554 = arith.addf %553, %552 : vector<2x16xf32>
    %555 = arith.divf %553, %554 : vector<2x16xf32>
    %556 = vector.extract_strided_slice %543 {offsets = [0, 32], sizes = [2, 16], strides = [1, 1]} : vector<2x64xf32> to vector<2x16xf32>
    %557 = math.tanh %556 : vector<2x16xf32>
    %558 = vector.extract_strided_slice %543 {offsets = [0, 48], sizes = [2, 16], strides = [1, 1]} : vector<2x64xf32> to vector<2x16xf32>
    %559 = arith.negf %558 : vector<2x16xf32>
    %560 = math.exp %559 : vector<2x16xf32>
    %cst_136 = arith.constant 1.000000e+00 : f32
    %561 = vector.broadcast %cst_136 : f32 to vector<2x16xf32>
    %562 = arith.addf %561, %560 : vector<2x16xf32>
    %563 = arith.divf %561, %562 : vector<2x16xf32>
    %564 = arith.mulf %555, %497 : vector<2x16xf32>
    %565 = arith.mulf %549, %557 : vector<2x16xf32>
    %566 = arith.addf %564, %565 : vector<2x16xf32>
    %567 = math.tanh %566 : vector<2x16xf32>
    %568 = arith.mulf %563, %567 : vector<2x16xf32>
    %569 = vector.broadcast %c4_i32 : i32 to vector<2x1xi32>
    %570 = arith.cmpi slt, %569, %74 : vector<2x1xi32>
    %571 = arith.extui %570 : vector<2x1xi1> to vector<2x1xi32>
    %572 = arith.sitofp %571 : vector<2x1xi32> to vector<2x1xf32>
    %573 = vector.broadcast %506 : i32 to vector<2x1xi32>
    %574 = arith.cmpi slt, %573, %74 : vector<2x1xi32>
    %575 = arith.extui %574 : vector<2x1xi1> to vector<2x1xi32>
    %576 = arith.sitofp %575 : vector<2x1xi32> to vector<2x1xf32>
    %577 = vector.broadcast %572 : vector<2x1xf32> to vector<2x16xf32>
    %578 = arith.mulf %577, %540 : vector<2x16xf32>
    %cst_137 = arith.constant 1.000000e+00 : f32
    %579 = vector.broadcast %cst_137 : f32 to vector<2x1xf32>
    %580 = arith.subf %579, %572 : vector<2x1xf32>
    %581 = vector.broadcast %580 : vector<2x1xf32> to vector<2x16xf32>
    %582 = arith.mulf %581, %476 : vector<2x16xf32>
    %583 = arith.addf %578, %582 : vector<2x16xf32>
    %584 = vector.broadcast %572 : vector<2x1xf32> to vector<2x16xf32>
    %585 = arith.mulf %584, %538 : vector<2x16xf32>
    %cst_138 = arith.constant 1.000000e+00 : f32
    %586 = vector.broadcast %cst_138 : f32 to vector<2x1xf32>
    %587 = arith.subf %586, %572 : vector<2x1xf32>
    %588 = vector.broadcast %587 : vector<2x1xf32> to vector<2x16xf32>
    %589 = arith.mulf %588, %483 : vector<2x16xf32>
    %590 = arith.addf %585, %589 : vector<2x16xf32>
    %591 = vector.broadcast %576 : vector<2x1xf32> to vector<2x16xf32>
    %592 = arith.mulf %591, %568 : vector<2x16xf32>
    %cst_139 = arith.constant 1.000000e+00 : f32
    %593 = vector.broadcast %cst_139 : f32 to vector<2x1xf32>
    %594 = arith.subf %593, %576 : vector<2x1xf32>
    %595 = vector.broadcast %594 : vector<2x1xf32> to vector<2x16xf32>
    %596 = arith.mulf %595, %490 : vector<2x16xf32>
    %597 = arith.addf %592, %596 : vector<2x16xf32>
    %598 = vector.broadcast %576 : vector<2x1xf32> to vector<2x16xf32>
    %599 = arith.mulf %598, %566 : vector<2x16xf32>
    %cst_140 = arith.constant 1.000000e+00 : f32
    %600 = vector.broadcast %cst_140 : f32 to vector<2x1xf32>
    %601 = arith.subf %600, %576 : vector<2x1xf32>
    %602 = vector.broadcast %601 : vector<2x1xf32> to vector<2x16xf32>
    %603 = arith.mulf %602, %497 : vector<2x16xf32>
    %604 = arith.addf %599, %603 : vector<2x16xf32>
    %605 = vector.broadcast %572 : vector<2x1xf32> to vector<2x16xf32>
    %606 = arith.mulf %583, %605 : vector<2x16xf32>
    %607 = vector.broadcast %576 : vector<2x1xf32> to vector<2x16xf32>
    %608 = arith.mulf %597, %607 : vector<2x16xf32>
    %609 = arith.addf %502, %606 : vector<2x16xf32>
    %610 = arith.addf %503, %608 : vector<2x16xf32>
    %611 = arith.maximumf %504, %606 : vector<2x16xf32>
    %612 = arith.maximumf %505, %608 : vector<2x16xf32>
    %c5_i32 = arith.constant 5 : i32
    %c7_i32_141 = arith.constant 7 : i32
    %613 = arith.subi %c7_i32_141, %c5_i32 : i32
    %614 = arith.index_cast %c5_i32 : i32 to index
    %c0_142 = arith.constant 0 : index
    %c0_143 = arith.constant 0 : index
    %615 = vector.load %arg8[%614, %c0_142, %c0_143] : memref<8x2x64xf32, #tpu.memory_space<vmem>>, vector<1x2x64xf32>
    %616 = vector.shape_cast %615 : vector<1x2x64xf32> to vector<2x64xf32>
    %617 = arith.index_cast %613 : i32 to index
    %c0_144 = arith.constant 0 : index
    %c0_145 = arith.constant 0 : index
    %618 = vector.load %arg9[%617, %c0_144, %c0_145] : memref<8x2x64xf32, #tpu.memory_space<vmem>>, vector<1x2x64xf32>
    %619 = vector.shape_cast %618 : vector<1x2x64xf32> to vector<2x64xf32>
    %620 = arith.truncf %583 : vector<2x16xf32> to vector<2x16xbf16>
    %cst_146 = arith.constant dense<0.000000e+00> : vector<2x64xf32>
    %621 = tpu.matmul %620, %71, %cst_146 {dimension_numbers = #tpu.dot_dimension_numbers<[1], [0], [0], [1], [0, 0, 1, 1], [], []>} : vector<2x16xbf16>, vector<16x64xbf16>, vector<2x64xf32> -> vector<2x64xf32>
    %622 = arith.addf %616, %621 : vector<2x64xf32>
    %623 = vector.extract_strided_slice %622 {offsets = [0, 0], sizes = [2, 16], strides = [1, 1]} : vector<2x64xf32> to vector<2x16xf32>
    %624 = arith.negf %623 : vector<2x16xf32>
    %625 = math.exp %624 : vector<2x16xf32>
    %cst_147 = arith.constant 1.000000e+00 : f32
    %626 = vector.broadcast %cst_147 : f32 to vector<2x16xf32>
    %627 = arith.addf %626, %625 : vector<2x16xf32>
    %628 = arith.divf %626, %627 : vector<2x16xf32>
    %629 = vector.extract_strided_slice %622 {offsets = [0, 16], sizes = [2, 16], strides = [1, 1]} : vector<2x64xf32> to vector<2x16xf32>
    %630 = arith.negf %629 : vector<2x16xf32>
    %631 = math.exp %630 : vector<2x16xf32>
    %cst_148 = arith.constant 1.000000e+00 : f32
    %632 = vector.broadcast %cst_148 : f32 to vector<2x16xf32>
    %633 = arith.addf %632, %631 : vector<2x16xf32>
    %634 = arith.divf %632, %633 : vector<2x16xf32>
    %635 = vector.extract_strided_slice %622 {offsets = [0, 32], sizes = [2, 16], strides = [1, 1]} : vector<2x64xf32> to vector<2x16xf32>
    %636 = math.tanh %635 : vector<2x16xf32>
    %637 = vector.extract_strided_slice %622 {offsets = [0, 48], sizes = [2, 16], strides = [1, 1]} : vector<2x64xf32> to vector<2x16xf32>
    %638 = arith.negf %637 : vector<2x16xf32>
    %639 = math.exp %638 : vector<2x16xf32>
    %cst_149 = arith.constant 1.000000e+00 : f32
    %640 = vector.broadcast %cst_149 : f32 to vector<2x16xf32>
    %641 = arith.addf %640, %639 : vector<2x16xf32>
    %642 = arith.divf %640, %641 : vector<2x16xf32>
    %643 = arith.mulf %634, %590 : vector<2x16xf32>
    %644 = arith.mulf %628, %636 : vector<2x16xf32>
    %645 = arith.addf %643, %644 : vector<2x16xf32>
    %646 = math.tanh %645 : vector<2x16xf32>
    %647 = arith.mulf %642, %646 : vector<2x16xf32>
    %648 = arith.truncf %597 : vector<2x16xf32> to vector<2x16xbf16>
    %cst_150 = arith.constant dense<0.000000e+00> : vector<2x64xf32>
    %649 = tpu.matmul %648, %72, %cst_150 {dimension_numbers = #tpu.dot_dimension_numbers<[1], [0], [0], [1], [0, 0, 1, 1], [], []>} : vector<2x16xbf16>, vector<16x64xbf16>, vector<2x64xf32> -> vector<2x64xf32>
    %650 = arith.addf %619, %649 : vector<2x64xf32>
    %651 = vector.extract_strided_slice %650 {offsets = [0, 0], sizes = [2, 16], strides = [1, 1]} : vector<2x64xf32> to vector<2x16xf32>
    %652 = arith.negf %651 : vector<2x16xf32>
    %653 = math.exp %652 : vector<2x16xf32>
    %cst_151 = arith.constant 1.000000e+00 : f32
    %654 = vector.broadcast %cst_151 : f32 to vector<2x16xf32>
    %655 = arith.addf %654, %653 : vector<2x16xf32>
    %656 = arith.divf %654, %655 : vector<2x16xf32>
    %657 = vector.extract_strided_slice %650 {offsets = [0, 16], sizes = [2, 16], strides = [1, 1]} : vector<2x64xf32> to vector<2x16xf32>
    %658 = arith.negf %657 : vector<2x16xf32>
    %659 = math.exp %658 : vector<2x16xf32>
    %cst_152 = arith.constant 1.000000e+00 : f32
    %660 = vector.broadcast %cst_152 : f32 to vector<2x16xf32>
    %661 = arith.addf %660, %659 : vector<2x16xf32>
    %662 = arith.divf %660, %661 : vector<2x16xf32>
    %663 = vector.extract_strided_slice %650 {offsets = [0, 32], sizes = [2, 16], strides = [1, 1]} : vector<2x64xf32> to vector<2x16xf32>
    %664 = math.tanh %663 : vector<2x16xf32>
    %665 = vector.extract_strided_slice %650 {offsets = [0, 48], sizes = [2, 16], strides = [1, 1]} : vector<2x64xf32> to vector<2x16xf32>
    %666 = arith.negf %665 : vector<2x16xf32>
    %667 = math.exp %666 : vector<2x16xf32>
    %cst_153 = arith.constant 1.000000e+00 : f32
    %668 = vector.broadcast %cst_153 : f32 to vector<2x16xf32>
    %669 = arith.addf %668, %667 : vector<2x16xf32>
    %670 = arith.divf %668, %669 : vector<2x16xf32>
    %671 = arith.mulf %662, %604 : vector<2x16xf32>
    %672 = arith.mulf %656, %664 : vector<2x16xf32>
    %673 = arith.addf %671, %672 : vector<2x16xf32>
    %674 = math.tanh %673 : vector<2x16xf32>
    %675 = arith.mulf %670, %674 : vector<2x16xf32>
    %676 = vector.broadcast %c5_i32 : i32 to vector<2x1xi32>
    %677 = arith.cmpi slt, %676, %74 : vector<2x1xi32>
    %678 = arith.extui %677 : vector<2x1xi1> to vector<2x1xi32>
    %679 = arith.sitofp %678 : vector<2x1xi32> to vector<2x1xf32>
    %680 = vector.broadcast %613 : i32 to vector<2x1xi32>
    %681 = arith.cmpi slt, %680, %74 : vector<2x1xi32>
    %682 = arith.extui %681 : vector<2x1xi1> to vector<2x1xi32>
    %683 = arith.sitofp %682 : vector<2x1xi32> to vector<2x1xf32>
    %684 = vector.broadcast %679 : vector<2x1xf32> to vector<2x16xf32>
    %685 = arith.mulf %684, %647 : vector<2x16xf32>
    %cst_154 = arith.constant 1.000000e+00 : f32
    %686 = vector.broadcast %cst_154 : f32 to vector<2x1xf32>
    %687 = arith.subf %686, %679 : vector<2x1xf32>
    %688 = vector.broadcast %687 : vector<2x1xf32> to vector<2x16xf32>
    %689 = arith.mulf %688, %583 : vector<2x16xf32>
    %690 = arith.addf %685, %689 : vector<2x16xf32>
    %691 = vector.broadcast %679 : vector<2x1xf32> to vector<2x16xf32>
    %692 = arith.mulf %691, %645 : vector<2x16xf32>
    %cst_155 = arith.constant 1.000000e+00 : f32
    %693 = vector.broadcast %cst_155 : f32 to vector<2x1xf32>
    %694 = arith.subf %693, %679 : vector<2x1xf32>
    %695 = vector.broadcast %694 : vector<2x1xf32> to vector<2x16xf32>
    %696 = arith.mulf %695, %590 : vector<2x16xf32>
    %697 = arith.addf %692, %696 : vector<2x16xf32>
    %698 = vector.broadcast %683 : vector<2x1xf32> to vector<2x16xf32>
    %699 = arith.mulf %698, %675 : vector<2x16xf32>
    %cst_156 = arith.constant 1.000000e+00 : f32
    %700 = vector.broadcast %cst_156 : f32 to vector<2x1xf32>
    %701 = arith.subf %700, %683 : vector<2x1xf32>
    %702 = vector.broadcast %701 : vector<2x1xf32> to vector<2x16xf32>
    %703 = arith.mulf %702, %597 : vector<2x16xf32>
    %704 = arith.addf %699, %703 : vector<2x16xf32>
    %705 = vector.broadcast %683 : vector<2x1xf32> to vector<2x16xf32>
    %706 = arith.mulf %705, %673 : vector<2x16xf32>
    %cst_157 = arith.constant 1.000000e+00 : f32
    %707 = vector.broadcast %cst_157 : f32 to vector<2x1xf32>
    %708 = arith.subf %707, %683 : vector<2x1xf32>
    %709 = vector.broadcast %708 : vector<2x1xf32> to vector<2x16xf32>
    %710 = arith.mulf %709, %604 : vector<2x16xf32>
    %711 = arith.addf %706, %710 : vector<2x16xf32>
    %712 = vector.broadcast %679 : vector<2x1xf32> to vector<2x16xf32>
    %713 = arith.mulf %690, %712 : vector<2x16xf32>
    %714 = vector.broadcast %683 : vector<2x1xf32> to vector<2x16xf32>
    %715 = arith.mulf %704, %714 : vector<2x16xf32>
    %716 = arith.addf %609, %713 : vector<2x16xf32>
    %717 = arith.addf %610, %715 : vector<2x16xf32>
    %718 = arith.maximumf %611, %713 : vector<2x16xf32>
    %719 = arith.maximumf %612, %715 : vector<2x16xf32>
    %c6_i32 = arith.constant 6 : i32
    %c7_i32_158 = arith.constant 7 : i32
    %720 = arith.subi %c7_i32_158, %c6_i32 : i32
    %721 = arith.index_cast %c6_i32 : i32 to index
    %c0_159 = arith.constant 0 : index
    %c0_160 = arith.constant 0 : index
    %722 = vector.load %arg8[%721, %c0_159, %c0_160] : memref<8x2x64xf32, #tpu.memory_space<vmem>>, vector<1x2x64xf32>
    %723 = vector.shape_cast %722 : vector<1x2x64xf32> to vector<2x64xf32>
    %724 = arith.index_cast %720 : i32 to index
    %c0_161 = arith.constant 0 : index
    %c0_162 = arith.constant 0 : index
    %725 = vector.load %arg9[%724, %c0_161, %c0_162] : memref<8x2x64xf32, #tpu.memory_space<vmem>>, vector<1x2x64xf32>
    %726 = vector.shape_cast %725 : vector<1x2x64xf32> to vector<2x64xf32>
    %727 = arith.truncf %690 : vector<2x16xf32> to vector<2x16xbf16>
    %cst_163 = arith.constant dense<0.000000e+00> : vector<2x64xf32>
    %728 = tpu.matmul %727, %71, %cst_163 {dimension_numbers = #tpu.dot_dimension_numbers<[1], [0], [0], [1], [0, 0, 1, 1], [], []>} : vector<2x16xbf16>, vector<16x64xbf16>, vector<2x64xf32> -> vector<2x64xf32>
    %729 = arith.addf %723, %728 : vector<2x64xf32>
    %730 = vector.extract_strided_slice %729 {offsets = [0, 0], sizes = [2, 16], strides = [1, 1]} : vector<2x64xf32> to vector<2x16xf32>
    %731 = arith.negf %730 : vector<2x16xf32>
    %732 = math.exp %731 : vector<2x16xf32>
    %cst_164 = arith.constant 1.000000e+00 : f32
    %733 = vector.broadcast %cst_164 : f32 to vector<2x16xf32>
    %734 = arith.addf %733, %732 : vector<2x16xf32>
    %735 = arith.divf %733, %734 : vector<2x16xf32>
    %736 = vector.extract_strided_slice %729 {offsets = [0, 16], sizes = [2, 16], strides = [1, 1]} : vector<2x64xf32> to vector<2x16xf32>
    %737 = arith.negf %736 : vector<2x16xf32>
    %738 = math.exp %737 : vector<2x16xf32>
    %cst_165 = arith.constant 1.000000e+00 : f32
    %739 = vector.broadcast %cst_165 : f32 to vector<2x16xf32>
    %740 = arith.addf %739, %738 : vector<2x16xf32>
    %741 = arith.divf %739, %740 : vector<2x16xf32>
    %742 = vector.extract_strided_slice %729 {offsets = [0, 32], sizes = [2, 16], strides = [1, 1]} : vector<2x64xf32> to vector<2x16xf32>
    %743 = math.tanh %742 : vector<2x16xf32>
    %744 = vector.extract_strided_slice %729 {offsets = [0, 48], sizes = [2, 16], strides = [1, 1]} : vector<2x64xf32> to vector<2x16xf32>
    %745 = arith.negf %744 : vector<2x16xf32>
    %746 = math.exp %745 : vector<2x16xf32>
    %cst_166 = arith.constant 1.000000e+00 : f32
    %747 = vector.broadcast %cst_166 : f32 to vector<2x16xf32>
    %748 = arith.addf %747, %746 : vector<2x16xf32>
    %749 = arith.divf %747, %748 : vector<2x16xf32>
    %750 = arith.mulf %741, %697 : vector<2x16xf32>
    %751 = arith.mulf %735, %743 : vector<2x16xf32>
    %752 = arith.addf %750, %751 : vector<2x16xf32>
    %753 = math.tanh %752 : vector<2x16xf32>
    %754 = arith.mulf %749, %753 : vector<2x16xf32>
    %755 = arith.truncf %704 : vector<2x16xf32> to vector<2x16xbf16>
    %cst_167 = arith.constant dense<0.000000e+00> : vector<2x64xf32>
    %756 = tpu.matmul %755, %72, %cst_167 {dimension_numbers = #tpu.dot_dimension_numbers<[1], [0], [0], [1], [0, 0, 1, 1], [], []>} : vector<2x16xbf16>, vector<16x64xbf16>, vector<2x64xf32> -> vector<2x64xf32>
    %757 = arith.addf %726, %756 : vector<2x64xf32>
    %758 = vector.extract_strided_slice %757 {offsets = [0, 0], sizes = [2, 16], strides = [1, 1]} : vector<2x64xf32> to vector<2x16xf32>
    %759 = arith.negf %758 : vector<2x16xf32>
    %760 = math.exp %759 : vector<2x16xf32>
    %cst_168 = arith.constant 1.000000e+00 : f32
    %761 = vector.broadcast %cst_168 : f32 to vector<2x16xf32>
    %762 = arith.addf %761, %760 : vector<2x16xf32>
    %763 = arith.divf %761, %762 : vector<2x16xf32>
    %764 = vector.extract_strided_slice %757 {offsets = [0, 16], sizes = [2, 16], strides = [1, 1]} : vector<2x64xf32> to vector<2x16xf32>
    %765 = arith.negf %764 : vector<2x16xf32>
    %766 = math.exp %765 : vector<2x16xf32>
    %cst_169 = arith.constant 1.000000e+00 : f32
    %767 = vector.broadcast %cst_169 : f32 to vector<2x16xf32>
    %768 = arith.addf %767, %766 : vector<2x16xf32>
    %769 = arith.divf %767, %768 : vector<2x16xf32>
    %770 = vector.extract_strided_slice %757 {offsets = [0, 32], sizes = [2, 16], strides = [1, 1]} : vector<2x64xf32> to vector<2x16xf32>
    %771 = math.tanh %770 : vector<2x16xf32>
    %772 = vector.extract_strided_slice %757 {offsets = [0, 48], sizes = [2, 16], strides = [1, 1]} : vector<2x64xf32> to vector<2x16xf32>
    %773 = arith.negf %772 : vector<2x16xf32>
    %774 = math.exp %773 : vector<2x16xf32>
    %cst_170 = arith.constant 1.000000e+00 : f32
    %775 = vector.broadcast %cst_170 : f32 to vector<2x16xf32>
    %776 = arith.addf %775, %774 : vector<2x16xf32>
    %777 = arith.divf %775, %776 : vector<2x16xf32>
    %778 = arith.mulf %769, %711 : vector<2x16xf32>
    %779 = arith.mulf %763, %771 : vector<2x16xf32>
    %780 = arith.addf %778, %779 : vector<2x16xf32>
    %781 = math.tanh %780 : vector<2x16xf32>
    %782 = arith.mulf %777, %781 : vector<2x16xf32>
    %783 = vector.broadcast %c6_i32 : i32 to vector<2x1xi32>
    %784 = arith.cmpi slt, %783, %74 : vector<2x1xi32>
    %785 = arith.extui %784 : vector<2x1xi1> to vector<2x1xi32>
    %786 = arith.sitofp %785 : vector<2x1xi32> to vector<2x1xf32>
    %787 = vector.broadcast %720 : i32 to vector<2x1xi32>
    %788 = arith.cmpi slt, %787, %74 : vector<2x1xi32>
    %789 = arith.extui %788 : vector<2x1xi1> to vector<2x1xi32>
    %790 = arith.sitofp %789 : vector<2x1xi32> to vector<2x1xf32>
    %791 = vector.broadcast %786 : vector<2x1xf32> to vector<2x16xf32>
    %792 = arith.mulf %791, %754 : vector<2x16xf32>
    %cst_171 = arith.constant 1.000000e+00 : f32
    %793 = vector.broadcast %cst_171 : f32 to vector<2x1xf32>
    %794 = arith.subf %793, %786 : vector<2x1xf32>
    %795 = vector.broadcast %794 : vector<2x1xf32> to vector<2x16xf32>
    %796 = arith.mulf %795, %690 : vector<2x16xf32>
    %797 = arith.addf %792, %796 : vector<2x16xf32>
    %798 = vector.broadcast %786 : vector<2x1xf32> to vector<2x16xf32>
    %799 = arith.mulf %798, %752 : vector<2x16xf32>
    %cst_172 = arith.constant 1.000000e+00 : f32
    %800 = vector.broadcast %cst_172 : f32 to vector<2x1xf32>
    %801 = arith.subf %800, %786 : vector<2x1xf32>
    %802 = vector.broadcast %801 : vector<2x1xf32> to vector<2x16xf32>
    %803 = arith.mulf %802, %697 : vector<2x16xf32>
    %804 = arith.addf %799, %803 : vector<2x16xf32>
    %805 = vector.broadcast %790 : vector<2x1xf32> to vector<2x16xf32>
    %806 = arith.mulf %805, %782 : vector<2x16xf32>
    %cst_173 = arith.constant 1.000000e+00 : f32
    %807 = vector.broadcast %cst_173 : f32 to vector<2x1xf32>
    %808 = arith.subf %807, %790 : vector<2x1xf32>
    %809 = vector.broadcast %808 : vector<2x1xf32> to vector<2x16xf32>
    %810 = arith.mulf %809, %704 : vector<2x16xf32>
    %811 = arith.addf %806, %810 : vector<2x16xf32>
    %812 = vector.broadcast %790 : vector<2x1xf32> to vector<2x16xf32>
    %813 = arith.mulf %812, %780 : vector<2x16xf32>
    %cst_174 = arith.constant 1.000000e+00 : f32
    %814 = vector.broadcast %cst_174 : f32 to vector<2x1xf32>
    %815 = arith.subf %814, %790 : vector<2x1xf32>
    %816 = vector.broadcast %815 : vector<2x1xf32> to vector<2x16xf32>
    %817 = arith.mulf %816, %711 : vector<2x16xf32>
    %818 = arith.addf %813, %817 : vector<2x16xf32>
    %819 = vector.broadcast %786 : vector<2x1xf32> to vector<2x16xf32>
    %820 = arith.mulf %797, %819 : vector<2x16xf32>
    %821 = vector.broadcast %790 : vector<2x1xf32> to vector<2x16xf32>
    %822 = arith.mulf %811, %821 : vector<2x16xf32>
    %823 = arith.addf %716, %820 : vector<2x16xf32>
    %824 = arith.addf %717, %822 : vector<2x16xf32>
    %825 = arith.maximumf %718, %820 : vector<2x16xf32>
    %826 = arith.maximumf %719, %822 : vector<2x16xf32>
    %c7_i32_175 = arith.constant 7 : i32
    %c7_i32_176 = arith.constant 7 : i32
    %827 = arith.subi %c7_i32_176, %c7_i32_175 : i32
    %828 = arith.index_cast %c7_i32_175 : i32 to index
    %c0_177 = arith.constant 0 : index
    %c0_178 = arith.constant 0 : index
    %829 = vector.load %arg8[%828, %c0_177, %c0_178] : memref<8x2x64xf32, #tpu.memory_space<vmem>>, vector<1x2x64xf32>
    %830 = vector.shape_cast %829 : vector<1x2x64xf32> to vector<2x64xf32>
    %831 = arith.index_cast %827 : i32 to index
    %c0_179 = arith.constant 0 : index
    %c0_180 = arith.constant 0 : index
    %832 = vector.load %arg9[%831, %c0_179, %c0_180] : memref<8x2x64xf32, #tpu.memory_space<vmem>>, vector<1x2x64xf32>
    %833 = vector.shape_cast %832 : vector<1x2x64xf32> to vector<2x64xf32>
    %834 = arith.truncf %797 : vector<2x16xf32> to vector<2x16xbf16>
    %cst_181 = arith.constant dense<0.000000e+00> : vector<2x64xf32>
    %835 = tpu.matmul %834, %71, %cst_181 {dimension_numbers = #tpu.dot_dimension_numbers<[1], [0], [0], [1], [0, 0, 1, 1], [], []>} : vector<2x16xbf16>, vector<16x64xbf16>, vector<2x64xf32> -> vector<2x64xf32>
    %836 = arith.addf %830, %835 : vector<2x64xf32>
    %837 = vector.extract_strided_slice %836 {offsets = [0, 0], sizes = [2, 16], strides = [1, 1]} : vector<2x64xf32> to vector<2x16xf32>
    %838 = arith.negf %837 : vector<2x16xf32>
    %839 = math.exp %838 : vector<2x16xf32>
    %cst_182 = arith.constant 1.000000e+00 : f32
    %840 = vector.broadcast %cst_182 : f32 to vector<2x16xf32>
    %841 = arith.addf %840, %839 : vector<2x16xf32>
    %842 = arith.divf %840, %841 : vector<2x16xf32>
    %843 = vector.extract_strided_slice %836 {offsets = [0, 16], sizes = [2, 16], strides = [1, 1]} : vector<2x64xf32> to vector<2x16xf32>
    %844 = arith.negf %843 : vector<2x16xf32>
    %845 = math.exp %844 : vector<2x16xf32>
    %cst_183 = arith.constant 1.000000e+00 : f32
    %846 = vector.broadcast %cst_183 : f32 to vector<2x16xf32>
    %847 = arith.addf %846, %845 : vector<2x16xf32>
    %848 = arith.divf %846, %847 : vector<2x16xf32>
    %849 = vector.extract_strided_slice %836 {offsets = [0, 32], sizes = [2, 16], strides = [1, 1]} : vector<2x64xf32> to vector<2x16xf32>
    %850 = math.tanh %849 : vector<2x16xf32>
    %851 = vector.extract_strided_slice %836 {offsets = [0, 48], sizes = [2, 16], strides = [1, 1]} : vector<2x64xf32> to vector<2x16xf32>
    %852 = arith.negf %851 : vector<2x16xf32>
    %853 = math.exp %852 : vector<2x16xf32>
    %cst_184 = arith.constant 1.000000e+00 : f32
    %854 = vector.broadcast %cst_184 : f32 to vector<2x16xf32>
    %855 = arith.addf %854, %853 : vector<2x16xf32>
    %856 = arith.divf %854, %855 : vector<2x16xf32>
    %857 = arith.mulf %848, %804 : vector<2x16xf32>
    %858 = arith.mulf %842, %850 : vector<2x16xf32>
    %859 = arith.addf %857, %858 : vector<2x16xf32>
    %860 = math.tanh %859 : vector<2x16xf32>
    %861 = arith.mulf %856, %860 : vector<2x16xf32>
    %862 = arith.truncf %811 : vector<2x16xf32> to vector<2x16xbf16>
    %cst_185 = arith.constant dense<0.000000e+00> : vector<2x64xf32>
    %863 = tpu.matmul %862, %72, %cst_185 {dimension_numbers = #tpu.dot_dimension_numbers<[1], [0], [0], [1], [0, 0, 1, 1], [], []>} : vector<2x16xbf16>, vector<16x64xbf16>, vector<2x64xf32> -> vector<2x64xf32>
    %864 = arith.addf %833, %863 : vector<2x64xf32>
    %865 = vector.extract_strided_slice %864 {offsets = [0, 0], sizes = [2, 16], strides = [1, 1]} : vector<2x64xf32> to vector<2x16xf32>
    %866 = arith.negf %865 : vector<2x16xf32>
    %867 = math.exp %866 : vector<2x16xf32>
    %cst_186 = arith.constant 1.000000e+00 : f32
    %868 = vector.broadcast %cst_186 : f32 to vector<2x16xf32>
    %869 = arith.addf %868, %867 : vector<2x16xf32>
    %870 = arith.divf %868, %869 : vector<2x16xf32>
    %871 = vector.extract_strided_slice %864 {offsets = [0, 16], sizes = [2, 16], strides = [1, 1]} : vector<2x64xf32> to vector<2x16xf32>
    %872 = arith.negf %871 : vector<2x16xf32>
    %873 = math.exp %872 : vector<2x16xf32>
    %cst_187 = arith.constant 1.000000e+00 : f32
    %874 = vector.broadcast %cst_187 : f32 to vector<2x16xf32>
    %875 = arith.addf %874, %873 : vector<2x16xf32>
    %876 = arith.divf %874, %875 : vector<2x16xf32>
    %877 = vector.extract_strided_slice %864 {offsets = [0, 32], sizes = [2, 16], strides = [1, 1]} : vector<2x64xf32> to vector<2x16xf32>
    %878 = math.tanh %877 : vector<2x16xf32>
    %879 = vector.extract_strided_slice %864 {offsets = [0, 48], sizes = [2, 16], strides = [1, 1]} : vector<2x64xf32> to vector<2x16xf32>
    %880 = arith.negf %879 : vector<2x16xf32>
    %881 = math.exp %880 : vector<2x16xf32>
    %cst_188 = arith.constant 1.000000e+00 : f32
    %882 = vector.broadcast %cst_188 : f32 to vector<2x16xf32>
    %883 = arith.addf %882, %881 : vector<2x16xf32>
    %884 = arith.divf %882, %883 : vector<2x16xf32>
    %885 = arith.mulf %876, %818 : vector<2x16xf32>
    %886 = arith.mulf %870, %878 : vector<2x16xf32>
    %887 = arith.addf %885, %886 : vector<2x16xf32>
    %888 = math.tanh %887 : vector<2x16xf32>
    %889 = arith.mulf %884, %888 : vector<2x16xf32>
    %890 = vector.broadcast %c7_i32_175 : i32 to vector<2x1xi32>
    %891 = arith.cmpi slt, %890, %74 : vector<2x1xi32>
    %892 = arith.extui %891 : vector<2x1xi1> to vector<2x1xi32>
    %893 = arith.sitofp %892 : vector<2x1xi32> to vector<2x1xf32>
    %894 = vector.broadcast %827 : i32 to vector<2x1xi32>
    %895 = arith.cmpi slt, %894, %74 : vector<2x1xi32>
    %896 = arith.extui %895 : vector<2x1xi1> to vector<2x1xi32>
    %897 = arith.sitofp %896 : vector<2x1xi32> to vector<2x1xf32>
    %898 = vector.broadcast %893 : vector<2x1xf32> to vector<2x16xf32>
    %899 = arith.mulf %898, %861 : vector<2x16xf32>
    %cst_189 = arith.constant 1.000000e+00 : f32
    %900 = vector.broadcast %cst_189 : f32 to vector<2x1xf32>
    %901 = arith.subf %900, %893 : vector<2x1xf32>
    %902 = vector.broadcast %901 : vector<2x1xf32> to vector<2x16xf32>
    %903 = arith.mulf %902, %797 : vector<2x16xf32>
    %904 = arith.addf %899, %903 : vector<2x16xf32>
    %905 = vector.broadcast %893 : vector<2x1xf32> to vector<2x16xf32>
    %906 = arith.mulf %905, %859 : vector<2x16xf32>
    %cst_190 = arith.constant 1.000000e+00 : f32
    %907 = vector.broadcast %cst_190 : f32 to vector<2x1xf32>
    %908 = arith.subf %907, %893 : vector<2x1xf32>
    %909 = vector.broadcast %908 : vector<2x1xf32> to vector<2x16xf32>
    %910 = arith.mulf %909, %804 : vector<2x16xf32>
    %911 = arith.addf %906, %910 : vector<2x16xf32>
    %912 = vector.broadcast %897 : vector<2x1xf32> to vector<2x16xf32>
    %913 = arith.mulf %912, %889 : vector<2x16xf32>
    %cst_191 = arith.constant 1.000000e+00 : f32
    %914 = vector.broadcast %cst_191 : f32 to vector<2x1xf32>
    %915 = arith.subf %914, %897 : vector<2x1xf32>
    %916 = vector.broadcast %915 : vector<2x1xf32> to vector<2x16xf32>
    %917 = arith.mulf %916, %811 : vector<2x16xf32>
    %918 = arith.addf %913, %917 : vector<2x16xf32>
    %919 = vector.broadcast %897 : vector<2x1xf32> to vector<2x16xf32>
    %920 = arith.mulf %919, %887 : vector<2x16xf32>
    %cst_192 = arith.constant 1.000000e+00 : f32
    %921 = vector.broadcast %cst_192 : f32 to vector<2x1xf32>
    %922 = arith.subf %921, %897 : vector<2x1xf32>
    %923 = vector.broadcast %922 : vector<2x1xf32> to vector<2x16xf32>
    %924 = arith.mulf %923, %818 : vector<2x16xf32>
    %925 = arith.addf %920, %924 : vector<2x16xf32>
    %926 = vector.broadcast %893 : vector<2x1xf32> to vector<2x16xf32>
    %927 = arith.mulf %904, %926 : vector<2x16xf32>
    %928 = vector.broadcast %897 : vector<2x1xf32> to vector<2x16xf32>
    %929 = arith.mulf %918, %928 : vector<2x16xf32>
    %930 = arith.addf %823, %927 : vector<2x16xf32>
    %931 = arith.addf %824, %929 : vector<2x16xf32>
    %932 = arith.maximumf %825, %927 : vector<2x16xf32>
    %933 = arith.maximumf %826, %929 : vector<2x16xf32>
    %c8_i32 = arith.constant 8 : i32
    %cst_193 = arith.constant 1.250000e-01 : f32
    %934 = vector.broadcast %cst_193 : f32 to vector<2x16xf32>
    %935 = arith.mulf %930, %934 : vector<2x16xf32>
    %cst_194 = arith.constant 1.250000e-01 : f32
    %936 = vector.broadcast %cst_194 : f32 to vector<2x16xf32>
    %937 = arith.mulf %931, %936 : vector<2x16xf32>
    %938 = tpu.concatenate %935, %937, %932, %933 in 1 : vector<2x16xf32>, vector<2x16xf32>, vector<2x16xf32>, vector<2x16xf32> -> vector<2x64xf32>
    %c0_195 = arith.constant 0 : index
    %c0_196 = arith.constant 0 : index
    %c0_197 = arith.constant 0 : index
    %939 = vector.load %arg7[%c0_195, %c0_196, %c0_197] : memref<1x2x64xf32, #tpu.memory_space<vmem>>, vector<1x2x64xf32>
    %940 = vector.shape_cast %939 : vector<1x2x64xf32> to vector<2x64xf32>
    %941 = vector.shape_cast %938 : vector<2x64xf32> to vector<1x2x64xf32>
    tpu.vector_store %arg7[%c0_195, %c0_196, %c0_197], %941 {strides = array<i32>} : memref<1x2x64xf32, #tpu.memory_space<vmem>>, vector<1x2x64xf32>,
    return
  }
  func.func @transform_0(%arg0: i32) -> (i32, i32, i32) {
    %c0_i32 = arith.constant 0 : i32
    %c0_i32_0 = arith.constant 0 : i32
    %c0_i32_1 = arith.constant 0 : i32
    return %arg0, %c0_i32, %c0_i32_0 : i32, i32, i32
  }
  func.func @transform_1(%arg0: i32) -> (i32, i32, i32) {
    %c0_i32 = arith.constant 0 : i32
    %c0_i32_0 = arith.constant 0 : i32
    %c0_i32_1 = arith.constant 0 : i32
    return %arg0, %c0_i32, %c0_i32_0 : i32, i32, i32
  }
  func.func @transform_2(%arg0: i32) -> (i32, i32) {
    %c0_i32 = arith.constant 0 : i32
    %c0_i32_0 = arith.constant 0 : i32
    %c0_i32_1 = arith.constant 0 : i32
    return %c0_i32, %c0_i32_0 : i32, i32
  }
  func.func @transform_3(%arg0: i32) -> (i32, i32) {
    %c0_i32 = arith.constant 0 : i32
    %c0_i32_0 = arith.constant 0 : i32
    %c0_i32_1 = arith.constant 0 : i32
    return %c0_i32, %c0_i32_0 : i32, i32
  }
  func.func @transform_4(%arg0: i32) -> (i32, i32) {
    %c0_i32 = arith.constant 0 : i32
    %c0_i32_0 = arith.constant 0 : i32
    %c0_i32_1 = arith.constant 0 : i32
    return %c0_i32, %c0_i32_0 : i32, i32
  }
  func.func @transform_5(%arg0: i32) -> (i32, i32) {
    %c0_i32 = arith.constant 0 : i32
    %c0_i32_0 = arith.constant 0 : i32
    %c0_i32_1 = arith.constant 0 : i32
    return %c0_i32, %c0_i32_0 : i32, i32
  }
  func.func @transform_6(%arg0: i32) -> (i32, i32, i32) {
    %c0_i32 = arith.constant 0 : i32
    %c0_i32_0 = arith.constant 0 : i32
    %c0_i32_1 = arith.constant 0 : i32
    return %arg0, %c0_i32, %c0_i32_0 : i32, i32, i32
  }
}

</mosaic_0001>

<bundles_post_ra>
// kernel: esim_forward.11
= control target key start
LH: loop header
LB: loop body
LE: loop exit
PB: predicated region body
PF: predicated region fallthrough
CT: control target
= control target key end

     0   :  { %v384_v3 = vmov 0.0|0.0   ;;  %vm385_vm0 = vmmov 0   ;;  %v386_v6 = vmov 0.0   ;;  %s507_s0 = inlined_call_operand.vmem [shape: f32[2,128], index: 0, kind: input, shape index: {}]   ;;  %s508_s1 = inlined_call_operand.vmem [shape: f32[128,32], index: 1, kind: input, shape index: {}]   ;;  %s509_s2 = inlined_call_operand.vmem [shape: f32[1,32], index: 2, kind: input, shape index: {}]   ;;  %s510_s3 = inlined_call_operand.vmem [shape: f32[32,3], index: 3, kind: input, shape index: {}]   ;;  %s511_s4 = inlined_call_operand.vmem [shape: f32[1,3], index: 4, kind: input, shape index: {}]   ;;  %s512_s5 = inlined_call_operand.vmem [shape: f32[2,3], index: 5, kind: input, shape index: {}]   ;;  %s513_s6 = inlined_call_operand.hbm [shape: f32[1,1], index: 6, kind: output, shape index: {}]  }
   0x1   :  { %v25_v0 = vld [vmem:[%s508_s1] sm:$0xff]  ;;  %v26_v1 = vld [vmem:[%s508_s1 + $0x8] sm:$0xff]  ;;  %v27_v2 = vld [vmem:[%s508_s1 + $0x10] sm:$0xff]  ;;  %320 = vmatprep.subr.bf16.mxu0 %v384_v3  ;;  %306 = vmatprep.mubr.msk.f32.mxu0 %vm385_vm0, %v386_v6 }
   0x2   :  { %v321_v4 = vpack.c.bf16 %v26_v1, %v25_v0  ;;  %v28_v5 = vld [vmem:[%s508_s1 + $0x18] sm:$0xff]  ;;  %344 = vmatprep.subr.bf16.mxu1 %v384_v3  ;;  %317 = vmatprep.mubr.msk.f32.mxu1 %vm385_vm0, %v386_v6  ;;  %v29_v8 = vld [vmem:[%s508_s1 + $0x20] sm:$0xff]  ;;  %v30_v9 = vld [vmem:[%s508_s1 + $0x28] sm:$0xff] }
   0x3   :  { %v324_v7 = vpack.c.bf16 %v28_v5, %v27_v2 }
   0x4   :  { %322 = vmatpush3.bf16.msra.mxu0 %v321_v4 }
   0x5   :  { %323 = vmatprep.subr.bf16.mxu0 %v384_v3 }
   0x6   :  { %11 = vsyncpa [#allocation3], 0  ;;  %v327_v10 = vpack.c.bf16 %v30_v9, %v29_v8  ;;  %v31_v11 = vld [vmem:[%s508_s1 + $0x30] sm:$0xff]  ;;  %v32_v12 = vld [vmem:[%s508_s1 + $0x38] sm:$0xff]  ;;  %vm130_vm1 = vcmask 261120   ;;  %vm204_vm2 = vcmask 17408  }
   0x7   :  { %v330_v13 = vpack.c.bf16 %v32_v12, %v31_v11  ;;  %v33_v14 = vld [vmem:[%s508_s1 + $0x40] sm:$0xff]  ;;  %v34_v15 = vld [vmem:[%s508_s1 + $0x48] sm:$0xff]  ;;  %v35_v17 = vld [vmem:[%s508_s1 + $0x50] sm:$0xff]  ;;  %vm223_vm3 = vcmask 1041408   ;;  %vm233_vm4 = vcmask 0  }
   0x8   :  { %325 = vmatpush3.bf16.msra.mxu0 %v324_v7  ;;  %v333_v16 = vpack.c.bf16 %v34_v15, %v33_v14  ;;  %v36_v18 = vld [vmem:[%s508_s1 + $0x58] sm:$0xff]  ;;  %v37_v20 = vld [vmem:[%s508_s1 + $0x60] sm:$0xff]  ;;  %v38_v21 = vld [vmem:[%s508_s1 + $0x68] sm:$0xff] }
   0x9   :  { %326 = vmatprep.subr.bf16.mxu0 %v384_v3  ;;  %v336_v19 = vpack.c.bf16 %v36_v18, %v35_v17  ;;  %v339_v22 = vpack.c.bf16 %v38_v21, %v37_v20  ;;  %v39_v23 = vld [vmem:[%s508_s1 + $0x70] sm:$0xff]  ;;  %v40_v24 = vld [vmem:[%s508_s1 + $0x78] sm:$0xff]  ;;  %v24_v26 = vld [vmem:[%s507_s0] sm:$0x3] }
   0xa   :  { %v342_v25 = vpack.c.bf16 %v40_v24, %v39_v23  ;;  %v119_v27 = vld [vmem:[%s510_s3] sm:$0xff]  ;;  %v120_v28 = vld [vmem:[%s510_s3 + $0x8] sm:$0xff]  ;;  %v121_v29 = vld [vmem:[%s510_s3 + $0x10] sm:$0xff] }
   0xb   :  { %v345_v30 = vpack.c.bf16 %v120_v28, %v119_v27  ;;  %v122_v31 = vld [vmem:[%s510_s3 + $0x18] sm:$0xff]  ;;  %v249_v33 = vld [vmem:[%s509_s2] ss:$0 sm:$0xff]  ;;  %s387_s2 = smov [#allocation2]  }
   0xc   :  { %328 = vmatpush3.bf16.msra.mxu0 %v327_v10  ;;  %v348_v32 = vpack.c.bf16 %v122_v31, %v121_v29  ;;  %v250_v38 = vld [vmem:[%s511_s4] ss:$0 sm:$0xff]  ;;  %s241_s4 = sshll.u32 %s387_s2, 4  ;;  %s242_s4 = int_to_ptr.vmem [resolvable:$true] %s241_s4 }
   0xd   :  { %329 = vmatprep.subr.bf16.mxu0 %v384_v3  ;;  %346 = vmatpush3.bf16.msra.mxu1 %v345_v30  ;;  %v217_v40 = vld [vmem:[%s512_s5] sm:$0x3]  ;;  %s360_s5 = scalar_lea.vmem %s242_s4, 16  ;;  %s364_s18 = scalar_lea.vmem %s242_s4, 32 }
   0xe   :  { %347 = vmatprep.subr.bf16.mxu1 %v384_v3  ;;  %p361_p0 = scmp.ne.s32.totalorder %s242_s4, %s360_s5  ;;  %p365_p1 = scmp.lt.s32.totalorder %s242_s4, %s242_s4 }
   0xf   :  { %p366_p2 = scmp.lt.s32.totalorder %s364_s18, %s360_s5 }
  0x10   :  { %331 = vmatpush3.bf16.msra.mxu0 %v330_v13 }
  0x11   :  { %332 = vmatprep.subr.bf16.mxu0 %v384_v3  ;;  %349 = vmatpush3.bf16.msra.mxu1 %v348_v32  ;;  %p367_p3 = por %p366_p2, %p365_p1 }
  0x13   :  { %p368_p4 = pnand %p367_p3, %p361_p0 }
  0x14   :  { %334 = vmatpush3.bf16.msra.mxu0 %v333_v16 }
  0x15   :  { %335 = vmatprep.subr.bf16.mxu0 %v384_v3 }
  0x18   :  { %337 = vmatpush3.bf16.msra.mxu0 %v336_v19 }
  0x19   :  { %338 = vmatprep.subr.bf16.mxu0 %v384_v3 }
  0x1c   :  { %340 = vmatpush3.bf16.msra.mxu0 %v339_v22 }
  0x1d   :  { %341 = vmatprep.subr.bf16.mxu0 %v384_v3 }
  0x20   :  { %343 = vmatpush3.bf16.msra.mxu0 %v342_v25 }
  0x23   :  { %307 = vmatmul.mubr.f32.vlgmr.msra.gmra.mrb[0].mxu0 %v24_v26 }
  0xf6   :  { %v114_v34 = vpop.f32.mrb[0].mxu0 }
  0xf7   :  { %v115_v35 = vadd.f32 %v249_v33, %v114_v34  ;;  %v308_v36 = vpop.f32.mrb[1].mxu0 }
  0xf9   :  { %354 = vtanh.f32 %v115_v35 }
 0x103   :  { %v355_v37 = vpop.eup %354 }
 0x104   :  { %318 = vmatmul.mubr.msk.f32.vlgmr.msra.gmra.mrb[0].mxu1 %vm130_vm1, %v355_v37 }
 0x1d7   :  { %v200_v39 = vpop.f32.mrb[0].mxu1 }
 0x1d8   :  { %v201_v41 = vadd.f32 %v250_v38, %v200_v39  ;;  %v319_v42 = vpop.f32.mrb[1].mxu1 }
 0x1da   :  { %v205_v43 = vsel %vm204_vm2, %v201_v41, -inf  ;;  %v218_v44 = vmul.f32 %v217_v40, %v201_v41 }
 0x1db   :  { %206 = vmax.xlane.f32.xlu0 %v205_v43 }
 0x1dc   :  { %v219_v45 = vsel %vm204_vm2, %v218_v44, 0.0 }
 0x1dd   :  { %220 = vadd.xlane.f32.xlu1 %v219_v45 }
 0x268   :  { %v207_v46 = vpop.xlane.xlu0 %206 }
 0x269   :  { %v208_v47 = vsub.f32 %v201_v41, %v207_v46 }
 0x26a   :  { %v221_v55 = vpop.xlane.xlu1 %220 }
 0x26b   :  { %v209_v48 = vmul.f32 1.442695, %v208_v47 }
 0x26d   :  { %356 = vpow2.f32 %v209_v48 }
 0x277   :  { %v357_v49 = vpop.eup %356 }
 0x278   :  { %v211_v50 = vsel %vm204_vm2, %v357_v49, 0.0 }
 0x279   :  { %212 = vadd.xlane.f32.xlu0 %v211_v50 }
 0x306   :  { %v213_v51 = vpop.xlane.xlu0 %212 }
 0x307   :  { %358 = vlog2.f32 %v213_v51 }
 0x311   :  { %v359_v52 = vpop.eup %358 }
 0x312   :  { %v215_v53 = vmul.f32 0.6931472, %v359_v52 }
 0x314   :  { %v216_v54 = vadd.f32 %v215_v53, %v207_v46 }
 0x316   :  { %v222_v56 = vsub.f32 %v216_v54, %v221_v55 }
 0x318   :  { %v224_v57 = vsel %vm223_vm3, %v222_v56, 0.0 }
 0x319   :  { %v225_v58 = vrot.slane %v224_v57, 4 }
 0x31b   :  { %v226_v59 = vadd.f32 %v225_v58, %v224_v57 }
 0x31d   :  { %v227_v60 = vrot.slane %v226_v59, 2 }
 0x31f   :  { %v228_v61 = vadd.f32 %v227_v60, %v226_v59 }
 0x321   :  { %v229_v62 = vrot.slane %v228_v61, 1 }
 0x323   :  { %v230_v63 = vadd.f32 %v229_v62, %v228_v61 }
 0x325   :  { %v232_v0 = vmul.f32 0.5, %v230_v63 }
 0x327   :  { %234 = vst.msk [vmem:[#allocation2] sm:$0x1] %vm233_vm4, %v232_v0 }
 0x328   :  { %371 = shalt.err (!%p368_p4)
}
 0x329   :  { %s372_s21 = scalar_lea.hbm %s513_s6, 16 }
 0x32a   :  { %p373_p5 = scmp.ne.s32.totalorder %s513_s6, %s372_s21  ;;  %p376_p6 = scmp.lt.u32.totalorder %s372_s21, %s513_s6 }
 0x32c   :  { %p378_p7 = pnand %p376_p6, %p373_p5 }
 0x32e   :  { %381 = shalt.err (!%p378_p7)
}
 0x32f   :  { %244 = dma.vmem_to_hbm [thread:$0]  %s242_s4, 16, %s513_s6, [#allocation3]  }
 0x330   :  { %382 = dma.done.wait [#allocation3], 16  }
 0x331   :  { %383 = vsyncadd [#allocation3], 4294967280 }
 0x332   :  { %248 = vsyncpa [#allocation3], 1 }

// kernel: esim_forward.8
= control target key start
LH: loop header
LB: loop body
LE: loop exit
PB: predicated region body
PF: predicated region fallthrough
CT: control target
= control target key end

     0   :  { %s1333_s0 = inlined_call_operand.vmem [shape: s32[2], index: 0, kind: input, shape index: {}]   ;;  %s1334_s2 = inlined_call_operand.vmem [shape: bf16[2,8,32], index: 2, kind: input, shape index: {}]   ;;  %s1335_s3 = inlined_call_operand.vmem [shape: bf16[2,8,32], index: 3, kind: input, shape index: {}]   ;;  %s1336_s4 = inlined_call_operand.vmem [shape: bf16[128,32], index: 4, kind: input, shape index: {}]   ;;  %s1337_s5 = inlined_call_operand.vmem [shape: f32[1,32], index: 5, kind: input, shape index: {}]   ;;  %s1338_s6 = inlined_call_operand.vmem [shape: bf16[2,8,32], index: 6, kind: output, shape index: {0}]   ;;  %s1339_s7 = inlined_call_operand.vmem [shape: bf16[2,8,32], index: 7, kind: output, shape index: {1}]   ;;  %s1340_s1 = inlined_call_operand.vmem [shape: s32[2], index: 1, kind: input, shape index: {}]  }
   0x1   :  { %s13_s26 = sshll.u32 %s1333_s0, 4  ;;  %s17_s29 = sshll.u32 %s1340_s1, 4  ;;  %s14_s26 = int_to_ptr.vmem [resolvable:$true] %s13_s26  ;;  %s18_s29 = int_to_ptr.vmem [resolvable:$true] %s17_s29 }
   0x2   :  { %s1018_s30 = scalar_lea.vmem %s14_s26, 16  ;;  %p1023_p1 = scmp.lt.s32.totalorder %s14_s26, %s14_s26 }
   0x3   :  { %p1019_p0 = scmp.ne.s32.totalorder %s14_s26, %s1018_s30  ;;  %p1024_p2 = scmp.lt.s32.totalorder %s1018_s30, %s1018_s30 }
   0x5   :  { %p1025_p3 = por %p1024_p2, %p1023_p1 }
   0x7   :  { %p1026_p4 = pnand %p1025_p3, %p1019_p0 }
   0x9   :  { %1029 = shalt.err (!%p1026_p4)  }
   0xa   :  { %s1044_s8 = smov [#allocation3]   ;;  %s1030_s9 = scalar_lea.vmem %s18_s29, 16 }
   0xb   :  { %16 = dma.vmem_to_smem %s14_s26, 16, %s1044_s8, [#allocation2] }
   0xc   :  { %p1031_p5 = scmp.ne.s32.totalorder %s18_s29, %s1030_s9  ;;  %p1035_p6 = scmp.lt.s32.totalorder %s18_s29, %s18_s29 }
   0xd   :  { %p1036_p7 = scmp.lt.s32.totalorder %s1030_s9, %s1030_s9 }
   0xf   :  { %p1037_p8 = por %p1036_p7, %p1035_p6 }
  0x11   :  { %p1038_p9 = pnand %p1037_p8, %p1031_p5 }
  0x13   :  { %1041 = shalt.err (!%p1038_p9)  }
  0x14   :  { %s1045_s0 = smov [#allocation4]  }
  0x15   :  { %20 = dma.vmem_to_smem %s18_s29, 16, %s1045_s0, [#allocation2] }
  0x16   :  { %1042 = dma.done.wait [#allocation2], 32 }
  0x17   :  { %1043 = vsyncadd [#allocation2], 4294967264 }
  0x18   :  { %22 = sfence }
  0x19   :  { %v1100_v0 = vld [vmem:[%s1335_s3] sm:$0xf]  ;;  %vm58_vm0 = vcmask 261120   ;;  %v1046_v1 = vmov 0.0   ;;  %vm1047_vm1 = vmmov 0   ;;  %s55_s13 = sld [smem:[#allocation4]]  ;;  %v49_v4 = vlaneseq }
  0x1a   :  { %858 = vmatprep.subr.bf16.mxu0 %v1046_v1  ;;  %v63_v2 = vsel %vm58_vm0, %v1100_v0, 0  ;;  %860 = vmatprep.mubr.msk.bf16.mxu0 %vm1047_vm1, %v1046_v1  ;;  %v1114_v3 = vld [vmem:[%s1334_s2] sm:$0xf]  ;;  %vm108_vm3 = vcmask 64512   ;;  %vm124_vm4 = vcmask 1043456   ;;  %v1140_v24 = vld [vmem:[%s1336_s4 + $0x8] sm:$0xff]  }
  0x1b   :  { %859 = vmatpush3.bf16.xpose.msra.mxu0 %v63_v2  ;;  %864 = vmatprep.subr.bf16.mxu1 %v1046_v1  ;;  %v1120_v5 = vand.u32 127, %v49_v4  ;;  %v125_v18 = vsel %vm124_vm4, %v1100_v0, 0  ;;  %v1134_v23 = vld [vmem:[%s1336_s4] sm:$0xff]   ;;  %v1147_v25 = vld [vmem:[%s1336_s4 + $0x10] sm:$0xff]   ;;  %v1154_v26 = vld [vmem:[%s1336_s4 + $0x18] sm:$0xff]   ;;  %s54_s26 = sld [smem:[#allocation3]]  ;;  %v264_v43 = vunpack.c.l.bf16 %v1114_v3 }
  0x1c   :  { %866 = vmatprep.mubr.msk.bf16.mxu1 %vm1047_vm1, %v1046_v1  ;;  %875 = vmatprep.subr.bf16.mxu0 %v1046_v1  ;;  %v1161_v27 = vld [vmem:[%s1336_s4 + $0x20] sm:$0xff]   ;;  %v1168_v28 = vld [vmem:[%s1336_s4 + $0x28] sm:$0xff]   ;;  %v1175_v29 = vld [vmem:[%s1336_s4 + $0x30] sm:$0xff]   ;;  %v1180_v30 = vshrl.u32 %v49_v4, 7  ;;  %s1048_s8 = smov 32   ;;  %s1049_s9 = smov 96  }
  0x1d   :  { %865 = vmatpush3.bf16.msra.mxu1 %v125_v18  ;;  %v1187_v41 = vld [vmem:[%s1336_s4 + $0x38] sm:$0xff]   ;;  %v224_v52 = vsel %vm124_vm4, %v1114_v3, 0  ;;  %s1050_s4 = smov 64   ;;  %vm281_vm6 = vcmask 523264   ;;  %vm283_vm7 = vcmask 785408   ;;  %vm440_vm8 = vcmask 257024  }
  0x1e   :  { %870 = vmatprep.subr.bf16.mxu1 %v1046_v1  ;;  %v1203_v2 = vld [vmem:[%s1335_s3 + $0x4] sm:$0xf] }
  0x1f   :  { %v105_v6 = vstv %s55_s13 }
  0x20   :  { %vm106_vm2 = vcmp.ge.s32.totalorder %v1120_v5, %v105_v6 }
  0x21   :  { %v167_v31 = vstv %s54_s26 }
  0x22   :  { %861 = vmatmul.mubr.msk.bf16.vlgmr.msra.gmra.mrb[0].mxu0 %vm58_vm0, %v1114_v3  ;;  %vm168_vm5 = vcmp.ge.s32.totalorder %v1180_v30, %v167_v31 }
  0x23   :  { %891 = vmatprep.mubr.msk.bf16.mxu0 %vm1047_vm1, %v1046_v1  ;;  %876 = vmatpush3.bf16.msra.mxu0 %v1134_v23 }
  0x24   :  { %877 = vmatprep.subr.bf16.mxu0 %v1046_v1 }
  0x27   :  { %878 = vmatpush3.bf16.msra.mxu0 %v1140_v24 }
  0x28   :  { %879 = vmatprep.subr.bf16.mxu0 %v1046_v1 }
  0x2b   :  { %880 = vmatpush3.bf16.msra.mxu0 %v1147_v25 }
  0x2c   :  { %881 = vmatprep.subr.bf16.mxu0 %v1046_v1 }
  0x2f   :  { %882 = vmatpush3.bf16.msra.mxu0 %v1154_v26 }
  0x30   :  { %883 = vmatprep.subr.bf16.mxu0 %v1046_v1 }
  0x33   :  { %884 = vmatpush3.bf16.msra.mxu0 %v1161_v27 }
  0x34   :  { %885 = vmatprep.subr.bf16.mxu0 %v1046_v1 }
  0x37   :  { %886 = vmatpush3.bf16.msra.mxu0 %v1168_v28 }
  0x38   :  { %887 = vmatprep.subr.bf16.mxu0 %v1046_v1 }
  0x3b   :  { %888 = vmatpush3.bf16.msra.mxu0 %v1175_v29 }
  0x3c   :  { %889 = vmatprep.subr.bf16.mxu0 %v1046_v1 }
  0x3f   :  { %890 = vmatpush3.bf16.msra.mxu0 %v1187_v41 }
  0x40   :  { %915 = vmatprep.subr.bf16.mxu0 %v1046_v1 }
  0xf5   :  { %v99_v7 = vpop.f32.mrb[0].mxu0 }
  0xf6   :  { %v862_v8 = vpop.f32.mrb[1].mxu0  ;;  %v107_v9 = vsel %vm106_vm2, -1e+30, %v99_v7  ;;  %v169_v32 = vsel %vm168_vm5, -1e+30, %v99_v7 }
  0xf7   :  { %v102_v10 = vpop.f32.mrb[2].mxu0  ;;  %v109_v11 = vsel %vm108_vm3, %v107_v9, -inf  ;;  %v170_v33 = vsel %vm108_vm3, %v169_v32, -inf  ;;  %v456_v8 = vsel %vm58_vm0, %v1203_v2, 0 }
  0xf8   :  { %v863_v12 = vpop.f32.mrb[3].mxu0  ;;  %110 = vmax.xlane.f32.xlu0 %v109_v11  ;;  %v171_v34 = vrot.slane %v170_v33, 4  ;;  %v1243_v11 = vld [vmem:[%s1337_s5] ss:$0 sm:$0xff]  ;;  %s801_s5 = sld [smem:[#allocation3 + $0x1]] }
  0xfa   :  { %v172_v35 = vmax.f32 %v170_v33, %v171_v34  ;;  %v265_v34 = vunpack.c.l.bf16 %v1100_v0 }
  0xfc   :  { %v173_v36 = vrot.slane %v172_v35, 2 }
  0xfe   :  { %v174_v37 = vmax.f32 %v172_v35, %v173_v36 }
 0x100   :  { %v175_v38 = vrot.slane %v174_v37, 1 }
 0x102   :  { %v176_v39 = vmax.f32 %v174_v37, %v175_v38  ;;  %v558_v38 = vstv %s801_s5 }
 0x103   :  { %vm559_vm10 = vcmp.ge.s32.totalorder %v1180_v30, %v558_v38 }
 0x104   :  { %v177_v40 = vsub.f32 %v169_v32, %v176_v39 }
 0x106   :  { %v178_v42 = vmul.f32 1.442695, %v177_v40 }
 0x185   :  { %v111_v13 = vpop.xlane.xlu0 %110 }
 0x186   :  { %v112_v14 = vsub.f32 %v107_v9, %v111_v13  ;;  %v1215_v9 = vld [vmem:[%s1334_s2 + $0x4] sm:$0xf]  ;;  %s802_s2 = sld [smem:[#allocation4 + $0x1]] }
 0x188   :  { %v113_v15 = vmul.f32 1.442695, %v112_v14 }
 0x18a   :  { %1002 = vpow2.f32 %v113_v15 }
 0x18c   :  { %v498_v18 = vstv %s802_s2 }
 0x18d   :  { %vm499_vm9 = vcmp.ge.s32.totalorder %v1120_v5, %v498_v18 }
 0x194   :  { %v1003_v16 = vpop.eup %1002 }
 0x195   :  { %v115_v17 = vsel %vm108_vm3, %v1003_v16, 0.0 }
 0x196   :  { %116 = vadd.xlane.f32.xlu0 %v115_v17 }
 0x223   :  { %v117_v19 = vpop.xlane.xlu0 %116 }
 0x224   :  { %1004 = vrcp.f32 %v117_v19 }
 0x225   :  { %1006 = vpow2.f32 %v178_v42 }
 0x22e   :  { %v1005_v20 = vpop.eup %1004 }
 0x22f   :  { %v119_v21 = vmul.f32 %v1005_v20, %v1003_v16  ;;  %v1007_v45 = vpop.eup %1006 }
 0x230   :  { %v180_v51 = vsel %vm108_vm3, %v1007_v45, 0.0 }
 0x231   :  { %v120_v22 = vpack.c.bf16 %v119_v21, %v119_v21  ;;  %v181_v53 = vrot.slane %v180_v51, 4 }
 0x233   :  { %867 = vmatmul.mubr.msk.bf16.vlgmr.msra.gmra.mrb[0].mxu1 %vm108_vm3, %v120_v22  ;;  %v182_v54 = vadd.f32 %v181_v53, %v180_v51 }
 0x234   :  { %872 = vmatprep.mubr.msk.f32.mxu1 %vm1047_vm1, %v1046_v1  ;;  %871 = vmatpush3.bf16.msra.mxu1 %v224_v52 }
 0x235   :  { %895 = vmatprep.subr.bf16.mxu1 %v1046_v1  ;;  %v183_v55 = vrot.slane %v182_v54, 2 }
 0x237   :  { %v184_v56 = vadd.f32 %v183_v55, %v182_v54 }
 0x239   :  { %v185_v57 = vrot.slane %v184_v56, 1 }
 0x23b   :  { %v186_v58 = vadd.f32 %v185_v57, %v184_v56 }
 0x23d   :  { %1008 = vrcp.f32 %v186_v58 }
 0x247   :  { %v1009_v59 = vpop.eup %1008 }
 0x248   :  { %v188_v60 = vmul.f32 %v1009_v59, %v1007_v45 }
 0x306   :  { %v161_v44 = vpop.f32.mrb[0].mxu1 }
 0x307   :  { %v267_v46 = vmul.f32 %v264_v43, %v161_v44  ;;  %269 = vrot.lane.b32.xlu1 %v161_v44, %s1048_s8  ;;  %v868_v47 = vpop.f32.mrb[1].mxu1  ;;  %v266_v49 = vsub.f32 %v264_v43, %v161_v44 }
 0x308   :  { %v164_v48 = vpop.f32.mrb[2].mxu1 }
 0x309   :  { %277 = vrot.lane.b32.xlu0 %v267_v46, %s1049_s9  ;;  %v869_v50 = vpop.f32.mrb[3].mxu1 }
 0x30b   :  { %273 = vrot.lane.b32.xlu1 %v266_v49, %s1050_s4 }
 0x334   :  { %189 = vxpose.xlu1.b32.start.end [1/1] (short) (narrow) %v188_v60, 8 }
 0x379   :  { %v270_v61 = vpop.permute.xlu1 %269 }
 0x37a   :  { %v280_v62 = vsel %vm58_vm0, %v264_v43, %v270_v61 }
 0x37b   :  { %v278_v3 = vpop.permute.xlu0 %277 }
 0x37d   :  { %v274_v63 = vpop.permute.xlu1 %273 }
 0x37e   :  { %v282_v4 = vsel %vm281_vm6, %v280_v62, %v274_v63 }
 0x37f   :  { %v284_v6 = vsel %vm283_vm7, %v282_v4, %v278_v3 }
 0x380   :  { %v302_v7 = vpack.c.bf16 %v284_v6, %v284_v6  ;;  %v516_v6 = vsel %vm124_vm4, %v1203_v2, 0 }
 0x382   :  { %892 = vmatmul.mubr.bf16.vlgmr.msra.gmra.mrb[4].mxu0 %v302_v7 }
 0x383   :  { %916 = vmatpush3.bf16.xpose.msra.mxu0 %v456_v8  ;;  %917 = vmatprep.mubr.msk.bf16.mxu0 %vm1047_vm1, %v1046_v1  ;;  %v615_v8 = vsel %vm124_vm4, %v1215_v9, 0 }
 0x384   :  { %927 = vmatprep.subr.bf16.mxu0 %v1046_v1 }
 0x38a   :  { %918 = vmatmul.mubr.msk.bf16.vlgmr.msra.gmra.mrb[8].mxu0 %vm58_vm0, %v1215_v9 }
 0x38b   :  { %929 = vmatprep.mubr.msk.f32.mxu0 %vm1047_vm1, %v1046_v1  ;;  %928 = vmatpush3.bf16.msra.mxu0 %v615_v8 }
 0x38c   :  { %952 = vmatprep.subr.bf16.mxu0 %v1046_v1 }
 0x3b4   :  { %v205_v10 = vpop.trf.xlu1 }
 0x3b5   :  { %873 = vmatmul.mubr.msk.f32.vlgmr.msra.gmra.mrb[4].mxu1 %vm108_vm3, %v205_v10 }
 0x3b6   :  { %896 = vmatpush3.bf16.msra.mxu1 %v1134_v23  ;;  %911 = vmatprep.mubr.msk.bf16.mxu1 %vm1047_vm1, %v1046_v1 }
 0x3b7   :  { %897 = vmatprep.subr.bf16.mxu1 %v1046_v1 }
 0x3ba   :  { %898 = vmatpush3.bf16.msra.mxu1 %v1140_v24 }
 0x3bb   :  { %899 = vmatprep.subr.bf16.mxu1 %v1046_v1 }
 0x3be   :  { %900 = vmatpush3.bf16.msra.mxu1 %v1147_v25 }
 0x3bf   :  { %901 = vmatprep.subr.bf16.mxu1 %v1046_v1 }
 0x3c2   :  { %902 = vmatpush3.bf16.msra.mxu1 %v1154_v26 }
 0x3c3   :  { %903 = vmatprep.subr.bf16.mxu1 %v1046_v1 }
 0x3c6   :  { %904 = vmatpush3.bf16.msra.mxu1 %v1161_v27 }
 0x3c7   :  { %905 = vmatprep.subr.bf16.mxu1 %v1046_v1 }
 0x3ca   :  { %906 = vmatpush3.bf16.msra.mxu1 %v1168_v28 }
 0x3cb   :  { %907 = vmatprep.subr.bf16.mxu1 %v1046_v1 }
 0x3ce   :  { %908 = vmatpush3.bf16.msra.mxu1 %v1175_v29 }
 0x3cf   :  { %909 = vmatprep.subr.bf16.mxu1 %v1046_v1 }
 0x3d2   :  { %910 = vmatpush3.bf16.msra.mxu1 %v1187_v41 }
 0x3d3   :  { %921 = vmatprep.subr.bf16.mxu1 %v1046_v1 }
 0x455   :  { %v391_v12 = vpop.f32.mrb[4].mxu0 }
 0x456   :  { %v392_v13 = vadd.f32 %v1243_v11, %v391_v12  ;;  %v893_v14 = vpop.f32.mrb[5].mxu0 }
 0x457   :  { %v394_v15 = vpop.f32.mrb[6].mxu0 }
 0x458   :  { %v438_v16 = vmax.f32 %v392_v13, 0.0  ;;  %v894_v17 = vpop.f32.mrb[7].mxu0 }
 0x45a   :  { %v439_v19 = vpack.c.bf16 %v438_v16, %v438_v16 }
 0x45c   :  { %441 = vst.msk [vmem:[%s1338_s6] sm:$0xf] %vm440_vm8, %v439_v19 }
 0x45d   :  { %v492_v20 = vpop.f32.mrb[8].mxu0 }
 0x45e   :  { %v919_v21 = vpop.f32.mrb[9].mxu0  ;;  %v500_v22 = vsel %vm499_vm9, -1e+30, %v492_v20  ;;  %v560_v39 = vsel %vm559_vm10, -1e+30, %v492_v20 }
 0x45f   :  { %v495_v31 = vpop.f32.mrb[10].mxu0  ;;  %v501_v32 = vsel %vm108_vm3, %v500_v22, -inf  ;;  %v561_v40 = vsel %vm108_vm3, %v560_v39, -inf }
 0x460   :  { %502 = vmax.xlane.f32.xlu0 %v501_v32  ;;  %v920_v33 = vpop.f32.mrb[11].mxu0  ;;  %v562_v42 = vrot.slane %v561_v40, 4 }
 0x462   :  { %v563_v43 = vmax.f32 %v561_v40, %v562_v42 }
 0x464   :  { %v564_v0 = vrot.slane %v563_v43, 2 }
 0x466   :  { %v565_v44 = vmax.f32 %v563_v43, %v564_v0 }
 0x468   :  { %v566_v45 = vrot.slane %v565_v44, 1 }
 0x46a   :  { %v567_v47 = vmax.f32 %v565_v44, %v566_v45 }
 0x46c   :  { %v568_v50 = vsub.f32 %v560_v39, %v567_v47 }
 0x46e   :  { %v569_v51 = vmul.f32 1.442695, %v568_v50 }
 0x488   :  { %v260_v35 = vpop.f32.mrb[4].mxu1 }
 0x489   :  { %v285_v36 = vsub.f32 %v265_v34, %v260_v35  ;;  %288 = vrot.lane.b32.xlu0 %v260_v35, %s1048_s8  ;;  %v874_v5 = vpop.f32.mrb[5].mxu1  ;;  %v286_v37 = vmul.f32 %v265_v34, %v260_v35 }
 0x48d   :  { %292 = vrot.lane.b32.xlu0 %v285_v36, %s1050_s4 }
 0x491   :  { %296 = vrot.lane.b32.xlu0 %v286_v37, %s1049_s9 }
 0x4ed   :  { %v503_v46 = vpop.xlane.xlu0 %502 }
 0x4ee   :  { %v504_v48 = vsub.f32 %v500_v22, %v503_v46 }
 0x4f0   :  { %v505_v49 = vmul.f32 1.442695, %v504_v48 }
 0x4f2   :  { %1010 = vpow2.f32 %v505_v49 }
 0x4f3   :  { %1012 = vpow2.f32 %v569_v51 }
 0x4fb   :  { %v289_v54 = vpop.permute.xlu0 %288 }
 0x4fc   :  { %v1011_v52 = vpop.eup %1010  ;;  %v299_v58 = vsel %vm58_vm0, %v265_v34, %v289_v54 }
 0x4fd   :  { %v507_v53 = vsel %vm108_vm3, %v1011_v52, 0.0  ;;  %v1013_v30 = vpop.eup %1012 }
 0x4fe   :  { %508 = vadd.xlane.f32.xlu1 %v507_v53  ;;  %v571_v55 = vsel %vm108_vm3, %v1013_v30, 0.0 }
 0x4ff   :  { %v572_v56 = vrot.slane %v571_v55, 4  ;;  %v293_v57 = vpop.permute.xlu0 %292 }
 0x500   :  { %v300_v60 = vsel %vm281_vm6, %v299_v58, %v293_v57 }
 0x501   :  { %v573_v59 = vadd.f32 %v572_v56, %v571_v55 }
 0x503   :  { %v297_v61 = vpop.permute.xlu0 %296  ;;  %v574_v3 = vrot.slane %v573_v59, 2 }
 0x504   :  { %v301_v62 = vsel %vm283_vm7, %v300_v60, %v297_v61 }
 0x505   :  { %v397_v63 = vpack.c.bf16 %v301_v62, %v301_v62  ;;  %v575_v4 = vadd.f32 %v574_v3, %v573_v59 }
 0x507   :  { %912 = vmatmul.mubr.bf16.vlgmr.msra.gmra.mrb[8].mxu1 %v397_v63  ;;  %v576_v7 = vrot.slane %v575_v4, 1 }
 0x508   :  { %923 = vmatprep.mubr.msk.bf16.mxu1 %vm1047_vm1, %v1046_v1  ;;  %922 = vmatpush3.bf16.msra.mxu1 %v516_v6 }
 0x509   :  { %932 = vmatprep.subr.bf16.mxu1 %v1046_v1  ;;  %v577_v10 = vadd.f32 %v576_v7, %v575_v4 }
 0x50b   :  { %1014 = vrcp.f32 %v577_v10 }
 0x515   :  { %v1015_v12 = vpop.eup %1014 }
 0x516   :  { %v579_v13 = vmul.f32 %v1015_v12, %v1013_v30 }
 0x531   :  { %580 = vxpose.xlu1.b32.start.end [1/1] (short) (narrow) %v579_v13, 8 }
 0x58b   :  { %v509_v14 = vpop.xlane.xlu1 %508 }
 0x58c   :  { %1016 = vrcp.f32 %v509_v14 }
 0x596   :  { %v1017_v15 = vpop.eup %1016 }
 0x597   :  { %v511_v16 = vmul.f32 %v1017_v15, %v1011_v52 }
 0x599   :  { %v512_v17 = vpack.c.bf16 %v511_v16, %v511_v16 }
 0x59b   :  { %924 = vmatmul.mubr.msk.bf16.vlgmr.msra.gmra.mrb[12].mxu1 %vm108_vm3, %v512_v17 }
 0x59c   :  { %933 = vmatpush3.bf16.msra.mxu1 %v1134_v23  ;;  %948 = vmatprep.mubr.msk.bf16.mxu1 %vm1047_vm1, %v1046_v1 }
 0x59d   :  { %934 = vmatprep.subr.bf16.mxu1 %v1046_v1 }
 0x5a0   :  { %935 = vmatpush3.bf16.msra.mxu1 %v1140_v24 }
 0x5a1   :  { %936 = vmatprep.subr.bf16.mxu1 %v1046_v1 }
 0x5a4   :  { %937 = vmatpush3.bf16.msra.mxu1 %v1147_v25 }
 0x5a5   :  { %938 = vmatprep.subr.bf16.mxu1 %v1046_v1 }
 0x5a8   :  { %939 = vmatpush3.bf16.msra.mxu1 %v1154_v26 }
 0x5a9   :  { %940 = vmatprep.subr.bf16.mxu1 %v1046_v1 }
 0x5ac   :  { %941 = vmatpush3.bf16.msra.mxu1 %v1161_v27 }
 0x5ad   :  { %942 = vmatprep.subr.bf16.mxu1 %v1046_v1 }
 0x5b0   :  { %943 = vmatpush3.bf16.msra.mxu1 %v1168_v28 }
 0x5b1   :  { %v596_v18 = vpop.trf.xlu1  ;;  %944 = vmatprep.subr.bf16.mxu1 %v1046_v1 }
 0x5b2   :  { %930 = vmatmul.mubr.msk.f32.vlgmr.msra.gmra.mrb[12].mxu0 %vm108_vm3, %v596_v18 }
 0x5b3   :  { %953 = vmatpush3.bf16.msra.mxu0 %v1134_v23  ;;  %968 = vmatprep.mubr.msk.bf16.mxu0 %vm1047_vm1, %v1046_v1 }
 0x5b4   :  { %954 = vmatprep.subr.bf16.mxu0 %v1046_v1  ;;  %945 = vmatpush3.bf16.msra.mxu1 %v1175_v29 }
 0x5b5   :  { %946 = vmatprep.subr.bf16.mxu1 %v1046_v1 }
 0x5b7   :  { %955 = vmatpush3.bf16.msra.mxu0 %v1140_v24 }
 0x5b8   :  { %956 = vmatprep.subr.bf16.mxu0 %v1046_v1  ;;  %947 = vmatpush3.bf16.msra.mxu1 %v1187_v41 }
 0x5bb   :  { %957 = vmatpush3.bf16.msra.mxu0 %v1147_v25 }
 0x5bc   :  { %958 = vmatprep.subr.bf16.mxu0 %v1046_v1 }
 0x5bf   :  { %959 = vmatpush3.bf16.msra.mxu0 %v1154_v26 }
 0x5c0   :  { %960 = vmatprep.subr.bf16.mxu0 %v1046_v1 }
 0x5c3   :  { %961 = vmatpush3.bf16.msra.mxu0 %v1161_v27 }
 0x5c4   :  { %962 = vmatprep.subr.bf16.mxu0 %v1046_v1 }
 0x5c7   :  { %963 = vmatpush3.bf16.msra.mxu0 %v1168_v28 }
 0x5c8   :  { %964 = vmatprep.subr.bf16.mxu0 %v1046_v1 }
 0x5cb   :  { %965 = vmatpush3.bf16.msra.mxu0 %v1175_v29 }
 0x5cc   :  { %966 = vmatprep.subr.bf16.mxu0 %v1046_v1  ;;  %v655_v1 = vunpack.c.l.bf16 %v1215_v9 }
 0x5cf   :  { %967 = vmatpush3.bf16.msra.mxu0 %v1187_v41  ;;  %v656_v41 = vunpack.c.l.bf16 %v1203_v2 }
 0x5da   :  { %v432_v23 = vpop.f32.mrb[8].mxu1 }
 0x5db   :  { %v433_v24 = vadd.f32 %v1243_v11, %v432_v23  ;;  %v913_v25 = vpop.f32.mrb[9].mxu1 }
 0x5dc   :  { %v435_v26 = vpop.f32.mrb[10].mxu1 }
 0x5dd   :  { %v442_v19 = vmax.f32 %v433_v24, 0.0  ;;  %v914_v20 = vpop.f32.mrb[11].mxu1 }
 0x5df   :  { %v443_v27 = vpack.c.bf16 %v442_v19, %v442_v19 }
 0x5e1   :  { %444 = vst.msk [vmem:[%s1339_s7] sm:$0xf] %vm440_vm8, %v443_v27 }
 0x66e   :  { %v552_v28 = vpop.f32.mrb[12].mxu1 }
 0x66f   :  { %v925_v21 = vpop.f32.mrb[13].mxu1  ;;  %v657_v31 = vsub.f32 %v655_v1, %v552_v28  ;;  %v658_v33 = vmul.f32 %v655_v1, %v552_v28 }
 0x670   :  { %v555_v29 = vpop.f32.mrb[14].mxu1 }
 0x671   :  { %v926_v22 = vpop.f32.mrb[15].mxu1 }
 0x685   :  { %v651_v32 = vpop.f32.mrb[12].mxu0 }
 0x686   :  { %v979_v34 = vpack.i.bf16 %v651_v32, %v552_v28  ;;  %v674_v35 = vsub.f32 %v656_v41, %v651_v32  ;;  %v675_v36 = vmul.f32 %v656_v41, %v651_v32  ;;  %v931_v5 = vpop.f32.mrb[13].mxu0 }
 0x688   :  { %980 = vrot.lane.b32.xlu0 %v979_v34, %s1048_s8  ;;  %v984_v37 = vpack.i.bf16 %v674_v35, %v657_v31  ;;  %v989_v38 = vpack.i.bf16 %v675_v36, %v658_v33 }
 0x68c   :  { %985 = vrot.lane.b32.xlu0 %v984_v37, %s1050_s4 }
 0x690   :  { %990 = vrot.lane.b32.xlu0 %v989_v38, %s1049_s9 }
 0x6fa   :  { %v981_v39 = vpop.permute.xlu0 %980 }
 0x6fb   :  { %v983_v9 = vunpack.i.h.bf16 %v981_v39  ;;  %v982_v42 = vunpack.i.l.bf16 %v981_v39 }
 0x6fd   :  { %v688_v44 = vsel %vm58_vm0, %v656_v41, %v983_v9  ;;  %v671_v45 = vsel %vm58_vm0, %v655_v1, %v982_v42 }
 0x6fe   :  { %v986_v40 = vpop.permute.xlu0 %985 }
 0x6ff   :  { %v988_v2 = vunpack.i.h.bf16 %v986_v40  ;;  %v987_v43 = vunpack.i.l.bf16 %v986_v40 }
 0x701   :  { %v689_v48 = vsel %vm281_vm6, %v688_v44, %v988_v2  ;;  %v672_v49 = vsel %vm281_vm6, %v671_v45, %v987_v43 }
 0x702   :  { %v991_v0 = vpop.permute.xlu0 %990 }
 0x703   :  { %v993_v46 = vunpack.i.h.bf16 %v991_v0  ;;  %v992_v47 = vunpack.i.l.bf16 %v991_v0 }
 0x705   :  { %v673_v50 = vsel %vm283_vm7, %v672_v49, %v992_v47  ;;  %v690_v51 = vsel %vm283_vm7, %v689_v48, %v993_v46 }
 0x706   :  { %v691_v52 = vpack.c.bf16 %v673_v50, %v673_v50  ;;  %v732_v53 = vpack.c.bf16 %v690_v51, %v690_v51 }
 0x708   :  { %949 = vmatmul.mubr.bf16.vlgmr.msra.gmra.mrb[16].mxu1 %v691_v52  ;;  %969 = vmatmul.mubr.bf16.vlgmr.msra.gmra.mrb[16].mxu0 %v732_v53 }
 0x7db   :  { %v726_v30 = vpop.f32.mrb[16].mxu1  ;;  %v767_v54 = vpop.f32.mrb[16].mxu0 }
 0x7dc   :  { %v727_v55 = vadd.f32 %v1243_v11, %v726_v30  ;;  %v768_v56 = vadd.f32 %v1243_v11, %v767_v54  ;;  %v950_v57 = vpop.f32.mrb[17].mxu1  ;;  %v970_v58 = vpop.f32.mrb[17].mxu0 }
 0x7dd   :  { %v729_v59 = vpop.f32.mrb[18].mxu1  ;;  %v770_v60 = vpop.f32.mrb[18].mxu0 }
 0x7de   :  { %v773_v61 = vmax.f32 %v727_v55, 0.0  ;;  %v777_v62 = vmax.f32 %v768_v56, 0.0  ;;  %v951_v63 = vpop.f32.mrb[19].mxu1  ;;  %v971_v3 = vpop.f32.mrb[19].mxu0 }
 0x7e0   :  { %v774_v4 = vpack.c.bf16 %v773_v61, %v773_v61  ;;  %v778_v6 = vpack.c.bf16 %v777_v62, %v777_v62 }
 0x7e2   :  { %808 = vst.msk [vmem:[%s1338_s6 + $0x4] sm:$0xf] %vm440_vm8, %v774_v4  ;;  %809 = vst.msk [vmem:[%s1339_s7 + $0x4] sm:$0xf] %vm440_vm8, %v778_v6 }

// kernel: esim_forward.7
= control target key start
LH: loop header
LB: loop body
LE: loop exit
PB: predicated region body
PF: predicated region fallthrough
CT: control target
= control target key end

     0   :  { %v2227_v0 = vmov 0.0   ;;  %vm2228_vm0 = vmmov 0   ;;  %vm48_vm1 = vcmask 130048   ;;  %v2229_v4 = vmov 0   ;;  %s2231_s9 = smov 96   ;;  %s2232_s12 = smov 16   ;;  %s2907_s2 = inlined_call_operand.vmem [shape: bf16[16,128], index: 2, kind: input, shape index: {}]   ;;  %s2908_s0 = inlined_call_operand.vmem [shape: bf16[1,16,16], index: 0, kind: input, shape index: {}]   ;;  %s2909_s3 = inlined_call_operand.vmem [shape: bf16[16,64], index: 3, kind: input, shape index: {}]   ;;  %s2910_s4 = inlined_call_operand.vmem [shape: bf16[16,64], index: 4, kind: input, shape index: {}]   ;;  %s2911_s5 = inlined_call_operand.vmem [shape: f32[1,128], index: 5, kind: input, shape index: {}]   ;;  %s2912_s1 = inlined_call_operand.vmem [shape: s32[1,2,1], index: 1, kind: input, shape index: {}]   ;;  %s2913_s6 = inlined_call_operand.vmem [shape: bf16[1,8,2,16], index: 6, kind: output, shape index: {0}]   ;;  %s2914_s7 = inlined_call_operand.vmem [shape: bf16[1,8,2,16], index: 7, kind: output, shape index: {1}]  }
   0x1   :  { %1960 = vmatprep.subr.bf16.mxu0 %v2227_v0  ;;  %v2093_v1 = vld [vmem:[%s2907_s2] sm:$0xff]   ;;  %1962 = vmatprep.mubr.msk.bf16.mxu0 %vm2228_vm0, %v2227_v0  ;;  %vm93_vm2 = vcmask 517120   ;;  %vm101_vm3 = vcmask 519170   ;;  %vm106_vm4 = vcmask 521220   ;;  %vm111_vm5 = vcmask 523270   ;;  %s2234_s13 = smov 80  }
   0x2   :  { %v2094_v2 = vld [vmem:[%s2908_s0] sm:$0xff]   ;;  %1966 = vmatprep.subr.bf16.mxu1 %v2227_v0  ;;  %1968 = vmatprep.mubr.msk.bf16.mxu1 %vm2228_vm0, %v2227_v0  ;;  %vm346_vm14 = vcmask 122880  }
   0x3   :  { %1961 = vmatpush3.bf16.msra.mxu0 %v2093_v1  ;;  %v2291_v3 = vld [vmem:[%s2909_s3] sm:$0xff]   ;;  %2071 = vset.pattern.permute.xlu1 %v2229_v4 }
   0x4   :  { %1972 = vmatprep.subr.bf16.mxu0 %v2227_v0  ;;  %v2297_v5 = vld [vmem:[%s2910_s4] sm:$0xff]   ;;  %2077 = vset.pattern.permute.xlu0 %v2229_v4 }
   0x5   :  { %1967 = vmatpush3.bf16.msra.mxu1 %v2291_v3  ;;  %v1868_v6 = vld [vmem:[%s2911_s5] ss:$0 sm:$0xff]  ;;  %s2230_s5 = smov 64  }
   0x6   :  { %1963 = vmatmul.mubr.msk.bf16.vlgmr.msra.gmra.mrb[0].mxu0 %vm48_vm1, %v2094_v2  ;;  %1978 = vmatprep.subr.bf16.mxu1 %v2227_v0  ;;  %v2340_v30 = vld [vmem:[%s2912_s1] sm:$0x3]  ;;  %s2233_s1 = smov 32  }
   0x7   :  { %1973 = vmatpush3.bf16.msra.mxu0 %v2297_v5  ;;  %1974 = vmatprep.mubr.msk.bf16.mxu0 %vm2228_vm0, %v2227_v0  ;;  %vm287_vm6 = vcmp.gt.s32.totalorder %v2340_v30, 0  ;;  %vm290_vm7 = vcmp.gt.s32.totalorder %v2340_v30, 7  ;;  %vm515_vm8 = vcmp.gt.s32.totalorder %v2340_v30, 1  ;;  %vm518_vm9 = vcmp.gt.s32.totalorder %v2340_v30, 6 }
   0x8   :  { %1969 = vmatmul.mubr.bf16.vlgmr.msra.gmra.mrb[0].mxu1 %v2229_v4  ;;  %1984 = vmatprep.subr.bf16.mxu0 %v2227_v0  ;;  %v1876_v34 = vsel %vm287_vm6, 1.0, %v2227_v0  ;;  %v1877_v35 = vsel %vm290_vm7, 1.0, %v2227_v0  ;;  %vm745_vm10 = vcmp.gt.s32.totalorder %v2340_v30, 2  ;;  %vm748_vm11 = vcmp.gt.s32.totalorder %v2340_v30, 5 }
   0x9   :  { %1979 = vmatpush3.bf16.msra.mxu1 %v2291_v3  ;;  %1980 = vmatprep.mubr.msk.bf16.mxu1 %vm2228_vm0, %v2227_v0  ;;  %v2072_v37 = vpack.i.bf16 %v1877_v35, %v1876_v34  ;;  %v315_v38 = vsub.f32 1.0, %v1877_v35  ;;  %v299_v46 = vsub.f32 1.0, %v1876_v34  ;;  %v1883_v35 = vsel %vm515_vm8, 1.0, %v2227_v0 }
   0xa   :  { %1990 = vmatprep.subr.bf16.mxu1 %v2227_v0  ;;  %vm975_vm12 = vcmp.gt.s32.totalorder %v2340_v30, 3  ;;  %vm978_vm13 = vcmp.gt.s32.totalorder %v2340_v30, 4 }
   0xe   :  { %1975 = vmatmul.mubr.bf16.vlgmr.msra.gmra.mrb[4].mxu0 %v2229_v4 }
   0xf   :  { %1985 = vmatpush3.bf16.msra.mxu0 %v2297_v5  ;;  %1986 = vmatprep.mubr.msk.bf16.mxu0 %vm2228_vm0, %v2227_v0 }
  0x10   :  { %1996 = vmatprep.subr.bf16.mxu0 %v2227_v0 }
  0xd9   :  { %v86_v7 = vpop.f32.mrb[0].mxu0 }
  0xda   :  { %v2317_v8 = vadd.f32 %v1868_v6, %v86_v7  ;;  %v1964_v9 = vpop.f32.mrb[1].mxu0 }
  0xdb   :  { %v89_v10 = vpop.f32.mrb[2].mxu0  ;;  %v185_v11 = vpop.f32.mrb[0].mxu1 }
  0xdc   :  { %94 = vst.msk [vmem:[#allocation2] sm:$0x3] %vm93_vm2, %v2317_v8  ;;  %v90_v12 = vadd.f32 %v1868_v6, %v89_v10  ;;  %v1965_v13 = vpop.f32.mrb[3].mxu0  ;;  %v1970_v14 = vpop.f32.mrb[1].mxu1 }
  0xdd   :  { %102 = vst.msk [vmem:[#allocation2] sm:$0xc] %vm101_vm3, %v2317_v8  ;;  %v188_v15 = vpop.f32.mrb[2].mxu1 }
  0xde   :  { %107 = vst.msk [vmem:[#allocation2] sm:$0x30] %vm106_vm4, %v2317_v8  ;;  %118 = vrot.lane.b32.xlu0 %v90_v12, %s2230_s5  ;;  %128 = vst.msk [vmem:[#allocation2 + $0x8] sm:$0x30] %vm106_vm4, %v90_v12  ;;  %v1971_v16 = vpop.f32.mrb[3].mxu1 }
  0xdf   :  { %112 = vst.msk [vmem:[#allocation2] sm:$0xc0] %vm111_vm5, %v2317_v8  ;;  %132 = vst.msk [vmem:[#allocation2 + $0x8] sm:$0xc0] %vm111_vm5, %v90_v12 }
  0xe0   :  { %116 = vst.msk [vmem:[#allocation2 + $0x8] sm:$0x3] %vm93_vm2, %v90_v12 }
  0xe1   :  { %124 = vst.msk [vmem:[#allocation2 + $0x8] sm:$0xc] %vm101_vm3, %v90_v12  ;;  %v256_v17 = vpop.f32.mrb[4].mxu0 }
  0xe2   :  { %v1976_v18 = vpop.f32.mrb[5].mxu0 }
  0xe3   :  { %v140_v19 = vld [vmem:[#allocation2] sm:$0x3]  ;;  %v259_v20 = vpop.f32.mrb[6].mxu0 }
  0xe4   :  { %v191_v21 = vadd.f32 %v185_v11, %v140_v19  ;;  %v1977_v22 = vpop.f32.mrb[7].mxu0  ;;  %v369_v15 = vld [vmem:[#allocation2 + $0x2] sm:$0x3] }
  0xe6   :  { %2097 = vtanh.f32 %v191_v21  ;;  %v1873_v24 = vmul.f32 -1.442695, %v191_v21 }
  0xe8   :  { %2099 = vpow2.f32 %v1873_v24 }
  0xf0   :  { %v2098_v23 = vpop.eup %2097 }
  0xf1   :  { %201 = vrot.lane.b32.xlu0 %v2098_v23, %s2231_s9 }
  0xf2   :  { %v2100_v26 = vpop.eup %2099 }
  0xf3   :  { %v195_v28 = vadd.f32 1.0, %v2100_v26 }
 0x150   :  { %v119_v25 = vpop.permute.xlu0 %118 }
 0x151   :  { %122 = vst.msk [vmem:[#allocation3 + $0x8] sm:$0x3] %vm93_vm2, %v119_v25 }
 0x152   :  { %126 = vst.msk [vmem:[#allocation3 + $0x8] sm:$0xc] %vm101_vm3, %v119_v25 }
 0x153   :  { %130 = vst.msk [vmem:[#allocation3 + $0x8] sm:$0x30] %vm106_vm4, %v119_v25 }
 0x154   :  { %134 = vst.msk [vmem:[#allocation3 + $0x8] sm:$0xc0] %vm111_vm5, %v119_v25 }
 0x15a   :  { %v370_v24 = vld [vmem:[#allocation3 + $0xc] sm:$0x3] }
 0x15b   :  { %v141_v27 = vld [vmem:[#allocation3 + $0xe] sm:$0x3] }
 0x15c   :  { %v262_v29 = vadd.f32 %v256_v17, %v141_v27 }
 0x15e   :  { %2101 = vtanh.f32 %v262_v29  ;;  %v1875_v39 = vmul.f32 -1.442695, %v262_v29 }
 0x15f   :  { %2103 = vrcp.f32 %v195_v28 }
 0x160   :  { %2105 = vpow2.f32 %v1875_v39 }
 0x163   :  { %v202_v32 = vpop.permute.xlu0 %201 }
 0x168   :  { %v2102_v31 = vpop.eup %2101 }
 0x169   :  { %272 = vrot.lane.b32.xlu1 %v2102_v31, %s2231_s9  ;;  %v2104_v33 = vpop.eup %2103 }
 0x16a   :  { %v204_v36 = vmul.f32 %v2104_v33, %v202_v32  ;;  %v2106_v40 = vpop.eup %2105  ;;  %v199_v45 = vmul.f32 0.0, %v2104_v33 }
 0x16b   :  { %v266_v41 = vadd.f32 1.0, %v2106_v40 }
 0x16d   :  { %206 = vrot.lane.b32.xlu1 %v204_v36, %s2232_s12  ;;  %2107 = vrcp.f32 %v266_v41  ;;  %v1884_v36 = vsel %vm518_vm9, 1.0, %v2227_v0 }
 0x16e   :  { %v544_v39 = vsub.f32 1.0, %v1884_v36 }
 0x171   :  { %2073 = vperm.xlu1 %2071, %v2072_v37  }
 0x175   :  { %318 = vperm.xlu1 %2071, %v315_v38   ;;  %v2078_v38 = vpack.i.bf16 %v1884_v36, %v1883_v35 }
 0x177   :  { %v2108_v42 = vpop.eup %2107 }
 0x178   :  { %v270_v50 = vmul.f32 0.0, %v2108_v42 }
 0x1db   :  { %v273_v43 = vpop.permute.xlu1 %272 }
 0x1dc   :  { %v275_v44 = vmul.f32 %v2108_v42, %v273_v43 }
 0x1de   :  { %277 = vrot.lane.b32.xlu0 %v275_v44, %s2232_s12 }
 0x1df   :  { %v207_v47 = vpop.permute.xlu1 %206 }
 0x1e0   :  { %v209_v48 = vadd.f32 %v207_v47, %v199_v45  ;;  %v527_v47 = vsub.f32 1.0, %v1883_v35 }
 0x1e2   :  { %2109 = vtanh.f32 %v209_v48  ;;  %302 = vperm.xlu0 %2077, %v299_v46  }
 0x1ec   :  { %v2110_v49 = vpop.eup %2109 }
 0x1ed   :  { %212 = vrot.lane.b32.xlu1 %v2110_v49, %s2233_s1 }
 0x1f0   :  { %v2074_v53 = vpop.permute.xlu1 %2073 }
 0x1f1   :  { %v2355_v56 = vunpack.i.l.bf16 %v2074_v53  ;;  %v2370_v6 = vunpack.i.h.bf16 %v2074_v53 }
 0x1f3   :  { %v307_v61 = vmul.f32 %v2355_v56, %v209_v48 }
 0x1f4   :  { %v2353_v54 = vpop.permute.xlu1 %318 }
 0x1f5   :  { %v2373_v9 = vmul.f32 0.0, %v2353_v54 }
 0x250   :  { %v278_v51 = vpop.permute.xlu0 %277 }
 0x251   :  { %v2350_v52 = vadd.f32 %v278_v51, %v270_v50 }
 0x253   :  { %2111 = vtanh.f32 %v2350_v52  ;;  %v323_v51 = vmul.f32 %v2370_v6, %v2350_v52 }
 0x255   :  { %v2408_v53 = vadd.f32 %v323_v51, %v2373_v9 }
 0x25d   :  { %v2112_v55 = vpop.eup %2111 }
 0x25e   :  { %283 = vrot.lane.b32.xlu0 %v2112_v55, %s2233_s1 }
 0x25f   :  { %v213_v57 = vpop.permute.xlu1 %212 }
 0x260   :  { %v215_v58 = vmul.f32 %v2104_v33, %v213_v57 }
 0x261   :  { %v2358_v59 = vpop.permute.xlu0 %302 }
 0x262   :  { %v298_v60 = vmul.f32 %v2355_v56, %v215_v58  ;;  %v305_v62 = vmul.f32 0.0, %v2358_v59 }
 0x264   :  { %v2363_v63 = vadd.f32 %v305_v62, %v298_v60  ;;  %v2365_v1 = vadd.f32 %v307_v61, %v305_v62 }
 0x266   :  { %v371_v2 = vpack.c.bf16 %v2363_v63, %v2363_v63 }
 0x268   :  { %373 = vrot.lane.b32.xlu1 %v371_v2, %s2234_s13 }
 0x2d0   :  { %v284_v4 = vpop.permute.xlu0 %283 }
 0x2d1   :  { %v286_v7 = vmul.f32 %v2108_v42, %v284_v4 }
 0x2d3   :  { %v314_v10 = vmul.f32 %v2370_v6, %v286_v7 }
 0x2d5   :  { %v2377_v11 = vadd.f32 %v2373_v9, %v314_v10 }
 0x2d7   :  { %v443_v12 = vpack.c.bf16 %v2377_v11, %v2377_v11 }
 0x2d9   :  { %445 = vrot.lane.b32.xlu0 %v443_v12, %s2234_s13 }
 0x2da   :  { %v374_v13 = vpop.permute.xlu1 %373 }
 0x2db   :  { %1981 = vmatmul.mubr.msk.bf16.vlgmr.msra.gmra.mrb[4].mxu1 %vm48_vm1, %v374_v13 }
 0x2dc   :  { %1991 = vmatpush3.bf16.msra.mxu1 %v2291_v3  ;;  %1992 = vmatprep.mubr.msk.bf16.mxu1 %vm2228_vm0, %v2227_v0 }
 0x2dd   :  { %2002 = vmatprep.subr.bf16.mxu1 %v2227_v0 }
 0x34b   :  { %v446_v14 = vpop.permute.xlu0 %445 }
 0x34c   :  { %1987 = vmatmul.mubr.msk.bf16.vlgmr.msra.gmra.mrb[8].mxu0 %vm48_vm1, %v446_v14 }
 0x34d   :  { %1997 = vmatpush3.bf16.msra.mxu0 %v2297_v5  ;;  %1998 = vmatprep.mubr.msk.bf16.mxu0 %vm2228_vm0, %v2227_v0 }
 0x34e   :  { %2008 = vmatprep.subr.bf16.mxu0 %v2227_v0 }
 0x3ae   :  { %v412_v16 = vpop.f32.mrb[4].mxu1 }
 0x3af   :  { %v418_v17 = vadd.f32 %v412_v16, %v369_v15  ;;  %v1982_v18 = vpop.f32.mrb[5].mxu1 }
 0x3b0   :  { %v415_v19 = vpop.f32.mrb[6].mxu1 }
 0x3b1   :  { %2113 = vtanh.f32 %v418_v17  ;;  %v1983_v20 = vpop.f32.mrb[7].mxu1  ;;  %v1880_v22 = vmul.f32 -1.442695, %v418_v17 }
 0x3b3   :  { %2115 = vpow2.f32 %v1880_v22 }
 0x3bb   :  { %v2114_v21 = vpop.eup %2113 }
 0x3bc   :  { %428 = vrot.lane.b32.xlu1 %v2114_v21, %s2231_s9 }
 0x3bd   :  { %v2116_v23 = vpop.eup %2115 }
 0x3be   :  { %v422_v26 = vadd.f32 1.0, %v2116_v23  ;;  %v599_v23 = vld [vmem:[#allocation2 + $0x4] sm:$0x3] }
 0x41f   :  { %v484_v25 = vpop.f32.mrb[8].mxu0 }
 0x420   :  { %v490_v27 = vadd.f32 %v484_v25, %v370_v24  ;;  %v1988_v28 = vpop.f32.mrb[9].mxu0 }
 0x421   :  { %v487_v29 = vpop.f32.mrb[10].mxu0 }
 0x422   :  { %2117 = vtanh.f32 %v490_v27  ;;  %v1989_v31 = vpop.f32.mrb[11].mxu0  ;;  %v1882_v40 = vmul.f32 -1.442695, %v490_v27 }
 0x423   :  { %2119 = vrcp.f32 %v422_v26 }
 0x424   :  { %2121 = vpow2.f32 %v1882_v40 }
 0x42c   :  { %v2118_v32 = vpop.eup %2117 }
 0x42d   :  { %500 = vrot.lane.b32.xlu0 %v2118_v32, %s2231_s9  ;;  %v2120_v33 = vpop.eup %2119  ;;  %v600_v32 = vld [vmem:[#allocation3 + $0xa] sm:$0x3] }
 0x42e   :  { %v429_v34 = vpop.permute.xlu1 %428  ;;  %v2122_v41 = vpop.eup %2121  ;;  %v426_v46 = vmul.f32 %v2120_v33, %v2365_v1 }
 0x42f   :  { %v431_v37 = vmul.f32 %v2120_v33, %v429_v34  ;;  %v494_v42 = vadd.f32 1.0, %v2122_v41 }
 0x431   :  { %433 = vrot.lane.b32.xlu1 %v431_v37, %s2232_s12  ;;  %2123 = vrcp.f32 %v494_v42 }
 0x435   :  { %2079 = vperm.xlu1 %2071, %v2078_v38  }
 0x439   :  { %547 = vperm.xlu1 %2071, %v544_v39  }
 0x43b   :  { %v2124_v43 = vpop.eup %2123 }
 0x43c   :  { %v498_v55 = vmul.f32 %v2124_v43, %v2408_v53 }
 0x49f   :  { %v501_v44 = vpop.permute.xlu0 %500 }
 0x4a0   :  { %v503_v45 = vmul.f32 %v2124_v43, %v501_v44  ;;  %v1892_v44 = vsel %vm748_vm11, 1.0, %v2227_v0 }
 0x4a2   :  { %505 = vrot.lane.b32.xlu0 %v503_v45, %s2232_s12 }
 0x4a3   :  { %v434_v48 = vpop.permute.xlu1 %433 }
 0x4a4   :  { %v2401_v49 = vadd.f32 %v434_v48, %v426_v46 }
 0x4a6   :  { %2125 = vtanh.f32 %v2401_v49  ;;  %530 = vperm.xlu0 %2077, %v527_v47   ;;  %v774_v47 = vsub.f32 1.0, %v1892_v44 }
 0x4b0   :  { %v2126_v50 = vpop.eup %2125 }
 0x4b1   :  { %439 = vrot.lane.b32.xlu0 %v2126_v50, %s2233_s1 }
 0x4b4   :  { %v2080_v62 = vpop.permute.xlu1 %2079 }
 0x4b5   :  { %v2417_v4 = vunpack.i.l.bf16 %v2080_v62  ;;  %v2429_v15 = vunpack.i.h.bf16 %v2080_v62 }
 0x4b8   :  { %v2427_v13 = vpop.permute.xlu1 %547 }
 0x4b9   :  { %v550_v17 = vmul.f32 %v2427_v13, %v2377_v11 }
 0x514   :  { %v506_v57 = vpop.permute.xlu0 %505 }
 0x515   :  { %v2411_v58 = vadd.f32 %v506_v57, %v498_v55 }
 0x517   :  { %2127 = vtanh.f32 %v2411_v58 }
 0x521   :  { %v2128_v60 = vpop.eup %2127 }
 0x522   :  { %511 = vrot.lane.b32.xlu1 %v2128_v60, %s2233_s1 }
 0x525   :  { %v2415_v61 = vpop.permute.xlu0 %530 }
 0x526   :  { %v533_v7 = vmul.f32 %v2415_v61, %v2363_v63  ;;  %v536_v62 = vmul.f32 %v2415_v61, %v2365_v1  ;;  %v552_v1 = vmul.f32 %v2429_v15, %v2411_v58 }
 0x529   :  { %v440_v2 = vpop.permute.xlu0 %439 }
 0x52a   :  { %v442_v52 = vmul.f32 %v2120_v33, %v440_v2 }
 0x52c   :  { %v526_v9 = vmul.f32 %v2417_v4, %v442_v52  ;;  %v535_v52 = vmul.f32 %v2417_v4, %v2401_v49 }
 0x52e   :  { %v2422_v10 = vadd.f32 %v533_v7, %v526_v9  ;;  %v2461_v7 = vadd.f32 %v536_v62, %v535_v52 }
 0x530   :  { %v601_v12 = vpack.c.bf16 %v2422_v10, %v2422_v10 }
 0x532   :  { %603 = vrot.lane.b32.xlu0 %v601_v12, %s2234_s13 }
 0x594   :  { %v512_v14 = vpop.permute.xlu1 %511 }
 0x595   :  { %v514_v16 = vmul.f32 %v2124_v43, %v512_v14  ;;  %v1891_v43 = vsel %vm745_vm10, 1.0, %v2227_v0 }
 0x596   :  { %v2083_v46 = vpack.i.bf16 %v1892_v44, %v1891_v43  ;;  %v757_v2 = vsub.f32 1.0, %v1891_v43 }
 0x597   :  { %v543_v18 = vmul.f32 %v2429_v15, %v514_v16 }
 0x599   :  { %v2434_v19 = vadd.f32 %v550_v17, %v543_v18  ;;  %v553_v17 = vmul.f32 %v2427_v13, %v2408_v53 }
 0x59b   :  { %v673_v20 = vpack.c.bf16 %v2434_v19, %v2434_v19  ;;  %v2472_v49 = vadd.f32 %v553_v17, %v552_v1  ;;  %v1899_v1 = vsel %vm975_vm12, 1.0, %v2227_v0  ;;  %v1900_v17 = vsel %vm978_vm13, 1.0, %v2227_v0 }
 0x59d   :  { %675 = vrot.lane.b32.xlu1 %v673_v20, %s2234_s13 }
 0x5a4   :  { %v604_v21 = vpop.permute.xlu0 %603 }
 0x5a5   :  { %1993 = vmatmul.mubr.msk.bf16.vlgmr.msra.gmra.mrb[8].mxu1 %vm48_vm1, %v604_v21 }
 0x5a6   :  { %2003 = vmatpush3.bf16.msra.mxu1 %v2291_v3  ;;  %2004 = vmatprep.mubr.msk.bf16.mxu1 %vm2228_vm0, %v2227_v0 }
 0x5a7   :  { %2014 = vmatprep.subr.bf16.mxu1 %v2227_v0 }
 0x60f   :  { %v676_v22 = vpop.permute.xlu1 %675 }
 0x610   :  { %1999 = vmatmul.mubr.msk.bf16.vlgmr.msra.gmra.mrb[12].mxu0 %vm48_vm1, %v676_v22 }
 0x611   :  { %2009 = vmatpush3.bf16.msra.mxu0 %v2297_v5  ;;  %2010 = vmatprep.mubr.msk.bf16.mxu0 %vm2228_vm0, %v2227_v0 }
 0x612   :  { %2020 = vmatprep.subr.bf16.mxu0 %v2227_v0 }
 0x678   :  { %v642_v24 = vpop.f32.mrb[8].mxu1 }
 0x679   :  { %v648_v25 = vadd.f32 %v642_v24, %v599_v23  ;;  %v1994_v26 = vpop.f32.mrb[9].mxu1 }
 0x67a   :  { %v645_v27 = vpop.f32.mrb[10].mxu1 }
 0x67b   :  { %2129 = vtanh.f32 %v648_v25  ;;  %v1995_v28 = vpop.f32.mrb[11].mxu1  ;;  %v1888_v31 = vmul.f32 -1.442695, %v648_v25 }
 0x67d   :  { %2131 = vpow2.f32 %v1888_v31 }
 0x685   :  { %v2130_v29 = vpop.eup %2129 }
 0x686   :  { %658 = vrot.lane.b32.xlu0 %v2130_v29, %s2231_s9 }
 0x687   :  { %v2132_v38 = vpop.eup %2131 }
 0x688   :  { %v652_v39 = vadd.f32 1.0, %v2132_v38 }
 0x6e3   :  { %v714_v33 = vpop.f32.mrb[12].mxu0 }
 0x6e4   :  { %v720_v34 = vadd.f32 %v714_v33, %v600_v32  ;;  %v2000_v35 = vpop.f32.mrb[13].mxu0 }
 0x6e5   :  { %v717_v36 = vpop.f32.mrb[14].mxu0 }
 0x6e6   :  { %2133 = vtanh.f32 %v720_v34  ;;  %v2001_v37 = vpop.f32.mrb[15].mxu0  ;;  %v1890_v48 = vmul.f32 -1.442695, %v720_v34 }
 0x6e7   :  { %2135 = vrcp.f32 %v652_v39 }
 0x6e8   :  { %2137 = vpow2.f32 %v1890_v48 }
 0x6f0   :  { %v2134_v40 = vpop.eup %2133 }
 0x6f1   :  { %730 = vrot.lane.b32.xlu1 %v2134_v40, %s2231_s9  ;;  %v2136_v41 = vpop.eup %2135 }
 0x6f2   :  { %v2138_v50 = vpop.eup %2137  ;;  %v656_v9 = vmul.f32 %v2136_v41, %v2461_v7 }
 0x6f3   :  { %v724_v51 = vadd.f32 1.0, %v2138_v50  ;;  %v830_v50 = vld [vmem:[#allocation3 + $0x8] sm:$0x3] }
 0x6f5   :  { %2139 = vrcp.f32 %v724_v51 }
 0x6f8   :  { %v659_v42 = vpop.permute.xlu0 %658 }
 0x6f9   :  { %v661_v45 = vmul.f32 %v2136_v41, %v659_v42 }
 0x6fb   :  { %663 = vrot.lane.b32.xlu0 %v661_v45, %s2232_s12 }
 0x6ff   :  { %2084 = vperm.xlu0 %2077, %v2083_v46   ;;  %v2140_v55 = vpop.eup %2139 }
 0x700   :  { %v728_v18 = vmul.f32 %v2140_v55, %v2472_v49 }
 0x703   :  { %777 = vperm.xlu0 %2077, %v774_v47  }
 0x763   :  { %v731_v57 = vpop.permute.xlu1 %730 }
 0x764   :  { %v733_v60 = vmul.f32 %v2140_v55, %v731_v57 }
 0x766   :  { %735 = vrot.lane.b32.xlu1 %v733_v60, %s2232_s12 }
 0x76a   :  { %760 = vperm.xlu1 %2071, %v757_v2  }
 0x76d   :  { %v664_v12 = vpop.permute.xlu0 %663 }
 0x76e   :  { %v2464_v14 = vadd.f32 %v664_v12, %v656_v9 }
 0x770   :  { %2141 = vtanh.f32 %v2464_v14 }
 0x77a   :  { %v2142_v16 = vpop.eup %2141 }
 0x77b   :  { %669 = vrot.lane.b32.xlu1 %v2142_v16, %s2233_s1 }
 0x77e   :  { %v2085_v24 = vpop.permute.xlu0 %2084 }
 0x77f   :  { %v2481_v58 = vunpack.i.l.bf16 %v2085_v24  ;;  %v2493_v33 = vunpack.i.h.bf16 %v2085_v24 }
 0x782   :  { %v2491_v31 = vpop.permute.xlu0 %777 }
 0x783   :  { %v780_v35 = vmul.f32 %v2491_v31, %v2434_v19 }
 0x7d8   :  { %v736_v20 = vpop.permute.xlu1 %735 }
 0x7d9   :  { %v2475_v21 = vadd.f32 %v736_v20, %v728_v18  ;;  %v2088_v20 = vpack.i.bf16 %v1900_v17, %v1899_v1 }
 0x7db   :  { %2143 = vtanh.f32 %v2475_v21 }
 0x7e5   :  { %v2144_v22 = vpop.eup %2143 }
 0x7e6   :  { %741 = vrot.lane.b32.xlu0 %v2144_v22, %s2233_s1  ;;  %v1004_v22 = vsub.f32 1.0, %v1900_v17 }
 0x7e9   :  { %v2479_v23 = vpop.permute.xlu1 %760 }
 0x7ea   :  { %v763_v53 = vmul.f32 %v2479_v23, %v2422_v10 }
 0x7ed   :  { %v670_v25 = vpop.permute.xlu1 %669 }
 0x7ee   :  { %v672_v26 = vmul.f32 %v2136_v41, %v670_v25  ;;  %v829_v41 = vld [vmem:[#allocation2 + $0x6] sm:$0x3] }
 0x7f0   :  { %v756_v27 = vmul.f32 %v2481_v58, %v672_v26 }
 0x7f2   :  { %v2486_v28 = vadd.f32 %v763_v53, %v756_v27 }
 0x7f4   :  { %v831_v29 = vpack.c.bf16 %v2486_v28, %v2486_v28 }
 0x7f6   :  { %833 = vrot.lane.b32.xlu1 %v831_v29, %s2234_s13  ;;  %v766_v29 = vmul.f32 %v2479_v23, %v2461_v7  ;;  %v782_v7 = vmul.f32 %v2493_v33, %v2475_v21 }
 0x858   :  { %v742_v32 = vpop.permute.xlu0 %741 }
 0x859   :  { %v744_v34 = vmul.f32 %v2140_v55, %v742_v32  ;;  %v987_v32 = vsub.f32 1.0, %v1899_v1 }
 0x85b   :  { %v773_v36 = vmul.f32 %v2493_v33, %v744_v34  ;;  %v765_v34 = vmul.f32 %v2481_v58, %v2464_v14 }
 0x85d   :  { %v2498_v37 = vadd.f32 %v780_v35, %v773_v36  ;;  %v2525_v35 = vadd.f32 %v766_v29, %v765_v34 }
 0x85f   :  { %v903_v38 = vpack.c.bf16 %v2498_v37, %v2498_v37 }
 0x861   :  { %905 = vrot.lane.b32.xlu0 %v903_v38, %s2234_s13 }
 0x868   :  { %v834_v39 = vpop.permute.xlu1 %833 }
 0x869   :  { %2005 = vmatmul.mubr.msk.bf16.vlgmr.msra.gmra.mrb[12].mxu1 %vm48_vm1, %v834_v39 }
 0x86a   :  { %2015 = vmatpush3.bf16.msra.mxu1 %v2291_v3  ;;  %2016 = vmatprep.mubr.msk.bf16.mxu1 %vm2228_vm0, %v2227_v0 }
 0x86b   :  { %2026 = vmatprep.subr.bf16.mxu1 %v2227_v0 }
 0x8d3   :  { %v906_v40 = vpop.permute.xlu0 %905 }
 0x8d4   :  { %2011 = vmatmul.mubr.msk.bf16.vlgmr.msra.gmra.mrb[16].mxu0 %vm48_vm1, %v906_v40 }
 0x8d5   :  { %2021 = vmatpush3.bf16.msra.mxu0 %v2297_v5  ;;  %2022 = vmatprep.mubr.msk.bf16.mxu0 %vm2228_vm0, %v2227_v0 }
 0x8d6   :  { %2032 = vmatprep.subr.bf16.mxu0 %v2227_v0 }
 0x93c   :  { %v872_v42 = vpop.f32.mrb[12].mxu1 }
 0x93d   :  { %v878_v43 = vadd.f32 %v872_v42, %v829_v41  ;;  %v2006_v44 = vpop.f32.mrb[13].mxu1  ;;  %v783_v41 = vmul.f32 %v2491_v31, %v2472_v49 }
 0x93e   :  { %v875_v45 = vpop.f32.mrb[14].mxu1 }
 0x93f   :  { %2145 = vtanh.f32 %v878_v43  ;;  %v2007_v46 = vpop.f32.mrb[15].mxu1  ;;  %v1896_v48 = vmul.f32 -1.442695, %v878_v43  ;;  %v2536_v14 = vadd.f32 %v783_v41, %v782_v7 }
 0x941   :  { %2147 = vpow2.f32 %v1896_v48 }
 0x949   :  { %v2146_v47 = vpop.eup %2145 }
 0x94a   :  { %888 = vrot.lane.b32.xlu1 %v2146_v47, %s2231_s9 }
 0x94b   :  { %v2148_v2 = vpop.eup %2147 }
 0x94c   :  { %v882_v52 = vadd.f32 1.0, %v2148_v2 }
 0x9a7   :  { %v944_v51 = vpop.f32.mrb[16].mxu0 }
 0x9a8   :  { %v950_v55 = vadd.f32 %v944_v51, %v830_v50  ;;  %v2012_v57 = vpop.f32.mrb[17].mxu0 }
 0x9a9   :  { %v947_v60 = vpop.f32.mrb[18].mxu0 }
 0x9aa   :  { %2149 = vtanh.f32 %v950_v55  ;;  %v2013_v62 = vpop.f32.mrb[19].mxu0  ;;  %v1898_v24 = vmul.f32 -1.442695, %v950_v55 }
 0x9ab   :  { %2151 = vrcp.f32 %v882_v52 }
 0x9ac   :  { %2153 = vpow2.f32 %v1898_v24 }
 0x9b4   :  { %v2150_v9 = vpop.eup %2149 }
 0x9b5   :  { %960 = vrot.lane.b32.xlu0 %v2150_v9, %s2231_s9  ;;  %v2152_v12 = vpop.eup %2151 }
 0x9b6   :  { %v2154_v25 = vpop.eup %2153  ;;  %v886_v36 = vmul.f32 %v2152_v12, %v2525_v35 }
 0x9b7   :  { %v954_v26 = vadd.f32 1.0, %v2154_v25 }
 0x9b9   :  { %2155 = vrcp.f32 %v954_v26 }
 0x9bc   :  { %v889_v16 = vpop.permute.xlu1 %888 }
 0x9bd   :  { %v891_v18 = vmul.f32 %v2152_v12, %v889_v16 }
 0x9bf   :  { %893 = vrot.lane.b32.xlu1 %v891_v18, %s2232_s12 }
 0x9c3   :  { %2089 = vperm.xlu1 %2071, %v2088_v20   ;;  %v2156_v53 = vpop.eup %2155  ;;  %v1059_v20 = vld [vmem:[#allocation2 + $0x8] sm:$0x3] }
 0x9c4   :  { %v958_v42 = vmul.f32 %v2156_v53, %v2536_v14 }
 0x9c7   :  { %1007 = vperm.xlu1 %2071, %v1004_v22  }
 0xa27   :  { %v961_v30 = vpop.permute.xlu0 %960 }
 0xa28   :  { %v963_v27 = vmul.f32 %v2156_v53, %v961_v30 }
 0xa2a   :  { %965 = vrot.lane.b32.xlu0 %v963_v27, %s2232_s12 }
 0xa2e   :  { %990 = vperm.xlu0 %2077, %v987_v32  }
 0xa31   :  { %v894_v38 = vpop.permute.xlu1 %893 }
 0xa32   :  { %v2528_v39 = vadd.f32 %v894_v38, %v886_v36 }
 0xa34   :  { %2157 = vtanh.f32 %v2528_v39 }
 0xa3e   :  { %v2158_v40 = vpop.eup %2157 }
 0xa3f   :  { %899 = vrot.lane.b32.xlu0 %v2158_v40, %s2233_s1 }
 0xa42   :  { %v2090_v47 = vpop.permute.xlu1 %2089 }
 0xa43   :  { %v2545_v21 = vunpack.i.l.bf16 %v2090_v47  ;;  %v2559_v2 = vunpack.i.h.bf16 %v2090_v47 }
 0xa46   :  { %v2557_v60 = vpop.permute.xlu1 %1007 }
 0xa47   :  { %v1010_v9 = vmul.f32 %v2557_v60, %v2498_v37 }
 0xa9c   :  { %v966_v43 = vpop.permute.xlu0 %965 }
 0xa9d   :  { %v2539_v44 = vadd.f32 %v966_v43, %v958_v42 }
 0xa9f   :  { %2159 = vtanh.f32 %v2539_v44 }
 0xaa9   :  { %v2160_v45 = vpop.eup %2159 }
 0xaaa   :  { %971 = vrot.lane.b32.xlu1 %v2160_v45, %s2233_s1 }
 0xaad   :  { %v2543_v46 = vpop.permute.xlu0 %990 }
 0xaae   :  { %v993_v49 = vmul.f32 %v2543_v46, %v2486_v28 }
 0xab1   :  { %v900_v48 = vpop.permute.xlu0 %899 }
 0xab2   :  { %v902_v50 = vmul.f32 %v2152_v12, %v900_v48 }
 0xab4   :  { %v986_v51 = vmul.f32 %v2545_v21, %v902_v50 }
 0xab6   :  { %v2550_v55 = vadd.f32 %v993_v49, %v986_v51 }
 0xab8   :  { %v1061_v57 = vpack.c.bf16 %v2550_v55, %v2550_v55 }
 0xaba   :  { %1063 = vrot.lane.b32.xlu0 %v1061_v57, %s2234_s13 }
 0xabe   :  { %96 = vrot.lane.b32.xlu0 %v2317_v8, %s2230_s5 }
 0xb1c   :  { %v972_v62 = vpop.permute.xlu1 %971 }
 0xb1d   :  { %v974_v52 = vmul.f32 %v2156_v53, %v972_v62 }
 0xb1f   :  { %v1003_v12 = vmul.f32 %v2559_v2, %v974_v52  ;;  %v996_v52 = vmul.f32 %v2543_v46, %v2525_v35  ;;  %v1012_v35 = vmul.f32 %v2559_v2, %v2539_v44  ;;  %v1206_v44 = vmul.f32 %v2557_v60, %v2550_v55 }
 0xb21   :  { %v2564_v16 = vadd.f32 %v1010_v9, %v1003_v12  ;;  %v995_v9 = vmul.f32 %v2545_v21, %v2528_v39 }
 0xb23   :  { %v1133_v1 = vpack.c.bf16 %v2564_v16, %v2564_v16  ;;  %v2591_v12 = vadd.f32 %v996_v52, %v995_v9 }
 0xb25   :  { %1135 = vrot.lane.b32.xlu1 %v1133_v1, %s2234_s13 }
 0xb2c   :  { %v1064_v17 = vpop.permute.xlu0 %1063 }
 0xb2d   :  { %2017 = vmatmul.mubr.msk.bf16.vlgmr.msra.gmra.mrb[16].mxu1 %vm48_vm1, %v1064_v17 }
 0xb2e   :  { %2027 = vmatpush3.bf16.msra.mxu1 %v2291_v3  ;;  %2028 = vmatprep.mubr.msk.bf16.mxu1 %vm2228_vm0, %v2227_v0 }
 0xb2f   :  { %2038 = vmatprep.subr.bf16.mxu1 %v2227_v0 }
 0xb30   :  { %v97_v8 = vpop.permute.xlu0 %96 }
 0xb31   :  { %99 = vst.msk [vmem:[#allocation3] sm:$0x3] %vm93_vm2, %v97_v8 }
 0xb32   :  { %104 = vst.msk [vmem:[#allocation3] sm:$0xc] %vm101_vm3, %v97_v8 }
 0xb33   :  { %109 = vst.msk [vmem:[#allocation3] sm:$0x30] %vm106_vm4, %v97_v8 }
 0xb34   :  { %114 = vst.msk [vmem:[#allocation3] sm:$0xc0] %vm111_vm5, %v97_v8 }
 0xb3b   :  { %v1060_v29 = vld [vmem:[#allocation3 + $0x6] sm:$0x3] }
 0xb97   :  { %v1136_v18 = vpop.permute.xlu1 %1135 }
 0xb98   :  { %2023 = vmatmul.mubr.msk.bf16.vlgmr.msra.gmra.mrb[20].mxu0 %vm48_vm1, %v1136_v18 }
 0xb99   :  { %2033 = vmatpush3.bf16.msra.mxu0 %v2297_v5  ;;  %2034 = vmatprep.mubr.msk.bf16.mxu0 %vm2228_vm0, %v2227_v0 }
 0xb9a   :  { %2044 = vmatprep.subr.bf16.mxu0 %v2227_v0 }
 0xc00   :  { %v1102_v22 = vpop.f32.mrb[16].mxu1 }
 0xc01   :  { %v1108_v24 = vadd.f32 %v1102_v22, %v1059_v20  ;;  %v2018_v25 = vpop.f32.mrb[17].mxu1  ;;  %v1013_v20 = vmul.f32 %v2557_v60, %v2536_v14 }
 0xc02   :  { %v1105_v26 = vpop.f32.mrb[18].mxu1 }
 0xc03   :  { %2161 = vtanh.f32 %v1108_v24  ;;  %v2019_v53 = vpop.f32.mrb[19].mxu1  ;;  %v1904_v27 = vmul.f32 -1.442695, %v1108_v24  ;;  %v2602_v22 = vadd.f32 %v1013_v20, %v1012_v35 }
 0xc05   :  { %2163 = vpow2.f32 %v1904_v27 }
 0xc0d   :  { %v2162_v30 = vpop.eup %2161 }
 0xc0e   :  { %1118 = vrot.lane.b32.xlu1 %v2162_v30, %s2231_s9 }
 0xc0f   :  { %v2164_v7 = vpop.eup %2163 }
 0xc10   :  { %v1112_v41 = vadd.f32 1.0, %v2164_v7 }
 0xc6b   :  { %v1174_v32 = vpop.f32.mrb[20].mxu0 }
 0xc6c   :  { %v1180_v34 = vadd.f32 %v1174_v32, %v1060_v29  ;;  %v2024_v36 = vpop.f32.mrb[21].mxu0 }
 0xc6d   :  { %v1177_v38 = vpop.f32.mrb[22].mxu0  ;;  %v1212_v36 = vmul.f32 %v2564_v16, %v2543_v46 }
 0xc6e   :  { %2165 = vtanh.f32 %v1180_v34  ;;  %v2025_v40 = vpop.f32.mrb[23].mxu0  ;;  %v1906_v48 = vmul.f32 -1.442695, %v1180_v34 }
 0xc6f   :  { %2167 = vrcp.f32 %v1112_v41 }
 0xc70   :  { %2169 = vpow2.f32 %v1906_v48 }
 0xc78   :  { %v2166_v42 = vpop.eup %2165 }
 0xc79   :  { %1190 = vrot.lane.b32.xlu0 %v2166_v42, %s2231_s9  ;;  %v2168_v43 = vpop.eup %2167 }
 0xc7a   :  { %v2170_v50 = vpop.eup %2169  ;;  %v1116_v1 = vmul.f32 %v2168_v43, %v2591_v12 }
 0xc7b   :  { %v1184_v49 = vadd.f32 1.0, %v2170_v50 }
 0xc7d   :  { %2171 = vrcp.f32 %v1184_v49 }
 0xc80   :  { %v1119_v45 = vpop.permute.xlu1 %1118 }
 0xc81   :  { %v1121_v47 = vmul.f32 %v2168_v43, %v1119_v45 }
 0xc83   :  { %1123 = vrot.lane.b32.xlu1 %v1121_v47, %s2232_s12 }
 0xc87   :  { %v2172_v51 = vpop.eup %2171 }
 0xc88   :  { %v1188_v39 = vmul.f32 %v2172_v51, %v2602_v22 }
 0xceb   :  { %v1191_v57 = vpop.permute.xlu0 %1190 }
 0xcec   :  { %v1193_v62 = vmul.f32 %v2172_v51, %v1191_v57  ;;  %v1262_v57 = vld [vmem:[#allocation3 + $0x4] sm:$0x3] }
 0xcee   :  { %1195 = vrot.lane.b32.xlu0 %v1193_v62, %s2232_s12 }
 0xcf5   :  { %v1124_v17 = vpop.permute.xlu1 %1123 }
 0xcf6   :  { %v2594_v8 = vadd.f32 %v1124_v17, %v1116_v1 }
 0xcf8   :  { %2173 = vtanh.f32 %v2594_v8 }
 0xd02   :  { %v2174_v18 = vpop.eup %2173 }
 0xd03   :  { %1129 = vrot.lane.b32.xlu1 %v2174_v18, %s2233_s1 }
 0xd60   :  { %v1196_v24 = vpop.permute.xlu0 %1195 }
 0xd61   :  { %v2605_v25 = vadd.f32 %v1196_v24, %v1188_v39 }
 0xd63   :  { %2175 = vtanh.f32 %v2605_v25 }
 0xd6d   :  { %v2176_v26 = vpop.eup %2175 }
 0xd6e   :  { %1201 = vrot.lane.b32.xlu0 %v2176_v26, %s2233_s1 }
 0xd75   :  { %v1130_v53 = vpop.permute.xlu1 %1129 }
 0xd76   :  { %v1132_v30 = vmul.f32 %v2168_v43, %v1130_v53  ;;  %v1261_v43 = vld [vmem:[#allocation2 + $0xa] sm:$0x3] }
 0xd78   :  { %v1205_v27 = vmul.f32 %v2559_v2, %v1132_v30 }
 0xd7a   :  { %v2612_v14 = vadd.f32 %v1206_v44, %v1205_v27 }
 0xd7c   :  { %v1263_v29 = vpack.c.bf16 %v2612_v14, %v2612_v14 }
 0xd7e   :  { %1265 = vrot.lane.b32.xlu1 %v1263_v29, %s2234_s13 }
 0xde0   :  { %v1202_v32 = vpop.permute.xlu0 %1201 }
 0xde1   :  { %v1204_v34 = vmul.f32 %v2172_v51, %v1202_v32  ;;  %v1208_v32 = vmul.f32 %v2559_v2, %v2594_v8  ;;  %v1214_v8 = vmul.f32 %v2545_v21, %v2605_v25  ;;  %v1408_v25 = vmul.f32 %v2612_v14, %v2491_v31 }
 0xde3   :  { %v1211_v38 = vmul.f32 %v2545_v21, %v1204_v34  ;;  %v1209_v34 = vmul.f32 %v2557_v60, %v2591_v12 }
 0xde5   :  { %v2620_v40 = vadd.f32 %v1212_v36, %v1211_v38  ;;  %v2643_v36 = vadd.f32 %v1209_v34, %v1208_v32 }
 0xde7   :  { %v1335_v7 = vpack.c.bf16 %v2620_v40, %v2620_v40 }
 0xde9   :  { %1337 = vrot.lane.b32.xlu0 %v1335_v7, %s2234_s13 }
 0xdf0   :  { %v1266_v41 = vpop.permute.xlu1 %1265 }
 0xdf1   :  { %2029 = vmatmul.mubr.msk.bf16.vlgmr.msra.gmra.mrb[20].mxu1 %vm48_vm1, %v1266_v41 }
 0xdf2   :  { %2039 = vmatpush3.bf16.msra.mxu1 %v2291_v3  ;;  %2040 = vmatprep.mubr.msk.bf16.mxu1 %vm2228_vm0, %v2227_v0 }
 0xdf3   :  { %2050 = vmatprep.subr.bf16.mxu1 %v2227_v0 }
 0xe5b   :  { %v1338_v42 = vpop.permute.xlu0 %1337 }
 0xe5c   :  { %2035 = vmatmul.mubr.msk.bf16.vlgmr.msra.gmra.mrb[24].mxu0 %vm48_vm1, %v1338_v42 }
 0xe5d   :  { %2045 = vmatpush3.bf16.msra.mxu0 %v2297_v5  ;;  %2046 = vmatprep.mubr.msk.bf16.mxu0 %vm2228_vm0, %v2227_v0 }
 0xe5e   :  { %2056 = vmatprep.subr.bf16.mxu0 %v2227_v0 }
 0xec4   :  { %v1304_v45 = vpop.f32.mrb[20].mxu1 }
 0xec5   :  { %v1310_v47 = vadd.f32 %v1304_v45, %v1261_v43  ;;  %v2030_v48 = vpop.f32.mrb[21].mxu1  ;;  %v1215_v43 = vmul.f32 %v2602_v22, %v2543_v46 }
 0xec6   :  { %v1307_v3 = vpop.f32.mrb[22].mxu1 }
 0xec7   :  { %2177 = vtanh.f32 %v1310_v47  ;;  %v2031_v50 = vpop.f32.mrb[23].mxu1  ;;  %v1910_v51 = vmul.f32 -1.442695, %v1310_v47  ;;  %v2654_v45 = vadd.f32 %v1215_v43, %v1214_v8 }
 0xec9   :  { %2179 = vpow2.f32 %v1910_v51 }
 0xed1   :  { %v2178_v49 = vpop.eup %2177 }
 0xed2   :  { %1320 = vrot.lane.b32.xlu1 %v2178_v49, %s2231_s9 }
 0xed3   :  { %v2180_v17 = vpop.eup %2179 }
 0xed4   :  { %v1314_v18 = vadd.f32 1.0, %v2180_v17  ;;  %v2225_v17 = vld [vmem:[%s2909_s3] sm:$0xff]  }
 0xf2f   :  { %v1376_v62 = vpop.f32.mrb[24].mxu0 }
 0xf30   :  { %v1382_v5 = vadd.f32 %v1376_v62, %v1262_v57  ;;  %v2036_v52 = vpop.f32.mrb[25].mxu0  ;;  %v1414_v62 = vmul.f32 %v2620_v40, %v2479_v23 }
 0xf31   :  { %v1379_v9 = vpop.f32.mrb[26].mxu0 }
 0xf32   :  { %2181 = vtanh.f32 %v1382_v5  ;;  %v2037_v1 = vpop.f32.mrb[27].mxu0  ;;  %v1912_v26 = vmul.f32 -1.442695, %v1382_v5 }
 0xf33   :  { %2183 = vrcp.f32 %v1314_v18 }
 0xf34   :  { %2185 = vpow2.f32 %v1912_v26 }
 0xf3c   :  { %v2182_v35 = vpop.eup %2181 }
 0xf3d   :  { %1392 = vrot.lane.b32.xlu0 %v2182_v35, %s2231_s9  ;;  %v2184_v20 = vpop.eup %2183  ;;  %v2226_v35 = vld [vmem:[%s2910_s4] sm:$0xff]  }
 0xf3e   :  { %v2186_v53 = vpop.eup %2185  ;;  %v1318_v38 = vmul.f32 %v2184_v20, %v2643_v36 }
 0xf3f   :  { %v1386_v30 = vadd.f32 1.0, %v2186_v53 }
 0xf41   :  { %2187 = vrcp.f32 %v1386_v30 }
 0xf44   :  { %v1321_v39 = vpop.permute.xlu1 %1320 }
 0xf45   :  { %v1323_v24 = vmul.f32 %v2184_v20, %v1321_v39 }
 0xf47   :  { %1325 = vrot.lane.b32.xlu1 %v1323_v24, %s2232_s12 }
 0xf4b   :  { %v2188_v44 = vpop.eup %2187 }
 0xf4c   :  { %v1390_v60 = vmul.f32 %v2188_v44, %v2654_v45 }
 0xfaf   :  { %v1393_v27 = vpop.permute.xlu0 %1392 }
 0xfb0   :  { %v1395_v29 = vmul.f32 %v2188_v44, %v1393_v27 }
 0xfb2   :  { %1397 = vrot.lane.b32.xlu0 %v1395_v29, %s2232_s12  ;;  %v1464_v29 = vld [vmem:[#allocation3 + $0x2] sm:$0x3] }
 0xfb9   :  { %v1326_v7 = vpop.permute.xlu1 %1325 }
 0xfba   :  { %v2646_v41 = vadd.f32 %v1326_v7, %v1318_v38 }
 0xfbc   :  { %2189 = vtanh.f32 %v2646_v41 }
 0xfc6   :  { %v2190_v42 = vpop.eup %2189 }
 0xfc7   :  { %1331 = vrot.lane.b32.xlu1 %v2190_v42, %s2233_s1 }
0x1024   :  { %v1398_v12 = vpop.permute.xlu0 %1397 }
0x1025   :  { %v2657_v47 = vadd.f32 %v1398_v12, %v1390_v60 }
0x1027   :  { %2191 = vtanh.f32 %v2657_v47 }
0x1031   :  { %v2192_v48 = vpop.eup %2191 }
0x1032   :  { %1403 = vrot.lane.b32.xlu0 %v2192_v48, %s2233_s1 }
0x1039   :  { %v1332_v3 = vpop.permute.xlu1 %1331 }
0x103a   :  { %v1334_v50 = vmul.f32 %v2184_v20, %v1332_v3  ;;  %v1463_v20 = vld [vmem:[#allocation2 + $0xc] sm:$0x3] }
0x103c   :  { %v1407_v49 = vmul.f32 %v2493_v33, %v1334_v50 }
0x103e   :  { %v2664_v46 = vadd.f32 %v1408_v25, %v1407_v49 }
0x1040   :  { %v1465_v22 = vpack.c.bf16 %v2664_v46, %v2664_v46 }
0x1042   :  { %1467 = vrot.lane.b32.xlu1 %v1465_v22, %s2234_s13 }
0x10a4   :  { %v1404_v51 = vpop.permute.xlu0 %1403 }
0x10a5   :  { %v1406_v57 = vmul.f32 %v2188_v44, %v1404_v51 }
0x10a7   :  { %v1413_v5 = vmul.f32 %v2481_v58, %v1406_v57  ;;  %v1410_v57 = vmul.f32 %v2493_v33, %v2646_v41  ;;  %v1416_v41 = vmul.f32 %v2481_v58, %v2657_v47  ;;  %v1610_v47 = vmul.f32 %v2664_v46, %v2427_v13 }
0x10a9   :  { %v2672_v52 = vadd.f32 %v1414_v62, %v1413_v5  ;;  %v1411_v62 = vmul.f32 %v2643_v36, %v2491_v31 }
0x10ab   :  { %v1537_v9 = vpack.c.bf16 %v2672_v52, %v2672_v52  ;;  %v2697_v5 = vadd.f32 %v1411_v62, %v1410_v57 }
0x10ad   :  { %1539 = vrot.lane.b32.xlu0 %v1537_v9, %s2234_s13 }
0x10b4   :  { %v1468_v1 = vpop.permute.xlu1 %1467 }
0x10b5   :  { %2041 = vmatmul.mubr.msk.bf16.vlgmr.msra.gmra.mrb[24].mxu1 %vm48_vm1, %v1468_v1 }
0x10b6   :  { %2051 = vmatpush3.bf16.msra.mxu1 %v2225_v17  ;;  %2052 = vmatprep.mubr.msk.bf16.mxu1 %vm2228_vm0, %v2227_v0 }
0x111f   :  { %v1540_v18 = vpop.permute.xlu0 %1539 }
0x1120   :  { %2047 = vmatmul.mubr.msk.bf16.vlgmr.msra.gmra.mrb[28].mxu0 %vm48_vm1, %v1540_v18 }
0x1121   :  { %2057 = vmatpush3.bf16.msra.mxu0 %v2226_v35  ;;  %2058 = vmatprep.mubr.msk.bf16.mxu0 %vm2228_vm0, %v2227_v0  ;;  %v1417_v35 = vmul.f32 %v2654_v45, %v2479_v23 }
0x1188   :  { %v1506_v39 = vpop.f32.mrb[24].mxu1 }
0x1189   :  { %v1512_v24 = vadd.f32 %v1506_v39, %v1463_v20  ;;  %v2042_v26 = vpop.f32.mrb[25].mxu1  ;;  %v2708_v20 = vadd.f32 %v1417_v35, %v1416_v41 }
0x118a   :  { %v1509_v53 = vpop.f32.mrb[26].mxu1 }
0x118b   :  { %2193 = vtanh.f32 %v1512_v24  ;;  %v2043_v30 = vpop.f32.mrb[27].mxu1  ;;  %v1916_v27 = vmul.f32 -1.442695, %v1512_v24 }
0x118d   :  { %2195 = vpow2.f32 %v1916_v27 }
0x1195   :  { %v2194_v44 = vpop.eup %2193 }
0x1196   :  { %1522 = vrot.lane.b32.xlu1 %v2194_v44, %s2231_s9 }
0x1197   :  { %v2196_v0 = vpop.eup %2195 }
0x1198   :  { %v1516_v8 = vadd.f32 1.0, %v2196_v0  ;;  %v1665_v0 = vld [vmem:[#allocation2 + $0xe] sm:$0x3] }
0x11f3   :  { %v1578_v32 = vpop.f32.mrb[28].mxu0 }
0x11f4   :  { %v1584_v34 = vadd.f32 %v1578_v32, %v1464_v29  ;;  %v2048_v38 = vpop.f32.mrb[29].mxu0  ;;  %v1616_v29 = vmul.f32 %v2672_v52, %v2415_v61 }
0x11f5   :  { %v1581_v7 = vpop.f32.mrb[30].mxu0 }
0x11f6   :  { %2197 = vtanh.f32 %v1584_v34  ;;  %v2049_v42 = vpop.f32.mrb[31].mxu0  ;;  %v1918_v3 = vmul.f32 -1.442695, %v1584_v34 }
0x11f7   :  { %2199 = vrcp.f32 %v1516_v8 }
0x11f8   :  { %2201 = vpow2.f32 %v1918_v3 }
0x1200   :  { %v2198_v43 = vpop.eup %2197 }
0x1201   :  { %1594 = vrot.lane.b32.xlu0 %v2198_v43, %s2231_s9  ;;  %v2200_v60 = vpop.eup %2199 }
0x1202   :  { %v2202_v50 = vpop.eup %2201  ;;  %v1520_v9 = vmul.f32 %v2200_v60, %v2697_v5 }
0x1203   :  { %v1588_v25 = vadd.f32 1.0, %v2202_v50 }
0x1205   :  { %2203 = vrcp.f32 %v1588_v25  ;;  %v1666_v25 = vld [vmem:[#allocation3] sm:$0x3] }
0x1208   :  { %v1523_v12 = vpop.permute.xlu1 %1522 }
0x1209   :  { %v1525_v48 = vmul.f32 %v2200_v60, %v1523_v12 }
0x120b   :  { %1527 = vrot.lane.b32.xlu1 %v1525_v48, %s2232_s12 }
0x120f   :  { %v2204_v49 = vpop.eup %2203 }
0x1210   :  { %v1592_v31 = vmul.f32 %v2204_v49, %v2708_v20 }
0x1273   :  { %v1595_v22 = vpop.permute.xlu0 %1594 }
0x1274   :  { %v1597_v51 = vmul.f32 %v2204_v49, %v1595_v22 }
0x1276   :  { %1599 = vrot.lane.b32.xlu0 %v1597_v51, %s2232_s12 }
0x127d   :  { %v1528_v1 = vpop.permute.xlu1 %1527 }
0x127e   :  { %v2700_v17 = vadd.f32 %v1528_v1, %v1520_v9 }
0x1280   :  { %2205 = vtanh.f32 %v2700_v17 }
0x128a   :  { %v2206_v18 = vpop.eup %2205 }
0x128b   :  { %1533 = vrot.lane.b32.xlu1 %v2206_v18, %s2233_s1 }
0x12e8   :  { %v1600_v36 = vpop.permute.xlu0 %1599 }
0x12e9   :  { %v2711_v39 = vadd.f32 %v1600_v36, %v1592_v31 }
0x12eb   :  { %2207 = vtanh.f32 %v2711_v39 }
0x12f5   :  { %v2208_v24 = vpop.eup %2207 }
0x12f6   :  { %1605 = vrot.lane.b32.xlu0 %v2208_v24, %s2233_s1 }
0x12fd   :  { %v1534_v26 = vpop.permute.xlu1 %1533 }
0x12fe   :  { %v1536_v53 = vmul.f32 %v2200_v60, %v1534_v26 }
0x1300   :  { %v1609_v30 = vmul.f32 %v2429_v15, %v1536_v53 }
0x1302   :  { %v2718_v23 = vadd.f32 %v1610_v47, %v1609_v30 }
0x1304   :  { %v1667_v45 = vpack.c.bf16 %v2718_v23, %v2718_v23 }
0x1306   :  { %1669 = vrot.lane.b32.xlu1 %v1667_v45, %s2234_s13  ;;  %v1612_v45 = vmul.f32 %v2429_v15, %v2700_v17 }
0x1368   :  { %v1606_v44 = vpop.permute.xlu0 %1605 }
0x1369   :  { %v1608_v27 = vmul.f32 %v2204_v49, %v1606_v44  ;;  %v1613_v44 = vmul.f32 %v2697_v5, %v2427_v13  ;;  %v555_v13 = vmul.f32 %v2417_v4, %v2422_v10 }
0x136b   :  { %v1615_v32 = vmul.f32 %v2417_v4, %v1608_v27  ;;  %v1614_v27 = vadd.f32 %v1613_v44, %v1612_v45  ;;  %v1618_v45 = vmul.f32 %v2417_v4, %v2711_v39  ;;  %v1619_v44 = vmul.f32 %v2708_v20, %v2415_v61 }
0x136d   :  { %v2726_v34 = vadd.f32 %v1616_v29, %v1615_v32 }
0x136f   :  { %v1739_v38 = vpack.c.bf16 %v2726_v34, %v2726_v34 }
0x1371   :  { %1741 = vrot.lane.b32.xlu0 %v1739_v38, %s2234_s13  ;;  %v2235_v38 = vmov 1966171168  }
0x1378   :  { %v1670_v7 = vpop.permute.xlu1 %1669 }
0x1379   :  { %2053 = vmatmul.mubr.msk.bf16.vlgmr.msra.gmra.mrb[28].mxu1 %vm48_vm1, %v1670_v7  ;;  %v330_v7 = vunpack.c.l.s4 %v2235_v38 }
0x13e3   :  { %v1742_v42 = vpop.permute.xlu0 %1741 }
0x13e4   :  { %2059 = vmatmul.mubr.msk.bf16.vlgmr.msra.gmra.mrb[32].mxu0 %vm48_vm1, %v1742_v42  ;;  %v332_v42 = vlaneseq }
0x144c   :  { %v1708_v8 = vpop.f32.mrb[28].mxu1 }
0x144d   :  { %v1714_v43 = vadd.f32 %v1708_v8, %v1665_v0  ;;  %v2054_v60 = vpop.f32.mrb[29].mxu1  ;;  %v325_v8 = vmul.f32 %v2355_v56, %v2363_v63 }
0x144e   :  { %v1711_v12 = vpop.f32.mrb[30].mxu1  ;;  %v333_v60 = vshrl.u32 %v332_v42, 7 }
0x144f   :  { %2209 = vtanh.f32 %v1714_v43  ;;  %v2055_v48 = vpop.f32.mrb[31].mxu1  ;;  %v1922_v50 = vmul.f32 -1.442695, %v1714_v43  ;;  %v331_v43 = vunpack.c.0.s8 %v330_v7  ;;  %v327_v17 = vpack.c.bf16 %v325_v8, %v325_v8 }
0x1450   :  { %v557_v48 = vpack.c.bf16 %v555_v13, %v555_v13  ;;  %v326_v7 = vmul.f32 %v2370_v6, %v2377_v11  ;;  %v786_v8 = vmul.f32 %v2493_v33, %v2498_v37  ;;  %v1218_v37 = vmul.f32 %v2545_v21, %v2620_v40 }
0x1451   :  { %2211 = vpow2.f32 %v1922_v50  ;;  %v2750_v12 = vsub.s32 %v331_v43, %v333_v60  ;;  %v1016_v60 = vmul.f32 %v2559_v2, %v2564_v16 }
0x1452   :  { %v348_v42 = vpack.c.bf16 %v326_v7, %v326_v7  ;;  %v808_v20 = vpack.c.bf16 %v786_v8, %v786_v8 }
0x1453   :  { %v335_v5 = vrot.slane %v327_v17, %v2750_v12  ;;  %v565_v63 = vrot.slane %v557_v48, %v2750_v12  ;;  %v1812_v48 = vmul.f32 %v2718_v23, %v2353_v54 }
0x1454   :  { %v356_v39 = vrot.slane %v348_v42, %v2750_v12 }
0x1455   :  { %v572_v10 = vrot.slane %v565_v63, %v2750_v12 }
0x1456   :  { %v363_v17 = vrot.slane %v356_v39, %v2750_v12 }
0x1459   :  { %v2210_v3 = vpop.eup %2209 }
0x145a   :  { %1724 = vrot.lane.b32.xlu1 %v2210_v3, %s2231_s9  ;;  %v785_v3 = vmul.f32 %v2481_v58, %v2486_v28  ;;  %v1217_v28 = vmul.f32 %v2559_v2, %v2612_v14  ;;  %v1621_v14 = vmul.f32 %v2429_v15, %v2718_v23 }
0x145b   :  { %v2212_v9 = vpop.eup %2211 }
0x145c   :  { %v1718_v1 = vadd.f32 1.0, %v2212_v9 }
0x14b7   :  { %v1780_v49 = vpop.f32.mrb[32].mxu0 }
0x14b8   :  { %v1786_v22 = vadd.f32 %v1780_v49, %v1666_v25  ;;  %v2060_v51 = vpop.f32.mrb[33].mxu0  ;;  %v342_v25 = vrot.slane %v335_v5, %v2750_v12  ;;  %v787_v49 = vpack.c.bf16 %v785_v3, %v785_v3 }
0x14b9   :  { %v1783_v57 = vpop.f32.mrb[34].mxu0 }
0x14ba   :  { %2213 = vtanh.f32 %v1786_v22  ;;  %v2061_v62 = vpop.f32.mrb[35].mxu0  ;;  %v1924_v36 = vmul.f32 -1.442695, %v1786_v22  ;;  %v1015_v22 = vmul.f32 %v2545_v21, %v2550_v55  ;;  %v795_v51 = vrot.slane %v787_v49, %v2750_v12 }
0x14bb   :  { %2215 = vrcp.f32 %v1718_v1  ;;  %v1219_v1 = vpack.c.bf16 %v1217_v28, %v1217_v28  ;;  %v1419_v55 = vmul.f32 %v2493_v33, %v2664_v46  ;;  %v1622_v49 = vmul.f32 %v2417_v4, %v2726_v34 }
0x14bc   :  { %2217 = vpow2.f32 %v1924_v36  ;;  %v1017_v57 = vpack.c.bf16 %v1015_v22, %v1015_v22  ;;  %v802_v62 = vrot.slane %v795_v51, %v2750_v12 }
0x14bd   :  { %v1644_v51 = vpack.c.bf16 %v1622_v49, %v1622_v49 }
0x14be   :  { %v1025_v9 = vrot.slane %v1017_v57, %v2750_v12 }
0x14c4   :  { %v2214_v18 = vpop.eup %2213 }
0x14c5   :  { %1796 = vrot.lane.b32.xlu0 %v2214_v18, %s2231_s9  ;;  %v2735_v41 = vpop.eup %2215  ;;  %v1032_v18 = vrot.slane %v1025_v9, %v2750_v12 }
0x14c6   :  { %v2218_v24 = vpop.eup %2217  ;;  %v1722_v29 = vmul.f32 %v2735_v41, %v1614_v27  ;;  %v1620_v27 = vadd.f32 %v1619_v44, %v1618_v45 }
0x14c7   :  { %v1790_v26 = vadd.f32 1.0, %v2218_v24 }
0x14c9   :  { %2219 = vrcp.f32 %v1790_v26  ;;  %v1623_v26 = vpack.c.bf16 %v1621_v14, %v1621_v14 }
0x14cc   :  { %v1725_v35 = vpop.permute.xlu1 %1724 }
0x14cd   :  { %v1727_v31 = vmul.f32 %v2735_v41, %v1725_v35  ;;  %v1227_v35 = vrot.slane %v1219_v1, %v2750_v12 }
0x14cf   :  { %1729 = vrot.lane.b32.xlu1 %v1727_v31, %s2232_s12  ;;  %v1421_v31 = vpack.c.bf16 %v1419_v55, %v1419_v55  ;;  %v1234_v36 = vrot.slane %v1227_v35, %v2750_v12 }
0x14d1   :  { %v1429_v24 = vrot.slane %v1421_v31, %v2750_v12 }
0x14d3   :  { %v2739_v53 = vpop.eup %2219  ;;  %v1436_v46 = vrot.slane %v1429_v24, %v2750_v12 }
0x1537   :  { %v1797_v47 = vpop.permute.xlu0 %1796 }
0x1538   :  { %v1799_v30 = vmul.f32 %v2739_v53, %v1797_v47  ;;  %v1631_v47 = vrot.slane %v1623_v26, %v2750_v12 }
0x153a   :  { %1801 = vrot.lane.b32.xlu0 %v1799_v30, %s2232_s12  ;;  %v1638_v30 = vrot.slane %v1631_v47, %v2750_v12 }
0x1541   :  { %v1730_v32 = vpop.permute.xlu1 %1729 }
0x1542   :  { %v1732_v0 = vadd.f32 %v1730_v32, %v1722_v29  ;;  %v1794_v29 = vmul.f32 %v2739_v53, %v1620_v27 }
0x1544   :  { %2221 = vtanh.f32 %v1732_v0  ;;  %v556_v0 = vmul.f32 %v2429_v15, %v2434_v19  ;;  %v816_v15 = vrot.slane %v808_v20, %v2750_v12  ;;  %v1038_v19 = vpack.c.bf16 %v1016_v60, %v1016_v60 }
0x1546   :  { %v578_v43 = vpack.c.bf16 %v556_v0, %v556_v0  ;;  %v823_v2 = vrot.slane %v816_v15, %v2750_v12  ;;  %v1046_v16 = vrot.slane %v1038_v19, %v2750_v12 }
0x1548   :  { %v586_v11 = vrot.slane %v578_v43, %v2750_v12 }
0x154a   :  { %v593_v33 = vrot.slane %v586_v11, %v2750_v12 }
0x154e   :  { %v2222_v50 = vpop.eup %2221 }
0x154f   :  { %1735 = vrot.lane.b32.xlu1 %v2222_v50, %s2233_s1  ;;  %v1240_v50 = vpack.c.bf16 %v1218_v37, %v1218_v37 }
0x1551   :  { %v1248_v54 = vrot.slane %v1240_v50, %v2750_v12 }
0x1553   :  { %343 = vrot.lane.b32.xlu1 %v342_v25, %s2234_s13  ;;  %v1420_v25 = vmul.f32 %v2481_v58, %v2672_v52  ;;  %v1255_v22 = vrot.slane %v1248_v54, %v2750_v12 }
0x1555   :  { %v1442_v23 = vpack.c.bf16 %v1420_v25, %v1420_v25 }
0x1557   :  { %573 = vrot.lane.b32.xlu1 %v572_v10, %s2234_s13 }
0x155b   :  { %803 = vrot.lane.b32.xlu1 %v802_v62, %s2234_s13  ;;  %v1652_v62 = vrot.slane %v1644_v51, %v2750_v12 }
0x155d   :  { %v1659_v1 = vrot.slane %v1652_v62, %v2750_v12 }
0x155f   :  { %1033 = vrot.lane.b32.xlu1 %v1032_v18, %s2234_s13 }
0x1563   :  { %1235 = vrot.lane.b32.xlu1 %v1234_v36, %s2234_s13  ;;  %v1815_v36 = vmul.f32 %v2726_v34, %v2358_v59 }
0x1567   :  { %1437 = vrot.lane.b32.xlu1 %v1436_v46, %s2234_s13 }
0x156b   :  { %1639 = vrot.lane.b32.xlu1 %v1638_v30, %s2234_s13 }
0x15ac   :  { %v1802_v32 = vpop.permute.xlu0 %1801 }
0x15ad   :  { %v1804_v38 = vadd.f32 %v1802_v32, %v1794_v29 }
0x15af   :  { %2223 = vtanh.f32 %v1804_v38 }
0x15b9   :  { %v2224_v61 = vpop.eup %2223 }
0x15ba   :  { %1807 = vrot.lane.b32.xlu0 %v2224_v61, %s2233_s1 }
0x15be   :  { %364 = vrot.lane.b32.xlu0 %v363_v17, %s2234_s13 }
0x15c1   :  { %v1736_v13 = vpop.permute.xlu1 %1735 }
0x15c2   :  { %v1738_v5 = vmul.f32 %v2735_v41, %v1736_v13  ;;  %594 = vrot.lane.b32.xlu0 %v593_v33, %s2234_s13  ;;  %v1053_v41 = vrot.slane %v1046_v16, %v2750_v12 }
0x15c4   :  { %v1811_v3 = vmul.f32 %v2370_v6, %v1738_v5 }
0x15c5   :  { %v344_v21 = vpop.permute.xlu1 %343 }
0x15c6   :  { %v1813_v40 = vadd.f32 %v1812_v48, %v1811_v3  ;;  %347 = vst.msk [vmem:[%s2913_s6] sm:$0x1] %vm346_vm14, %v344_v21  ;;  %824 = vrot.lane.b32.xlu0 %v823_v2, %s2234_s13 }
0x15c8   :  { %v1817_v63 = vmul.f32 %v2370_v6, %v1813_v40  ;;  %v1450_v6 = vrot.slane %v1442_v23, %v2750_v12 }
0x15c9   :  { %v574_v58 = vpop.permute.xlu1 %573 }
0x15ca   :  { %v1819_v52 = vpack.c.bf16 %v1817_v63, %v1817_v63  ;;  %1885 = vst.msk [vmem:[%s2913_s6 + $0x1] sm:$0x1] %vm346_vm14, %v574_v58  ;;  %1054 = vrot.lane.b32.xlu0 %v1053_v41, %s2234_s13  ;;  %v1457_v28 = vrot.slane %v1450_v6, %v2750_v12 }
0x15cc   :  { %v1827_v10 = vrot.slane %v1819_v52, %v2750_v12 }
0x15cd   :  { %v804_v57 = vpop.permute.xlu1 %803 }
0x15ce   :  { %1893 = vst.msk [vmem:[%s2913_s6 + $0x2] sm:$0x1] %vm346_vm14, %v804_v57  ;;  %1256 = vrot.lane.b32.xlu0 %v1255_v22, %s2234_s13  ;;  %v1834_v4 = vrot.slane %v1827_v10, %v2750_v12 }
0x15d0   :  { %1835 = vrot.lane.b32.xlu1 %v1834_v4, %s2234_s13 }
0x15d1   :  { %v1034_v9 = vpop.permute.xlu1 %1033 }
0x15d2   :  { %1901 = vst.msk [vmem:[%s2913_s6 + $0x3] sm:$0x1] %vm346_vm14, %v1034_v9  ;;  %1458 = vrot.lane.b32.xlu0 %v1457_v28, %s2234_s13 }
0x15d5   :  { %v1236_v55 = vpop.permute.xlu1 %1235 }
0x15d6   :  { %1907 = vst.msk [vmem:[%s2913_s6 + $0x4] sm:$0x1] %vm346_vm14, %v1236_v55  ;;  %1660 = vrot.lane.b32.xlu0 %v1659_v1, %s2234_s13 }
0x15d9   :  { %v1438_v18 = vpop.permute.xlu1 %1437 }
0x15da   :  { %1913 = vst.msk [vmem:[%s2913_s6 + $0x5] sm:$0x1] %vm346_vm14, %v1438_v18 }
0x15dd   :  { %v1640_v35 = vpop.permute.xlu1 %1639 }
0x15de   :  { %1919 = vst.msk [vmem:[%s2913_s6 + $0x6] sm:$0x1] %vm346_vm14, %v1640_v35 }
0x162c   :  { %v1808_v31 = vpop.permute.xlu0 %1807 }
0x162d   :  { %v1810_v14 = vmul.f32 %v2739_v53, %v1808_v31 }
0x162f   :  { %v1814_v24 = vmul.f32 %v2355_v56, %v1810_v14 }
0x1630   :  { %v365_v26 = vpop.permute.xlu0 %364 }
0x1631   :  { %v1816_v46 = vadd.f32 %v1815_v36, %v1814_v24  ;;  %1878 = vst.msk [vmem:[%s2914_s7 + $0x7] sm:$0x1] %vm346_vm14, %v365_v26 }
0x1633   :  { %v1818_v47 = vmul.f32 %v2355_v56, %v1816_v46 }
0x1634   :  { %v595_v30 = vpop.permute.xlu0 %594 }
0x1635   :  { %v1840_v45 = vpack.c.bf16 %v1818_v47, %v1818_v47  ;;  %1886 = vst.msk [vmem:[%s2914_s7 + $0x6] sm:$0x1] %vm346_vm14, %v595_v30 }
0x1637   :  { %v1848_v59 = vrot.slane %v1840_v45, %v2750_v12 }
0x1638   :  { %v825_v34 = vpop.permute.xlu0 %824 }
0x1639   :  { %1894 = vst.msk [vmem:[%s2914_s7 + $0x5] sm:$0x1] %vm346_vm14, %v825_v34  ;;  %v1855_v53 = vrot.slane %v1848_v59, %v2750_v12 }
0x163b   :  { %1856 = vrot.lane.b32.xlu0 %v1855_v53, %s2234_s13 }
0x163c   :  { %v1055_v56 = vpop.permute.xlu0 %1054 }
0x163d   :  { %1902 = vst.msk [vmem:[%s2914_s7 + $0x4] sm:$0x1] %vm346_vm14, %v1055_v56 }
0x1640   :  { %v1257_v44 = vpop.permute.xlu0 %1256 }
0x1641   :  { %1908 = vst.msk [vmem:[%s2914_s7 + $0x3] sm:$0x1] %vm346_vm14, %v1257_v44 }
0x1642   :  { %v1836_v27 = vpop.permute.xlu1 %1835 }
0x1643   :  { %1925 = vst.msk [vmem:[%s2913_s6 + $0x7] sm:$0x1] %vm346_vm14, %v1836_v27 }
0x1644   :  { %v1459_v12 = vpop.permute.xlu0 %1458 }
0x1645   :  { %1914 = vst.msk [vmem:[%s2914_s7 + $0x2] sm:$0x1] %vm346_vm14, %v1459_v12 }
0x1648   :  { %v1661_v29 = vpop.permute.xlu0 %1660 }
0x1649   :  { %1920 = vst.msk [vmem:[%s2914_s7 + $0x1] sm:$0x1] %vm346_vm14, %v1661_v29 }
0x16ad   :  { %v1857_v32 = vpop.permute.xlu0 %1856 }
0x16ae   :  { %1859 = vst.msk [vmem:[%s2914_s7] sm:$0x1] %vm346_vm14, %v1857_v32 }

// kernel: esim_forward.9
= control target key start
LH: loop header
LB: loop body
LE: loop exit
PB: predicated region body
PF: predicated region fallthrough
CT: control target
= control target key end

     0   :  { %v1935_v0 = vmov 0.0   ;;  %vm1936_vm0 = vmmov 0   ;;  %v1937_v3 = vmov 0   ;;  %vm54_vm1 = vcmask 261120   ;;  %s1939_s7 = smov 96   ;;  %s1940_s10 = smov 16   ;;  %s2573_s2 = inlined_call_operand.vmem [shape: bf16[32,128], index: 2, kind: input, shape index: {}]   ;;  %s2574_s3 = inlined_call_operand.vmem [shape: bf16[16,64], index: 3, kind: input, shape index: {}]   ;;  %s2575_s0 = inlined_call_operand.vmem [shape: bf16[1,16,32], index: 0, kind: input, shape index: {}]   ;;  %s2576_s4 = inlined_call_operand.vmem [shape: bf16[16,64], index: 4, kind: input, shape index: {}]   ;;  %s2577_s5 = inlined_call_operand.vmem [shape: f32[1,128], index: 5, kind: input, shape index: {}]   ;;  %s2578_s1 = inlined_call_operand.vmem [shape: s32[1,2,1], index: 1, kind: input, shape index: {}]   ;;  %s2579_s6 = inlined_call_operand.vmem [shape: f32[1,2,64], index: 6, kind: output, shape index: {}]  }
   0x1   :  { %1665 = vmatprep.subr.bf16.mxu0 %v1935_v0  ;;  %v1800_v1 = vld [vmem:[%s2573_s2] sm:$0xff]   ;;  %1669 = vmatprep.mubr.msk.bf16.mxu0 %vm1936_vm0, %v1935_v0  ;;  %v1801_v2 = vld [vmem:[%s2573_s2 + $0x8] sm:$0xff]   ;;  %vm99_vm2 = vcmask 517120   ;;  %vm107_vm3 = vcmask 519170   ;;  %vm112_vm4 = vcmask 521220   ;;  %vm117_vm5 = vcmask 523270  }
   0x2   :  { %1673 = vmatprep.subr.bf16.mxu1 %v1935_v0  ;;  %1675 = vmatprep.mubr.msk.bf16.mxu1 %vm1936_vm0, %v1935_v0  ;;  %v1995_v4 = vld [vmem:[%s2574_s3] sm:$0xff]   ;;  %s1942_s11 = smov 80   ;;  %vm154_vm8 = vcmask 130048   ;;  %vm1578_vm15 = vcmask 392192  }
   0x3   :  { %1666 = vmatpush3.bf16.msra.mxu0 %v1800_v1  ;;  %1778 = vset.pattern.permute.xlu1 %v1937_v3  ;;  %v1802_v5 = vld [vmem:[%s2575_s0] sm:$0xff]  }
   0x4   :  { %1667 = vmatprep.subr.bf16.mxu0 %v1935_v0  ;;  %1784 = vset.pattern.permute.xlu0 %v1937_v3  ;;  %v2004_v6 = vld [vmem:[%s2576_s4] sm:$0xff]  }
   0x5   :  { %1674 = vmatpush3.bf16.msra.mxu1 %v1995_v4  ;;  %v1585_v7 = vld [vmem:[%s2577_s5] ss:$0 sm:$0xff]  ;;  %s1938_s5 = smov 64  }
   0x6   :  { %1679 = vmatprep.subr.bf16.mxu1 %v1935_v0  ;;  %v2047_v31 = vld [vmem:[%s2578_s1] sm:$0x3]  ;;  %s1941_s1 = smov 32  }
   0x7   :  { %1668 = vmatpush3.bf16.msra.mxu0 %v1801_v2  ;;  %vm294_vm6 = vcmp.gt.s32.totalorder %v2047_v31, 0  ;;  %vm297_vm7 = vcmp.gt.s32.totalorder %v2047_v31, 7  ;;  %vm482_vm9 = vcmp.gt.s32.totalorder %v2047_v31, 1  ;;  %vm485_vm10 = vcmp.gt.s32.totalorder %v2047_v31, 6 }
   0x8   :  { %1685 = vmatprep.subr.bf16.mxu0 %v1935_v0  ;;  %1676 = vmatmul.mubr.bf16.vlgmr.msra.gmra.mrb[0].mxu1 %v1937_v3  ;;  %v1594_v35 = vsel %vm294_vm6, 1.0, %v1935_v0  ;;  %v1595_v36 = vsel %vm297_vm7, 1.0, %v1935_v0  ;;  %vm674_vm11 = vcmp.gt.s32.totalorder %v2047_v31, 2  ;;  %vm677_vm12 = vcmp.gt.s32.totalorder %v2047_v31, 5 }
   0x9   :  { %1680 = vmatpush3.bf16.msra.mxu1 %v2004_v6  ;;  %1681 = vmatprep.mubr.msk.bf16.mxu1 %vm1936_vm0, %v1935_v0  ;;  %v1779_v38 = vpack.i.bf16 %v1595_v36, %v1594_v35  ;;  %v322_v39 = vsub.f32 1.0, %v1595_v36  ;;  %v306_v47 = vsub.f32 1.0, %v1594_v35  ;;  %v1600_v36 = vsel %vm482_vm9, 1.0, %v1935_v0 }
   0xa   :  { %1670 = vmatmul.mubr.msk.bf16.vlgmr.msra.gmra.mrb[0].mxu0 %vm54_vm1, %v1802_v5  ;;  %1691 = vmatprep.subr.bf16.mxu1 %v1935_v0  ;;  %vm866_vm13 = vcmp.gt.s32.totalorder %v2047_v31, 3  ;;  %vm869_vm14 = vcmp.gt.s32.totalorder %v2047_v31, 4 }
   0xb   :  { %1686 = vmatpush3.bf16.msra.mxu0 %v1995_v4  ;;  %1687 = vmatprep.mubr.msk.bf16.mxu0 %vm1936_vm0, %v1935_v0 }
   0xc   :  { %1697 = vmatprep.subr.bf16.mxu0 %v1935_v0 }
  0x10   :  { %1682 = vmatmul.mubr.bf16.vlgmr.msra.gmra.mrb[4].mxu1 %v1937_v3 }
  0x11   :  { %1692 = vmatpush3.bf16.msra.mxu1 %v2004_v6  ;;  %1693 = vmatprep.mubr.msk.bf16.mxu1 %vm1936_vm0, %v1935_v0 }
  0x12   :  { %1703 = vmatprep.subr.bf16.mxu1 %v1935_v0 }
  0xdb   :  { %v192_v8 = vpop.f32.mrb[0].mxu1 }
  0xdc   :  { %v1677_v10 = vpop.f32.mrb[1].mxu1 }
  0xdd   :  { %v92_v9 = vpop.f32.mrb[0].mxu0  ;;  %v195_v13 = vpop.f32.mrb[2].mxu1 }
  0xde   :  { %v2024_v11 = vadd.f32 %v1585_v7, %v92_v9  ;;  %v1671_v12 = vpop.f32.mrb[1].mxu0  ;;  %v1678_v15 = vpop.f32.mrb[3].mxu1 }
  0xdf   :  { %v95_v14 = vpop.f32.mrb[2].mxu0 }
  0xe0   :  { %100 = vst.msk [vmem:[#allocation2] sm:$0x3] %vm99_vm2, %v2024_v11  ;;  %v96_v16 = vadd.f32 %v1585_v7, %v95_v14  ;;  %v1672_v17 = vpop.f32.mrb[3].mxu0 }
  0xe1   :  { %108 = vst.msk [vmem:[#allocation2] sm:$0xc] %vm107_vm3, %v2024_v11 }
  0xe2   :  { %113 = vst.msk [vmem:[#allocation2] sm:$0x30] %vm112_vm4, %v2024_v11  ;;  %124 = vrot.lane.b32.xlu0 %v96_v16, %s1938_s5  ;;  %134 = vst.msk [vmem:[#allocation2 + $0x8] sm:$0x30] %vm112_vm4, %v96_v16 }
  0xe3   :  { %118 = vst.msk [vmem:[#allocation2] sm:$0xc0] %vm117_vm5, %v2024_v11  ;;  %138 = vst.msk [vmem:[#allocation2 + $0x8] sm:$0xc0] %vm117_vm5, %v96_v16  ;;  %v263_v18 = vpop.f32.mrb[4].mxu1 }
  0xe4   :  { %122 = vst.msk [vmem:[#allocation2 + $0x8] sm:$0x3] %vm99_vm2, %v96_v16  ;;  %v1683_v19 = vpop.f32.mrb[5].mxu1 }
  0xe5   :  { %130 = vst.msk [vmem:[#allocation2 + $0x8] sm:$0xc] %vm107_vm3, %v96_v16  ;;  %v266_v20 = vpop.f32.mrb[6].mxu1 }
  0xe6   :  { %v1684_v22 = vpop.f32.mrb[7].mxu1 }
  0xe7   :  { %v146_v21 = vld [vmem:[#allocation2] sm:$0x3] }
  0xe8   :  { %v198_v23 = vadd.f32 %v192_v8, %v146_v21  ;;  %v336_v16 = vld [vmem:[#allocation2 + $0x2] sm:$0x3] }
  0xea   :  { %1805 = vtanh.f32 %v198_v23  ;;  %v1591_v25 = vmul.f32 -1.442695, %v198_v23 }
  0xec   :  { %1807 = vpow2.f32 %v1591_v25 }
  0xf4   :  { %v1806_v24 = vpop.eup %1805 }
  0xf5   :  { %208 = vrot.lane.b32.xlu0 %v1806_v24, %s1939_s7 }
  0xf6   :  { %v1808_v27 = vpop.eup %1807 }
  0xf7   :  { %v202_v29 = vadd.f32 1.0, %v1808_v27 }
 0x154   :  { %v125_v26 = vpop.permute.xlu0 %124 }
 0x155   :  { %128 = vst.msk [vmem:[#allocation3 + $0x8] sm:$0x3] %vm99_vm2, %v125_v26 }
 0x156   :  { %132 = vst.msk [vmem:[#allocation3 + $0x8] sm:$0xc] %vm107_vm3, %v125_v26 }
 0x157   :  { %136 = vst.msk [vmem:[#allocation3 + $0x8] sm:$0x30] %vm112_vm4, %v125_v26 }
 0x158   :  { %140 = vst.msk [vmem:[#allocation3 + $0x8] sm:$0xc0] %vm117_vm5, %v125_v26 }
 0x15e   :  { %v337_v25 = vld [vmem:[#allocation3 + $0xc] sm:$0x3] }
 0x15f   :  { %v147_v28 = vld [vmem:[#allocation3 + $0xe] sm:$0x3] }
 0x160   :  { %v269_v30 = vadd.f32 %v263_v18, %v147_v28 }
 0x162   :  { %1809 = vtanh.f32 %v269_v30  ;;  %v1593_v40 = vmul.f32 -1.442695, %v269_v30 }
 0x163   :  { %1811 = vrcp.f32 %v202_v29 }
 0x164   :  { %1813 = vpow2.f32 %v1593_v40 }
 0x167   :  { %v209_v33 = vpop.permute.xlu0 %208 }
 0x16c   :  { %v1810_v32 = vpop.eup %1809 }
 0x16d   :  { %279 = vrot.lane.b32.xlu1 %v1810_v32, %s1939_s7  ;;  %v1812_v34 = vpop.eup %1811 }
 0x16e   :  { %v211_v37 = vmul.f32 %v1812_v34, %v209_v33  ;;  %v1814_v41 = vpop.eup %1813  ;;  %v206_v46 = vmul.f32 0.0, %v1812_v34 }
 0x16f   :  { %v273_v42 = vadd.f32 1.0, %v1814_v41 }
 0x171   :  { %213 = vrot.lane.b32.xlu1 %v211_v37, %s1940_s10  ;;  %1815 = vrcp.f32 %v273_v42  ;;  %v1601_v37 = vsel %vm485_vm10, 1.0, %v1935_v0 }
 0x172   :  { %v511_v40 = vsub.f32 1.0, %v1601_v37 }
 0x175   :  { %1780 = vperm.xlu1 %1778, %v1779_v38  }
 0x179   :  { %325 = vperm.xlu1 %1778, %v322_v39   ;;  %v1785_v39 = vpack.i.bf16 %v1601_v37, %v1600_v36 }
 0x17b   :  { %v1816_v43 = vpop.eup %1815 }
 0x17c   :  { %v277_v51 = vmul.f32 0.0, %v1816_v43 }
 0x1df   :  { %v280_v44 = vpop.permute.xlu1 %279 }
 0x1e0   :  { %v282_v45 = vmul.f32 %v1816_v43, %v280_v44 }
 0x1e2   :  { %284 = vrot.lane.b32.xlu0 %v282_v45, %s1940_s10 }
 0x1e3   :  { %v214_v48 = vpop.permute.xlu1 %213 }
 0x1e4   :  { %v216_v49 = vadd.f32 %v214_v48, %v206_v46  ;;  %v494_v48 = vsub.f32 1.0, %v1600_v36 }
 0x1e6   :  { %1817 = vtanh.f32 %v216_v49  ;;  %309 = vperm.xlu0 %1784, %v306_v47  }
 0x1f0   :  { %v1818_v50 = vpop.eup %1817 }
 0x1f1   :  { %219 = vrot.lane.b32.xlu1 %v1818_v50, %s1941_s1 }
 0x1f4   :  { %v1781_v54 = vpop.permute.xlu1 %1780 }
 0x1f5   :  { %v2062_v57 = vunpack.i.l.bf16 %v1781_v54  ;;  %v2077_v7 = vunpack.i.h.bf16 %v1781_v54 }
 0x1f7   :  { %v314_v62 = vmul.f32 %v2062_v57, %v216_v49 }
 0x1f8   :  { %v2060_v55 = vpop.permute.xlu1 %325 }
 0x1f9   :  { %v2080_v9 = vmul.f32 0.0, %v2060_v55 }
 0x254   :  { %v285_v52 = vpop.permute.xlu0 %284 }
 0x255   :  { %v2057_v53 = vadd.f32 %v285_v52, %v277_v51 }
 0x257   :  { %1819 = vtanh.f32 %v2057_v53  ;;  %v330_v52 = vmul.f32 %v2077_v7, %v2057_v53 }
 0x259   :  { %v2115_v54 = vadd.f32 %v330_v52, %v2080_v9 }
 0x261   :  { %v1820_v56 = vpop.eup %1819 }
 0x262   :  { %290 = vrot.lane.b32.xlu0 %v1820_v56, %s1941_s1 }
 0x263   :  { %v220_v58 = vpop.permute.xlu1 %219 }
 0x264   :  { %v222_v59 = vmul.f32 %v1812_v34, %v220_v58 }
 0x265   :  { %v2065_v60 = vpop.permute.xlu0 %309 }
 0x266   :  { %v305_v61 = vmul.f32 %v2062_v57, %v222_v59  ;;  %v312_v63 = vmul.f32 0.0, %v2065_v60 }
 0x268   :  { %v2070_v1 = vadd.f32 %v312_v63, %v305_v61  ;;  %v2072_v2 = vadd.f32 %v314_v62, %v312_v63 }
 0x26a   :  { %v338_v3 = vpack.c.bf16 %v2070_v1, %v2070_v1 }
 0x26c   :  { %340 = vrot.lane.b32.xlu1 %v338_v3, %s1942_s11 }
 0x2d4   :  { %v291_v5 = vpop.permute.xlu0 %290 }
 0x2d5   :  { %v293_v8 = vmul.f32 %v1816_v43, %v291_v5 }
 0x2d7   :  { %v321_v10 = vmul.f32 %v2077_v7, %v293_v8 }
 0x2d9   :  { %v2084_v12 = vadd.f32 %v2080_v9, %v321_v10 }
 0x2db   :  { %v410_v13 = vpack.c.bf16 %v2084_v12, %v2084_v12 }
 0x2dd   :  { %412 = vrot.lane.b32.xlu0 %v410_v13, %s1942_s11 }
 0x2de   :  { %v341_v14 = vpop.permute.xlu1 %340 }
 0x2df   :  { %1688 = vmatmul.mubr.msk.bf16.vlgmr.msra.gmra.mrb[4].mxu0 %vm154_vm8, %v341_v14 }
 0x2e0   :  { %1698 = vmatpush3.bf16.msra.mxu0 %v1995_v4  ;;  %1699 = vmatprep.mubr.msk.bf16.mxu0 %vm1936_vm0, %v1935_v0 }
 0x2e1   :  { %1709 = vmatprep.subr.bf16.mxu0 %v1935_v0 }
 0x34f   :  { %v413_v15 = vpop.permute.xlu0 %412 }
 0x350   :  { %1694 = vmatmul.mubr.msk.bf16.vlgmr.msra.gmra.mrb[8].mxu1 %vm154_vm8, %v413_v15 }
 0x351   :  { %1704 = vmatpush3.bf16.msra.mxu1 %v2004_v6  ;;  %1705 = vmatprep.mubr.msk.bf16.mxu1 %vm1936_vm0, %v1935_v0 }
 0x352   :  { %1715 = vmatprep.subr.bf16.mxu1 %v1935_v0 }
 0x3b2   :  { %v379_v17 = vpop.f32.mrb[4].mxu0 }
 0x3b3   :  { %v385_v18 = vadd.f32 %v379_v17, %v336_v16  ;;  %v1689_v19 = vpop.f32.mrb[5].mxu0 }
 0x3b4   :  { %v382_v20 = vpop.f32.mrb[6].mxu0 }
 0x3b5   :  { %1821 = vtanh.f32 %v385_v18  ;;  %v1690_v21 = vpop.f32.mrb[7].mxu0  ;;  %v1597_v23 = vmul.f32 -1.442695, %v385_v18 }
 0x3b6   :  { %v2145_v21 = vmul.f32 %v2077_v7, %v2084_v12 }
 0x3b7   :  { %1823 = vpow2.f32 %v1597_v23 }
 0x3bf   :  { %v1822_v22 = vpop.eup %1821 }
 0x3c0   :  { %395 = vrot.lane.b32.xlu1 %v1822_v22, %s1939_s7 }
 0x3c1   :  { %v1824_v24 = vpop.eup %1823 }
 0x3c2   :  { %v389_v27 = vadd.f32 1.0, %v1824_v24 }
 0x423   :  { %v451_v26 = vpop.f32.mrb[8].mxu1 }
 0x424   :  { %v457_v28 = vadd.f32 %v451_v26, %v337_v25  ;;  %v1695_v29 = vpop.f32.mrb[9].mxu1  ;;  %v528_v26 = vld [vmem:[#allocation2 + $0x4] sm:$0x3] }
 0x425   :  { %v454_v30 = vpop.f32.mrb[10].mxu1 }
 0x426   :  { %1825 = vtanh.f32 %v457_v28  ;;  %v1696_v32 = vpop.f32.mrb[11].mxu1  ;;  %v1599_v41 = vmul.f32 -1.442695, %v457_v28 }
 0x427   :  { %1827 = vrcp.f32 %v389_v27 }
 0x428   :  { %1829 = vpow2.f32 %v1599_v41 }
 0x430   :  { %v1826_v33 = vpop.eup %1825 }
 0x431   :  { %467 = vrot.lane.b32.xlu0 %v1826_v33, %s1939_s7  ;;  %v1828_v34 = vpop.eup %1827 }
 0x432   :  { %v396_v35 = vpop.permute.xlu1 %395  ;;  %v1830_v42 = vpop.eup %1829  ;;  %v393_v47 = vmul.f32 %v1828_v34, %v2072_v2 }
 0x433   :  { %v398_v38 = vmul.f32 %v1828_v34, %v396_v35  ;;  %v461_v43 = vadd.f32 1.0, %v1830_v42  ;;  %v529_v35 = vld [vmem:[#allocation3 + $0xa] sm:$0x3] }
 0x435   :  { %400 = vrot.lane.b32.xlu1 %v398_v38, %s1940_s10  ;;  %1831 = vrcp.f32 %v461_v43 }
 0x439   :  { %1786 = vperm.xlu1 %1778, %v1785_v39  }
 0x43d   :  { %514 = vperm.xlu1 %1778, %v511_v40  }
 0x43f   :  { %v1832_v44 = vpop.eup %1831 }
 0x440   :  { %v465_v56 = vmul.f32 %v1832_v44, %v2115_v54 }
 0x4a3   :  { %v468_v45 = vpop.permute.xlu0 %467 }
 0x4a4   :  { %v470_v46 = vmul.f32 %v1832_v44, %v468_v45 }
 0x4a6   :  { %472 = vrot.lane.b32.xlu0 %v470_v46, %s1940_s10  ;;  %v1606_v46 = vsel %vm674_vm11, 1.0, %v1935_v0 }
 0x4a7   :  { %v401_v49 = vpop.permute.xlu1 %400 }
 0x4a8   :  { %v2108_v50 = vadd.f32 %v401_v49, %v393_v47  ;;  %v1607_v47 = vsel %vm677_vm12, 1.0, %v1935_v0 }
 0x4a9   :  { %v1790_v49 = vpack.i.bf16 %v1607_v47, %v1606_v46 }
 0x4aa   :  { %1833 = vtanh.f32 %v2108_v50  ;;  %497 = vperm.xlu0 %1784, %v494_v48  }
 0x4b4   :  { %v1834_v51 = vpop.eup %1833 }
 0x4b5   :  { %406 = vrot.lane.b32.xlu0 %v1834_v51, %s1941_s1  ;;  %v703_v51 = vsub.f32 1.0, %v1607_v47 }
 0x4b8   :  { %v1787_v63 = vpop.permute.xlu1 %1786 }
 0x4b9   :  { %v2124_v5 = vunpack.i.l.bf16 %v1787_v63  ;;  %v2136_v16 = vunpack.i.h.bf16 %v1787_v63 }
 0x4bc   :  { %v2134_v14 = vpop.permute.xlu1 %514 }
 0x4bd   :  { %v517_v18 = vmul.f32 %v2134_v14, %v2084_v12 }
 0x518   :  { %v473_v58 = vpop.permute.xlu0 %472 }
 0x519   :  { %v2118_v59 = vadd.f32 %v473_v58, %v465_v56 }
 0x51b   :  { %1835 = vtanh.f32 %v2118_v59 }
 0x525   :  { %v1836_v61 = vpop.eup %1835 }
 0x526   :  { %478 = vrot.lane.b32.xlu1 %v1836_v61, %s1941_s1 }
 0x529   :  { %v2122_v62 = vpop.permute.xlu0 %497 }
 0x52a   :  { %v500_v8 = vmul.f32 %v2122_v62, %v2070_v1 }
 0x52d   :  { %v407_v3 = vpop.permute.xlu0 %406 }
 0x52e   :  { %v409_v53 = vmul.f32 %v1828_v34, %v407_v3 }
 0x530   :  { %v493_v9 = vmul.f32 %v2124_v5, %v409_v53  ;;  %v503_v53 = vmul.f32 %v2122_v62, %v2072_v2  ;;  %v519_v2 = vmul.f32 %v2136_v16, %v2118_v59 }
 0x532   :  { %v2129_v10 = vadd.f32 %v500_v8, %v493_v9  ;;  %v686_v8 = vsub.f32 1.0, %v1606_v46  ;;  %v502_v9 = vmul.f32 %v2124_v5, %v2108_v50 }
 0x534   :  { %v530_v13 = vpack.c.bf16 %v2129_v10, %v2129_v10 }
 0x536   :  { %532 = vrot.lane.b32.xlu0 %v530_v13, %s1942_s11  ;;  %v2178_v13 = vadd.f32 %v503_v53, %v502_v9 }
 0x598   :  { %v479_v15 = vpop.permute.xlu1 %478 }
 0x599   :  { %v481_v17 = vmul.f32 %v1832_v44, %v479_v15 }
 0x59b   :  { %v510_v19 = vmul.f32 %v2136_v16, %v481_v17 }
 0x59d   :  { %v2141_v20 = vadd.f32 %v517_v18, %v510_v19 }
 0x59f   :  { %v2149_v22 = vmul.f32 %v2136_v16, %v2141_v20  ;;  %v602_v23 = vpack.c.bf16 %v2141_v20, %v2141_v20 }
 0x5a1   :  { %v527_v24 = vmax.f32 %v2145_v21, %v2149_v22  ;;  %604 = vrot.lane.b32.xlu1 %v602_v23, %s1942_s11  ;;  %v520_v23 = vmul.f32 %v2134_v14, %v2115_v54 }
 0x5a3   :  { %v2189_v50 = vadd.f32 %v520_v23, %v519_v2 }
 0x5a8   :  { %v533_v25 = vpop.permute.xlu0 %532 }
 0x5a9   :  { %1700 = vmatmul.mubr.msk.bf16.vlgmr.msra.gmra.mrb[8].mxu0 %vm154_vm8, %v533_v25 }
 0x5aa   :  { %1710 = vmatpush3.bf16.msra.mxu0 %v1995_v4  ;;  %1711 = vmatprep.mubr.msk.bf16.mxu0 %vm1936_vm0, %v1935_v0 }
 0x5ab   :  { %1721 = vmatprep.subr.bf16.mxu0 %v1935_v0 }
 0x613   :  { %v605_v12 = vpop.permute.xlu1 %604 }
 0x614   :  { %1706 = vmatmul.mubr.msk.bf16.vlgmr.msra.gmra.mrb[12].mxu1 %vm154_vm8, %v605_v12 }
 0x615   :  { %1716 = vmatpush3.bf16.msra.mxu1 %v2004_v6  ;;  %1717 = vmatprep.mubr.msk.bf16.mxu1 %vm1936_vm0, %v1935_v0 }
 0x616   :  { %1727 = vmatprep.subr.bf16.mxu1 %v1935_v0 }
 0x67c   :  { %v571_v27 = vpop.f32.mrb[8].mxu0 }
 0x67d   :  { %v577_v28 = vadd.f32 %v571_v27, %v528_v26  ;;  %v1701_v29 = vpop.f32.mrb[9].mxu0 }
 0x67e   :  { %v574_v30 = vpop.f32.mrb[10].mxu0 }
 0x67f   :  { %1837 = vtanh.f32 %v577_v28  ;;  %v1702_v32 = vpop.f32.mrb[11].mxu0  ;;  %v1603_v34 = vmul.f32 -1.442695, %v577_v28 }
 0x681   :  { %1839 = vpow2.f32 %v1603_v34 }
 0x689   :  { %v1838_v33 = vpop.eup %1837 }
 0x68a   :  { %587 = vrot.lane.b32.xlu0 %v1838_v33, %s1939_s7 }
 0x68b   :  { %v1840_v41 = vpop.eup %1839 }
 0x68c   :  { %v581_v42 = vadd.f32 1.0, %v1840_v41 }
 0x6e7   :  { %v643_v36 = vpop.f32.mrb[12].mxu1 }
 0x6e8   :  { %v649_v37 = vadd.f32 %v643_v36, %v529_v35  ;;  %v1707_v38 = vpop.f32.mrb[13].mxu1 }
 0x6e9   :  { %v646_v39 = vpop.f32.mrb[14].mxu1 }
 0x6ea   :  { %1841 = vtanh.f32 %v649_v37  ;;  %v1708_v40 = vpop.f32.mrb[15].mxu1  ;;  %v1605_v52 = vmul.f32 -1.442695, %v649_v37 }
 0x6eb   :  { %1843 = vrcp.f32 %v581_v42 }
 0x6ec   :  { %1845 = vpow2.f32 %v1605_v52 }
 0x6f4   :  { %v1842_v43 = vpop.eup %1841 }
 0x6f5   :  { %659 = vrot.lane.b32.xlu1 %v1842_v43, %s1939_s7  ;;  %v1844_v44 = vpop.eup %1843 }
 0x6f6   :  { %v1846_v56 = vpop.eup %1845  ;;  %v585_v15 = vmul.f32 %v1844_v44, %v2178_v13 }
 0x6f7   :  { %v653_v58 = vadd.f32 1.0, %v1846_v56 }
 0x6f9   :  { %1847 = vrcp.f32 %v653_v58 }
 0x6fc   :  { %v588_v45 = vpop.permute.xlu0 %587 }
 0x6fd   :  { %v590_v48 = vmul.f32 %v1844_v44, %v588_v45 }
 0x6ff   :  { %592 = vrot.lane.b32.xlu0 %v590_v48, %s1940_s10 }
 0x703   :  { %1791 = vperm.xlu0 %1784, %v1790_v49   ;;  %v1848_v61 = vpop.eup %1847 }
 0x704   :  { %v657_v25 = vmul.f32 %v1848_v61, %v2189_v50 }
 0x707   :  { %706 = vperm.xlu0 %1784, %v703_v51  }
 0x767   :  { %v660_v63 = vpop.permute.xlu1 %659 }
 0x768   :  { %v662_v3 = vmul.f32 %v1848_v61, %v660_v63 }
 0x76a   :  { %664 = vrot.lane.b32.xlu1 %v662_v3, %s1940_s10 }
 0x76e   :  { %689 = vperm.xlu1 %1778, %v686_v8  }
 0x771   :  { %v593_v17 = vpop.permute.xlu0 %592 }
 0x772   :  { %v2181_v18 = vadd.f32 %v593_v17, %v585_v15 }
 0x774   :  { %1849 = vtanh.f32 %v2181_v18 }
 0x77e   :  { %v1850_v19 = vpop.eup %1849 }
 0x77f   :  { %598 = vrot.lane.b32.xlu1 %v1850_v19, %s1941_s1 }
 0x782   :  { %v1792_v29 = vpop.permute.xlu0 %1791 }
 0x783   :  { %v2198_v59 = vunpack.i.l.bf16 %v1792_v29  ;;  %v2210_v38 = vunpack.i.h.bf16 %v1792_v29 }
 0x786   :  { %v2208_v36 = vpop.permute.xlu0 %706 }
 0x787   :  { %v709_v40 = vmul.f32 %v2208_v36, %v2141_v20 }
 0x7dc   :  { %v665_v12 = vpop.permute.xlu1 %664 }
 0x7dd   :  { %v2192_v26 = vadd.f32 %v665_v12, %v657_v25  ;;  %v1612_v25 = vsel %vm866_vm13, 1.0, %v1935_v0  ;;  %v1613_v12 = vsel %vm869_vm14, 1.0, %v1935_v0 }
 0x7de   :  { %v1795_v29 = vpack.i.bf16 %v1613_v12, %v1612_v25 }
 0x7df   :  { %1851 = vtanh.f32 %v2192_v26 }
 0x7e9   :  { %v1852_v27 = vpop.eup %1851 }
 0x7ea   :  { %670 = vrot.lane.b32.xlu0 %v1852_v27, %s1941_s1 }
 0x7ed   :  { %v2196_v28 = vpop.permute.xlu1 %689 }
 0x7ee   :  { %v692_v54 = vmul.f32 %v2196_v28, %v2129_v10 }
 0x7f1   :  { %v599_v30 = vpop.permute.xlu1 %598 }
 0x7f2   :  { %v601_v32 = vmul.f32 %v1844_v44, %v599_v30  ;;  %v895_v30 = vsub.f32 1.0, %v1613_v12 }
 0x7f4   :  { %v685_v33 = vmul.f32 %v2198_v59, %v601_v32 }
 0x7f6   :  { %v2203_v34 = vadd.f32 %v692_v54, %v685_v33 }
 0x7f8   :  { %v722_v35 = vpack.c.bf16 %v2203_v34, %v2203_v34 }
 0x7fa   :  { %724 = vrot.lane.b32.xlu1 %v722_v35, %s1942_s11 }
 0x85c   :  { %v671_v37 = vpop.permute.xlu0 %670 }
 0x85d   :  { %v673_v39 = vmul.f32 %v1848_v61, %v671_v37  ;;  %v721_v61 = vld [vmem:[#allocation3 + $0x8] sm:$0x3] }
 0x85f   :  { %v702_v41 = vmul.f32 %v2210_v38, %v673_v39  ;;  %v695_v39 = vmul.f32 %v2196_v28, %v2178_v13  ;;  %v711_v13 = vmul.f32 %v2210_v38, %v2192_v26 }
 0x861   :  { %v2215_v42 = vadd.f32 %v709_v40, %v702_v41  ;;  %v878_v40 = vsub.f32 1.0, %v1612_v25  ;;  %v694_v41 = vmul.f32 %v2198_v59, %v2181_v18 }
 0x863   :  { %v2219_v43 = vmul.f32 %v2210_v38, %v2215_v42  ;;  %v794_v44 = vpack.c.bf16 %v2215_v42, %v2215_v42 }
 0x865   :  { %v2227_v45 = vmax.f32 %v527_v24, %v2219_v43  ;;  %796 = vrot.lane.b32.xlu0 %v794_v44, %s1942_s11  ;;  %v720_v24 = vld [vmem:[#allocation2 + $0x6] sm:$0x3]  ;;  %v2252_v44 = vadd.f32 %v695_v39, %v694_v41 }
 0x86c   :  { %v725_v20 = vpop.permute.xlu1 %724 }
 0x86d   :  { %1712 = vmatmul.mubr.msk.bf16.vlgmr.msra.gmra.mrb[12].mxu0 %vm154_vm8, %v725_v20 }
 0x86e   :  { %1722 = vmatpush3.bf16.msra.mxu0 %v1995_v4  ;;  %1723 = vmatprep.mubr.msk.bf16.mxu0 %vm1936_vm0, %v1935_v0 }
 0x86f   :  { %1733 = vmatprep.subr.bf16.mxu0 %v1935_v0 }
 0x8d7   :  { %v797_v46 = vpop.permute.xlu0 %796 }
 0x8d8   :  { %1718 = vmatmul.mubr.msk.bf16.vlgmr.msra.gmra.mrb[16].mxu1 %vm154_vm8, %v797_v46 }
 0x8d9   :  { %1728 = vmatpush3.bf16.msra.mxu1 %v2004_v6  ;;  %1729 = vmatprep.mubr.msk.bf16.mxu1 %vm1936_vm0, %v1935_v0 }
 0x8da   :  { %1739 = vmatprep.subr.bf16.mxu1 %v1935_v0 }
 0x940   :  { %v763_v47 = vpop.f32.mrb[12].mxu0 }
 0x941   :  { %v769_v48 = vadd.f32 %v763_v47, %v720_v24  ;;  %v1713_v49 = vpop.f32.mrb[13].mxu0 }
 0x942   :  { %v766_v51 = vpop.f32.mrb[14].mxu0 }
 0x943   :  { %1853 = vtanh.f32 %v769_v48  ;;  %v1714_v52 = vpop.f32.mrb[15].mxu0  ;;  %v1609_v58 = vmul.f32 -1.442695, %v769_v48  ;;  %v712_v48 = vmul.f32 %v2208_v36, %v2189_v50 }
 0x945   :  { %1855 = vpow2.f32 %v1609_v58  ;;  %v2263_v18 = vadd.f32 %v712_v48, %v711_v13 }
 0x94d   :  { %v1854_v56 = vpop.eup %1853 }
 0x94e   :  { %779 = vrot.lane.b32.xlu1 %v1854_v56, %s1939_s7 }
 0x94f   :  { %v1856_v15 = vpop.eup %1855 }
 0x950   :  { %v773_v17 = vadd.f32 1.0, %v1856_v15 }
 0x9ab   :  { %v835_v63 = vpop.f32.mrb[16].mxu1 }
 0x9ac   :  { %v841_v3 = vadd.f32 %v835_v63, %v721_v61  ;;  %v1719_v53 = vpop.f32.mrb[17].mxu1 }
 0x9ad   :  { %v838_v8 = vpop.f32.mrb[18].mxu1 }
 0x9ae   :  { %1857 = vtanh.f32 %v841_v3  ;;  %v1720_v9 = vpop.f32.mrb[19].mxu1  ;;  %v1611_v32 = vmul.f32 -1.442695, %v841_v3 }
 0x9af   :  { %1859 = vrcp.f32 %v773_v17 }
 0x9b0   :  { %1861 = vpow2.f32 %v1611_v32 }
 0x9b8   :  { %v1858_v19 = vpop.eup %1857 }
 0x9b9   :  { %851 = vrot.lane.b32.xlu0 %v1858_v19, %s1939_s7  ;;  %v1860_v2 = vpop.eup %1859 }
 0x9ba   :  { %v1862_v54 = vpop.eup %1861  ;;  %v777_v20 = vmul.f32 %v1860_v2, %v2252_v44 }
 0x9bb   :  { %v845_v33 = vadd.f32 1.0, %v1862_v54 }
 0x9bd   :  { %1863 = vrcp.f32 %v845_v33 }
 0x9c0   :  { %v780_v23 = vpop.permute.xlu1 %779 }
 0x9c1   :  { %v782_v27 = vmul.f32 %v1860_v2, %v780_v23 }
 0x9c3   :  { %784 = vrot.lane.b32.xlu1 %v782_v27, %s1940_s10 }
 0x9c7   :  { %1796 = vperm.xlu1 %1778, %v1795_v29   ;;  %v1864_v35 = vpop.eup %1863 }
 0x9c8   :  { %v849_v49 = vmul.f32 %v1864_v35, %v2263_v18 }
 0x9cb   :  { %898 = vperm.xlu1 %1778, %v895_v30  }
 0xa2b   :  { %v852_v31 = vpop.permute.xlu0 %851 }
 0xa2c   :  { %v854_v37 = vmul.f32 %v1864_v35, %v852_v31 }
 0xa2e   :  { %856 = vrot.lane.b32.xlu0 %v854_v37, %s1940_s10 }
 0xa32   :  { %881 = vperm.xlu0 %1784, %v878_v40  }
 0xa35   :  { %v785_v46 = vpop.permute.xlu1 %784 }
 0xa36   :  { %v2255_v24 = vadd.f32 %v785_v46, %v777_v20 }
 0xa38   :  { %1865 = vtanh.f32 %v2255_v24 }
 0xa42   :  { %v1866_v47 = vpop.eup %1865 }
 0xa43   :  { %790 = vrot.lane.b32.xlu0 %v1866_v47, %s1941_s1 }
 0xa46   :  { %v1797_v61 = vpop.permute.xlu1 %1796 }
 0xa47   :  { %v2272_v26 = vunpack.i.l.bf16 %v1797_v61  ;;  %v2286_v19 = vunpack.i.h.bf16 %v1797_v61 }
 0xa4a   :  { %v2284_v15 = vpop.permute.xlu1 %898 }
 0xa4b   :  { %v901_v23 = vmul.f32 %v2284_v15, %v2215_v42 }
 0xaa0   :  { %v857_v51 = vpop.permute.xlu0 %856 }
 0xaa1   :  { %v2266_v52 = vadd.f32 %v857_v51, %v849_v49 }
 0xaa3   :  { %1867 = vtanh.f32 %v2266_v52 }
 0xaad   :  { %v1868_v56 = vpop.eup %1867 }
 0xaae   :  { %862 = vrot.lane.b32.xlu1 %v1868_v56, %s1941_s1 }
 0xab1   :  { %v2270_v58 = vpop.permute.xlu0 %881 }
 0xab2   :  { %v884_v50 = vmul.f32 %v2270_v58, %v2203_v34 }
 0xab5   :  { %v791_v63 = vpop.permute.xlu0 %790 }
 0xab6   :  { %v793_v3 = vmul.f32 %v1860_v2, %v791_v63 }
 0xab8   :  { %v877_v53 = vmul.f32 %v2272_v26, %v793_v3 }
 0xaba   :  { %v2277_v8 = vadd.f32 %v884_v50, %v877_v53 }
 0xabc   :  { %v914_v9 = vpack.c.bf16 %v2277_v8, %v2277_v8 }
 0xabe   :  { %916 = vrot.lane.b32.xlu0 %v914_v9, %s1942_s11 }
 0xac2   :  { %102 = vrot.lane.b32.xlu0 %v2024_v11, %s1938_s5 }
 0xb20   :  { %v863_v17 = vpop.permute.xlu1 %862 }
 0xb21   :  { %v865_v2 = vmul.f32 %v1864_v35, %v863_v17 }
 0xb23   :  { %v894_v25 = vmul.f32 %v2286_v19, %v865_v2 }
 0xb25   :  { %v2291_v12 = vadd.f32 %v901_v23, %v894_v25  ;;  %v887_v23 = vmul.f32 %v2270_v58, %v2252_v44  ;;  %v886_v25 = vmul.f32 %v2272_v26, %v2255_v24  ;;  %v903_v44 = vmul.f32 %v2286_v19, %v2266_v52 }
 0xb26   :  { %v332_v52 = vmul.f32 %v2062_v57, %v2070_v1 }
 0xb27   :  { %v2295_v27 = vmul.f32 %v2286_v19, %v2291_v12  ;;  %v986_v11 = vpack.c.bf16 %v2291_v12, %v2291_v12 }
 0xb29   :  { %v911_v29 = vmax.f32 %v2227_v45, %v2295_v27  ;;  %988 = vrot.lane.b32.xlu1 %v986_v11, %s1942_s11  ;;  %v2324_v11 = vadd.f32 %v887_v23, %v886_v25 }
 0xb30   :  { %v917_v30 = vpop.permute.xlu0 %916 }
 0xb31   :  { %1724 = vmatmul.mubr.msk.bf16.vlgmr.msra.gmra.mrb[16].mxu0 %vm154_vm8, %v917_v30 }
 0xb32   :  { %1734 = vmatpush3.bf16.msra.mxu0 %v1995_v4  ;;  %1735 = vmatprep.mubr.msk.bf16.mxu0 %vm1936_vm0, %v1935_v0  ;;  %v912_v4 = vld [vmem:[#allocation2 + $0x8] sm:$0x3] }
 0xb33   :  { %1745 = vmatprep.subr.bf16.mxu0 %v1935_v0 }
 0xb34   :  { %v103_v42 = vpop.permute.xlu0 %102 }
 0xb35   :  { %105 = vst.msk [vmem:[#allocation3] sm:$0x3] %vm99_vm2, %v103_v42 }
 0xb36   :  { %110 = vst.msk [vmem:[#allocation3] sm:$0xc] %vm107_vm3, %v103_v42 }
 0xb37   :  { %115 = vst.msk [vmem:[#allocation3] sm:$0x30] %vm112_vm4, %v103_v42 }
 0xb38   :  { %120 = vst.msk [vmem:[#allocation3] sm:$0xc0] %vm117_vm5, %v103_v42 }
 0xb3f   :  { %v913_v41 = vld [vmem:[#allocation3 + $0x6] sm:$0x3] }
 0xb9b   :  { %v989_v32 = vpop.permute.xlu1 %988 }
 0xb9c   :  { %1730 = vmatmul.mubr.msk.bf16.vlgmr.msra.gmra.mrb[20].mxu1 %vm154_vm8, %v989_v32 }
 0xb9d   :  { %1740 = vmatpush3.bf16.msra.mxu1 %v2004_v6  ;;  %1741 = vmatprep.mubr.msk.bf16.mxu1 %vm1936_vm0, %v1935_v0 }
 0xb9e   :  { %1751 = vmatprep.subr.bf16.mxu1 %v1935_v0 }
 0xc04   :  { %v955_v54 = vpop.f32.mrb[16].mxu0 }
 0xc05   :  { %v961_v33 = vadd.f32 %v955_v54, %v912_v4  ;;  %v1725_v35 = vpop.f32.mrb[17].mxu0  ;;  %v904_v54 = vmul.f32 %v2284_v15, %v2263_v18  ;;  %v714_v18 = vmul.f32 %v2198_v59, %v2203_v34 }
 0xc06   :  { %v958_v31 = vpop.f32.mrb[18].mxu0 }
 0xc07   :  { %1869 = vtanh.f32 %v961_v33  ;;  %v1726_v37 = vpop.f32.mrb[19].mxu0  ;;  %v1615_v40 = vmul.f32 -1.442695, %v961_v33  ;;  %v2335_v33 = vadd.f32 %v904_v54, %v903_v44 }
 0xc09   :  { %1871 = vpow2.f32 %v1615_v40 }
 0xc11   :  { %v1870_v39 = vpop.eup %1869 }
 0xc12   :  { %971 = vrot.lane.b32.xlu1 %v1870_v39, %s1939_s7  ;;  %v522_v39 = vmul.f32 %v2124_v5, %v2129_v10 }
 0xc13   :  { %v1872_v48 = vpop.eup %1871 }
 0xc14   :  { %v965_v49 = vadd.f32 1.0, %v1872_v48 }
 0xc6f   :  { %v1027_v20 = vpop.f32.mrb[20].mxu1 }
 0xc70   :  { %v1033_v6 = vadd.f32 %v1027_v20, %v913_v41  ;;  %v1731_v46 = vpop.f32.mrb[21].mxu1  ;;  %v524_v20 = vadd.f32 %v522_v39, %v332_v52 }
 0xc71   :  { %v1030_v47 = vpop.f32.mrb[22].mxu1  ;;  %v906_v46 = vmul.f32 %v2272_v26, %v2277_v8 }
 0xc72   :  { %1873 = vtanh.f32 %v1033_v6  ;;  %v1732_v13 = vpop.f32.mrb[23].mxu1  ;;  %v1617_v3 = vmul.f32 -1.442695, %v1033_v6  ;;  %v526_v6 = vmax.f32 %v332_v52, %v522_v39  ;;  %v1059_v47 = vmul.f32 %v2284_v15, %v2277_v8  ;;  %v1077_v39 = vld [vmem:[#allocation3 + $0x4] sm:$0x3] }
 0xc73   :  { %1875 = vrcp.f32 %v965_v49  ;;  %v716_v48 = vadd.f32 %v714_v18, %v524_v20 }
 0xc74   :  { %1877 = vpow2.f32 %v1617_v3  ;;  %v718_v10 = vmax.f32 %v526_v6, %v714_v18 }
 0xc75   :  { %v908_v1 = vadd.f32 %v906_v46, %v716_v48 }
 0xc7c   :  { %v1874_v51 = vpop.eup %1873 }
 0xc7d   :  { %1043 = vrot.lane.b32.xlu0 %v1874_v51, %s1939_s7  ;;  %v1876_v56 = vpop.eup %1875  ;;  %v910_v51 = vmax.f32 %v718_v10, %v906_v46 }
 0xc7e   :  { %v1878_v50 = vpop.eup %1877  ;;  %v969_v30 = vmul.f32 %v1876_v56, %v2324_v11 }
 0xc7f   :  { %v1037_v53 = vadd.f32 1.0, %v1878_v50  ;;  %v525_v50 = vadd.f32 %v2149_v22, %v2145_v21 }
 0xc81   :  { %1879 = vrcp.f32 %v1037_v53  ;;  %v1065_v53 = vmul.f32 %v2291_v12, %v2270_v58  ;;  %v2389_v12 = vld [vmem:[%s2574_s3] sm:$0xff]   ;;  %s1943_s3 = smov 112  }
 0xc84   :  { %v972_v61 = vpop.permute.xlu1 %971 }
 0xc85   :  { %v974_v63 = vmul.f32 %v1876_v56, %v972_v61 }
 0xc87   :  { %976 = vrot.lane.b32.xlu1 %v974_v63, %s1940_s10 }
 0xc8b   :  { %v1880_v9 = vpop.eup %1879 }
 0xc8c   :  { %v1041_v24 = vmul.f32 %v1880_v9, %v2335_v33 }
 0xcef   :  { %v1044_v17 = vpop.permute.xlu0 %1043 }
 0xcf0   :  { %v1046_v2 = vmul.f32 %v1880_v9, %v1044_v17 }
 0xcf2   :  { %1048 = vrot.lane.b32.xlu0 %v1046_v2, %s1940_s10  ;;  %v717_v2 = vadd.f32 %v2219_v43, %v525_v50 }
 0xcf4   :  { %v909_v25 = vadd.f32 %v2295_v27, %v717_v2  ;;  %v2399_v27 = vld [vmem:[%s2576_s4] sm:$0xff]  }
 0xcf9   :  { %v977_v42 = vpop.permute.xlu1 %976 }
 0xcfa   :  { %v2327_v32 = vadd.f32 %v977_v42, %v969_v30 }
 0xcfc   :  { %1881 = vtanh.f32 %v2327_v32  ;;  %v1061_v50 = vmul.f32 %v2286_v19, %v2327_v32  ;;  %v1068_v32 = vmul.f32 %v2335_v33, %v2270_v58 }
 0xd06   :  { %v1882_v4 = vpop.eup %1881 }
 0xd07   :  { %982 = vrot.lane.b32.xlu1 %v1882_v4, %s1941_s1 }
 0xd64   :  { %v1049_v35 = vpop.permute.xlu0 %1048 }
 0xd65   :  { %v2338_v31 = vadd.f32 %v1049_v35, %v1041_v24 }
 0xd67   :  { %1883 = vtanh.f32 %v2338_v31 }
 0xd71   :  { %v1884_v37 = vpop.eup %1883 }
 0xd72   :  { %1054 = vrot.lane.b32.xlu0 %v1884_v37, %s1941_s1 }
 0xd79   :  { %v983_v40 = vpop.permute.xlu1 %982 }
 0xd7a   :  { %v985_v41 = vmul.f32 %v1876_v56, %v983_v40 }
 0xd7c   :  { %v1058_v13 = vmul.f32 %v2286_v19, %v985_v41 }
 0xd7e   :  { %v2353_v49 = vadd.f32 %v1059_v47, %v1058_v13 }
 0xd80   :  { %v1070_v34 = vmul.f32 %v2286_v19, %v2353_v49  ;;  %v1078_v56 = vpack.c.bf16 %v2353_v49, %v2353_v49  ;;  %v1067_v19 = vmul.f32 %v2272_v26, %v2338_v31 }
 0xd82   :  { %1080 = vrot.lane.b32.xlu1 %v1078_v56, %s1942_s11  ;;  %v2360_v61 = vadd.f32 %v1070_v34, %v908_v1  ;;  %v2362_v63 = vmax.f32 %v910_v51, %v1070_v34 }
 0xde4   :  { %v1055_v8 = vpop.permute.xlu0 %1054 }
 0xde5   :  { %v1057_v3 = vmul.f32 %v1880_v9, %v1055_v8 }
 0xde7   :  { %v1064_v17 = vmul.f32 %v2272_v26, %v1057_v3 }
 0xde9   :  { %v2370_v23 = vadd.f32 %v1065_v53, %v1064_v17  ;;  %v1062_v53 = vmul.f32 %v2284_v15, %v2324_v11 }
 0xdeb   :  { %v1071_v30 = vmul.f32 %v2272_v26, %v2370_v23  ;;  %v1150_v9 = vpack.c.bf16 %v2370_v23, %v2370_v23  ;;  %v2413_v17 = vadd.f32 %v1062_v53, %v1061_v50  ;;  %v1223_v26 = vmul.f32 %v2353_v49, %v2208_v36 }
 0xded   :  { %v2380_v21 = vmax.f32 %v911_v29, %v1071_v30  ;;  %1152 = vrot.lane.b32.xlu0 %v1150_v9, %s1942_s11  ;;  %v2383_v22 = vadd.f32 %v1071_v30, %v909_v25  ;;  %v1076_v29 = vld [vmem:[#allocation2 + $0xa] sm:$0x3] }
 0xdf4   :  { %v1081_v43 = vpop.permute.xlu1 %1080 }
 0xdf5   :  { %1736 = vmatmul.mubr.msk.bf16.vlgmr.msra.gmra.mrb[20].mxu0 %vm154_vm8, %v1081_v43  ;;  %v2424_v43 = vadd.f32 %v1068_v32, %v1067_v19 }
 0xdf6   :  { %1746 = vmatpush3.bf16.msra.mxu0 %v2389_v12  ;;  %1747 = vmatprep.mubr.msk.bf16.mxu0 %vm1936_vm0, %v1935_v0 }
 0xdf7   :  { %1757 = vmatprep.subr.bf16.mxu0 %v1935_v0 }
 0xe5f   :  { %v1153_v45 = vpop.permute.xlu0 %1152 }
 0xe60   :  { %1742 = vmatmul.mubr.msk.bf16.vlgmr.msra.gmra.mrb[24].mxu1 %vm154_vm8, %v1153_v45 }
 0xe61   :  { %1752 = vmatpush3.bf16.msra.mxu1 %v2399_v27  ;;  %1753 = vmatprep.mubr.msk.bf16.mxu1 %vm1936_vm0, %v1935_v0 }
 0xe62   :  { %1763 = vmatprep.subr.bf16.mxu1 %v1935_v0 }
 0xec8   :  { %v1119_v42 = vpop.f32.mrb[20].mxu0 }
 0xec9   :  { %v1125_v4 = vadd.f32 %v1119_v42, %v1076_v29  ;;  %v1737_v44 = vpop.f32.mrb[21].mxu0 }
 0xeca   :  { %v1122_v54 = vpop.f32.mrb[22].mxu0 }
 0xecb   :  { %1885 = vtanh.f32 %v1125_v4  ;;  %v1738_v24 = vpop.f32.mrb[23].mxu0  ;;  %v1619_v37 = vmul.f32 -1.442695, %v1125_v4 }
 0xecd   :  { %1887 = vpow2.f32 %v1619_v37  ;;  %v1229_v37 = vmul.f32 %v2370_v23, %v2196_v28 }
 0xed5   :  { %v1886_v35 = vpop.eup %1885 }
 0xed6   :  { %1135 = vrot.lane.b32.xlu1 %v1886_v35, %s1939_s7 }
 0xed7   :  { %v1888_v6 = vpop.eup %1887 }
 0xed8   :  { %v1129_v46 = vadd.f32 1.0, %v1888_v6  ;;  %v1240_v6 = vld [vmem:[#allocation2 + $0xc] sm:$0x3] }
 0xf33   :  { %v1191_v52 = vpop.f32.mrb[24].mxu1 }
 0xf34   :  { %v1197_v40 = vadd.f32 %v1191_v52, %v1077_v39  ;;  %v1743_v18 = vpop.f32.mrb[25].mxu1 }
 0xf35   :  { %v1194_v41 = vpop.f32.mrb[26].mxu1 }
 0xf36   :  { %1889 = vtanh.f32 %v1197_v40  ;;  %v1744_v20 = vpop.f32.mrb[27].mxu1  ;;  %v1621_v1 = vmul.f32 -1.442695, %v1197_v40 }
 0xf37   :  { %1891 = vrcp.f32 %v1129_v46 }
 0xf38   :  { %1893 = vpow2.f32 %v1621_v1  ;;  %v1241_v1 = vld [vmem:[#allocation3 + $0x2] sm:$0x3] }
 0xf40   :  { %v1890_v47 = vpop.eup %1889 }
 0xf41   :  { %1207 = vrot.lane.b32.xlu0 %v1890_v47, %s1939_s7  ;;  %v1892_v13 = vpop.eup %1891 }
 0xf42   :  { %v1894_v51 = vpop.eup %1893  ;;  %v1133_v2 = vmul.f32 %v1892_v13, %v2413_v17 }
 0xf43   :  { %v1201_v34 = vadd.f32 1.0, %v1894_v51 }
 0xf45   :  { %1895 = vrcp.f32 %v1201_v34 }
 0xf48   :  { %v1136_v48 = vpop.permute.xlu1 %1135 }
 0xf49   :  { %v1138_v10 = vmul.f32 %v1892_v13, %v1136_v48 }
 0xf4b   :  { %1140 = vrot.lane.b32.xlu1 %v1138_v10, %s1940_s10 }
 0xf4f   :  { %v1896_v56 = vpop.eup %1895 }
 0xf50   :  { %v1205_v15 = vmul.f32 %v1896_v56, %v2424_v43 }
 0xfb3   :  { %v1208_v8 = vpop.permute.xlu0 %1207 }
 0xfb4   :  { %v1210_v3 = vmul.f32 %v1896_v56, %v1208_v8 }
 0xfb6   :  { %1212 = vrot.lane.b32.xlu0 %v1210_v3, %s1940_s10 }
 0xfbd   :  { %v1141_v25 = vpop.permute.xlu1 %1140 }
 0xfbe   :  { %v2416_v30 = vadd.f32 %v1141_v25, %v1133_v2 }
 0xfc0   :  { %1897 = vtanh.f32 %v2416_v30 }
 0xfca   :  { %v1898_v9 = vpop.eup %1897 }
 0xfcb   :  { %1146 = vrot.lane.b32.xlu1 %v1898_v9, %s1941_s1 }
0x1028   :  { %v1213_v11 = vpop.permute.xlu0 %1212 }
0x1029   :  { %v2427_v45 = vadd.f32 %v1213_v11, %v1205_v15 }
0x102b   :  { %1899 = vtanh.f32 %v2427_v45 }
0x1035   :  { %v1900_v29 = vpop.eup %1899 }
0x1036   :  { %1218 = vrot.lane.b32.xlu0 %v1900_v29, %s1941_s1 }
0x103d   :  { %v1147_v42 = vpop.permute.xlu1 %1146 }
0x103e   :  { %v1149_v4 = vmul.f32 %v1892_v13, %v1147_v42  ;;  %v1225_v42 = vmul.f32 %v2210_v38, %v2416_v30  ;;  %v1232_v30 = vmul.f32 %v2424_v43, %v2196_v28 }
0x1040   :  { %v1222_v31 = vmul.f32 %v2210_v38, %v1149_v4  ;;  %v1226_v4 = vmul.f32 %v2413_v17, %v2208_v36 }
0x1042   :  { %v2434_v58 = vadd.f32 %v1223_v26, %v1222_v31  ;;  %v2483_v26 = vadd.f32 %v1226_v4, %v1225_v42 }
0x1044   :  { %v2438_v33 = vmul.f32 %v2210_v38, %v2434_v58  ;;  %v1242_v44 = vpack.c.bf16 %v2434_v58, %v2434_v58  ;;  %v1231_v38 = vmul.f32 %v2198_v59, %v2427_v45 }
0x1046   :  { %1244 = vrot.lane.b32.xlu1 %v1242_v44, %s1942_s11  ;;  %v2445_v54 = vadd.f32 %v2438_v33, %v2360_v61  ;;  %v1238_v49 = vmax.f32 %v2362_v63, %v2438_v33 }
0x10a8   :  { %v1219_v24 = vpop.permute.xlu0 %1218 }
0x10a9   :  { %v1221_v35 = vmul.f32 %v1896_v56, %v1219_v24 }
0x10ab   :  { %v1228_v39 = vmul.f32 %v2198_v59, %v1221_v35 }
0x10ad   :  { %v2452_v52 = vadd.f32 %v1229_v37, %v1228_v39  ;;  %v2494_v37 = vadd.f32 %v1232_v30, %v1231_v38  ;;  %v1390_v38 = vmul.f32 %v2483_v26, %v2134_v14 }
0x10af   :  { %v2456_v40 = vmul.f32 %v2198_v59, %v2452_v52  ;;  %v1314_v61 = vpack.c.bf16 %v2452_v52, %v2452_v52  ;;  %v1387_v59 = vmul.f32 %v2434_v58, %v2134_v14 }
0x10b1   :  { %v1239_v18 = vmax.f32 %v2380_v21, %v2456_v40  ;;  %1316 = vrot.lane.b32.xlu0 %v1314_v61, %s1942_s11  ;;  %v2465_v41 = vadd.f32 %v2456_v40, %v2383_v22  ;;  %v1405_v21 = vld [vmem:[#allocation3] sm:$0x3] }
0x10b8   :  { %v1245_v23 = vpop.permute.xlu1 %1244 }
0x10b9   :  { %1748 = vmatmul.mubr.msk.bf16.vlgmr.msra.gmra.mrb[24].mxu0 %vm154_vm8, %v1245_v23 }
0x10ba   :  { %1758 = vmatpush3.bf16.msra.mxu0 %v2389_v12  ;;  %1759 = vmatprep.mubr.msk.bf16.mxu0 %vm1936_vm0, %v1935_v0 }
0x1123   :  { %v1317_v20 = vpop.permute.xlu0 %1316 }
0x1124   :  { %1754 = vmatmul.mubr.msk.bf16.vlgmr.msra.gmra.mrb[28].mxu1 %vm154_vm8, %v1317_v20 }
0x1125   :  { %1764 = vmatpush3.bf16.msra.mxu1 %v2399_v27  ;;  %1765 = vmatprep.mubr.msk.bf16.mxu1 %vm1936_vm0, %v1935_v0 }
0x118c   :  { %v1283_v46 = vpop.f32.mrb[24].mxu0 }
0x118d   :  { %v1289_v22 = vadd.f32 %v1283_v46, %v1240_v6  ;;  %v1749_v47 = vpop.f32.mrb[25].mxu0 }
0x118e   :  { %v1286_v13 = vpop.f32.mrb[26].mxu0 }
0x118f   :  { %1901 = vtanh.f32 %v1289_v22  ;;  %v1750_v48 = vpop.f32.mrb[27].mxu0  ;;  %v1623_v12 = vmul.f32 -1.442695, %v1289_v22  ;;  %v1393_v13 = vmul.f32 %v2452_v52, %v2122_v62 }
0x1191   :  { %1903 = vpow2.f32 %v1623_v12 }
0x1199   :  { %v1902_v10 = vpop.eup %1901 }
0x119a   :  { %1299 = vrot.lane.b32.xlu1 %v1902_v10, %s1939_s7 }
0x119b   :  { %v1904_v0 = vpop.eup %1903 }
0x119c   :  { %v1293_v3 = vadd.f32 1.0, %v1904_v0 }
0x11f7   :  { %v1355_v51 = vpop.f32.mrb[28].mxu1 }
0x11f8   :  { %v1361_v34 = vadd.f32 %v1355_v51, %v1241_v1  ;;  %v1755_v56 = vpop.f32.mrb[29].mxu1  ;;  %v1404_v1 = vld [vmem:[#allocation2 + $0xe] sm:$0x3] }
0x11f9   :  { %v1358_v27 = vpop.f32.mrb[30].mxu1 }
0x11fa   :  { %1905 = vtanh.f32 %v1361_v34  ;;  %v1756_v8 = vpop.f32.mrb[31].mxu1  ;;  %v1625_v9 = vmul.f32 -1.442695, %v1361_v34 }
0x11fb   :  { %1907 = vrcp.f32 %v1293_v3 }
0x11fc   :  { %1909 = vpow2.f32 %v1625_v9 }
0x1204   :  { %v1906_v50 = vpop.eup %1905 }
0x1205   :  { %1371 = vrot.lane.b32.xlu0 %v1906_v50, %s1939_s7  ;;  %v1908_v53 = vpop.eup %1907 }
0x1206   :  { %v1910_v19 = vpop.eup %1909  ;;  %v1297_v31 = vmul.f32 %v1908_v53, %v2483_v26 }
0x1207   :  { %v1365_v32 = vadd.f32 1.0, %v1910_v19 }
0x1209   :  { %1911 = vrcp.f32 %v1365_v32 }
0x120c   :  { %v1300_v2 = vpop.permute.xlu1 %1299 }
0x120d   :  { %v1302_v25 = vmul.f32 %v1908_v53, %v1300_v2 }
0x120f   :  { %1304 = vrot.lane.b32.xlu1 %v1302_v25, %s1940_s10 }
0x1213   :  { %v1912_v15 = vpop.eup %1911 }
0x1214   :  { %v1369_v36 = vmul.f32 %v1912_v15, %v2494_v37 }
0x1277   :  { %v1372_v11 = vpop.permute.xlu0 %1371 }
0x1278   :  { %v1374_v29 = vmul.f32 %v1912_v15, %v1372_v11 }
0x127a   :  { %1376 = vrot.lane.b32.xlu0 %v1374_v29, %s1940_s10 }
0x1281   :  { %v1305_v44 = vpop.permute.xlu1 %1304 }
0x1282   :  { %v2486_v24 = vadd.f32 %v1305_v44, %v1297_v31 }
0x1284   :  { %1913 = vtanh.f32 %v2486_v24 }
0x128e   :  { %v1914_v35 = vpop.eup %1913 }
0x128f   :  { %1310 = vrot.lane.b32.xlu1 %v1914_v35, %s1941_s1  ;;  %v1389_v35 = vmul.f32 %v2136_v16, %v2486_v24 }
0x1291   :  { %v1391_v30 = vadd.f32 %v1390_v38, %v1389_v35 }
0x12ec   :  { %v1377_v17 = vpop.permute.xlu0 %1376 }
0x12ed   :  { %v2497_v39 = vadd.f32 %v1377_v17, %v1369_v36 }
0x12ef   :  { %1915 = vtanh.f32 %v2497_v39 }
0x12f9   :  { %v1916_v61 = vpop.eup %1915 }
0x12fa   :  { %1382 = vrot.lane.b32.xlu0 %v1916_v61, %s1941_s1 }
0x1301   :  { %v1311_v23 = vpop.permute.xlu1 %1310 }
0x1302   :  { %v1313_v20 = vmul.f32 %v1908_v53, %v1311_v23 }
0x1304   :  { %v1386_v45 = vmul.f32 %v2136_v16, %v1313_v20  ;;  %v1395_v20 = vmul.f32 %v2124_v5, %v2497_v39 }
0x1306   :  { %v2504_v28 = vadd.f32 %v1387_v59, %v1386_v45  ;;  %v1396_v59 = vmul.f32 %v2494_v37, %v2122_v62 }
0x1308   :  { %v1406_v43 = vpack.c.bf16 %v2504_v28, %v2504_v28  ;;  %v1398_v6 = vmul.f32 %v2136_v16, %v2504_v28  ;;  %v1397_v16 = vadd.f32 %v1396_v59, %v1395_v20 }
0x130a   :  { %1408 = vrot.lane.b32.xlu1 %v1406_v43, %s1942_s11  ;;  %v2512_v46 = vadd.f32 %v1398_v6, %v2445_v54  ;;  %v2517_v22 = vmax.f32 %v1238_v49, %v1398_v6 }
0x136c   :  { %v1383_v58 = vpop.permute.xlu0 %1382 }
0x136d   :  { %v1385_v47 = vmul.f32 %v1912_v15, %v1383_v58  ;;  %v1551_v58 = vmul.f32 %v2504_v28, %v2060_v55 }
0x136f   :  { %v1392_v48 = vmul.f32 %v2124_v5, %v1385_v47 }
0x1371   :  { %v2522_v10 = vadd.f32 %v1393_v13, %v1392_v48 }
0x1373   :  { %v1478_v12 = vpack.c.bf16 %v2522_v10, %v2522_v10  ;;  %v1399_v54 = vmul.f32 %v2124_v5, %v2522_v10 }
0x1375   :  { %1480 = vrot.lane.b32.xlu0 %v1478_v12, %s1942_s11  ;;  %v2530_v63 = vadd.f32 %v1399_v54, %v2465_v41  ;;  %v2535_v33 = vmax.f32 %v1239_v18, %v1399_v54  ;;  %v1554_v54 = vmul.f32 %v2522_v10, %v2065_v60 }
0x137c   :  { %v1409_v49 = vpop.permute.xlu1 %1408 }
0x137d   :  { %1760 = vmatmul.mubr.msk.bf16.vlgmr.msra.gmra.mrb[28].mxu0 %vm154_vm8, %v1409_v49 }
0x13e7   :  { %v1481_v52 = vpop.permute.xlu0 %1480 }
0x13e8   :  { %1766 = vmatmul.mubr.msk.bf16.vlgmr.msra.gmra.mrb[32].mxu1 %vm154_vm8, %v1481_v52 }
0x1450   :  { %v1447_v51 = vpop.f32.mrb[28].mxu0 }
0x1451   :  { %v1453_v34 = vadd.f32 %v1447_v51, %v1404_v1  ;;  %v1761_v56 = vpop.f32.mrb[29].mxu0 }
0x1452   :  { %v1450_v27 = vpop.f32.mrb[30].mxu0 }
0x1453   :  { %1917 = vtanh.f32 %v1453_v34  ;;  %v1762_v8 = vpop.f32.mrb[31].mxu0  ;;  %v1627_v0 = vmul.f32 -1.442695, %v1453_v34 }
0x1455   :  { %1919 = vpow2.f32 %v1627_v0 }
0x145d   :  { %v1918_v41 = vpop.eup %1917 }
0x145e   :  { %1463 = vrot.lane.b32.xlu1 %v1918_v41, %s1939_s7 }
0x145f   :  { %v1920_v2 = vpop.eup %1919 }
0x1460   :  { %v1457_v25 = vadd.f32 1.0, %v1920_v2 }
0x14bb   :  { %v1519_v40 = vpop.f32.mrb[32].mxu1 }
0x14bc   :  { %v1525_v18 = vadd.f32 %v1519_v40, %v1405_v21  ;;  %v1767_v3 = vpop.f32.mrb[33].mxu1 }
0x14bd   :  { %v1522_v50 = vpop.f32.mrb[34].mxu1 }
0x14be   :  { %1921 = vtanh.f32 %v1525_v18  ;;  %v1768_v53 = vpop.f32.mrb[35].mxu1  ;;  %v1629_v11 = vmul.f32 -1.442695, %v1525_v18 }
0x14bf   :  { %1923 = vrcp.f32 %v1457_v25 }
0x14c0   :  { %1925 = vpow2.f32 %v1629_v11 }
0x14c8   :  { %v1922_v9 = vpop.eup %1921 }
0x14c9   :  { %1535 = vrot.lane.b32.xlu0 %v1922_v9, %s1939_s7  ;;  %v1924_v19 = vpop.eup %1923 }
0x14ca   :  { %v1926_v29 = vpop.eup %1925  ;;  %v1461_v36 = vmul.f32 %v1924_v19, %v1391_v30 }
0x14cb   :  { %v1529_v42 = vadd.f32 1.0, %v1926_v29 }
0x14cd   :  { %1927 = vrcp.f32 %v1529_v42 }
0x14d0   :  { %v1464_v32 = vpop.permute.xlu1 %1463 }
0x14d1   :  { %v1466_v15 = vmul.f32 %v1924_v19, %v1464_v32 }
0x14d3   :  { %1468 = vrot.lane.b32.xlu1 %v1466_v15, %s1940_s10 }
0x14d7   :  { %v1928_v4 = vpop.eup %1927 }
0x14d8   :  { %v1533_v24 = vmul.f32 %v1928_v4, %v1397_v16 }
0x153b   :  { %v1536_v31 = vpop.permute.xlu0 %1535 }
0x153c   :  { %v1538_v44 = vmul.f32 %v1928_v4, %v1536_v31 }
0x153e   :  { %1540 = vrot.lane.b32.xlu0 %v1538_v44, %s1940_s10 }
0x1545   :  { %v1469_v17 = vpop.permute.xlu1 %1468 }
0x1546   :  { %v1471_v61 = vadd.f32 %v1469_v17, %v1461_v36 }
0x1548   :  { %1929 = vtanh.f32 %v1471_v61 }
0x1552   :  { %v1930_v23 = vpop.eup %1929 }
0x1553   :  { %1474 = vrot.lane.b32.xlu1 %v1930_v23, %s1941_s1 }
0x15b0   :  { %v1541_v45 = vpop.permute.xlu0 %1540 }
0x15b1   :  { %v1543_v43 = vadd.f32 %v1541_v45, %v1533_v24 }
0x15b3   :  { %1931 = vtanh.f32 %v1543_v43 }
0x15bd   :  { %v1932_v14 = vpop.eup %1931 }
0x15be   :  { %1546 = vrot.lane.b32.xlu0 %v1932_v14, %s1941_s1 }
0x15c5   :  { %v1475_v26 = vpop.permute.xlu1 %1474 }
0x15c6   :  { %v1477_v6 = vmul.f32 %v1924_v19, %v1475_v26 }
0x15c8   :  { %v1550_v47 = vmul.f32 %v2077_v7, %v1477_v6 }
0x15ca   :  { %v1552_v13 = vadd.f32 %v1551_v58, %v1550_v47 }
0x15cc   :  { %v1556_v5 = vmul.f32 %v2077_v7, %v1552_v13 }
0x15ce   :  { %v1558_v62 = vadd.f32 %v1556_v5, %v2512_v46  ;;  %v1560_v37 = vmax.f32 %v2517_v22, %v1556_v5 }
0x15d0   :  { %v1562_v39 = vmul.f32 0.125, %v1558_v62 }
0x15d2   :  { %1565 = vrot.lane.b32.xlu1 %v1562_v39, %s1942_s11 }
0x15d6   :  { %1573 = vrot.lane.b32.xlu1 %v1560_v37, %s1943_s3 }
0x1630   :  { %v1547_v48 = vpop.permute.xlu0 %1546 }
0x1631   :  { %v1549_v12 = vmul.f32 %v1928_v4, %v1547_v48 }
0x1633   :  { %v1553_v55 = vmul.f32 %v2062_v57, %v1549_v12 }
0x1635   :  { %v1555_v28 = vadd.f32 %v1554_v54, %v1553_v55 }
0x1637   :  { %v1557_v49 = vmul.f32 %v2062_v57, %v1555_v28 }
0x1639   :  { %v1559_v7 = vadd.f32 %v1557_v49, %v2530_v63  ;;  %v1561_v46 = vmax.f32 %v2535_v33, %v1557_v49 }
0x163b   :  { %v1563_v22 = vmul.f32 0.125, %v1559_v7 }
0x163d   :  { %1569 = vrot.lane.b32.xlu0 %v1563_v22, %s1939_s7 }
0x1644   :  { %v1566_v52 = vpop.permute.xlu1 %1565 }
0x1648   :  { %v1574_v51 = vpop.permute.xlu1 %1573 }
0x16af   :  { %v1570_v1 = vpop.permute.xlu0 %1569 }
0x16b0   :  { %v1576_v34 = vsel %vm154_vm8, %v1566_v52, %v1570_v1 }
0x16b1   :  { %v1577_v60 = vsel %vm54_vm1, %v1576_v34, %v1574_v51 }
0x16b2   :  { %v1579_v10 = vsel %vm1578_vm15, %v1577_v60, %v1561_v46 }
0x16b3   :  { %1580 = vst.msk [vmem:[%s2579_s6] sm:$0x3] %vm99_vm2, %v1579_v10 }

</bundles_post_ra>
